<compile_context>
chip_gen: v6e
topology: v6e:2x2x1
jax: 0.10.0
libtpu: 0.0.40
codegen_flags: <defaults>
</compile_context>

<pallas_src>
import functools
import math

import jax
import jax.numpy as jnp
from jax.experimental import pallas as pl
from jax.experimental.pallas import tpu as pltpu

# ----------------------------------------------------------------------------- config
NUM_CLASSES = 10
FEAT = 64          # analog of the 2560-d EfficientNet-B7 feature dim
PROJ_OUT = 32      # analog of the 1280-d projection output
BN_EPS = 1e-5
ADAIN_EPS = 1e-5

# (kernel, stride, cin, cout)  -- analog of model.features[:4]
STAGES_PRE = [
    (3, 2, 3, 16),    # stem
    (3, 1, 16, 16),
    (3, 2, 16, 24),
    (3, 2, 24, 32),
]
# analog of model.features[4:]  (last entry = final 1x1 conv -> FEAT channels)
STAGES_POST = [
    (3, 2, 32, 48),
    (3, 1, 48, 64),
    (3, 2, 64, 80),
    (3, 1, 80, 96),
    (1, 1, 96, FEAT),
]
PRE_STRIDES = tuple(s for (_k, s, _ci, _co) in STAGES_PRE)     # static (never traced)
POST_STRIDES = tuple(s for (_k, s, _ci, _co) in STAGES_POST)   # static (never traced)


# ----------------------------------------------------------------------------- kernels
def _matmul_bias_act_kernel(x_ref, w_ref, scale_ref, bias_ref, o_ref, *, act):
    """y = act((x @ w) * scale + bias); scale/bias are (1, N) row vectors, f32 epilogue."""
    y = jnp.dot(x_ref[...], w_ref[...], preferred_element_type=jnp.float32)
    y = y * scale_ref[...] + bias_ref[...]
    if act == "relu":
        y = jnp.maximum(y, 0.0)
    elif act == "silu":
        y = y * jax.nn.sigmoid(y)
    o_ref[...] = y.astype(o_ref.dtype)


def _adain_pair_kernel(a_ref, b_ref, ab_ref, ba_ref, *, eps):
    """Both AdaIN directions in one pass.  Inputs/outputs are (N, H*W, C)."""
    a = a_ref[...].astype(jnp.float32)
    b = b_ref[...].astype(jnp.float32)
    a_mean = jnp.mean(a, axis=1, keepdims=True)
    a_var = jnp.mean((a - a_mean) ** 2, axis=1, keepdims=True)
    b_mean = jnp.mean(b, axis=1, keepdims=True)
    b_var = jnp.mean((b - b_mean) ** 2, axis=1, keepdims=True)
    a_inv = jax.lax.rsqrt(a_var + eps)
    b_inv = jax.lax.rsqrt(b_var + eps)
    a_std = jnp.sqrt(a_var + eps)
    b_std = jnp.sqrt(b_var + eps)
    # adain(content=a, style=b) and adain(content=b, style=a)
    ab_ref[...] = ((a - a_mean) * a_inv * b_std + b_mean).astype(ab_ref.dtype)
    ba_ref[...] = ((b - b_mean) * b_inv * a_std + a_mean).astype(ba_ref.dtype)


def _avgpool_kernel(x_ref, o_ref):
    """x: (N, H*W, C) -> o: (N, C).  Whole batch in one block."""
    x = x_ref[...].astype(jnp.float32)
    o_ref[...] = jnp.mean(x, axis=1).astype(o_ref.dtype)


# ----------------------------------------------------------------------------- wrappers
def _round_up(x, m):
    return ((x + m - 1) // m) * m


def _pick_tm(M, K, Np):
    """M-tile: big enough to amortize per-step overhead (prefer 512), small enough that
    double-buffered blocks stay well inside VMEM on every generation (v7x: 64 MiB)."""
    tm = min(512, _round_up(max(M, 8), 8))
    budget = 16 * 1024 * 1024  # conservative vs. ~32 MiB scoped default
    while tm > 8:
        blk_bytes = (2 * tm * K * 2          # bf16 x block, double-buffered
                     + 2 * K * Np * 2        # bf16 w block
                     + 2 * tm * Np * 4       # f32 output block
                     + 2 * 2 * Np * 4)       # scale + bias
        if blk_bytes <= budget:
            break
        tm = max(8, _round_up(tm // 2, 8))
    return tm


def matmul_bias_act(x, w, scale, bias, act):
    """x: (M, K), w: (K, N), scale/bias: (N,) or None. Returns act((x@w)*scale+bias), (M,N)."""
    M, K = x.shape
    N = w.shape[1]
    Np = _round_up(N, 128)                     # lane-dense output stores
    TM = _pick_tm(M, K, Np)
    Mp = _round_up(M, TM)

    if scale is None:
        scale = jnp.ones((N,), jnp.float32)
    scale = scale.astype(jnp.float32)
    bias = bias.astype(jnp.float32)

    xb = x.astype(jnp.bfloat16)
    wb = w.astype(jnp.bfloat16)
    if Mp != M:
        xb = jnp.pad(xb, ((0, Mp - M), (0, 0)))
    if Np != N:
        wb = jnp.pad(wb, ((0, 0), (0, Np - N)))
        scale = jnp.pad(scale, (0, Np - N))
        bias = jnp.pad(bias, (0, Np - N))

    # TODO(synk): if K grows to real B7 scale (kh*kw*Cin up to ~23k), add a K grid axis
    # with an f32 VMEM accumulator instead of loading the full (K, Np) weight block.
    out = pl.pallas_call(
        functools.partial(_matmul_bias_act_kernel, act=act),
        out_shape=jax.ShapeDtypeStruct((Mp, Np), jnp.float32),
        grid=(Mp // TM,),
        in_specs=[
            pl.BlockSpec((TM, K), lambda i: (i, 0)),
            pl.BlockSpec((K, Np), lambda i: (0, 0)),
            pl.BlockSpec((1, Np), lambda i: (0, 0)),
            pl.BlockSpec((1, Np), lambda i: (0, 0)),
        ],
        out_specs=pl.BlockSpec((TM, Np), lambda i: (i, 0)),
        compiler_params=pltpu.CompilerParams(dimension_semantics=("parallel",)),
    )(xb, wb, scale.reshape(1, Np), bias.reshape(1, Np))
    return out[:M, :N]


def _im2col(x, kh, kw, stride, pad):
    """x: (N, H, W, C) -> patches (N, Ho, Wo, kh*kw*C), ordering (di, dj, c).
    All slice bounds are static Python ints."""
    x = jnp.pad(x, ((0, 0), (pad, pad), (pad, pad), (0, 0)))
    _, Hp, Wp, _ = x.shape
    Ho = (Hp - kh) // stride + 1
    Wo = (Wp - kw) // stride + 1
    cols = []
    for di in range(kh):
        for dj in range(kw):
            cols.append(x[:, di:di + stride * (Ho - 1) + 1:stride,
                          dj:dj + stride * (Wo - 1) + 1:stride, :])
    return jnp.concatenate(cols, axis=-1), Ho, Wo


def conv_bn_act(x, w, bn_scale, bn_bias, stride, act="silu"):
    """x: (N,H,W,Cin) NHWC, w: (kh,kw,Cin,Cout). Conv(padding=(k-1)//2) + folded-BN + act."""
    kh, kw, cin, cout = w.shape
    n = x.shape[0]
    x = x.astype(jnp.bfloat16)                 # cast before im2col: halves HBM traffic
    if kh == 1 and kw == 1 and stride == 1:
        patches, Ho, Wo = x, x.shape[1], x.shape[2]
    else:
        patches, Ho, Wo = _im2col(x, kh, kw, stride, (kh - 1) // 2)
    y = matmul_bias_act(patches.reshape(n * Ho * Wo, kh * kw * cin),
                        w.reshape(kh * kw * cin, cout), bn_scale, bn_bias, act)
    return y.reshape(n, Ho, Wo, cout)


def adain_pair(a, b):
    """Returns (adain(a, b), adain(b, a)); a/b: (N, H, W, C)."""
    n, h, w, c = a.shape
    out_sd = jax.ShapeDtypeStruct((n, h * w, c), a.dtype)
    ab, ba = pl.pallas_call(
        functools.partial(_adain_pair_kernel, eps=ADAIN_EPS),
        out_shape=(out_sd, out_sd),
    )(a.reshape(n, h * w, c), b.reshape(n, h * w, c))
    return ab.reshape(n, h, w, c), ba.reshape(n, h, w, c)


def global_avgpool(x):
    """x: (N,H,W,C) -> (N,C)   (model.avgpool + nn.Flatten), whole batch in one block."""
    n, h, w, c = x.shape
    return pl.pallas_call(
        _avgpool_kernel,
        out_shape=jax.ShapeDtypeStruct((n, c), x.dtype),
    )(x.reshape(n, h * w, c))


# ----------------------------------------------------------------------------- params
def _make_conv_params(key, kh, kw, cin, cout):
    k1, k2, k3, k4, k5 = jax.random.split(key, 5)
    w = jax.random.normal(k1, (kh, kw, cin, cout), jnp.float32) / math.sqrt(kh * kw * cin)
    gamma = 1.0 + 0.05 * jax.random.normal(k2, (cout,), jnp.float32)
    beta = 0.05 * jax.random.normal(k3, (cout,), jnp.float32)
    r_mean = 0.05 * jax.random.normal(k4, (cout,), jnp.float32)
    r_var = 1.0 + 0.05 * jax.random.uniform(k5, (cout,), jnp.float32)
    scale = gamma / jnp.sqrt(r_var + BN_EPS)          # folded (eval-mode) BatchNorm
    bias = beta - r_mean * scale
    return {"w": w, "scale": scale, "bias": bias}     # strides kept static, NOT in pytree


def _make_linear(key, din, dout):
    k1, k2 = jax.random.split(key)
    w = jax.random.normal(k1, (din, dout), jnp.float32) / math.sqrt(din)
    b = 0.05 * jax.random.normal(k2, (dout,), jnp.float32)
    return {"w": w, "b": b}


def init_params(seed=0):
    key = jax.random.PRNGKey(seed)
    keys = jax.random.split(key, len(STAGES_PRE) + len(STAGES_POST) + 3)
    i = 0
    pre, post = [], []
    for (k, _s, cin, cout) in STAGES_PRE:
        pre.append(_make_conv_params(keys[i], k, k, cin, cout)); i += 1
    for (k, _s, cin, cout) in STAGES_POST:
        post.append(_make_conv_params(keys[i], k, k, cin, cout)); i += 1
    # Projection(FEAT, PROJ_OUT): gap = FEAT - PROJ_OUT; hidden = FEAT - gap // 2
    gap = FEAT - PROJ_OUT
    hidden = FEAT - gap // 2
    proj_fc1 = _make_linear(keys[i], FEAT, hidden); i += 1
    proj_fc2 = _make_linear(keys[i], hidden, PROJ_OUT); i += 1
    classifier = _make_linear(keys[i], FEAT, NUM_CLASSES); i += 1
    return {"pre": pre, "post": post, "proj_fc1": proj_fc1, "proj_fc2": proj_fc2,
            "classifier": classifier}


# ----------------------------------------------------------------------------- model
def _features(stage_params, strides, x):
    for p, s in zip(stage_params, strides):
        x = conv_bn_act(x, p["w"], p["scale"], p["bias"], s, act="silu")
    return x


def _projection_head(params, feats):
    p1, p2 = params["proj_fc1"], params["proj_fc2"]
    h = matmul_bias_act(feats, p1["w"], None, p1["b"], act="relu")
    return matmul_bias_act(h, p2["w"], None, p2["b"], act="none")


def _classifier(params, feats):
    # Dropout(0.5) -> identity (eval mode), then Linear(FEAT, NUM_CLASSES)
    c = params["classifier"]
    return matmul_bias_act(feats, c["w"], None, c["b"], act="none")


def effi_b7_forward(params, source_images, target_images):
    """source/target images: (B, 3, H, W) float32, NCHW like the PyTorch reference."""
    b = source_images.shape[0]
    # batch source+target through features[:4] in one stream
    x = jnp.concatenate([source_images, target_images], axis=0)
    x = jnp.transpose(x, (0, 2, 3, 1))                # -> NHWC
    z = _features(params["pre"], PRE_STRIDES, x)      # model.features[:4]
    z_s, z_t = z[:b], z[b:]

    z_st, z_ts = adain_pair(z_s, z_t)                 # both AdaIN directions, one kernel

    # batch the four streams through features[4:], avgpool, heads
    z_all = jnp.concatenate([z_s, z_t, z_st, z_ts], axis=0)      # (4B, h, w, c)
    z_all = _features(params["post"], POST_STRIDES, z_all)       # model.features[4:]

    feats = global_avgpool(z_all)                     # avgpool + Flatten   (4B, FEAT)
    projected = _projection_head(params, feats)       # (4B, PROJ_OUT)
    logits = _classifier(params, feats)               # (4B, NUM_CLASSES)

    pred_z_s, pred_z_t, pred_z_st, pred_z_ts = jnp.split(logits, 4, axis=0)
    projected_z_s, projected_z_t, projected_z_st, projected_z_ts = jnp.split(projected, 4, axis=0)

    return (pred_z_s, pred_z_t, pred_z_st, pred_z_ts,
            projected_z_s, projected_z_t, projected_z_st, projected_z_ts)


# ----------------------------------------------------------------------------- main
if __name__ == "__main__":
    params = init_params(seed=0)

    key = jax.random.PRNGKey(0)
    k_src, k_tgt = jax.random.split(key)
    source_images = jax.random.normal(k_src, (2, 3, 64, 64), jnp.float32)
    target_images = jax.random.normal(k_tgt, (2, 3, 64, 64), jnp.float32)

    fwd = jax.jit(effi_b7_forward)
    outs = fwd(params, source_images, target_images)
    outs = jax.block_until_ready(outs)

    expected_shapes = [(2, NUM_CLASSES)] * 4 + [(2, PROJ_OUT)] * 4
    assert all(o.shape == s for o, s in zip(outs, expected_shapes))
    assert all(bool(jnp.all(jnp.isfinite(o))) for o in outs)
    print("KERNEL_OK")
</pallas_src>

<mosaic_0001>
module attributes {stable_mosaic.version = 11 : i64} {
  func.func @_matmul_bias_act_kernel(%arg0: i32, %arg1: memref<512x27xbf16, #tpu.memory_space<vmem>>, %arg2: memref<27x128xbf16, #tpu.memory_space<vmem>>, %arg3: memref<1x128xf32, #tpu.memory_space<vmem>>, %arg4: memref<1x128xf32, #tpu.memory_space<vmem>>, %arg5: memref<512x128xf32, #tpu.memory_space<vmem>>) attributes {dimension_semantics = [#tpu.dimension_semantics<parallel>], iteration_bounds = array<i64: 8>, scalar_prefetch = 0 : i64, scratch_operands = 0 : i64, tpu.core_type = #tpu.core_type<tc>, window_params = [{transform_indices = @transform_0, window_bounds = array<i64: 512, 27>}, {pipeline_mode = #tpu.pipeline_mode<synchronous>, transform_indices = @transform_1, window_bounds = array<i64: 27, 128>}, {pipeline_mode = #tpu.pipeline_mode<synchronous>, transform_indices = @transform_2, window_bounds = array<i64: 1, 128>}, {pipeline_mode = #tpu.pipeline_mode<synchronous>, transform_indices = @transform_3, window_bounds = array<i64: 1, 128>}, {transform_indices = @transform_4, window_bounds = array<i64: 512, 128>}]} {
    %c0 = arith.constant 0 : index
    %c0_0 = arith.constant 0 : index
    %0 = vector.load %arg1[%c0, %c0_0] : memref<512x27xbf16, #tpu.memory_space<vmem>>, vector<512x27xbf16>
    %c0_1 = arith.constant 0 : index
    %c0_2 = arith.constant 0 : index
    %1 = vector.load %arg2[%c0_1, %c0_2] : memref<27x128xbf16, #tpu.memory_space<vmem>>, vector<27x128xbf16>
    %cst = arith.constant dense<0.000000e+00> : vector<512x128xf32>
    %2 = tpu.matmul %0, %1, %cst {dimension_numbers = #tpu.dot_dimension_numbers<[1], [0], [0], [1], [0, 0, 1, 1], [], []>} : vector<512x27xbf16>, vector<27x128xbf16>, vector<512x128xf32> -> vector<512x128xf32>
    %c0_3 = arith.constant 0 : index
    %c0_4 = arith.constant 0 : index
    %3 = vector.load %arg3[%c0_3, %c0_4] : memref<1x128xf32, #tpu.memory_space<vmem>>, vector<1x128xf32>
    %4 = vector.broadcast %3 : vector<1x128xf32> to vector<512x128xf32>
    %5 = arith.mulf %2, %4 : vector<512x128xf32>
    %c0_5 = arith.constant 0 : index
    %c0_6 = arith.constant 0 : index
    %6 = vector.load %arg4[%c0_5, %c0_6] : memref<1x128xf32, #tpu.memory_space<vmem>>, vector<1x128xf32>
    %7 = vector.broadcast %6 : vector<1x128xf32> to vector<512x128xf32>
    %8 = arith.addf %5, %7 : vector<512x128xf32>
    %9 = arith.negf %8 : vector<512x128xf32>
    %10 = math.exp %9 : vector<512x128xf32>
    %cst_7 = arith.constant 1.000000e+00 : f32
    %11 = vector.broadcast %cst_7 : f32 to vector<512x128xf32>
    %12 = arith.addf %11, %10 : vector<512x128xf32>
    %13 = arith.divf %11, %12 : vector<512x128xf32>
    %14 = arith.mulf %8, %13 : vector<512x128xf32>
    %c0_8 = arith.constant 0 : index
    %c0_9 = arith.constant 0 : index
    %15 = vector.load %arg5[%c0_8, %c0_9] : memref<512x128xf32, #tpu.memory_space<vmem>>, vector<512x128xf32>
    tpu.vector_store %arg5[%c0_8, %c0_9], %14 {strides = array<i32>} : memref<512x128xf32, #tpu.memory_space<vmem>>, vector<512x128xf32>,
    return
  }
  func.func @transform_0(%arg0: i32) -> (i32, i32) {
    %c0_i32 = arith.constant 0 : i32
    %c0_i32_0 = arith.constant 0 : i32
    return %arg0, %c0_i32 : i32, i32
  }
  func.func @transform_1(%arg0: i32) -> (i32, i32) {
    %c0_i32 = arith.constant 0 : i32
    %c0_i32_0 = arith.constant 0 : i32
    %c0_i32_1 = arith.constant 0 : i32
    return %c0_i32, %c0_i32_0 : i32, i32
  }
  func.func @transform_2(%arg0: i32) -> (i32, i32) {
    %c0_i32 = arith.constant 0 : i32
    %c0_i32_0 = arith.constant 0 : i32
    %c0_i32_1 = arith.constant 0 : i32
    return %c0_i32, %c0_i32_0 : i32, i32
  }
  func.func @transform_3(%arg0: i32) -> (i32, i32) {
    %c0_i32 = arith.constant 0 : i32
    %c0_i32_0 = arith.constant 0 : i32
    %c0_i32_1 = arith.constant 0 : i32
    return %c0_i32, %c0_i32_0 : i32, i32
  }
  func.func @transform_4(%arg0: i32) -> (i32, i32) {
    %c0_i32 = arith.constant 0 : i32
    %c0_i32_0 = arith.constant 0 : i32
    return %arg0, %c0_i32 : i32, i32
  }
}

module attributes {stable_mosaic.version = 11 : i64} {
  func.func @_matmul_bias_act_kernel(%arg0: i32, %arg1: memref<512x144xbf16, #tpu.memory_space<vmem>>, %arg2: memref<144x128xbf16, #tpu.memory_space<vmem>>, %arg3: memref<1x128xf32, #tpu.memory_space<vmem>>, %arg4: memref<1x128xf32, #tpu.memory_space<vmem>>, %arg5: memref<512x128xf32, #tpu.memory_space<vmem>>) attributes {dimension_semantics = [#tpu.dimension_semantics<parallel>], iteration_bounds = array<i64: 8>, scalar_prefetch = 0 : i64, scratch_operands = 0 : i64, tpu.core_type = #tpu.core_type<tc>, window_params = [{transform_indices = @transform_0, window_bounds = array<i64: 512, 144>}, {pipeline_mode = #tpu.pipeline_mode<synchronous>, transform_indices = @transform_1, window_bounds = array<i64: 144, 128>}, {pipeline_mode = #tpu.pipeline_mode<synchronous>, transform_indices = @transform_2, window_bounds = array<i64: 1, 128>}, {pipeline_mode = #tpu.pipeline_mode<synchronous>, transform_indices = @transform_3, window_bounds = array<i64: 1, 128>}, {transform_indices = @transform_4, window_bounds = array<i64: 512, 128>}]} {
    %c0 = arith.constant 0 : index
    %c0_0 = arith.constant 0 : index
    %0 = vector.load %arg1[%c0, %c0_0] : memref<512x144xbf16, #tpu.memory_space<vmem>>, vector<512x144xbf16>
    %c0_1 = arith.constant 0 : index
    %c0_2 = arith.constant 0 : index
    %1 = vector.load %arg2[%c0_1, %c0_2] : memref<144x128xbf16, #tpu.memory_space<vmem>>, vector<144x128xbf16>
    %cst = arith.constant dense<0.000000e+00> : vector<512x128xf32>
    %2 = tpu.matmul %0, %1, %cst {dimension_numbers = #tpu.dot_dimension_numbers<[1], [0], [0], [1], [0, 0, 1, 1], [], []>} : vector<512x144xbf16>, vector<144x128xbf16>, vector<512x128xf32> -> vector<512x128xf32>
    %c0_3 = arith.constant 0 : index
    %c0_4 = arith.constant 0 : index
    %3 = vector.load %arg3[%c0_3, %c0_4] : memref<1x128xf32, #tpu.memory_space<vmem>>, vector<1x128xf32>
    %4 = vector.broadcast %3 : vector<1x128xf32> to vector<512x128xf32>
    %5 = arith.mulf %2, %4 : vector<512x128xf32>
    %c0_5 = arith.constant 0 : index
    %c0_6 = arith.constant 0 : index
    %6 = vector.load %arg4[%c0_5, %c0_6] : memref<1x128xf32, #tpu.memory_space<vmem>>, vector<1x128xf32>
    %7 = vector.broadcast %6 : vector<1x128xf32> to vector<512x128xf32>
    %8 = arith.addf %5, %7 : vector<512x128xf32>
    %9 = arith.negf %8 : vector<512x128xf32>
    %10 = math.exp %9 : vector<512x128xf32>
    %cst_7 = arith.constant 1.000000e+00 : f32
    %11 = vector.broadcast %cst_7 : f32 to vector<512x128xf32>
    %12 = arith.addf %11, %10 : vector<512x128xf32>
    %13 = arith.divf %11, %12 : vector<512x128xf32>
    %14 = arith.mulf %8, %13 : vector<512x128xf32>
    %c0_8 = arith.constant 0 : index
    %c0_9 = arith.constant 0 : index
    %15 = vector.load %arg5[%c0_8, %c0_9] : memref<512x128xf32, #tpu.memory_space<vmem>>, vector<512x128xf32>
    tpu.vector_store %arg5[%c0_8, %c0_9], %14 {strides = array<i32>} : memref<512x128xf32, #tpu.memory_space<vmem>>, vector<512x128xf32>,
    return
  }
  func.func @transform_0(%arg0: i32) -> (i32, i32) {
    %c0_i32 = arith.constant 0 : i32
    %c0_i32_0 = arith.constant 0 : i32
    return %arg0, %c0_i32 : i32, i32
  }
  func.func @transform_1(%arg0: i32) -> (i32, i32) {
    %c0_i32 = arith.constant 0 : i32
    %c0_i32_0 = arith.constant 0 : i32
    %c0_i32_1 = arith.constant 0 : i32
    return %c0_i32, %c0_i32_0 : i32, i32
  }
  func.func @transform_2(%arg0: i32) -> (i32, i32) {
    %c0_i32 = arith.constant 0 : i32
    %c0_i32_0 = arith.constant 0 : i32
    %c0_i32_1 = arith.constant 0 : i32
    return %c0_i32, %c0_i32_0 : i32, i32
  }
  func.func @transform_3(%arg0: i32) -> (i32, i32) {
    %c0_i32 = arith.constant 0 : i32
    %c0_i32_0 = arith.constant 0 : i32
    %c0_i32_1 = arith.constant 0 : i32
    return %c0_i32, %c0_i32_0 : i32, i32
  }
  func.func @transform_4(%arg0: i32) -> (i32, i32) {
    %c0_i32 = arith.constant 0 : i32
    %c0_i32_0 = arith.constant 0 : i32
    return %arg0, %c0_i32 : i32, i32
  }
}

module attributes {stable_mosaic.version = 11 : i64} {
  func.func @_matmul_bias_act_kernel(%arg0: i32, %arg1: memref<512x144xbf16, #tpu.memory_space<vmem>>, %arg2: memref<144x128xbf16, #tpu.memory_space<vmem>>, %arg3: memref<1x128xf32, #tpu.memory_space<vmem>>, %arg4: memref<1x128xf32, #tpu.memory_space<vmem>>, %arg5: memref<512x128xf32, #tpu.memory_space<vmem>>) attributes {dimension_semantics = [#tpu.dimension_semantics<parallel>], iteration_bounds = array<i64: 2>, scalar_prefetch = 0 : i64, scratch_operands = 0 : i64, tpu.core_type = #tpu.core_type<tc>, window_params = [{transform_indices = @transform_0, window_bounds = array<i64: 512, 144>}, {pipeline_mode = #tpu.pipeline_mode<synchronous>, transform_indices = @transform_1, window_bounds = array<i64: 144, 128>}, {pipeline_mode = #tpu.pipeline_mode<synchronous>, transform_indices = @transform_2, window_bounds = array<i64: 1, 128>}, {pipeline_mode = #tpu.pipeline_mode<synchronous>, transform_indices = @transform_3, window_bounds = array<i64: 1, 128>}, {transform_indices = @transform_4, window_bounds = array<i64: 512, 128>}]} {
    %c0 = arith.constant 0 : index
    %c0_0 = arith.constant 0 : index
    %0 = vector.load %arg1[%c0, %c0_0] : memref<512x144xbf16, #tpu.memory_space<vmem>>, vector<512x144xbf16>
    %c0_1 = arith.constant 0 : index
    %c0_2 = arith.constant 0 : index
    %1 = vector.load %arg2[%c0_1, %c0_2] : memref<144x128xbf16, #tpu.memory_space<vmem>>, vector<144x128xbf16>
    %cst = arith.constant dense<0.000000e+00> : vector<512x128xf32>
    %2 = tpu.matmul %0, %1, %cst {dimension_numbers = #tpu.dot_dimension_numbers<[1], [0], [0], [1], [0, 0, 1, 1], [], []>} : vector<512x144xbf16>, vector<144x128xbf16>, vector<512x128xf32> -> vector<512x128xf32>
    %c0_3 = arith.constant 0 : index
    %c0_4 = arith.constant 0 : index
    %3 = vector.load %arg3[%c0_3, %c0_4] : memref<1x128xf32, #tpu.memory_space<vmem>>, vector<1x128xf32>
    %4 = vector.broadcast %3 : vector<1x128xf32> to vector<512x128xf32>
    %5 = arith.mulf %2, %4 : vector<512x128xf32>
    %c0_5 = arith.constant 0 : index
    %c0_6 = arith.constant 0 : index
    %6 = vector.load %arg4[%c0_5, %c0_6] : memref<1x128xf32, #tpu.memory_space<vmem>>, vector<1x128xf32>
    %7 = vector.broadcast %6 : vector<1x128xf32> to vector<512x128xf32>
    %8 = arith.addf %5, %7 : vector<512x128xf32>
    %9 = arith.negf %8 : vector<512x128xf32>
    %10 = math.exp %9 : vector<512x128xf32>
    %cst_7 = arith.constant 1.000000e+00 : f32
    %11 = vector.broadcast %cst_7 : f32 to vector<512x128xf32>
    %12 = arith.addf %11, %10 : vector<512x128xf32>
    %13 = arith.divf %11, %12 : vector<512x128xf32>
    %14 = arith.mulf %8, %13 : vector<512x128xf32>
    %c0_8 = arith.constant 0 : index
    %c0_9 = arith.constant 0 : index
    %15 = vector.load %arg5[%c0_8, %c0_9] : memref<512x128xf32, #tpu.memory_space<vmem>>, vector<512x128xf32>
    tpu.vector_store %arg5[%c0_8, %c0_9], %14 {strides = array<i32>} : memref<512x128xf32, #tpu.memory_space<vmem>>, vector<512x128xf32>,
    return
  }
  func.func @transform_0(%arg0: i32) -> (i32, i32) {
    %c0_i32 = arith.constant 0 : i32
    %c0_i32_0 = arith.constant 0 : i32
    return %arg0, %c0_i32 : i32, i32
  }
  func.func @transform_1(%arg0: i32) -> (i32, i32) {
    %c0_i32 = arith.constant 0 : i32
    %c0_i32_0 = arith.constant 0 : i32
    %c0_i32_1 = arith.constant 0 : i32
    return %c0_i32, %c0_i32_0 : i32, i32
  }
  func.func @transform_2(%arg0: i32) -> (i32, i32) {
    %c0_i32 = arith.constant 0 : i32
    %c0_i32_0 = arith.constant 0 : i32
    %c0_i32_1 = arith.constant 0 : i32
    return %c0_i32, %c0_i32_0 : i32, i32
  }
  func.func @transform_3(%arg0: i32) -> (i32, i32) {
    %c0_i32 = arith.constant 0 : i32
    %c0_i32_0 = arith.constant 0 : i32
    %c0_i32_1 = arith.constant 0 : i32
    return %c0_i32, %c0_i32_0 : i32, i32
  }
  func.func @transform_4(%arg0: i32) -> (i32, i32) {
    %c0_i32 = arith.constant 0 : i32
    %c0_i32_0 = arith.constant 0 : i32
    return %arg0, %c0_i32 : i32, i32
  }
}

module attributes {stable_mosaic.version = 11 : i64} {
  func.func @_matmul_bias_act_kernel(%arg0: i32, %arg1: memref<256x216xbf16, #tpu.memory_space<vmem>>, %arg2: memref<216x128xbf16, #tpu.memory_space<vmem>>, %arg3: memref<1x128xf32, #tpu.memory_space<vmem>>, %arg4: memref<1x128xf32, #tpu.memory_space<vmem>>, %arg5: memref<256x128xf32, #tpu.memory_space<vmem>>) attributes {dimension_semantics = [#tpu.dimension_semantics<parallel>], iteration_bounds = array<i64: 1>, scalar_prefetch = 0 : i64, scratch_operands = 0 : i64, tpu.core_type = #tpu.core_type<tc>, window_params = [{transform_indices = @transform_0, window_bounds = array<i64: 256, 216>}, {pipeline_mode = #tpu.pipeline_mode<synchronous>, transform_indices = @transform_1, window_bounds = array<i64: 216, 128>}, {pipeline_mode = #tpu.pipeline_mode<synchronous>, transform_indices = @transform_2, window_bounds = array<i64: 1, 128>}, {pipeline_mode = #tpu.pipeline_mode<synchronous>, transform_indices = @transform_3, window_bounds = array<i64: 1, 128>}, {transform_indices = @transform_4, window_bounds = array<i64: 256, 128>}]} {
    %c0 = arith.constant 0 : index
    %c0_0 = arith.constant 0 : index
    %0 = vector.load %arg1[%c0, %c0_0] : memref<256x216xbf16, #tpu.memory_space<vmem>>, vector<256x216xbf16>
    %c0_1 = arith.constant 0 : index
    %c0_2 = arith.constant 0 : index
    %1 = vector.load %arg2[%c0_1, %c0_2] : memref<216x128xbf16, #tpu.memory_space<vmem>>, vector<216x128xbf16>
    %cst = arith.constant dense<0.000000e+00> : vector<256x128xf32>
    %2 = tpu.matmul %0, %1, %cst {dimension_numbers = #tpu.dot_dimension_numbers<[1], [0], [0], [1], [0, 0, 1, 1], [], []>} : vector<256x216xbf16>, vector<216x128xbf16>, vector<256x128xf32> -> vector<256x128xf32>
    %c0_3 = arith.constant 0 : index
    %c0_4 = arith.constant 0 : index
    %3 = vector.load %arg3[%c0_3, %c0_4] : memref<1x128xf32, #tpu.memory_space<vmem>>, vector<1x128xf32>
    %4 = vector.broadcast %3 : vector<1x128xf32> to vector<256x128xf32>
    %5 = arith.mulf %2, %4 : vector<256x128xf32>
    %c0_5 = arith.constant 0 : index
    %c0_6 = arith.constant 0 : index
    %6 = vector.load %arg4[%c0_5, %c0_6] : memref<1x128xf32, #tpu.memory_space<vmem>>, vector<1x128xf32>
    %7 = vector.broadcast %6 : vector<1x128xf32> to vector<256x128xf32>
    %8 = arith.addf %5, %7 : vector<256x128xf32>
    %9 = arith.negf %8 : vector<256x128xf32>
    %10 = math.exp %9 : vector<256x128xf32>
    %cst_7 = arith.constant 1.000000e+00 : f32
    %11 = vector.broadcast %cst_7 : f32 to vector<256x128xf32>
    %12 = arith.addf %11, %10 : vector<256x128xf32>
    %13 = arith.divf %11, %12 : vector<256x128xf32>
    %14 = arith.mulf %8, %13 : vector<256x128xf32>
    %c0_8 = arith.constant 0 : index
    %c0_9 = arith.constant 0 : index
    %15 = vector.load %arg5[%c0_8, %c0_9] : memref<256x128xf32, #tpu.memory_space<vmem>>, vector<256x128xf32>
    tpu.vector_store %arg5[%c0_8, %c0_9], %14 {strides = array<i32>} : memref<256x128xf32, #tpu.memory_space<vmem>>, vector<256x128xf32>,
    return
  }
  func.func @transform_0(%arg0: i32) -> (i32, i32) {
    %c0_i32 = arith.constant 0 : i32
    %c0_i32_0 = arith.constant 0 : i32
    return %arg0, %c0_i32 : i32, i32
  }
  func.func @transform_1(%arg0: i32) -> (i32, i32) {
    %c0_i32 = arith.constant 0 : i32
    %c0_i32_0 = arith.constant 0 : i32
    %c0_i32_1 = arith.constant 0 : i32
    return %c0_i32, %c0_i32_0 : i32, i32
  }
  func.func @transform_2(%arg0: i32) -> (i32, i32) {
    %c0_i32 = arith.constant 0 : i32
    %c0_i32_0 = arith.constant 0 : i32
    %c0_i32_1 = arith.constant 0 : i32
    return %c0_i32, %c0_i32_0 : i32, i32
  }
  func.func @transform_3(%arg0: i32) -> (i32, i32) {
    %c0_i32 = arith.constant 0 : i32
    %c0_i32_0 = arith.constant 0 : i32
    %c0_i32_1 = arith.constant 0 : i32
    return %c0_i32, %c0_i32_0 : i32, i32
  }
  func.func @transform_4(%arg0: i32) -> (i32, i32) {
    %c0_i32 = arith.constant 0 : i32
    %c0_i32_0 = arith.constant 0 : i32
    return %arg0, %c0_i32 : i32, i32
  }
}

module attributes {stable_mosaic.version = 11 : i64} {
  func.func @_adain_pair_kernel(%arg0: memref<2x64x32xf32, #tpu.memory_space<vmem>>, %arg1: memref<2x64x32xf32, #tpu.memory_space<vmem>>, %arg2: memref<2x64x32xf32, #tpu.memory_space<vmem>>, %arg3: memref<2x64x32xf32, #tpu.memory_space<vmem>>) attributes {dimension_semantics = [], scalar_prefetch = 0 : i64, scratch_operands = 0 : i64, tpu.core_type = #tpu.core_type<tc>} {
    %c0 = arith.constant 0 : index
    %c0_0 = arith.constant 0 : index
    %c0_1 = arith.constant 0 : index
    %0 = vector.load %arg0[%c0, %c0_0, %c0_1] : memref<2x64x32xf32, #tpu.memory_space<vmem>>, vector<2x64x32xf32>
    %c0_2 = arith.constant 0 : index
    %c0_3 = arith.constant 0 : index
    %c0_4 = arith.constant 0 : index
    %1 = vector.load %arg1[%c0_2, %c0_3, %c0_4] : memref<2x64x32xf32, #tpu.memory_space<vmem>>, vector<2x64x32xf32>
    %cst = arith.constant dense<0.000000e+00> : vector<2x32xf32>
    %2 = vector.multi_reduction <add>, %0, %cst [1] : vector<2x64x32xf32> to vector<2x32xf32>
    %3 = vector.shape_cast %2 : vector<2x32xf32> to vector<2x1x32xf32>
    %cst_5 = arith.constant 6.400000e+01 : f32
    %4 = vector.broadcast %cst_5 : f32 to vector<2x1x32xf32>
    %5 = arith.divf %3, %4 : vector<2x1x32xf32>
    %6 = vector.broadcast %5 : vector<2x1x32xf32> to vector<2x64x32xf32>
    %7 = arith.subf %0, %6 : vector<2x64x32xf32>
    %8 = arith.mulf %7, %7 : vector<2x64x32xf32>
    %cst_6 = arith.constant dense<0.000000e+00> : vector<2x32xf32>
    %9 = vector.multi_reduction <add>, %8, %cst_6 [1] : vector<2x64x32xf32> to vector<2x32xf32>
    %10 = vector.shape_cast %9 : vector<2x32xf32> to vector<2x1x32xf32>
    %cst_7 = arith.constant 6.400000e+01 : f32
    %11 = vector.broadcast %cst_7 : f32 to vector<2x1x32xf32>
    %12 = arith.divf %10, %11 : vector<2x1x32xf32>
    %cst_8 = arith.constant dense<0.000000e+00> : vector<2x32xf32>
    %13 = vector.multi_reduction <add>, %1, %cst_8 [1] : vector<2x64x32xf32> to vector<2x32xf32>
    %14 = vector.shape_cast %13 : vector<2x32xf32> to vector<2x1x32xf32>
    %cst_9 = arith.constant 6.400000e+01 : f32
    %15 = vector.broadcast %cst_9 : f32 to vector<2x1x32xf32>
    %16 = arith.divf %14, %15 : vector<2x1x32xf32>
    %17 = vector.broadcast %16 : vector<2x1x32xf32> to vector<2x64x32xf32>
    %18 = arith.subf %1, %17 : vector<2x64x32xf32>
    %19 = arith.mulf %18, %18 : vector<2x64x32xf32>
    %cst_10 = arith.constant dense<0.000000e+00> : vector<2x32xf32>
    %20 = vector.multi_reduction <add>, %19, %cst_10 [1] : vector<2x64x32xf32> to vector<2x32xf32>
    %21 = vector.shape_cast %20 : vector<2x32xf32> to vector<2x1x32xf32>
    %cst_11 = arith.constant 6.400000e+01 : f32
    %22 = vector.broadcast %cst_11 : f32 to vector<2x1x32xf32>
    %23 = arith.divf %21, %22 : vector<2x1x32xf32>
    %cst_12 = arith.constant 9.99999974E-6 : f32
    %24 = vector.broadcast %cst_12 : f32 to vector<2x1x32xf32>
    %25 = arith.addf %12, %24 : vector<2x1x32xf32>
    %26 = math.rsqrt %25 : vector<2x1x32xf32>
    %cst_13 = arith.constant 9.99999974E-6 : f32
    %27 = vector.broadcast %cst_13 : f32 to vector<2x1x32xf32>
    %28 = arith.addf %23, %27 : vector<2x1x32xf32>
    %29 = math.rsqrt %28 : vector<2x1x32xf32>
    %cst_14 = arith.constant 9.99999974E-6 : f32
    %30 = vector.broadcast %cst_14 : f32 to vector<2x1x32xf32>
    %31 = arith.addf %12, %30 : vector<2x1x32xf32>
    %32 = math.sqrt %31 : vector<2x1x32xf32>
    %cst_15 = arith.constant 9.99999974E-6 : f32
    %33 = vector.broadcast %cst_15 : f32 to vector<2x1x32xf32>
    %34 = arith.addf %23, %33 : vector<2x1x32xf32>
    %35 = math.sqrt %34 : vector<2x1x32xf32>
    %36 = vector.broadcast %5 : vector<2x1x32xf32> to vector<2x64x32xf32>
    %37 = arith.subf %0, %36 : vector<2x64x32xf32>
    %38 = vector.broadcast %26 : vector<2x1x32xf32> to vector<2x64x32xf32>
    %39 = arith.mulf %37, %38 : vector<2x64x32xf32>
    %40 = vector.broadcast %35 : vector<2x1x32xf32> to vector<2x64x32xf32>
    %41 = arith.mulf %39, %40 : vector<2x64x32xf32>
    %42 = vector.broadcast %16 : vector<2x1x32xf32> to vector<2x64x32xf32>
    %43 = arith.addf %41, %42 : vector<2x64x32xf32>
    %c0_16 = arith.constant 0 : index
    %c0_17 = arith.constant 0 : index
    %c0_18 = arith.constant 0 : index
    %44 = vector.load %arg2[%c0_16, %c0_17, %c0_18] : memref<2x64x32xf32, #tpu.memory_space<vmem>>, vector<2x64x32xf32>
    tpu.vector_store %arg2[%c0_16, %c0_17, %c0_18], %43 {strides = array<i32>} : memref<2x64x32xf32, #tpu.memory_space<vmem>>, vector<2x64x32xf32>,
    %45 = vector.broadcast %16 : vector<2x1x32xf32> to vector<2x64x32xf32>
    %46 = arith.subf %1, %45 : vector<2x64x32xf32>
    %47 = vector.broadcast %29 : vector<2x1x32xf32> to vector<2x64x32xf32>
    %48 = arith.mulf %46, %47 : vector<2x64x32xf32>
    %49 = vector.broadcast %32 : vector<2x1x32xf32> to vector<2x64x32xf32>
    %50 = arith.mulf %48, %49 : vector<2x64x32xf32>
    %51 = vector.broadcast %5 : vector<2x1x32xf32> to vector<2x64x32xf32>
    %52 = arith.addf %50, %51 : vector<2x64x32xf32>
    %c0_19 = arith.constant 0 : index
    %c0_20 = arith.constant 0 : index
    %c0_21 = arith.constant 0 : index
    %53 = vector.load %arg3[%c0_19, %c0_20, %c0_21] : memref<2x64x32xf32, #tpu.memory_space<vmem>>, vector<2x64x32xf32>
    tpu.vector_store %arg3[%c0_19, %c0_20, %c0_21], %52 {strides = array<i32>} : memref<2x64x32xf32, #tpu.memory_space<vmem>>, vector<2x64x32xf32>,
    return
  }
}

module attributes {stable_mosaic.version = 11 : i64} {
  func.func @_matmul_bias_act_kernel(%arg0: i32, %arg1: memref<128x288xbf16, #tpu.memory_space<vmem>>, %arg2: memref<288x128xbf16, #tpu.memory_space<vmem>>, %arg3: memref<1x128xf32, #tpu.memory_space<vmem>>, %arg4: memref<1x128xf32, #tpu.memory_space<vmem>>, %arg5: memref<128x128xf32, #tpu.memory_space<vmem>>) attributes {dimension_semantics = [#tpu.dimension_semantics<parallel>], iteration_bounds = array<i64: 1>, scalar_prefetch = 0 : i64, scratch_operands = 0 : i64, tpu.core_type = #tpu.core_type<tc>, window_params = [{transform_indices = @transform_0, window_bounds = array<i64: 128, 288>}, {pipeline_mode = #tpu.pipeline_mode<synchronous>, transform_indices = @transform_1, window_bounds = array<i64: 288, 128>}, {pipeline_mode = #tpu.pipeline_mode<synchronous>, transform_indices = @transform_2, window_bounds = array<i64: 1, 128>}, {pipeline_mode = #tpu.pipeline_mode<synchronous>, transform_indices = @transform_3, window_bounds = array<i64: 1, 128>}, {transform_indices = @transform_4, window_bounds = array<i64: 128, 128>}]} {
    %c0 = arith.constant 0 : index
    %c0_0 = arith.constant 0 : index
    %0 = vector.load %arg1[%c0, %c0_0] : memref<128x288xbf16, #tpu.memory_space<vmem>>, vector<128x288xbf16>
    %c0_1 = arith.constant 0 : index
    %c0_2 = arith.constant 0 : index
    %1 = vector.load %arg2[%c0_1, %c0_2] : memref<288x128xbf16, #tpu.memory_space<vmem>>, vector<288x128xbf16>
    %cst = arith.constant dense<0.000000e+00> : vector<128x128xf32>
    %2 = tpu.matmul %0, %1, %cst {dimension_numbers = #tpu.dot_dimension_numbers<[1], [0], [0], [1], [0, 0, 1, 1], [], []>} : vector<128x288xbf16>, vector<288x128xbf16>, vector<128x128xf32> -> vector<128x128xf32>
    %c0_3 = arith.constant 0 : index
    %c0_4 = arith.constant 0 : index
    %3 = vector.load %arg3[%c0_3, %c0_4] : memref<1x128xf32, #tpu.memory_space<vmem>>, vector<1x128xf32>
    %4 = vector.broadcast %3 : vector<1x128xf32> to vector<128x128xf32>
    %5 = arith.mulf %2, %4 : vector<128x128xf32>
    %c0_5 = arith.constant 0 : index
    %c0_6 = arith.constant 0 : index
    %6 = vector.load %arg4[%c0_5, %c0_6] : memref<1x128xf32, #tpu.memory_space<vmem>>, vector<1x128xf32>
    %7 = vector.broadcast %6 : vector<1x128xf32> to vector<128x128xf32>
    %8 = arith.addf %5, %7 : vector<128x128xf32>
    %9 = arith.negf %8 : vector<128x128xf32>
    %10 = math.exp %9 : vector<128x128xf32>
    %cst_7 = arith.constant 1.000000e+00 : f32
    %11 = vector.broadcast %cst_7 : f32 to vector<128x128xf32>
    %12 = arith.addf %11, %10 : vector<128x128xf32>
    %13 = arith.divf %11, %12 : vector<128x128xf32>
    %14 = arith.mulf %8, %13 : vector<128x128xf32>
    %c0_8 = arith.constant 0 : index
    %c0_9 = arith.constant 0 : index
    %15 = vector.load %arg5[%c0_8, %c0_9] : memref<128x128xf32, #tpu.memory_space<vmem>>, vector<128x128xf32>
    tpu.vector_store %arg5[%c0_8, %c0_9], %14 {strides = array<i32>} : memref<128x128xf32, #tpu.memory_space<vmem>>, vector<128x128xf32>,
    return
  }
  func.func @transform_0(%arg0: i32) -> (i32, i32) {
    %c0_i32 = arith.constant 0 : i32
    %c0_i32_0 = arith.constant 0 : i32
    return %arg0, %c0_i32 : i32, i32
  }
  func.func @transform_1(%arg0: i32) -> (i32, i32) {
    %c0_i32 = arith.constant 0 : i32
    %c0_i32_0 = arith.constant 0 : i32
    %c0_i32_1 = arith.constant 0 : i32
    return %c0_i32, %c0_i32_0 : i32, i32
  }
  func.func @transform_2(%arg0: i32) -> (i32, i32) {
    %c0_i32 = arith.constant 0 : i32
    %c0_i32_0 = arith.constant 0 : i32
    %c0_i32_1 = arith.constant 0 : i32
    return %c0_i32, %c0_i32_0 : i32, i32
  }
  func.func @transform_3(%arg0: i32) -> (i32, i32) {
    %c0_i32 = arith.constant 0 : i32
    %c0_i32_0 = arith.constant 0 : i32
    %c0_i32_1 = arith.constant 0 : i32
    return %c0_i32, %c0_i32_0 : i32, i32
  }
  func.func @transform_4(%arg0: i32) -> (i32, i32) {
    %c0_i32 = arith.constant 0 : i32
    %c0_i32_0 = arith.constant 0 : i32
    return %arg0, %c0_i32 : i32, i32
  }
}

module attributes {stable_mosaic.version = 11 : i64} {
  func.func @_matmul_bias_act_kernel(%arg0: i32, %arg1: memref<128x432xbf16, #tpu.memory_space<vmem>>, %arg2: memref<432x128xbf16, #tpu.memory_space<vmem>>, %arg3: memref<1x128xf32, #tpu.memory_space<vmem>>, %arg4: memref<1x128xf32, #tpu.memory_space<vmem>>, %arg5: memref<128x128xf32, #tpu.memory_space<vmem>>) attributes {dimension_semantics = [#tpu.dimension_semantics<parallel>], iteration_bounds = array<i64: 1>, scalar_prefetch = 0 : i64, scratch_operands = 0 : i64, tpu.core_type = #tpu.core_type<tc>, window_params = [{transform_indices = @transform_0, window_bounds = array<i64: 128, 432>}, {pipeline_mode = #tpu.pipeline_mode<synchronous>, transform_indices = @transform_1, window_bounds = array<i64: 432, 128>}, {pipeline_mode = #tpu.pipeline_mode<synchronous>, transform_indices = @transform_2, window_bounds = array<i64: 1, 128>}, {pipeline_mode = #tpu.pipeline_mode<synchronous>, transform_indices = @transform_3, window_bounds = array<i64: 1, 128>}, {transform_indices = @transform_4, window_bounds = array<i64: 128, 128>}]} {
    %c0 = arith.constant 0 : index
    %c0_0 = arith.constant 0 : index
    %0 = vector.load %arg1[%c0, %c0_0] : memref<128x432xbf16, #tpu.memory_space<vmem>>, vector<128x432xbf16>
    %c0_1 = arith.constant 0 : index
    %c0_2 = arith.constant 0 : index
    %1 = vector.load %arg2[%c0_1, %c0_2] : memref<432x128xbf16, #tpu.memory_space<vmem>>, vector<432x128xbf16>
    %cst = arith.constant dense<0.000000e+00> : vector<128x128xf32>
    %2 = tpu.matmul %0, %1, %cst {dimension_numbers = #tpu.dot_dimension_numbers<[1], [0], [0], [1], [0, 0, 1, 1], [], []>} : vector<128x432xbf16>, vector<432x128xbf16>, vector<128x128xf32> -> vector<128x128xf32>
    %c0_3 = arith.constant 0 : index
    %c0_4 = arith.constant 0 : index
    %3 = vector.load %arg3[%c0_3, %c0_4] : memref<1x128xf32, #tpu.memory_space<vmem>>, vector<1x128xf32>
    %4 = vector.broadcast %3 : vector<1x128xf32> to vector<128x128xf32>
    %5 = arith.mulf %2, %4 : vector<128x128xf32>
    %c0_5 = arith.constant 0 : index
    %c0_6 = arith.constant 0 : index
    %6 = vector.load %arg4[%c0_5, %c0_6] : memref<1x128xf32, #tpu.memory_space<vmem>>, vector<1x128xf32>
    %7 = vector.broadcast %6 : vector<1x128xf32> to vector<128x128xf32>
    %8 = arith.addf %5, %7 : vector<128x128xf32>
    %9 = arith.negf %8 : vector<128x128xf32>
    %10 = math.exp %9 : vector<128x128xf32>
    %cst_7 = arith.constant 1.000000e+00 : f32
    %11 = vector.broadcast %cst_7 : f32 to vector<128x128xf32>
    %12 = arith.addf %11, %10 : vector<128x128xf32>
    %13 = arith.divf %11, %12 : vector<128x128xf32>
    %14 = arith.mulf %8, %13 : vector<128x128xf32>
    %c0_8 = arith.constant 0 : index
    %c0_9 = arith.constant 0 : index
    %15 = vector.load %arg5[%c0_8, %c0_9] : memref<128x128xf32, #tpu.memory_space<vmem>>, vector<128x128xf32>
    tpu.vector_store %arg5[%c0_8, %c0_9], %14 {strides = array<i32>} : memref<128x128xf32, #tpu.memory_space<vmem>>, vector<128x128xf32>,
    return
  }
  func.func @transform_0(%arg0: i32) -> (i32, i32) {
    %c0_i32 = arith.constant 0 : i32
    %c0_i32_0 = arith.constant 0 : i32
    return %arg0, %c0_i32 : i32, i32
  }
  func.func @transform_1(%arg0: i32) -> (i32, i32) {
    %c0_i32 = arith.constant 0 : i32
    %c0_i32_0 = arith.constant 0 : i32
    %c0_i32_1 = arith.constant 0 : i32
    return %c0_i32, %c0_i32_0 : i32, i32
  }
  func.func @transform_2(%arg0: i32) -> (i32, i32) {
    %c0_i32 = arith.constant 0 : i32
    %c0_i32_0 = arith.constant 0 : i32
    %c0_i32_1 = arith.constant 0 : i32
    return %c0_i32, %c0_i32_0 : i32, i32
  }
  func.func @transform_3(%arg0: i32) -> (i32, i32) {
    %c0_i32 = arith.constant 0 : i32
    %c0_i32_0 = arith.constant 0 : i32
    %c0_i32_1 = arith.constant 0 : i32
    return %c0_i32, %c0_i32_0 : i32, i32
  }
  func.func @transform_4(%arg0: i32) -> (i32, i32) {
    %c0_i32 = arith.constant 0 : i32
    %c0_i32_0 = arith.constant 0 : i32
    return %arg0, %c0_i32 : i32, i32
  }
}

module attributes {stable_mosaic.version = 11 : i64} {
  func.func @_matmul_bias_act_kernel(%arg0: i32, %arg1: memref<32x576xbf16, #tpu.memory_space<vmem>>, %arg2: memref<576x128xbf16, #tpu.memory_space<vmem>>, %arg3: memref<1x128xf32, #tpu.memory_space<vmem>>, %arg4: memref<1x128xf32, #tpu.memory_space<vmem>>, %arg5: memref<32x128xf32, #tpu.memory_space<vmem>>) attributes {dimension_semantics = [#tpu.dimension_semantics<parallel>], iteration_bounds = array<i64: 1>, scalar_prefetch = 0 : i64, scratch_operands = 0 : i64, tpu.core_type = #tpu.core_type<tc>, window_params = [{transform_indices = @transform_0, window_bounds = array<i64: 32, 576>}, {pipeline_mode = #tpu.pipeline_mode<synchronous>, transform_indices = @transform_1, window_bounds = array<i64: 576, 128>}, {pipeline_mode = #tpu.pipeline_mode<synchronous>, transform_indices = @transform_2, window_bounds = array<i64: 1, 128>}, {pipeline_mode = #tpu.pipeline_mode<synchronous>, transform_indices = @transform_3, window_bounds = array<i64: 1, 128>}, {transform_indices = @transform_4, window_bounds = array<i64: 32, 128>}]} {
    %c0 = arith.constant 0 : index
    %c0_0 = arith.constant 0 : index
    %0 = vector.load %arg1[%c0, %c0_0] : memref<32x576xbf16, #tpu.memory_space<vmem>>, vector<32x576xbf16>
    %c0_1 = arith.constant 0 : index
    %c0_2 = arith.constant 0 : index
    %1 = vector.load %arg2[%c0_1, %c0_2] : memref<576x128xbf16, #tpu.memory_space<vmem>>, vector<576x128xbf16>
    %cst = arith.constant dense<0.000000e+00> : vector<32x128xf32>
    %2 = tpu.matmul %0, %1, %cst {dimension_numbers = #tpu.dot_dimension_numbers<[1], [0], [0], [1], [0, 0, 1, 1], [], []>} : vector<32x576xbf16>, vector<576x128xbf16>, vector<32x128xf32> -> vector<32x128xf32>
    %c0_3 = arith.constant 0 : index
    %c0_4 = arith.constant 0 : index
    %3 = vector.load %arg3[%c0_3, %c0_4] : memref<1x128xf32, #tpu.memory_space<vmem>>, vector<1x128xf32>
    %4 = vector.broadcast %3 : vector<1x128xf32> to vector<32x128xf32>
    %5 = arith.mulf %2, %4 : vector<32x128xf32>
    %c0_5 = arith.constant 0 : index
    %c0_6 = arith.constant 0 : index
    %6 = vector.load %arg4[%c0_5, %c0_6] : memref<1x128xf32, #tpu.memory_space<vmem>>, vector<1x128xf32>
    %7 = vector.broadcast %6 : vector<1x128xf32> to vector<32x128xf32>
    %8 = arith.addf %5, %7 : vector<32x128xf32>
    %9 = arith.negf %8 : vector<32x128xf32>
    %10 = math.exp %9 : vector<32x128xf32>
    %cst_7 = arith.constant 1.000000e+00 : f32
    %11 = vector.broadcast %cst_7 : f32 to vector<32x128xf32>
    %12 = arith.addf %11, %10 : vector<32x128xf32>
    %13 = arith.divf %11, %12 : vector<32x128xf32>
    %14 = arith.mulf %8, %13 : vector<32x128xf32>
    %c0_8 = arith.constant 0 : index
    %c0_9 = arith.constant 0 : index
    %15 = vector.load %arg5[%c0_8, %c0_9] : memref<32x128xf32, #tpu.memory_space<vmem>>, vector<32x128xf32>
    tpu.vector_store %arg5[%c0_8, %c0_9], %14 {strides = array<i32>} : memref<32x128xf32, #tpu.memory_space<vmem>>, vector<32x128xf32>,
    return
  }
  func.func @transform_0(%arg0: i32) -> (i32, i32) {
    %c0_i32 = arith.constant 0 : i32
    %c0_i32_0 = arith.constant 0 : i32
    return %arg0, %c0_i32 : i32, i32
  }
  func.func @transform_1(%arg0: i32) -> (i32, i32) {
    %c0_i32 = arith.constant 0 : i32
    %c0_i32_0 = arith.constant 0 : i32
    %c0_i32_1 = arith.constant 0 : i32
    return %c0_i32, %c0_i32_0 : i32, i32
  }
  func.func @transform_2(%arg0: i32) -> (i32, i32) {
    %c0_i32 = arith.constant 0 : i32
    %c0_i32_0 = arith.constant 0 : i32
    %c0_i32_1 = arith.constant 0 : i32
    return %c0_i32, %c0_i32_0 : i32, i32
  }
  func.func @transform_3(%arg0: i32) -> (i32, i32) {
    %c0_i32 = arith.constant 0 : i32
    %c0_i32_0 = arith.constant 0 : i32
    %c0_i32_1 = arith.constant 0 : i32
    return %c0_i32, %c0_i32_0 : i32, i32
  }
  func.func @transform_4(%arg0: i32) -> (i32, i32) {
    %c0_i32 = arith.constant 0 : i32
    %c0_i32_0 = arith.constant 0 : i32
    return %arg0, %c0_i32 : i32, i32
  }
}

module attributes {stable_mosaic.version = 11 : i64} {
  func.func @_matmul_bias_act_kernel(%arg0: i32, %arg1: memref<32x720xbf16, #tpu.memory_space<vmem>>, %arg2: memref<720x128xbf16, #tpu.memory_space<vmem>>, %arg3: memref<1x128xf32, #tpu.memory_space<vmem>>, %arg4: memref<1x128xf32, #tpu.memory_space<vmem>>, %arg5: memref<32x128xf32, #tpu.memory_space<vmem>>) attributes {dimension_semantics = [#tpu.dimension_semantics<parallel>], iteration_bounds = array<i64: 1>, scalar_prefetch = 0 : i64, scratch_operands = 0 : i64, tpu.core_type = #tpu.core_type<tc>, window_params = [{transform_indices = @transform_0, window_bounds = array<i64: 32, 720>}, {pipeline_mode = #tpu.pipeline_mode<synchronous>, transform_indices = @transform_1, window_bounds = array<i64: 720, 128>}, {pipeline_mode = #tpu.pipeline_mode<synchronous>, transform_indices = @transform_2, window_bounds = array<i64: 1, 128>}, {pipeline_mode = #tpu.pipeline_mode<synchronous>, transform_indices = @transform_3, window_bounds = array<i64: 1, 128>}, {transform_indices = @transform_4, window_bounds = array<i64: 32, 128>}]} {
    %c0 = arith.constant 0 : index
    %c0_0 = arith.constant 0 : index
    %0 = vector.load %arg1[%c0, %c0_0] : memref<32x720xbf16, #tpu.memory_space<vmem>>, vector<32x720xbf16>
    %c0_1 = arith.constant 0 : index
    %c0_2 = arith.constant 0 : index
    %1 = vector.load %arg2[%c0_1, %c0_2] : memref<720x128xbf16, #tpu.memory_space<vmem>>, vector<720x128xbf16>
    %cst = arith.constant dense<0.000000e+00> : vector<32x128xf32>
    %2 = tpu.matmul %0, %1, %cst {dimension_numbers = #tpu.dot_dimension_numbers<[1], [0], [0], [1], [0, 0, 1, 1], [], []>} : vector<32x720xbf16>, vector<720x128xbf16>, vector<32x128xf32> -> vector<32x128xf32>
    %c0_3 = arith.constant 0 : index
    %c0_4 = arith.constant 0 : index
    %3 = vector.load %arg3[%c0_3, %c0_4] : memref<1x128xf32, #tpu.memory_space<vmem>>, vector<1x128xf32>
    %4 = vector.broadcast %3 : vector<1x128xf32> to vector<32x128xf32>
    %5 = arith.mulf %2, %4 : vector<32x128xf32>
    %c0_5 = arith.constant 0 : index
    %c0_6 = arith.constant 0 : index
    %6 = vector.load %arg4[%c0_5, %c0_6] : memref<1x128xf32, #tpu.memory_space<vmem>>, vector<1x128xf32>
    %7 = vector.broadcast %6 : vector<1x128xf32> to vector<32x128xf32>
    %8 = arith.addf %5, %7 : vector<32x128xf32>
    %9 = arith.negf %8 : vector<32x128xf32>
    %10 = math.exp %9 : vector<32x128xf32>
    %cst_7 = arith.constant 1.000000e+00 : f32
    %11 = vector.broadcast %cst_7 : f32 to vector<32x128xf32>
    %12 = arith.addf %11, %10 : vector<32x128xf32>
    %13 = arith.divf %11, %12 : vector<32x128xf32>
    %14 = arith.mulf %8, %13 : vector<32x128xf32>
    %c0_8 = arith.constant 0 : index
    %c0_9 = arith.constant 0 : index
    %15 = vector.load %arg5[%c0_8, %c0_9] : memref<32x128xf32, #tpu.memory_space<vmem>>, vector<32x128xf32>
    tpu.vector_store %arg5[%c0_8, %c0_9], %14 {strides = array<i32>} : memref<32x128xf32, #tpu.memory_space<vmem>>, vector<32x128xf32>,
    return
  }
  func.func @transform_0(%arg0: i32) -> (i32, i32) {
    %c0_i32 = arith.constant 0 : i32
    %c0_i32_0 = arith.constant 0 : i32
    return %arg0, %c0_i32 : i32, i32
  }
  func.func @transform_1(%arg0: i32) -> (i32, i32) {
    %c0_i32 = arith.constant 0 : i32
    %c0_i32_0 = arith.constant 0 : i32
    %c0_i32_1 = arith.constant 0 : i32
    return %c0_i32, %c0_i32_0 : i32, i32
  }
  func.func @transform_2(%arg0: i32) -> (i32, i32) {
    %c0_i32 = arith.constant 0 : i32
    %c0_i32_0 = arith.constant 0 : i32
    %c0_i32_1 = arith.constant 0 : i32
    return %c0_i32, %c0_i32_0 : i32, i32
  }
  func.func @transform_3(%arg0: i32) -> (i32, i32) {
    %c0_i32 = arith.constant 0 : i32
    %c0_i32_0 = arith.constant 0 : i32
    %c0_i32_1 = arith.constant 0 : i32
    return %c0_i32, %c0_i32_0 : i32, i32
  }
  func.func @transform_4(%arg0: i32) -> (i32, i32) {
    %c0_i32 = arith.constant 0 : i32
    %c0_i32_0 = arith.constant 0 : i32
    return %arg0, %c0_i32 : i32, i32
  }
}

module attributes {stable_mosaic.version = 11 : i64} {
  func.func @_avgpool_kernel(%arg0: memref<8x4x64xf32, #tpu.memory_space<vmem>>, %arg1: memref<8x64xf32, #tpu.memory_space<vmem>>) attributes {dimension_semantics = [], scalar_prefetch = 0 : i64, scratch_operands = 0 : i64, tpu.core_type = #tpu.core_type<tc>} {
    %c0 = arith.constant 0 : index
    %c0_0 = arith.constant 0 : index
    %c0_1 = arith.constant 0 : index
    %0 = vector.load %arg0[%c0, %c0_0, %c0_1] : memref<8x4x64xf32, #tpu.memory_space<vmem>>, vector<8x4x64xf32>
    %cst = arith.constant dense<0.000000e+00> : vector<8x64xf32>
    %1 = vector.multi_reduction <add>, %0, %cst [1] : vector<8x4x64xf32> to vector<8x64xf32>
    %cst_2 = arith.constant 4.000000e+00 : f32
    %2 = vector.broadcast %cst_2 : f32 to vector<8x64xf32>
    %3 = arith.divf %1, %2 : vector<8x64xf32>
    %c0_3 = arith.constant 0 : index
    %c0_4 = arith.constant 0 : index
    %4 = vector.load %arg1[%c0_3, %c0_4] : memref<8x64xf32, #tpu.memory_space<vmem>>, vector<8x64xf32>
    tpu.vector_store %arg1[%c0_3, %c0_4], %3 {strides = array<i32>} : memref<8x64xf32, #tpu.memory_space<vmem>>, vector<8x64xf32>,
    return
  }
}

module attributes {stable_mosaic.version = 11 : i64} {
  func.func @_matmul_bias_act_kernel(%arg0: i32, %arg1: memref<32x96xbf16, #tpu.memory_space<vmem>>, %arg2: memref<96x128xbf16, #tpu.memory_space<vmem>>, %arg3: memref<1x128xf32, #tpu.memory_space<vmem>>, %arg4: memref<1x128xf32, #tpu.memory_space<vmem>>, %arg5: memref<32x128xf32, #tpu.memory_space<vmem>>) attributes {dimension_semantics = [#tpu.dimension_semantics<parallel>], iteration_bounds = array<i64: 1>, scalar_prefetch = 0 : i64, scratch_operands = 0 : i64, tpu.core_type = #tpu.core_type<tc>, window_params = [{transform_indices = @transform_0, window_bounds = array<i64: 32, 96>}, {pipeline_mode = #tpu.pipeline_mode<synchronous>, transform_indices = @transform_1, window_bounds = array<i64: 96, 128>}, {pipeline_mode = #tpu.pipeline_mode<synchronous>, transform_indices = @transform_2, window_bounds = array<i64: 1, 128>}, {pipeline_mode = #tpu.pipeline_mode<synchronous>, transform_indices = @transform_3, window_bounds = array<i64: 1, 128>}, {transform_indices = @transform_4, window_bounds = array<i64: 32, 128>}]} {
    %c0 = arith.constant 0 : index
    %c0_0 = arith.constant 0 : index
    %0 = vector.load %arg1[%c0, %c0_0] : memref<32x96xbf16, #tpu.memory_space<vmem>>, vector<32x96xbf16>
    %c0_1 = arith.constant 0 : index
    %c0_2 = arith.constant 0 : index
    %1 = vector.load %arg2[%c0_1, %c0_2] : memref<96x128xbf16, #tpu.memory_space<vmem>>, vector<96x128xbf16>
    %cst = arith.constant dense<0.000000e+00> : vector<32x128xf32>
    %2 = tpu.matmul %0, %1, %cst {dimension_numbers = #tpu.dot_dimension_numbers<[1], [0], [0], [1], [0, 0, 1, 1], [], []>} : vector<32x96xbf16>, vector<96x128xbf16>, vector<32x128xf32> -> vector<32x128xf32>
    %c0_3 = arith.constant 0 : index
    %c0_4 = arith.constant 0 : index
    %3 = vector.load %arg3[%c0_3, %c0_4] : memref<1x128xf32, #tpu.memory_space<vmem>>, vector<1x128xf32>
    %4 = vector.broadcast %3 : vector<1x128xf32> to vector<32x128xf32>
    %5 = arith.mulf %2, %4 : vector<32x128xf32>
    %c0_5 = arith.constant 0 : index
    %c0_6 = arith.constant 0 : index
    %6 = vector.load %arg4[%c0_5, %c0_6] : memref<1x128xf32, #tpu.memory_space<vmem>>, vector<1x128xf32>
    %7 = vector.broadcast %6 : vector<1x128xf32> to vector<32x128xf32>
    %8 = arith.addf %5, %7 : vector<32x128xf32>
    %9 = arith.negf %8 : vector<32x128xf32>
    %10 = math.exp %9 : vector<32x128xf32>
    %cst_7 = arith.constant 1.000000e+00 : f32
    %11 = vector.broadcast %cst_7 : f32 to vector<32x128xf32>
    %12 = arith.addf %11, %10 : vector<32x128xf32>
    %13 = arith.divf %11, %12 : vector<32x128xf32>
    %14 = arith.mulf %8, %13 : vector<32x128xf32>
    %c0_8 = arith.constant 0 : index
    %c0_9 = arith.constant 0 : index
    %15 = vector.load %arg5[%c0_8, %c0_9] : memref<32x128xf32, #tpu.memory_space<vmem>>, vector<32x128xf32>
    tpu.vector_store %arg5[%c0_8, %c0_9], %14 {strides = array<i32>} : memref<32x128xf32, #tpu.memory_space<vmem>>, vector<32x128xf32>,
    return
  }
  func.func @transform_0(%arg0: i32) -> (i32, i32) {
    %c0_i32 = arith.constant 0 : i32
    %c0_i32_0 = arith.constant 0 : i32
    return %arg0, %c0_i32 : i32, i32
  }
  func.func @transform_1(%arg0: i32) -> (i32, i32) {
    %c0_i32 = arith.constant 0 : i32
    %c0_i32_0 = arith.constant 0 : i32
    %c0_i32_1 = arith.constant 0 : i32
    return %c0_i32, %c0_i32_0 : i32, i32
  }
  func.func @transform_2(%arg0: i32) -> (i32, i32) {
    %c0_i32 = arith.constant 0 : i32
    %c0_i32_0 = arith.constant 0 : i32
    %c0_i32_1 = arith.constant 0 : i32
    return %c0_i32, %c0_i32_0 : i32, i32
  }
  func.func @transform_3(%arg0: i32) -> (i32, i32) {
    %c0_i32 = arith.constant 0 : i32
    %c0_i32_0 = arith.constant 0 : i32
    %c0_i32_1 = arith.constant 0 : i32
    return %c0_i32, %c0_i32_0 : i32, i32
  }
  func.func @transform_4(%arg0: i32) -> (i32, i32) {
    %c0_i32 = arith.constant 0 : i32
    %c0_i32_0 = arith.constant 0 : i32
    return %arg0, %c0_i32 : i32, i32
  }
}

module attributes {stable_mosaic.version = 11 : i64} {
  func.func @_matmul_bias_act_kernel(%arg0: i32, %arg1: memref<8x64xbf16, #tpu.memory_space<vmem>>, %arg2: memref<64x128xbf16, #tpu.memory_space<vmem>>, %arg3: memref<1x128xf32, #tpu.memory_space<vmem>>, %arg4: memref<1x128xf32, #tpu.memory_space<vmem>>, %arg5: memref<8x128xf32, #tpu.memory_space<vmem>>) attributes {dimension_semantics = [#tpu.dimension_semantics<parallel>], iteration_bounds = array<i64: 1>, scalar_prefetch = 0 : i64, scratch_operands = 0 : i64, tpu.core_type = #tpu.core_type<tc>, window_params = [{transform_indices = @transform_0, window_bounds = array<i64: 8, 64>}, {pipeline_mode = #tpu.pipeline_mode<synchronous>, transform_indices = @transform_1, window_bounds = array<i64: 64, 128>}, {pipeline_mode = #tpu.pipeline_mode<synchronous>, transform_indices = @transform_2, window_bounds = array<i64: 1, 128>}, {pipeline_mode = #tpu.pipeline_mode<synchronous>, transform_indices = @transform_3, window_bounds = array<i64: 1, 128>}, {transform_indices = @transform_4, window_bounds = array<i64: 8, 128>}]} {
    %c0 = arith.constant 0 : index
    %c0_0 = arith.constant 0 : index
    %0 = vector.load %arg1[%c0, %c0_0] : memref<8x64xbf16, #tpu.memory_space<vmem>>, vector<8x64xbf16>
    %c0_1 = arith.constant 0 : index
    %c0_2 = arith.constant 0 : index
    %1 = vector.load %arg2[%c0_1, %c0_2] : memref<64x128xbf16, #tpu.memory_space<vmem>>, vector<64x128xbf16>
    %cst = arith.constant dense<0.000000e+00> : vector<8x128xf32>
    %2 = tpu.matmul %0, %1, %cst {dimension_numbers = #tpu.dot_dimension_numbers<[1], [0], [0], [1], [0, 0, 1, 1], [], []>} : vector<8x64xbf16>, vector<64x128xbf16>, vector<8x128xf32> -> vector<8x128xf32>
    %c0_3 = arith.constant 0 : index
    %c0_4 = arith.constant 0 : index
    %3 = vector.load %arg3[%c0_3, %c0_4] : memref<1x128xf32, #tpu.memory_space<vmem>>, vector<1x128xf32>
    %4 = vector.broadcast %3 : vector<1x128xf32> to vector<8x128xf32>
    %5 = arith.mulf %2, %4 : vector<8x128xf32>
    %c0_5 = arith.constant 0 : index
    %c0_6 = arith.constant 0 : index
    %6 = vector.load %arg4[%c0_5, %c0_6] : memref<1x128xf32, #tpu.memory_space<vmem>>, vector<1x128xf32>
    %7 = vector.broadcast %6 : vector<1x128xf32> to vector<8x128xf32>
    %8 = arith.addf %5, %7 : vector<8x128xf32>
    %cst_7 = arith.constant 0.000000e+00 : f32
    %9 = vector.broadcast %cst_7 : f32 to vector<8x128xf32>
    %10 = arith.maximumf %8, %9 : vector<8x128xf32>
    %c0_8 = arith.constant 0 : index
    %c0_9 = arith.constant 0 : index
    %11 = vector.load %arg5[%c0_8, %c0_9] : memref<8x128xf32, #tpu.memory_space<vmem>>, vector<8x128xf32>
    tpu.vector_store %arg5[%c0_8, %c0_9], %10 {strides = array<i32>} : memref<8x128xf32, #tpu.memory_space<vmem>>, vector<8x128xf32>,
    return
  }
  func.func @transform_0(%arg0: i32) -> (i32, i32) {
    %c0_i32 = arith.constant 0 : i32
    %c0_i32_0 = arith.constant 0 : i32
    return %arg0, %c0_i32 : i32, i32
  }
  func.func @transform_1(%arg0: i32) -> (i32, i32) {
    %c0_i32 = arith.constant 0 : i32
    %c0_i32_0 = arith.constant 0 : i32
    %c0_i32_1 = arith.constant 0 : i32
    return %c0_i32, %c0_i32_0 : i32, i32
  }
  func.func @transform_2(%arg0: i32) -> (i32, i32) {
    %c0_i32 = arith.constant 0 : i32
    %c0_i32_0 = arith.constant 0 : i32
    %c0_i32_1 = arith.constant 0 : i32
    return %c0_i32, %c0_i32_0 : i32, i32
  }
  func.func @transform_3(%arg0: i32) -> (i32, i32) {
    %c0_i32 = arith.constant 0 : i32
    %c0_i32_0 = arith.constant 0 : i32
    %c0_i32_1 = arith.constant 0 : i32
    return %c0_i32, %c0_i32_0 : i32, i32
  }
  func.func @transform_4(%arg0: i32) -> (i32, i32) {
    %c0_i32 = arith.constant 0 : i32
    %c0_i32_0 = arith.constant 0 : i32
    return %arg0, %c0_i32 : i32, i32
  }
}

module attributes {stable_mosaic.version = 11 : i64} {
  func.func @_matmul_bias_act_kernel(%arg0: i32, %arg1: memref<8x48xbf16, #tpu.memory_space<vmem>>, %arg2: memref<48x128xbf16, #tpu.memory_space<vmem>>, %arg3: memref<1x128xf32, #tpu.memory_space<vmem>>, %arg4: memref<1x128xf32, #tpu.memory_space<vmem>>, %arg5: memref<8x128xf32, #tpu.memory_space<vmem>>) attributes {dimension_semantics = [#tpu.dimension_semantics<parallel>], iteration_bounds = array<i64: 1>, scalar_prefetch = 0 : i64, scratch_operands = 0 : i64, tpu.core_type = #tpu.core_type<tc>, window_params = [{transform_indices = @transform_0, window_bounds = array<i64: 8, 48>}, {pipeline_mode = #tpu.pipeline_mode<synchronous>, transform_indices = @transform_1, window_bounds = array<i64: 48, 128>}, {pipeline_mode = #tpu.pipeline_mode<synchronous>, transform_indices = @transform_2, window_bounds = array<i64: 1, 128>}, {pipeline_mode = #tpu.pipeline_mode<synchronous>, transform_indices = @transform_3, window_bounds = array<i64: 1, 128>}, {transform_indices = @transform_4, window_bounds = array<i64: 8, 128>}]} {
    %c0 = arith.constant 0 : index
    %c0_0 = arith.constant 0 : index
    %0 = vector.load %arg1[%c0, %c0_0] : memref<8x48xbf16, #tpu.memory_space<vmem>>, vector<8x48xbf16>
    %c0_1 = arith.constant 0 : index
    %c0_2 = arith.constant 0 : index
    %1 = vector.load %arg2[%c0_1, %c0_2] : memref<48x128xbf16, #tpu.memory_space<vmem>>, vector<48x128xbf16>
    %cst = arith.constant dense<0.000000e+00> : vector<8x128xf32>
    %2 = tpu.matmul %0, %1, %cst {dimension_numbers = #tpu.dot_dimension_numbers<[1], [0], [0], [1], [0, 0, 1, 1], [], []>} : vector<8x48xbf16>, vector<48x128xbf16>, vector<8x128xf32> -> vector<8x128xf32>
    %c0_3 = arith.constant 0 : index
    %c0_4 = arith.constant 0 : index
    %3 = vector.load %arg3[%c0_3, %c0_4] : memref<1x128xf32, #tpu.memory_space<vmem>>, vector<1x128xf32>
    %4 = vector.broadcast %3 : vector<1x128xf32> to vector<8x128xf32>
    %5 = arith.mulf %2, %4 : vector<8x128xf32>
    %c0_5 = arith.constant 0 : index
    %c0_6 = arith.constant 0 : index
    %6 = vector.load %arg4[%c0_5, %c0_6] : memref<1x128xf32, #tpu.memory_space<vmem>>, vector<1x128xf32>
    %7 = vector.broadcast %6 : vector<1x128xf32> to vector<8x128xf32>
    %8 = arith.addf %5, %7 : vector<8x128xf32>
    %c0_7 = arith.constant 0 : index
    %c0_8 = arith.constant 0 : index
    %9 = vector.load %arg5[%c0_7, %c0_8] : memref<8x128xf32, #tpu.memory_space<vmem>>, vector<8x128xf32>
    tpu.vector_store %arg5[%c0_7, %c0_8], %8 {strides = array<i32>} : memref<8x128xf32, #tpu.memory_space<vmem>>, vector<8x128xf32>,
    return
  }
  func.func @transform_0(%arg0: i32) -> (i32, i32) {
    %c0_i32 = arith.constant 0 : i32
    %c0_i32_0 = arith.constant 0 : i32
    return %arg0, %c0_i32 : i32, i32
  }
  func.func @transform_1(%arg0: i32) -> (i32, i32) {
    %c0_i32 = arith.constant 0 : i32
    %c0_i32_0 = arith.constant 0 : i32
    %c0_i32_1 = arith.constant 0 : i32
    return %c0_i32, %c0_i32_0 : i32, i32
  }
  func.func @transform_2(%arg0: i32) -> (i32, i32) {
    %c0_i32 = arith.constant 0 : i32
    %c0_i32_0 = arith.constant 0 : i32
    %c0_i32_1 = arith.constant 0 : i32
    return %c0_i32, %c0_i32_0 : i32, i32
  }
  func.func @transform_3(%arg0: i32) -> (i32, i32) {
    %c0_i32 = arith.constant 0 : i32
    %c0_i32_0 = arith.constant 0 : i32
    %c0_i32_1 = arith.constant 0 : i32
    return %c0_i32, %c0_i32_0 : i32, i32
  }
  func.func @transform_4(%arg0: i32) -> (i32, i32) {
    %c0_i32 = arith.constant 0 : i32
    %c0_i32_0 = arith.constant 0 : i32
    return %arg0, %c0_i32 : i32, i32
  }
}

module attributes {stable_mosaic.version = 11 : i64} {
  func.func @_matmul_bias_act_kernel(%arg0: i32, %arg1: memref<8x64xbf16, #tpu.memory_space<vmem>>, %arg2: memref<64x128xbf16, #tpu.memory_space<vmem>>, %arg3: memref<1x128xf32, #tpu.memory_space<vmem>>, %arg4: memref<1x128xf32, #tpu.memory_space<vmem>>, %arg5: memref<8x128xf32, #tpu.memory_space<vmem>>) attributes {dimension_semantics = [#tpu.dimension_semantics<parallel>], iteration_bounds = array<i64: 1>, scalar_prefetch = 0 : i64, scratch_operands = 0 : i64, tpu.core_type = #tpu.core_type<tc>, window_params = [{transform_indices = @transform_0, window_bounds = array<i64: 8, 64>}, {pipeline_mode = #tpu.pipeline_mode<synchronous>, transform_indices = @transform_1, window_bounds = array<i64: 64, 128>}, {pipeline_mode = #tpu.pipeline_mode<synchronous>, transform_indices = @transform_2, window_bounds = array<i64: 1, 128>}, {pipeline_mode = #tpu.pipeline_mode<synchronous>, transform_indices = @transform_3, window_bounds = array<i64: 1, 128>}, {transform_indices = @transform_4, window_bounds = array<i64: 8, 128>}]} {
    %c0 = arith.constant 0 : index
    %c0_0 = arith.constant 0 : index
    %0 = vector.load %arg1[%c0, %c0_0] : memref<8x64xbf16, #tpu.memory_space<vmem>>, vector<8x64xbf16>
    %c0_1 = arith.constant 0 : index
    %c0_2 = arith.constant 0 : index
    %1 = vector.load %arg2[%c0_1, %c0_2] : memref<64x128xbf16, #tpu.memory_space<vmem>>, vector<64x128xbf16>
    %cst = arith.constant dense<0.000000e+00> : vector<8x128xf32>
    %2 = tpu.matmul %0, %1, %cst {dimension_numbers = #tpu.dot_dimension_numbers<[1], [0], [0], [1], [0, 0, 1, 1], [], []>} : vector<8x64xbf16>, vector<64x128xbf16>, vector<8x128xf32> -> vector<8x128xf32>
    %c0_3 = arith.constant 0 : index
    %c0_4 = arith.constant 0 : index
    %3 = vector.load %arg3[%c0_3, %c0_4] : memref<1x128xf32, #tpu.memory_space<vmem>>, vector<1x128xf32>
    %4 = vector.broadcast %3 : vector<1x128xf32> to vector<8x128xf32>
    %5 = arith.mulf %2, %4 : vector<8x128xf32>
    %c0_5 = arith.constant 0 : index
    %c0_6 = arith.constant 0 : index
    %6 = vector.load %arg4[%c0_5, %c0_6] : memref<1x128xf32, #tpu.memory_space<vmem>>, vector<1x128xf32>
    %7 = vector.broadcast %6 : vector<1x128xf32> to vector<8x128xf32>
    %8 = arith.addf %5, %7 : vector<8x128xf32>
    %c0_7 = arith.constant 0 : index
    %c0_8 = arith.constant 0 : index
    %9 = vector.load %arg5[%c0_7, %c0_8] : memref<8x128xf32, #tpu.memory_space<vmem>>, vector<8x128xf32>
    tpu.vector_store %arg5[%c0_7, %c0_8], %8 {strides = array<i32>} : memref<8x128xf32, #tpu.memory_space<vmem>>, vector<8x128xf32>,
    return
  }
  func.func @transform_0(%arg0: i32) -> (i32, i32) {
    %c0_i32 = arith.constant 0 : i32
    %c0_i32_0 = arith.constant 0 : i32
    return %arg0, %c0_i32 : i32, i32
  }
  func.func @transform_1(%arg0: i32) -> (i32, i32) {
    %c0_i32 = arith.constant 0 : i32
    %c0_i32_0 = arith.constant 0 : i32
    %c0_i32_1 = arith.constant 0 : i32
    return %c0_i32, %c0_i32_0 : i32, i32
  }
  func.func @transform_2(%arg0: i32) -> (i32, i32) {
    %c0_i32 = arith.constant 0 : i32
    %c0_i32_0 = arith.constant 0 : i32
    %c0_i32_1 = arith.constant 0 : i32
    return %c0_i32, %c0_i32_0 : i32, i32
  }
  func.func @transform_3(%arg0: i32) -> (i32, i32) {
    %c0_i32 = arith.constant 0 : i32
    %c0_i32_0 = arith.constant 0 : i32
    %c0_i32_1 = arith.constant 0 : i32
    return %c0_i32, %c0_i32_0 : i32, i32
  }
  func.func @transform_4(%arg0: i32) -> (i32, i32) {
    %c0_i32 = arith.constant 0 : i32
    %c0_i32_0 = arith.constant 0 : i32
    return %arg0, %c0_i32 : i32, i32
  }
}

</mosaic_0001>

<bundles_post_ra>
// kernel: effi_b7_forward.14
= control target key start
LH: loop header
LB: loop body
LE: loop exit
PB: predicated region body
PF: predicated region fallthrough
CT: control target
= control target key end

     0   :  { %s2128_s15 = smov 0   ;;  %s2697_s0 = inlined_call_operand.vmem [shape: bf16[4096,27], index: 0, kind: input, shape index: {}]   ;;  %s2698_s1 = inlined_call_operand.vmem [shape: bf16[27,128], index: 1, kind: input, shape index: {}]   ;;  %s2699_s2 = inlined_call_operand.vmem [shape: f32[1,128], index: 2, kind: input, shape index: {}]   ;;  %s2700_s3 = inlined_call_operand.vmem [shape: f32[1,128], index: 3, kind: input, shape index: {}]   ;;  %s2701_s4 = inlined_call_operand.vmem [shape: f32[4096,128], index: 4, kind: output, shape index: {}]  }
   0x1 LB: > { %s1544_s16 = sadd.s32 4294967295, %s2100_s15   ;;  %p1548_p0 = scmp.ge.s32.totalorder %s2100_s15, 1  ;;  %s2100_s15 = sphi %s2128_s15, %s14_s15  }
   0x2   : > { %p163_p1 = scmp.lt.s32.totalorder %s2100_s15, 9 }
   0x4   : > { %p164_p2 = pnand %p1548_p0, %p163_p1 }
   0x5   : > { %s1549_s19 = sshll.u32 (!%p164_p2), %s1544_s16, 6 }
   0x6   : > { %167 = sbr.rel (%p164_p2) target bundleno = 372 (0x174), region = 36  ;;  %p190_p3 = scmp.lt.s32.totalorder (!%p164_p2), %s1549_s19, 511 }
   0xb   : > { %v1802_v0 = vld [vmem:[%s2698_s1 + $0x8] sm:$0x3f]   ;;  %vm538_vm0 = vcmask 1044480   ;;  %vm539_vm1 = vcmask 1045504   ;;  %v2102_v1 = vmov 65535   ;;  %v1803_v5 = vld [vmem:[%s2698_s1] sm:$0xff]  }
   0xc   : > { %v540_v2 = vsel %vm538_vm0, 4294967295, %v2102_v1  ;;  %s2703_s19 = smov (!%p190_p3, %s1549_s19), 511  ;;  %vm441_vm2 = vcmask 220160   ;;  %v2217_v38 = vld [vmem:[%s2699_s2] ss:$0 sm:$0xff] }
   0xd   : > { %v541_v3 = vsel %vm539_vm1, %v540_v2, 0  ;;  %s1550_s22 = sshll.u32 %s2703_s19, 2  ;;  %v2222_v40 = vld [vmem:[%s2700_s3] ss:$0 sm:$0xff]  ;;  %s1552_s30 = sshll.u32 %s2703_s19, 3 }
   0xe   : > { %v543_v4 = vand.u32 %v1802_v0, %v541_v3  ;;  %s2148_s25 = scalar_lea.vmem %s2697_s0, %s1550_s22  ;;  %s2341_s7 = scalar_lea.vmem %s2701_s4, %s1552_s30 }
   0xf   : > { %v1804_v6 = vld [vmem:[%s2148_s25] sm:$0xff]   ;;  %v1806_v8 = vld [vmem:[%s2148_s25 + $0x8] sm:$0xff]   ;;  %v1808_v10 = vld [vmem:[%s2148_s25 + $0x10] sm:$0xff]  }
  0x10   : > { %1721 = vmatprep.subr.bf16.mxu0 %v543_v4  ;;  %1789 = vmatprep.subr.bf16.mxu1 %v543_v4  ;;  %v1805_v7 = vld [vmem:[%s2148_s25 + $0x80] sm:$0xff]   ;;  %v1807_v9 = vld [vmem:[%s2148_s25 + $0x88] sm:$0xff]   ;;  %v1809_v11 = vld [vmem:[%s2148_s25 + $0x90] sm:$0xff]  }
  0x11   : > { %1722 = vmatpush3.bf16.msra.mxu0 %v543_v4  ;;  %1791 = vmatpush3.bf16.msra.mxu1 %v543_v4  ;;  %v1810_v12 = vld [vmem:[%s2148_s25 + $0x18] sm:$0xff]   ;;  %v1812_v14 = vld [vmem:[%s2148_s25 + $0x20] sm:$0xff]   ;;  %v1814_v16 = vld [vmem:[%s2148_s25 + $0x28] sm:$0xff]  }
  0x12   : > { %1723 = vmatprep.subr.bf16.mxu0 %v1803_v5  ;;  %1790 = vmatprep.subr.bf16.mxu1 %v1803_v5  ;;  %v1811_v13 = vld [vmem:[%s2148_s25 + $0x98] sm:$0xff]   ;;  %v1813_v15 = vld [vmem:[%s2148_s25 + $0xa0] sm:$0xff]   ;;  %v1815_v17 = vld [vmem:[%s2148_s25 + $0xa8] sm:$0xff]  }
  0x13   : > { %1725 = vmatprep.mubr.msk.bf16.mxu0 %vm441_vm2, %v1804_v6  ;;  %1757 = vmatprep.mubr.msk.bf16.mxu1 %vm441_vm2, %v1805_v7  ;;  %v1816_v18 = vld [vmem:[%s2148_s25 + $0x30] sm:$0xff]   ;;  %v1818_v20 = vld [vmem:[%s2148_s25 + $0x38] sm:$0xff]   ;;  %v1820_v22 = vld [vmem:[%s2148_s25 + $0x40] sm:$0xff]  }
  0x14   : > { %v1817_v19 = vld [vmem:[%s2148_s25 + $0xb0] sm:$0xff]   ;;  %v1819_v21 = vld [vmem:[%s2148_s25 + $0xb8] sm:$0xff]   ;;  %v1821_v23 = vld [vmem:[%s2148_s25 + $0xc0] sm:$0xff]  }
  0x15   : > { %1724 = vmatpush3.bf16.msra.mxu0 %v1803_v5  ;;  %1792 = vmatpush3.bf16.msra.mxu1 %v1803_v5  ;;  %v1822_v24 = vld [vmem:[%s2148_s25 + $0x48] sm:$0xff]   ;;  %v1824_v26 = vld [vmem:[%s2148_s25 + $0x50] sm:$0xff]   ;;  %v1826_v28 = vld [vmem:[%s2148_s25 + $0x58] sm:$0xff]  }
  0x16   : > { %v1823_v25 = vld [vmem:[%s2148_s25 + $0xc8] sm:$0xff]   ;;  %v1825_v27 = vld [vmem:[%s2148_s25 + $0xd0] sm:$0xff]   ;;  %v1827_v29 = vld [vmem:[%s2148_s25 + $0xd8] sm:$0xff]  }
  0x17   : > { %v1828_v30 = vld [vmem:[%s2148_s25 + $0x60] sm:$0xff]   ;;  %v1830_v32 = vld [vmem:[%s2148_s25 + $0x68] sm:$0xff]   ;;  %v1832_v34 = vld [vmem:[%s2148_s25 + $0x70] sm:$0xff]  }
  0x18   : > { %1726 = vmatmul.mubr.msk.bf16.vlgmr.msra.gmra.mxu0 %vm441_vm2, %v1806_v8  ;;  %1758 = vmatmul.mubr.msk.bf16.vlgmr.msra.gmra.mxu1 %vm441_vm2, %v1807_v9  ;;  %v1829_v31 = vld [vmem:[%s2148_s25 + $0xe0] sm:$0xff]   ;;  %v1831_v33 = vld [vmem:[%s2148_s25 + $0xe8] sm:$0xff]   ;;  %v1833_v35 = vld [vmem:[%s2148_s25 + $0xf0] sm:$0xff]  }
  0x19   : > { %1729 = vmatprep.mubr.msk.bf16.mxu0 %vm441_vm2, %v1808_v10  ;;  %1761 = vmatprep.mubr.msk.bf16.mxu1 %vm441_vm2, %v1809_v11  ;;  %v1834_v36 = vld [vmem:[%s2148_s25 + $0x78] sm:$0xff]  }
  0x1a   : > { %v1835_v37 = vld [vmem:[%s2148_s25 + $0xf8] sm:$0xff]  }
  0x20   : > { %1730 = vmatmul.mubr.msk.bf16.gmra.mxu0 %vm441_vm2, %v1810_v12  ;;  %1762 = vmatmul.mubr.msk.bf16.gmra.mxu1 %vm441_vm2, %v1811_v13 }
  0x21   : > { %1733 = vmatprep.mubr.msk.bf16.mxu0 %vm441_vm2, %v1812_v14  ;;  %1765 = vmatprep.mubr.msk.bf16.mxu1 %vm441_vm2, %v1813_v15 }
  0x28   : > { %1734 = vmatmul.mubr.msk.bf16.gmra.mxu0 %vm441_vm2, %v1814_v16  ;;  %1766 = vmatmul.mubr.msk.bf16.gmra.mxu1 %vm441_vm2, %v1815_v17 }
  0x29   : > { %1737 = vmatprep.mubr.msk.bf16.mxu0 %vm441_vm2, %v1816_v18  ;;  %1769 = vmatprep.mubr.msk.bf16.mxu1 %vm441_vm2, %v1817_v19 }
  0x30   : > { %1738 = vmatmul.mubr.msk.bf16.gmra.mxu0 %vm441_vm2, %v1818_v20  ;;  %1770 = vmatmul.mubr.msk.bf16.gmra.mxu1 %vm441_vm2, %v1819_v21 }
  0x31   : > { %1741 = vmatprep.mubr.msk.bf16.mxu0 %vm441_vm2, %v1820_v22  ;;  %1773 = vmatprep.mubr.msk.bf16.mxu1 %vm441_vm2, %v1821_v23 }
  0x38   : > { %1742 = vmatmul.mubr.msk.bf16.gmra.mxu0 %vm441_vm2, %v1822_v24  ;;  %1774 = vmatmul.mubr.msk.bf16.gmra.mxu1 %vm441_vm2, %v1823_v25 }
  0x39   : > { %1745 = vmatprep.mubr.msk.bf16.mxu0 %vm441_vm2, %v1824_v26  ;;  %1777 = vmatprep.mubr.msk.bf16.mxu1 %vm441_vm2, %v1825_v27 }
  0x40   : > { %1746 = vmatmul.mubr.msk.bf16.gmra.mxu0 %vm441_vm2, %v1826_v28  ;;  %1778 = vmatmul.mubr.msk.bf16.gmra.mxu1 %vm441_vm2, %v1827_v29 }
  0x41   : > { %1749 = vmatprep.mubr.msk.bf16.mxu0 %vm441_vm2, %v1828_v30  ;;  %1781 = vmatprep.mubr.msk.bf16.mxu1 %vm441_vm2, %v1829_v31 }
  0x48   : > { %1750 = vmatmul.mubr.msk.bf16.gmra.mxu0 %vm441_vm2, %v1830_v32  ;;  %1782 = vmatmul.mubr.msk.bf16.gmra.mxu1 %vm441_vm2, %v1831_v33 }
  0x49   : > { %1753 = vmatprep.mubr.msk.bf16.mxu0 %vm441_vm2, %v1832_v34  ;;  %1785 = vmatprep.mubr.msk.bf16.mxu1 %vm441_vm2, %v1833_v35 }
  0x50   : > { %1754 = vmatmul.mubr.msk.bf16.gmra.mxu0 %vm441_vm2, %v1834_v36  ;;  %1786 = vmatmul.mubr.msk.bf16.gmra.mxu1 %vm441_vm2, %v1835_v37 }
  0xd8   : > { %v1727_v39 = vpop.f32.mrf.mxu0  ;;  %v1759_v41 = vpop.f32.mrf.mxu1 }
  0xd9   : > { %v843_v42 = vmul.f32 %v1727_v39, %v2217_v38  ;;  %v875_v43 = vmul.f32 %v1759_v41, %v2217_v38 }
  0xda   : > { %v579_v44 = vpop.f32.mrf.mxu0  ;;  %v707_v45 = vpop.f32.mrf.mxu1 }
  0xdb   : > { %v2227_v46 = vadd.f32 %v2222_v40, %v843_v42  ;;  %v2230_v47 = vadd.f32 %v2222_v40, %v875_v43  ;;  %v841_v48 = vmul.f32 %v2217_v38, %v579_v44  ;;  %v873_v49 = vmul.f32 %v2217_v38, %v707_v45 }
  0xdc   : > { %v1728_v50 = vpop.f32.mrf.mxu0  ;;  %v1760_v51 = vpop.f32.mrf.mxu1 }
  0xdd   : > { %v1623_v52 = vmul.f32 -1.442695, %v2227_v46  ;;  %v1655_v53 = vmul.f32 -1.442695, %v2230_v47  ;;  %v2237_v54 = vadd.f32 %v2222_v40, %v841_v48  ;;  %v2240_v55 = vadd.f32 %v2222_v40, %v873_v49 }
  0xde   : > { %v844_v56 = vmul.f32 %v1728_v50, %v2217_v38  ;;  %v876_v57 = vmul.f32 %v1760_v51, %v2217_v38  ;;  %v582_v58 = vpop.f32.mrf.mxu0  ;;  %v710_v59 = vpop.f32.mrf.mxu1 }
  0xdf   : > { %1836 = vpow2.f32 %v1623_v52  ;;  %v1621_v60 = vmul.f32 -1.442695, %v2237_v54  ;;  %v1653_v61 = vmul.f32 -1.442695, %v2240_v55  ;;  %v842_v62 = vmul.f32 %v2217_v38, %v582_v58 }
  0xe0   : > { %1838 = vpow2.f32 %v1655_v53  ;;  %v2248_v63 = vadd.f32 %v2222_v40, %v844_v56  ;;  %v2251_v0 = vadd.f32 %v2222_v40, %v876_v57  ;;  %v874_v1 = vmul.f32 %v2217_v38, %v710_v59  ;;  %v1731_v2 = vpop.f32.mrf.mxu0  ;;  %v1763_v3 = vpop.f32.mrf.mxu1 }
  0xe1   : > { %1840 = vpow2.f32 %v1621_v60  ;;  %v2255_v4 = vadd.f32 %v2222_v40, %v842_v62  ;;  %v847_v5 = vmul.f32 %v1731_v2, %v2217_v38  ;;  %v879_v6 = vmul.f32 %v1763_v3, %v2217_v38 }
  0xe2   : > { %1842 = vpow2.f32 %v1653_v61  ;;  %v1624_v7 = vmul.f32 -1.442695, %v2248_v63  ;;  %v1656_v8 = vmul.f32 -1.442695, %v2251_v0  ;;  %v2262_v9 = vadd.f32 %v2222_v40, %v874_v1  ;;  %v595_v10 = vpop.f32.mrf.mxu0  ;;  %v723_v11 = vpop.f32.mrf.mxu1 }
  0xe3   : > { %v1622_v12 = vmul.f32 -1.442695, %v2255_v4  ;;  %v2266_v13 = vadd.f32 %v2222_v40, %v847_v5  ;;  %v2269_v14 = vadd.f32 %v2222_v40, %v879_v6  ;;  %v845_v15 = vmul.f32 %v2217_v38, %v595_v10 }
  0xe4   : > { %1844 = vpow2.f32 %v1624_v7  ;;  %v1654_v16 = vmul.f32 -1.442695, %v2262_v9  ;;  %v877_v17 = vmul.f32 %v2217_v38, %v723_v11  ;;  %v1732_v18 = vpop.f32.mrf.mxu0  ;;  %v1764_v19 = vpop.f32.mrf.mxu1 }
  0xe5   : > { %1846 = vpow2.f32 %v1656_v8  ;;  %v1627_v20 = vmul.f32 -1.442695, %v2266_v13  ;;  %v1659_v21 = vmul.f32 -1.442695, %v2269_v14  ;;  %v2277_v22 = vadd.f32 %v2222_v40, %v845_v15 }
  0xe6   : > { %1848 = vpow2.f32 %v1622_v12  ;;  %v2280_v23 = vadd.f32 %v2222_v40, %v877_v17  ;;  %v848_v24 = vmul.f32 %v1732_v18, %v2217_v38  ;;  %v880_v25 = vmul.f32 %v1764_v19, %v2217_v38  ;;  %v598_v26 = vpop.f32.mrf.mxu0  ;;  %v726_v27 = vpop.f32.mrf.mxu1 }
  0xe7   : > { %1850 = vpow2.f32 %v1654_v16  ;;  %v1625_v28 = vmul.f32 -1.442695, %v2277_v22  ;;  %v846_v29 = vmul.f32 %v2217_v38, %v598_v26  ;;  %v878_v30 = vmul.f32 %v2217_v38, %v726_v27 }
  0xe8   : > { %1852 = vpow2.f32 %v1627_v20  ;;  %v1657_v31 = vmul.f32 -1.442695, %v2280_v23  ;;  %v2289_v32 = vadd.f32 %v2222_v40, %v848_v24  ;;  %v2292_v33 = vadd.f32 %v2222_v40, %v880_v25  ;;  %v1735_v34 = vpop.f32.mrf.mxu0  ;;  %v1767_v35 = vpop.f32.mrf.mxu1 }
  0xe9   : > { %1854 = vpow2.f32 %v1659_v21  ;;  %v2295_v36 = vadd.f32 %v2222_v40, %v846_v29  ;;  %v2301_v44 = vadd.f32 %v2222_v40, %v878_v30  ;;  %v851_v61 = vmul.f32 %v1735_v34, %v2217_v38 }
  0xea   : > { %1856 = vpow2.f32 %v1625_v28  ;;  %v1628_v37 = vmul.f32 -1.442695, %v2289_v32  ;;  %v1660_v39 = vmul.f32 -1.442695, %v2292_v33  ;;  %v611_v41 = vpop.f32.mrf.mxu0  ;;  %v739_v42 = vpop.f32.mrf.mxu1  ;;  %v883_v1 = vmul.f32 %v1767_v35, %v2217_v38 }
  0xeb   : > { %1858 = vpow2.f32 %v1657_v31  ;;  %v1626_v43 = vmul.f32 -1.442695, %v2295_v36  ;;  %v1658_v58 = vmul.f32 -1.442695, %v2301_v44  ;;  %v849_v5 = vmul.f32 %v2217_v38, %v611_v41 }
  0xec   : > { %v1837_v45 = vpop.eup %1836  ;;  %1860 = vpow2.f32 %v1628_v37  ;;  %v1736_v48 = vpop.f32.mrf.mxu0  ;;  %v881_v10 = vmul.f32 %v2217_v38, %v739_v42  ;;  %v2309_v16 = vadd.f32 %v2222_v40, %v851_v61  ;;  %v2313_v20 = vadd.f32 %v2222_v40, %v883_v1 }
  0xed   : > { %v1839_v49 = vpop.eup %1838  ;;  %v1170_v50 = vadd.f32 1.0, %v1837_v45  ;;  %1862 = vpow2.f32 %v1660_v39  ;;  %v1768_v53 = vpop.f32.mrf.mxu1  ;;  %v852_v17 = vmul.f32 %v1736_v48, %v2217_v38  ;;  %v2317_v26 = vadd.f32 %v2222_v40, %v849_v5 }
  0xee   : > { %v1841_v51 = vpop.eup %1840  ;;  %v1202_v52 = vadd.f32 1.0, %v1839_v49  ;;  %1864 = vpow2.f32 %v1626_v43  ;;  %v614_v59 = vpop.f32.mrf.mxu0  ;;  %v884_v21 = vmul.f32 %v1768_v53, %v2217_v38  ;;  %v2320_v30 = vadd.f32 %v2222_v40, %v881_v10 }
  0xef   : > { %v1843_v56 = vpop.eup %1842  ;;  %1866 = vrcp.f32 %v1170_v50  ;;  %v1168_v57 = vadd.f32 1.0, %v1841_v51  ;;  %v742_v6 = vpop.f32.mrf.mxu1  ;;  %v850_v31 = vmul.f32 %v2217_v38, %v614_v59  ;;  %v1631_v39 = vmul.f32 -1.442695, %v2309_v16 }
  0xf0   : > { %1868 = vrcp.f32 %v1202_v52  ;;  %v1200_v60 = vadd.f32 1.0, %v1843_v56  ;;  %v1739_v11 = vpop.f32.mrf.mxu0  ;;  %v2325_v41 = vadd.f32 %v2222_v40, %v852_v17  ;;  %v1663_v45 = vmul.f32 -1.442695, %v2313_v20 }
  0xf1   : > { %v1845_v62 = vpop.eup %1844  ;;  %1870 = vrcp.f32 %v1168_v57  ;;  %v1771_v27 = vpop.f32.mrf.mxu1  ;;  %v2330_v48 = vadd.f32 %v2222_v40, %v884_v21  ;;  %v1629_v51 = vmul.f32 -1.442695, %v2317_v26  ;;  %v882_v52 = vmul.f32 %v2217_v38, %v742_v6 }
  0xf2   : > { %v1847_v2 = vpop.eup %1846  ;;  %1872 = vrcp.f32 %v1200_v60  ;;  %v1171_v3 = vadd.f32 1.0, %v1845_v62  ;;  %v627_v34 = vpop.f32.mrf.mxu0  ;;  %v2336_v59 = vadd.f32 %v2222_v40, %v850_v31  ;;  %v1632_v1 = vmul.f32 -1.442695, %v2325_v41 }
  0xf3   : > { %v1849_v7 = vpop.eup %1848  ;;  %v1203_v8 = vadd.f32 1.0, %v1847_v2  ;;  %1874 = vpow2.f32 %v1658_v58  ;;  %v755_v53 = vpop.f32.mrf.mxu1  ;;  %v1661_v58 = vmul.f32 -1.442695, %v2320_v30  ;;  %v855_v2 = vmul.f32 %v1739_v11, %v2217_v38 }
  0xf4   : > { %v1851_v12 = vpop.eup %1850  ;;  %1876 = vrcp.f32 %v1171_v3  ;;  %v1169_v15 = vadd.f32 1.0, %v1849_v7  ;;  %v1740_v60 = vpop.f32.mrf.mxu0  ;;  %v1664_v6 = vmul.f32 -1.442695, %v2330_v48  ;;  %v887_v7 = vmul.f32 %v1771_v27, %v2217_v38 }
  0xf5   : > { %v1853_v18 = vpop.eup %1852  ;;  %1878 = vrcp.f32 %v1203_v8  ;;  %v1201_v19 = vadd.f32 1.0, %v1851_v12  ;;  %v2350_v12 = vadd.f32 %v2222_v40, %v882_v52  ;;  %v1772_v11 = vpop.f32.mrf.mxu1  ;;  %v856_v27 = vmul.f32 %v1740_v60, %v2217_v38 }
  0xf6   : > { %v1855_v24 = vpop.eup %1854  ;;  %1880 = vrcp.f32 %v1169_v15  ;;  %v1174_v25 = vadd.f32 1.0, %v1853_v18  ;;  %v853_v15 = vmul.f32 %v2217_v38, %v627_v34  ;;  %v1630_v18 = vmul.f32 -1.442695, %v2336_v59  ;;  %v630_v21 = vpop.f32.mrf.mxu0 }
  0xf7   : > { %v1857_v28 = vpop.eup %1856  ;;  %1882 = vrcp.f32 %v1201_v19  ;;  %v1206_v29 = vadd.f32 1.0, %v1855_v24  ;;  %v885_v19 = vmul.f32 %v2217_v38, %v755_v53  ;;  %v888_v31 = vmul.f32 %v1772_v11, %v2217_v38 }
  0xf8   : > { %v1859_v35 = vpop.eup %1858  ;;  %1884 = vrcp.f32 %v1174_v25  ;;  %v1172_v37 = vadd.f32 1.0, %v1857_v28  ;;  %v2360_v25 = vadd.f32 %v2222_v40, %v855_v2  ;;  %v2385_v53 = vadd.f32 %v2222_v40, %v856_v27 }
  0xf9   : > { %v1861_v42 = vpop.eup %1860  ;;  %1886 = vrcp.f32 %v1206_v29  ;;  %v1204_v43 = vadd.f32 1.0, %v1859_v35  ;;  %v2365_v29 = vadd.f32 %v2222_v40, %v887_v7  ;;  %v2371_v35 = vadd.f32 %v2222_v40, %v853_v15 }
  0xfa   : > { %v1863_v49 = vpop.eup %1862  ;;  %1888 = vrcp.f32 %v1172_v37  ;;  %v1175_v50 = vadd.f32 1.0, %v1861_v42  ;;  %v854_v37 = vmul.f32 %v2217_v38, %v630_v21  ;;  %v1635_v52 = vmul.f32 -1.442695, %v2360_v25 }
  0xfb   : > { %v1865_v56 = vpop.eup %1864  ;;  %1890 = vrcp.f32 %v1204_v43  ;;  %v1207_v57 = vadd.f32 1.0, %v1863_v49  ;;  %v2377_v49 = vadd.f32 %v2222_v40, %v885_v19 }
  0xfc   : > { %v1867_v61 = vpop.eup %1866  ;;  %1892 = vrcp.f32 %v1175_v50  ;;  %v1173_v62 = vadd.f32 1.0, %v1865_v56  ;;  %v2379_v50 = vpop.f32.mrf.mxu0 }
  0xfd   : > { %v1869_v3 = vpop.eup %1868  ;;  %v1362_v5 = vmul.f32 %v1867_v61, %v2227_v46  ;;  %1894 = vrcp.f32 %v1207_v57  ;;  %v1667_v57 = vmul.f32 -1.442695, %v2365_v29  ;;  %v1633_v61 = vmul.f32 -1.442695, %v2371_v35 }
  0xfe   : > { %v1871_v8 = vpop.eup %1870  ;;  %v1394_v10 = vmul.f32 %v1869_v3, %v2230_v47  ;;  %1896 = vrcp.f32 %v1173_v62  ;;  %v2397_v62 = vadd.f32 %v2222_v40, %v854_v37  ;;  %v1665_v3 = vmul.f32 -1.442695, %v2377_v49 }
  0xff   : > { %v1873_v17 = vpop.eup %1872  ;;  %1426 = vst [vmem:[%s2341_s7 + $0x10] sm:$0xff] %v1362_v5  ;;  %v1360_v46 = vmul.f32 %v1871_v8, %v2237_v54  ;;  %1898 = vpow2.f32 %v1631_v39  ;;  %v758_v39 = vpop.f32.mrf.mxu1  ;;  %v1636_v8 = vmul.f32 -1.442695, %v2385_v53 }
 0x100   : > { %v1875_v47 = vpop.eup %1874  ;;  %1458 = vst [vmem:[%s2341_s7 + $0x110] sm:$0xff] %v1394_v10  ;;  %v1392_v24 = vmul.f32 %v1873_v17, %v2240_v55  ;;  %1900 = vpow2.f32 %v1663_v45  ;;  %v1662_v45 = vmul.f32 -1.442695, %v2350_v12  ;;  %v886_v5 = vmul.f32 %v2217_v38, %v758_v39 }
 0x101   : > { %v1877_v28 = vpop.eup %1876  ;;  %1424 = vst [vmem:[%s2341_s7] sm:$0xff] %v1360_v46  ;;  %v1205_v54 = vadd.f32 1.0, %v1875_v47  ;;  %1902 = vpow2.f32 %v1629_v51  ;;  %v1634_v46 = vmul.f32 -1.442695, %v2397_v62 }
 0x102   : > { %v1879_v34 = vpop.eup %1878  ;;  %1456 = vst [vmem:[%s2341_s7 + $0x100] sm:$0xff] %v1392_v24  ;;  %v1363_v55 = vmul.f32 %v1877_v28, %v2248_v63  ;;  %1904 = vpow2.f32 %v1661_v58  ;;  %v2391_v58 = vadd.f32 %v2222_v40, %v888_v31 }
 0x103   : > { %v1881_v42 = vpop.eup %1880  ;;  %v1395_v43 = vmul.f32 %v1879_v34, %v2251_v0  ;;  %1906 = vrcp.f32 %v1205_v54 }
 0x104   : > { %v1883_v63 = vpop.eup %1882  ;;  %1427 = vst [vmem:[%s2341_s7 + $0x18] sm:$0xff] %v1363_v55  ;;  %v1361_v51 = vmul.f32 %v1881_v42, %v2255_v4  ;;  %1908 = vpow2.f32 %v1632_v1  ;;  %v1775_v1 = vpop.f32.mrf.mxu1  ;;  %v859_v42 = vmul.f32 %v2379_v50, %v2217_v38 }
 0x105   : > { %v1885_v0 = vpop.eup %1884  ;;  %1459 = vst [vmem:[%s2341_s7 + $0x118] sm:$0xff] %v1395_v43  ;;  %v1393_v56 = vmul.f32 %v1883_v63, %v2262_v9  ;;  %1910 = vpow2.f32 %v1664_v6  ;;  %v643_v6 = vpop.f32.mrf.mxu0  ;;  %v891_v63 = vmul.f32 %v1775_v1, %v2217_v38 }
 0x106   : > { %v1887_v60 = vpop.eup %1886  ;;  %1425 = vst [vmem:[%s2341_s7 + $0x8] sm:$0xff] %v1361_v51  ;;  %v1366_v4 = vmul.f32 %v1885_v0, %v2266_v13  ;;  %1912 = vpow2.f32 %v1630_v18  ;;  %v857_v0 = vmul.f32 %v2217_v38, %v643_v6 }
 0x107   : > { %v1889_v9 = vpop.eup %1888  ;;  %1457 = vst [vmem:[%s2341_s7 + $0x108] sm:$0xff] %v1393_v56  ;;  %v1398_v2 = vmul.f32 %v1887_v60, %v2269_v14  ;;  %1914 = vpow2.f32 %v1662_v45  ;;  %v1668_v14 = vmul.f32 -1.442695, %v2391_v58  ;;  %v1744_v21 = vpop.f32.mrf.mxu0 }
 0x108   : > { %v1891_v13 = vpop.eup %1890  ;;  %1430 = vst [vmem:[%s2341_s7 + $0x30] sm:$0xff] %v1366_v4  ;;  %v1364_v7 = vmul.f32 %v1889_v9, %v2277_v22  ;;  %1916 = vpow2.f32 %v1635_v52  ;;  %v771_v22 = vpop.f32.mrf.mxu1  ;;  %v860_v1 = vmul.f32 %v1744_v21, %v2217_v38 }
 0x109   : > { %v1893_v10 = vpop.eup %1892  ;;  %1462 = vst [vmem:[%s2341_s7 + $0x130] sm:$0xff] %v1398_v2  ;;  %v1396_v15 = vmul.f32 %v1891_v13, %v2280_v23  ;;  %1918 = vpow2.f32 %v1667_v57  ;;  %v2415_v23 = vadd.f32 %v2222_v40, %v886_v5  ;;  %v646_v37 = vpop.f32.mrf.mxu0  ;;  %v889_v4 = vmul.f32 %v2217_v38, %v771_v22 }
 0x10a   : > { %v1895_v11 = vpop.eup %1894  ;;  %1428 = vst [vmem:[%s2341_s7 + $0x20] sm:$0xff] %v1364_v7  ;;  %v1367_v17 = vmul.f32 %v1893_v10, %v2289_v32  ;;  %1920 = vpow2.f32 %v1633_v61  ;;  %v1776_v31 = vpop.f32.mrf.mxu1  ;;  %v2434_v5 = vadd.f32 %v2222_v40, %v891_v63  ;;  %v2446_v21 = vadd.f32 %v2222_v40, %v860_v1 }
 0x10b   : > { %v1897_v18 = vpop.eup %1896  ;;  %1460 = vst [vmem:[%s2341_s7 + $0x120] sm:$0xff] %v1396_v15  ;;  %v1399_v19 = vmul.f32 %v1895_v11, %v2292_v33  ;;  %1922 = vpow2.f32 %v1665_v3  ;;  %v1666_v55 = vmul.f32 -1.442695, %v2415_v23  ;;  %v1747_v61 = vpop.f32.mrf.mxu0  ;;  %v892_v6 = vmul.f32 %v1776_v31, %v2217_v38 }
 0x10c   : > { %v1899_v47 = vpop.eup %1898  ;;  %1431 = vst [vmem:[%s2341_s7 + $0x38] sm:$0xff] %v1367_v17  ;;  %v1365_v24 = vmul.f32 %v1897_v18, %v2295_v36  ;;  %1924 = vpow2.f32 %v1636_v8  ;;  %v774_v56 = vpop.f32.mrf.mxu1  ;;  %v2438_v8 = vadd.f32 %v2222_v40, %v857_v0  ;;  %v2441_v11 = vadd.f32 %v2222_v40, %v889_v4 }
 0x10d   : > { %v1901_v32 = vpop.eup %1900  ;;  %1463 = vst [vmem:[%s2341_s7 + $0x138] sm:$0xff] %v1399_v19  ;;  %v1178_v27 = vadd.f32 1.0, %v1899_v47  ;;  %1926 = vpow2.f32 %v1668_v14  ;;  %v858_v17 = vmul.f32 %v2217_v38, %v646_v37  ;;  %v1640_v63 = vmul.f32 -1.442695, %v2446_v21 }
 0x10e   : > { %v1903_v28 = vpop.eup %1902  ;;  %1429 = vst [vmem:[%s2341_s7 + $0x28] sm:$0xff] %v1365_v24  ;;  %v1210_v54 = vadd.f32 1.0, %v1901_v32  ;;  %1928 = vpow2.f32 %v1634_v46  ;;  %v1779_v10 = vpop.f32.mrf.mxu1  ;;  %v1671_v32 = vmul.f32 -1.442695, %v2434_v5  ;;  %v1637_v31 = vmul.f32 -1.442695, %v2438_v8 }
 0x10f   : > { %v1905_v33 = vpop.eup %1904  ;;  %1930 = vrcp.f32 %v1178_v27  ;;  %v1176_v34 = vadd.f32 1.0, %v1903_v28  ;;  %v659_v46 = vpop.f32.mrf.mxu0  ;;  %v2450_v27 = vadd.f32 %v2222_v40, %v892_v6 }
 0x110   : > { %v1907_v39 = vpop.eup %1906  ;;  %1932 = vrcp.f32 %v1210_v54  ;;  %v1208_v36 = vadd.f32 1.0, %v1905_v33  ;;  %v890_v33 = vmul.f32 %v2217_v38, %v774_v56 }
 0x111   : > { %v1909_v43 = vpop.eup %1908  ;;  %v1397_v45 = vmul.f32 %v1907_v39, %v2301_v44  ;;  %1934 = vrcp.f32 %v1176_v34  ;;  %v2430_v44 = vadd.f32 %v2222_v40, %v859_v42  ;;  %v787_v34 = vpop.f32.mrf.mxu1  ;;  %v1669_v39 = vmul.f32 -1.442695, %v2441_v11 }
 0x112   : > { %v1911_v51 = vpop.eup %1910  ;;  %1936 = vrcp.f32 %v1208_v36  ;;  %v1179_v52 = vadd.f32 1.0, %v1909_v43  ;;  %v2456_v36 = vadd.f32 %v2222_v40, %v858_v17  ;;  %v1748_v42 = vpop.f32.mrf.mxu0  ;;  %v1672_v56 = vmul.f32 -1.442695, %v2450_v27 }
 0x113   : > { %v1913_v57 = vpop.eup %1912  ;;  %1461 = vst [vmem:[%s2341_s7 + $0x128] sm:$0xff] %v1397_v45  ;;  %v1211_v60 = vadd.f32 1.0, %v1911_v51  ;;  %1938 = vpow2.f32 %v1666_v55  ;;  %v1639_v19 = vmul.f32 -1.442695, %v2430_v44  ;;  %v863_v51 = vmul.f32 %v1747_v61, %v2217_v38  ;;  %v1780_v61 = vpop.f32.mrf.mxu1 }
 0x114   : > { %v1915_v50 = vpop.eup %1914  ;;  %1940 = vrcp.f32 %v1179_v52  ;;  %v1177_v9 = vadd.f32 1.0, %v1913_v57  ;;  %v895_v57 = vmul.f32 %v1779_v10, %v2217_v38  ;;  %v662_v6 = vpop.f32.mrf.mxu0  ;;  %v864_v10 = vmul.f32 %v1748_v42, %v2217_v38 }
 0x115   : > { %v1917_v2 = vpop.eup %1916  ;;  %1942 = vrcp.f32 %v1211_v60  ;;  %v1209_v3 = vadd.f32 1.0, %v1915_v50  ;;  %v2465_v50 = vadd.f32 %v2222_v40, %v890_v33  ;;  %v896_v17 = vmul.f32 %v1780_v61, %v2217_v38 }
 0x116   : > { %v1919_v13 = vpop.eup %1918  ;;  %1944 = vrcp.f32 %v1177_v9  ;;  %v1182_v7 = vadd.f32 1.0, %v1917_v2  ;;  %v861_v9 = vmul.f32 %v2217_v38, %v659_v46  ;;  %v1638_v2 = vmul.f32 -1.442695, %v2456_v36 }
 0x117   : > { %v1921_v15 = vpop.eup %1920  ;;  %1946 = vrcp.f32 %v1209_v3  ;;  %v1214_v14 = vadd.f32 1.0, %v1919_v13  ;;  %v893_v3 = vmul.f32 %v2217_v38, %v787_v34  ;;  %v2500_v34 = vadd.f32 %v2222_v40, %v864_v10 }
 0x118   : > { %v1923_v22 = vpop.eup %1922  ;;  %1948 = vrcp.f32 %v1182_v7  ;;  %v1180_v18 = vadd.f32 1.0, %v1921_v15  ;;  %v2475_v7 = vadd.f32 %v2222_v40, %v863_v51 }
 0x119   : > { %v1925_v47 = vpop.eup %1924  ;;  %1950 = vrcp.f32 %v1214_v14  ;;  %v1212_v24 = vadd.f32 1.0, %v1923_v22  ;;  %v2480_v14 = vadd.f32 %v2222_v40, %v895_v57  ;;  %v2486_v22 = vadd.f32 %v2222_v40, %v861_v9 }
 0x11a   : > { %v1927_v28 = vpop.eup %1926  ;;  %1952 = vrcp.f32 %v1180_v18  ;;  %v1183_v54 = vadd.f32 1.0, %v1925_v47  ;;  %v862_v18 = vmul.f32 %v2217_v38, %v662_v6  ;;  %v1643_v33 = vmul.f32 -1.442695, %v2475_v7 }
 0x11b   : > { %v1929_v55 = vpop.eup %1928  ;;  %1954 = vrcp.f32 %v1212_v24  ;;  %v1215_v37 = vadd.f32 1.0, %v1927_v28  ;;  %v2492_v28 = vadd.f32 %v2222_v40, %v893_v3 }
 0x11c   : > { %v1931_v43 = vpop.eup %1930  ;;  %1956 = vrcp.f32 %v1183_v54  ;;  %v1181_v45 = vadd.f32 1.0, %v1929_v55  ;;  %v2494_v54 = vpop.f32.mrf.mxu0 }
 0x11d   : > { %v1933_v52 = vpop.eup %1932  ;;  %v1370_v0 = vmul.f32 %v1931_v43, %v2309_v16  ;;  %1958 = vrcp.f32 %v1215_v37  ;;  %v1675_v37 = vmul.f32 -1.442695, %v2480_v14  ;;  %v1641_v43 = vmul.f32 -1.442695, %v2486_v22 }
 0x11e   : > { %v1935_v60 = vpop.eup %1934  ;;  %v1402_v4 = vmul.f32 %v1933_v52, %v2313_v20  ;;  %1960 = vrcp.f32 %v1181_v45  ;;  %v2512_v45 = vadd.f32 %v2222_v40, %v862_v18  ;;  %v1673_v52 = vmul.f32 -1.442695, %v2492_v28 }
 0x11f   : > { %v1937_v1 = vpop.eup %1936  ;;  %1434 = vst [vmem:[%s2341_s7 + $0x50] sm:$0xff] %v1370_v0  ;;  %v1368_v16 = vmul.f32 %v1935_v60, %v2317_v26  ;;  %1962 = vpow2.f32 %v1639_v19  ;;  %v790_v19 = vpop.f32.mrf.mxu1  ;;  %v1644_v60 = vmul.f32 -1.442695, %v2500_v34 }
 0x120   : > { %v1939_v20 = vpop.eup %1938  ;;  %1466 = vst [vmem:[%s2341_s7 + $0x150] sm:$0xff] %v1402_v4  ;;  %v1400_v13 = vmul.f32 %v1937_v1, %v2320_v30  ;;  %1964 = vpow2.f32 %v1671_v32  ;;  %v1670_v32 = vmul.f32 -1.442695, %v2465_v50  ;;  %v894_v0 = vmul.f32 %v2217_v38, %v790_v19 }
 0x121   : > { %v1941_v15 = vpop.eup %1940  ;;  %1432 = vst [vmem:[%s2341_s7 + $0x40] sm:$0xff] %v1368_v16  ;;  %v1213_v26 = vadd.f32 1.0, %v1939_v20  ;;  %1966 = vpow2.f32 %v1637_v31  ;;  %v1642_v16 = vmul.f32 -1.442695, %v2512_v45 }
 0x122   : > { %v1943_v46 = vpop.eup %1942  ;;  %1464 = vst [vmem:[%s2341_s7 + $0x140] sm:$0xff] %v1400_v13  ;;  %v1371_v30 = vmul.f32 %v1941_v15, %v2325_v41  ;;  %1968 = vpow2.f32 %v1669_v39  ;;  %v2506_v39 = vadd.f32 %v2222_v40, %v896_v17 }
 0x123   : > { %v1945_v47 = vpop.eup %1944  ;;  %v1403_v24 = vmul.f32 %v1943_v46, %v2330_v48  ;;  %1970 = vrcp.f32 %v1213_v26 }
 0x124   : > { %v1947_v41 = vpop.eup %1946  ;;  %1435 = vst [vmem:[%s2341_s7 + $0x58] sm:$0xff] %v1371_v30  ;;  %v1369_v31 = vmul.f32 %v1945_v47, %v2336_v59  ;;  %1972 = vpow2.f32 %v1640_v63  ;;  %v1783_v63 = vpop.f32.mrf.mxu1  ;;  %v867_v47 = vmul.f32 %v2494_v54, %v2217_v38 }
 0x125   : > { %v1949_v48 = vpop.eup %1948  ;;  %1467 = vst [vmem:[%s2341_s7 + $0x158] sm:$0xff] %v1403_v24  ;;  %v1401_v55 = vmul.f32 %v1947_v41, %v2350_v12  ;;  %1974 = vpow2.f32 %v1672_v56  ;;  %v675_v56 = vpop.f32.mrf.mxu0  ;;  %v899_v41 = vmul.f32 %v1783_v63, %v2217_v38 }
 0x126   : > { %v1951_v42 = vpop.eup %1950  ;;  %1433 = vst [vmem:[%s2341_s7 + $0x48] sm:$0xff] %v1369_v31  ;;  %v1374_v59 = vmul.f32 %v1949_v48, %v2360_v25  ;;  %1976 = vpow2.f32 %v1638_v2  ;;  %v865_v48 = vmul.f32 %v2217_v38, %v675_v56 }
 0x127   : > { %v1953_v12 = vpop.eup %1952  ;;  %1465 = vst [vmem:[%s2341_s7 + $0x148] sm:$0xff] %v1401_v55  ;;  %v1406_v51 = vmul.f32 %v1951_v42, %v2365_v29  ;;  %1978 = vpow2.f32 %v1670_v32  ;;  %v1676_v29 = vmul.f32 -1.442695, %v2506_v39  ;;  %v1752_v6 = vpop.f32.mrf.mxu0 }
 0x128   : > { %v1955_v25 = vpop.eup %1954  ;;  %1438 = vst [vmem:[%s2341_s7 + $0x70] sm:$0xff] %v1374_v59  ;;  %v1372_v57 = vmul.f32 %v1953_v12, %v2371_v35  ;;  %1980 = vpow2.f32 %v1643_v33  ;;  %v803_v35 = vpop.f32.mrf.mxu1  ;;  %v868_v63 = vmul.f32 %v1752_v6, %v2217_v38 }
 0x129   : > { %v1957_v4 = vpop.eup %1956  ;;  %1470 = vst [vmem:[%s2341_s7 + $0x170] sm:$0xff] %v1406_v51  ;;  %v1404_v9 = vmul.f32 %v1955_v25, %v2377_v49  ;;  %1982 = vpow2.f32 %v1675_v37  ;;  %v2530_v49 = vadd.f32 %v2222_v40, %v894_v0  ;;  %v678_v18 = vpop.f32.mrf.mxu0  ;;  %v897_v59 = vmul.f32 %v2217_v38, %v803_v35 }
 0x12a   : > { %v1959_v61 = vpop.eup %1958  ;;  %1436 = vst [vmem:[%s2341_s7 + $0x60] sm:$0xff] %v1372_v57  ;;  %v1375_v1 = vmul.f32 %v1957_v4, %v2385_v53  ;;  %1984 = vpow2.f32 %v1641_v43  ;;  %v1784_v17 = vpop.f32.mrf.mxu1  ;;  %v2549_v0 = vadd.f32 %v2222_v40, %v899_v41  ;;  %v2561_v6 = vadd.f32 %v2222_v40, %v868_v63 }
 0x12b   : > { %v1961_v2 = vpop.eup %1960  ;;  %1468 = vst [vmem:[%s2341_s7 + $0x160] sm:$0xff] %v1404_v9  ;;  %v1407_v3 = vmul.f32 %v1959_v61, %v2391_v58  ;;  %1986 = vpow2.f32 %v1673_v52  ;;  %v1674_v30 = vmul.f32 -1.442695, %v2530_v49  ;;  %v1755_v43 = vpop.f32.mrf.mxu0  ;;  %v900_v56 = vmul.f32 %v1784_v17, %v2217_v38 }
 0x12c   : > { %v1963_v20 = vpop.eup %1962  ;;  %1439 = vst [vmem:[%s2341_s7 + $0x78] sm:$0xff] %v1375_v1  ;;  %v1373_v13 = vmul.f32 %v1961_v2, %v2397_v62  ;;  %1988 = vpow2.f32 %v1644_v60  ;;  %v806_v55 = vpop.f32.mrf.mxu1  ;;  %v2553_v60 = vadd.f32 %v2222_v40, %v865_v48  ;;  %v2556_v61 = vadd.f32 %v2222_v40, %v897_v59  ;;  %v2587_v59 = vld [vmem:[%s2700_s3] ss:$0 sm:$0xff] }
 0x12d   : > { %v1965_v53 = vpop.eup %1964  ;;  %1471 = vst [vmem:[%s2341_s7 + $0x178] sm:$0xff] %v1407_v3  ;;  %v1186_v10 = vadd.f32 1.0, %v1963_v20  ;;  %1990 = vpow2.f32 %v1676_v29  ;;  %v866_v1 = vmul.f32 %v2217_v38, %v678_v18  ;;  %v1648_v41 = vmul.f32 -1.442695, %v2561_v6 }
 0x12e   : > { %v1967_v15 = vpop.eup %1966  ;;  %1437 = vst [vmem:[%s2341_s7 + $0x68] sm:$0xff] %v1373_v13  ;;  %v1218_v26 = vadd.f32 1.0, %v1965_v53  ;;  %1992 = vpow2.f32 %v1642_v16  ;;  %v1787_v4 = vpop.f32.mrf.mxu1  ;;  %v1679_v53 = vmul.f32 -1.442695, %v2549_v0  ;;  %v1645_v17 = vmul.f32 -1.442695, %v2553_v60 }
 0x12f   : > { %v1969_v58 = vpop.eup %1968  ;;  %1994 = vrcp.f32 %v1186_v10  ;;  %v1184_v46 = vadd.f32 1.0, %v1967_v15  ;;  %v691_v16 = vpop.f32.mrf.mxu0  ;;  %v2565_v10 = vadd.f32 %v2222_v40, %v900_v56 }
 0x130   : > { %v1971_v19 = vpop.eup %1970  ;;  %1996 = vrcp.f32 %v1218_v26  ;;  %v1216_v62 = vadd.f32 1.0, %v1969_v58  ;;  %v898_v58 = vmul.f32 %v2217_v38, %v806_v55  ;;  %v2577_v38 = vld [vmem:[%s2699_s2] ss:$0 sm:$0xff] }
 0x131   : > { %v1973_v24 = vpop.eup %1972  ;;  %v1405_v32 = vmul.f32 %v1971_v19, %v2415_v23  ;;  %1998 = vrcp.f32 %v1184_v46  ;;  %v2545_v23 = vadd.f32 %v2222_v40, %v867_v47  ;;  %v819_v46 = vpop.f32.mrf.mxu1  ;;  %v1677_v19 = vmul.f32 -1.442695, %v2556_v61 }
 0x132   : > { %v1975_v31 = vpop.eup %1974  ;;  %2000 = vrcp.f32 %v1216_v62  ;;  %v1187_v33 = vadd.f32 1.0, %v1973_v24  ;;  %v2571_v62 = vadd.f32 %v2222_v40, %v866_v1  ;;  %v1756_v47 = vpop.f32.mrf.mxu0  ;;  %v1680_v40 = vmul.f32 -1.442695, %v2565_v10 }
 0x133   : > { %v1977_v37 = vpop.eup %1976  ;;  %1469 = vst [vmem:[%s2341_s7 + $0x168] sm:$0xff] %v1405_v32  ;;  %v1219_v42 = vadd.f32 1.0, %v1975_v31  ;;  %2002 = vpow2.f32 %v1674_v30  ;;  %v1647_v3 = vmul.f32 -1.442695, %v2545_v23  ;;  %v871_v31 = vmul.f32 %v2577_v38, %v1755_v43 }
 0x134   : > { %v1979_v54 = vpop.eup %1978  ;;  %2004 = vrcp.f32 %v1187_v33  ;;  %v1185_v12 = vadd.f32 1.0, %v1977_v37  ;;  %v903_v55 = vmul.f32 %v2577_v38, %v1787_v4  ;;  %v2590_v43 = vadd.f32 %v2587_v59, %v898_v58 }
 0x135   : > { %v1981_v51 = vpop.eup %1980  ;;  %2006 = vrcp.f32 %v1219_v42  ;;  %v1217_v52 = vadd.f32 1.0, %v1979_v54  ;;  %v1788_v54 = vpop.f32.mrf.mxu1  ;;  %v872_v4 = vmul.f32 %v2577_v38, %v1756_v47 }
 0x136   : > { %v1983_v25 = vpop.eup %1982  ;;  %2008 = vrcp.f32 %v1185_v12  ;;  %v1190_v57 = vadd.f32 1.0, %v1981_v51  ;;  %v901_v51 = vmul.f32 %v2577_v38, %v819_v46  ;;  %v904_v1 = vmul.f32 %v2577_v38, %v1788_v54 }
 0x137   : > { %v1985_v9 = vpop.eup %1984  ;;  %2010 = vrcp.f32 %v1217_v52  ;;  %v1222_v29 = vadd.f32 1.0, %v1983_v25  ;;  %v694_v52 = vpop.f32.mrf.mxu0 }
 0x138   : > { %v1987_v35 = vpop.eup %1986  ;;  %2012 = vrcp.f32 %v1190_v57  ;;  %v1188_v2 = vadd.f32 1.0, %v1985_v9  ;;  %v2600_v57 = vadd.f32 %v2587_v59, %v871_v31  ;;  %v822_v58 = vpop.f32.mrf.mxu1 }
 0x139   : > { %v1989_v20 = vpop.eup %1988  ;;  %2014 = vrcp.f32 %v1222_v29  ;;  %v1220_v13 = vadd.f32 1.0, %v1987_v35  ;;  %v2605_v29 = vadd.f32 %v2587_v59, %v903_v55  ;;  %v902_v31 = vmul.f32 %v2577_v38, %v822_v58 }
 0x13a   : > { %v1991_v15 = vpop.eup %1990  ;;  %2016 = vrcp.f32 %v1188_v2  ;;  %v1191_v26 = vadd.f32 1.0, %v1989_v20  ;;  %v870_v2 = vmul.f32 %v2577_v38, %v694_v52 }
 0x13b   : > { %v1993_v30 = vpop.eup %1992  ;;  %2018 = vrcp.f32 %v1220_v13  ;;  %v1223_v18 = vadd.f32 1.0, %v1991_v15  ;;  %v1678_v13 = vmul.f32 -1.442695, %v2590_v43  ;;  %v2653_v54 = vadd.f32 %v2587_v59, %v902_v31 }
 0x13c   : > { %v1995_v24 = vpop.eup %1994  ;;  %2020 = vrcp.f32 %v1191_v26  ;;  %v1189_v32 = vadd.f32 1.0, %v1993_v30  ;;  %v1651_v26 = vmul.f32 -1.442695, %v2600_v57  ;;  %v1683_v30 = vmul.f32 -1.442695, %v2605_v29 }
 0x13d   : > { %v1997_v33 = vpop.eup %1996  ;;  %v1378_v48 = vmul.f32 %v1995_v24, %v2430_v44  ;;  %2022 = vrcp.f32 %v1223_v18  ;;  %v869_v44 = vmul.f32 %v2577_v38, %v691_v16  ;;  %v2629_v18 = vadd.f32 %v2587_v59, %v904_v1 }
 0x13e   : > { %v1999_v37 = vpop.eup %1998  ;;  %v1410_v42 = vmul.f32 %v1997_v33, %v2434_v5  ;;  %2024 = vrcp.f32 %v1189_v32  ;;  %v1646_v5 = vmul.f32 -1.442695, %v2571_v62  ;;  %v2635_v24 = vadd.f32 %v2587_v59, %v870_v2 }
 0x13f   : > { %v2001_v12 = vpop.eup %2000  ;;  %1442 = vst [vmem:[%s2341_s7 + $0x90] sm:$0xff] %v1378_v48  ;;  %v1376_v63 = vmul.f32 %v1999_v37, %v2438_v8  ;;  %2026 = vpow2.f32 %v1647_v3  ;;  %v2611_v35 = vadd.f32 %v2587_v59, %v869_v44 }
 0x140   : > { %v2003_v56 = vpop.eup %2002  ;;  %1474 = vst [vmem:[%s2341_s7 + $0x190] sm:$0xff] %v1410_v42  ;;  %v1408_v25 = vmul.f32 %v2001_v12, %v2441_v11  ;;  %2028 = vpow2.f32 %v1679_v53  ;;  %v2617_v53 = vadd.f32 %v2587_v59, %v901_v51 }
 0x141   : > { %v2005_v9 = vpop.eup %2004  ;;  %1440 = vst [vmem:[%s2341_s7 + $0x80] sm:$0xff] %v1376_v63  ;;  %v1221_v8 = vadd.f32 1.0, %v2003_v56  ;;  %2030 = vpow2.f32 %v1645_v17  ;;  %v2623_v17 = vadd.f32 %v2587_v59, %v872_v4  ;;  %v1649_v47 = vmul.f32 -1.442695, %v2611_v35 }
 0x142   : > { %v2007_v16 = vpop.eup %2006  ;;  %1472 = vst [vmem:[%s2341_s7 + $0x180] sm:$0xff] %v1408_v25  ;;  %v1379_v11 = vmul.f32 %v2005_v9, %v2446_v21  ;;  %2032 = vpow2.f32 %v1677_v19  ;;  %v1682_v59 = vmul.f32 -1.442695, %v2653_v54 }
 0x143   : > { %v2009_v3 = vpop.eup %2008  ;;  %v1411_v20 = vmul.f32 %v2007_v16, %v2450_v27  ;;  %2034 = vrcp.f32 %v1221_v8  ;;  %v1652_v48 = vmul.f32 -1.442695, %v2623_v17 }
 0x144   : > { %v2011_v15 = vpop.eup %2010  ;;  %1443 = vst [vmem:[%s2341_s7 + $0x98] sm:$0xff] %v1379_v11  ;;  %v1377_v21 = vmul.f32 %v2009_v3, %v2456_v36  ;;  %2036 = vpow2.f32 %v1648_v41  ;;  %v1681_v41 = vmul.f32 -1.442695, %v2617_v53 }
 0x145   : > { %v2013_v27 = vpop.eup %2012  ;;  %1475 = vst [vmem:[%s2341_s7 + $0x198] sm:$0xff] %v1411_v20  ;;  %v1409_v46 = vmul.f32 %v2011_v15, %v2465_v50  ;;  %2038 = vpow2.f32 %v1680_v40 }
 0x146   : > { %v2015_v36 = vpop.eup %2014  ;;  %1441 = vst [vmem:[%s2341_s7 + $0x88] sm:$0xff] %v1377_v21  ;;  %v1382_v19 = vmul.f32 %v2013_v27, %v2475_v7  ;;  %2040 = vpow2.f32 %v1646_v5 }
 0x147   : > { %v2017_v32 = vpop.eup %2016  ;;  %1473 = vst [vmem:[%s2341_s7 + $0x188] sm:$0xff] %v1409_v46  ;;  %v1414_v50 = vmul.f32 %v2015_v36, %v2480_v14  ;;  %2042 = vpow2.f32 %v1678_v13  ;;  %v1684_v14 = vmul.f32 -1.442695, %v2629_v18 }
 0x148   : > { %v2019_v33 = vpop.eup %2018  ;;  %1446 = vst [vmem:[%s2341_s7 + $0xb0] sm:$0xff] %v1382_v19  ;;  %v1380_v7 = vmul.f32 %v2017_v32, %v2486_v22  ;;  %2044 = vpow2.f32 %v1651_v26  ;;  %v1650_v22 = vmul.f32 -1.442695, %v2635_v24 }
 0x149   : > { %v2021_v40 = vpop.eup %2020  ;;  %1478 = vst [vmem:[%s2341_s7 + $0x1b0] sm:$0xff] %v1414_v50  ;;  %v1412_v55 = vmul.f32 %v2019_v33, %v2492_v28  ;;  %2046 = vpow2.f32 %v1683_v30 }
 0x14a   : > { %v2023_v37 = vpop.eup %2022  ;;  %1444 = vst [vmem:[%s2341_s7 + $0xa0] sm:$0xff] %v1380_v7  ;;  %v1383_v38 = vmul.f32 %v2021_v40, %v2500_v34  ;;  %2048 = vpow2.f32 %v1649_v47 }
 0x14b   : > { %v2025_v42 = vpop.eup %2024  ;;  %1476 = vst [vmem:[%s2341_s7 + $0x1a0] sm:$0xff] %v1412_v55  ;;  %v1415_v44 = vmul.f32 %v2023_v37, %v2506_v39  ;;  %2050 = vpow2.f32 %v1681_v41 }
 0x14c   : > { %v2027_v28 = vpop.eup %2026  ;;  %1447 = vst [vmem:[%s2341_s7 + $0xb8] sm:$0xff] %v1383_v38  ;;  %v1381_v12 = vmul.f32 %v2025_v42, %v2512_v45  ;;  %2052 = vpow2.f32 %v1652_v48 }
 0x14d   : > { %v2029_v63 = vpop.eup %2028  ;;  %1479 = vst [vmem:[%s2341_s7 + $0x1b8] sm:$0xff] %v1415_v44  ;;  %v1194_v34 = vadd.f32 1.0, %v2027_v28  ;;  %2054 = vpow2.f32 %v1684_v14 }
 0x14e   : > { %v2031_v5 = vpop.eup %2030  ;;  %1445 = vst [vmem:[%s2341_s7 + $0xa8] sm:$0xff] %v1381_v12  ;;  %v1226_v51 = vadd.f32 1.0, %v2029_v63  ;;  %2056 = vpow2.f32 %v1650_v22 }
 0x14f   : > { %v2033_v52 = vpop.eup %2032  ;;  %2058 = vrcp.f32 %v1194_v34  ;;  %v1192_v39 = vadd.f32 1.0, %v2031_v5 }
 0x150   : > { %v2035_v56 = vpop.eup %2034  ;;  %2060 = vrcp.f32 %v1226_v51  ;;  %v1224_v25 = vadd.f32 1.0, %v2033_v52 }
 0x151   : > { %v2037_v4 = vpop.eup %2036  ;;  %v1413_v45 = vmul.f32 %v2035_v56, %v2530_v49  ;;  %2062 = vrcp.f32 %v1192_v39 }
 0x152   : > { %v2039_v9 = vpop.eup %2038  ;;  %2064 = vrcp.f32 %v1224_v25  ;;  %v1195_v8 = vadd.f32 1.0, %v2037_v4 }
 0x153   : > { %v2041_v1 = vpop.eup %2040  ;;  %1477 = vst [vmem:[%s2341_s7 + $0x1a8] sm:$0xff] %v1413_v45  ;;  %v1227_v16 = vadd.f32 1.0, %v2039_v9  ;;  %2066 = vpow2.f32 %v1682_v59 }
 0x154   : > { %v2043_v11 = vpop.eup %2042  ;;  %2068 = vrcp.f32 %v1195_v8  ;;  %v1193_v2 = vadd.f32 1.0, %v2041_v1 }
 0x155   : > { %v2045_v3 = vpop.eup %2044  ;;  %2070 = vrcp.f32 %v1227_v16  ;;  %v1225_v20 = vadd.f32 1.0, %v2043_v11 }
 0x156   : > { %v2047_v13 = vpop.eup %2046  ;;  %2072 = vrcp.f32 %v1193_v2  ;;  %v1198_v15 = vadd.f32 1.0, %v2045_v3 }
 0x157   : > { %v2049_v21 = vpop.eup %2048  ;;  %2074 = vrcp.f32 %v1225_v20  ;;  %v1230_v49 = vadd.f32 1.0, %v2047_v13 }
 0x158   : > { %v2051_v26 = vpop.eup %2050  ;;  %2076 = vrcp.f32 %v1198_v15  ;;  %v1196_v58 = vadd.f32 1.0, %v2049_v21 }
 0x159   : > { %v2053_v27 = vpop.eup %2052  ;;  %2078 = vrcp.f32 %v1230_v49  ;;  %v1228_v46 = vadd.f32 1.0, %v2051_v26 }
 0x15a   : > { %v2055_v30 = vpop.eup %2054  ;;  %2080 = vrcp.f32 %v1196_v58  ;;  %v1199_v36 = vadd.f32 1.0, %v2053_v27 }
 0x15b   : > { %v2057_v19 = vpop.eup %2056  ;;  %2082 = vrcp.f32 %v1228_v46  ;;  %v1231_v47 = vadd.f32 1.0, %v2055_v30 }
 0x15c   : > { %v2059_v32 = vpop.eup %2058  ;;  %2084 = vrcp.f32 %v1199_v36  ;;  %v1197_v50 = vadd.f32 1.0, %v2057_v19 }
 0x15d   : > { %v2061_v41 = vpop.eup %2060  ;;  %v1386_v31 = vmul.f32 %v2059_v32, %v2545_v23  ;;  %2086 = vrcp.f32 %v1231_v47 }
 0x15e   : > { %v2063_v33 = vpop.eup %2062  ;;  %v1418_v7 = vmul.f32 %v2061_v41, %v2549_v0  ;;  %2088 = vrcp.f32 %v1197_v50 }
 0x15f   : > { %v2065_v48 = vpop.eup %2064  ;;  %1450 = vst [vmem:[%s2341_s7 + $0xd0] sm:$0xff] %v1386_v31  ;;  %v1384_v40 = vmul.f32 %v2063_v33, %v2553_v60 }
 0x160   : > { %v2067_v55 = vpop.eup %2066  ;;  %1482 = vst [vmem:[%s2341_s7 + $0x1d0] sm:$0xff] %v1418_v7  ;;  %v1416_v14 = vmul.f32 %v2065_v48, %v2556_v61 }
 0x161   : > { %v2069_v37 = vpop.eup %2068  ;;  %1448 = vst [vmem:[%s2341_s7 + $0xc0] sm:$0xff] %v1384_v40  ;;  %v1229_v38 = vadd.f32 1.0, %v2067_v55 }
 0x162   : > { %v2071_v23 = vpop.eup %2070  ;;  %1480 = vst [vmem:[%s2341_s7 + $0x1c0] sm:$0xff] %v1416_v14  ;;  %v1387_v0 = vmul.f32 %v2069_v37, %v2561_v6 }
 0x163   : > { %v2073_v22 = vpop.eup %2072  ;;  %v1419_v42 = vmul.f32 %v2071_v23, %v2565_v10  ;;  %2090 = vrcp.f32 %v1229_v38 }
 0x164   : > { %v2075_v60 = vpop.eup %2074  ;;  %1451 = vst [vmem:[%s2341_s7 + $0xd8] sm:$0xff] %v1387_v0  ;;  %v1385_v44 = vmul.f32 %v2073_v22, %v2571_v62 }
 0x165   : > { %v2077_v61 = vpop.eup %2076  ;;  %1483 = vst [vmem:[%s2341_s7 + $0x1d8] sm:$0xff] %v1419_v42  ;;  %v1417_v28 = vmul.f32 %v2075_v60, %v2590_v43 }
 0x166   : > { %v2079_v12 = vpop.eup %2078  ;;  %1449 = vst [vmem:[%s2341_s7 + $0xc8] sm:$0xff] %v1385_v44  ;;  %v1390_v6 = vmul.f32 %v2077_v61, %v2600_v57 }
 0x167   : > { %v2081_v63 = vpop.eup %2080  ;;  %1481 = vst [vmem:[%s2341_s7 + $0x1c8] sm:$0xff] %v1417_v28  ;;  %v1422_v10 = vmul.f32 %v2079_v12, %v2605_v29 }
 0x168   : > { %v2083_v34 = vpop.eup %2082  ;;  %1454 = vst [vmem:[%s2341_s7 + $0xf0] sm:$0xff] %v1390_v6  ;;  %v1388_v62 = vmul.f32 %v2081_v63, %v2611_v35 }
 0x169   : > { %v2085_v5 = vpop.eup %2084  ;;  %1486 = vst [vmem:[%s2341_s7 + $0x1f0] sm:$0xff] %v1422_v10  ;;  %v1420_v43 = vmul.f32 %v2083_v34, %v2617_v53 }
 0x16a   : > { %v2087_v51 = vpop.eup %2086  ;;  %1452 = vst [vmem:[%s2341_s7 + $0xe0] sm:$0xff] %v1388_v62  ;;  %v1391_v57 = vmul.f32 %v2085_v5, %v2623_v17 }
 0x16b   : > { %v2089_v52 = vpop.eup %2088  ;;  %1484 = vst [vmem:[%s2341_s7 + $0x1e0] sm:$0xff] %v1420_v43  ;;  %v1423_v39 = vmul.f32 %v2087_v51, %v2629_v18 }
 0x16c   : > { %1455 = vst [vmem:[%s2341_s7 + $0xf8] sm:$0xff] %v1391_v57  ;;  %v1389_v29 = vmul.f32 %v2089_v52, %v2635_v24 }
 0x16d   : > { %1487 = vst [vmem:[%s2341_s7 + $0x1f8] sm:$0xff] %v1423_v39 }
 0x16e   : > { %1453 = vst [vmem:[%s2341_s7 + $0xe8] sm:$0xff] %v1389_v29 }
 0x170   : > { %v2091_v59 = vpop.eup %2090 }
 0x171   : > { %v1421_v35 = vmul.f32 %v2091_v59, %v2653_v54 }
 0x173   : > { %1485 = vst [vmem:[%s2341_s7 + $0x1e8] sm:$0xff] %v1421_v35 }
 0x174 PF: > { %s14_s15 = sadd.s32 1, %s2100_s15  }
 0x175   : > { %p11_p4 = scmp.ge.s32.totalorder %s14_s15, 10  }
 0x177   :  { %13 = sbr.rel (!%p11_p4) target bundleno = 1 (0x1), region = 66 }

// kernel: effi_b7_forward.15
= control target key start
LH: loop header
LB: loop body
LE: loop exit
PB: predicated region body
PF: predicated region fallthrough
CT: control target
= control target key end

     0   :  { %s2333_s15 = smov 0   ;;  %s2952_s0 = inlined_call_operand.vmem [shape: bf16[4096,144], index: 0, kind: input, shape index: {}]   ;;  %s2953_s1 = inlined_call_operand.vmem [shape: bf16[144,128], index: 1, kind: input, shape index: {}]   ;;  %s2954_s2 = inlined_call_operand.vmem [shape: f32[1,128], index: 2, kind: input, shape index: {}]   ;;  %s2955_s3 = inlined_call_operand.vmem [shape: f32[1,128], index: 3, kind: input, shape index: {}]   ;;  %s2956_s4 = inlined_call_operand.vmem [shape: f32[4096,128], index: 4, kind: output, shape index: {}]  }
   0x1 LB: > { %s1725_s16 = sadd.s32 4294967295, %s2305_s15   ;;  %p1729_p0 = scmp.ge.s32.totalorder %s2305_s15, 1  ;;  %s2305_s15 = sphi %s2333_s15, %s14_s15  }
   0x2   : > { %p164_p1 = scmp.lt.s32.totalorder %s2305_s15, 9 }
   0x4   : > { %p165_p2 = pnand %p1729_p0, %p164_p1 }
   0x5   : > { %s1730_s19 = sshll.u32 (!%p165_p2), %s1725_s16, 6 }
   0x6   : > { %168 = sbr.rel (%p165_p2) target bundleno = 407 (0x197), region = 36  ;;  %p192_p3 = scmp.lt.s32.totalorder (!%p165_p2), %s1730_s19, 511 }
   0xb   : > { %v1936_v0 = vld [vmem:[%s2953_s1 + $0x38] sm:$0xff]   ;;  %v2307_v1 = vmov 0   ;;  %v1937_v2 = vld [vmem:[%s2953_s1 + $0x30] sm:$0xff]   ;;  %s2958_s19 = smov (!%p192_p3, %s1730_s19), 511  ;;  %v1938_v3 = vld [vmem:[%s2953_s1 + $0x28] sm:$0xff]   ;;  %vm629_vm0 = vcmask 130048  }
   0xc   : > { %726 = vmatprep.subr.bf16.mxu0 %v2307_v1  ;;  %1909 = vmatprep.subr.bf16.mxu1 %v2307_v1  ;;  %s1908_s24 = sshll.u32 %s2958_s19, 3  ;;  %v1939_v4 = vld [vmem:[%s2953_s1 + $0x20] sm:$0xff]   ;;  %v1940_v7 = vld [vmem:[%s2953_s1 + $0x18] sm:$0xff]   ;;  %v1941_v8 = vld [vmem:[%s2953_s1 + $0x10] sm:$0xff]  }
   0xd   : > { %727 = vmatpush1.bf16.msra.mxu0 %v1936_v0  ;;  %1918 = vmatpush1.bf16.msra.mxu1 %v1936_v0  ;;  %s2358_s27 = scalar_lea.vmem %s2952_s0, %s1908_s24  ;;  %v1942_v9 = vld [vmem:[%s2953_s1 + $0x8] sm:$0xff]   ;;  %v1943_v10 = vld [vmem:[%s2953_s1] sm:$0xff]   ;;  %s2574_s22 = scalar_lea.vmem %s2956_s4, %s1908_s24 }
   0xe   : > { %728 = vmatprep.subr.bf16.mxu0 %v2307_v1  ;;  %1910 = vmatprep.subr.bf16.mxu1 %v2307_v1  ;;  %v1947_v5 = vld [vmem:[%s2358_s27 + $0x4] ss:$8 sps:$4 sm:$0xff]   ;;  %v1945_v12 = vld [vmem:[%s2358_s27] ss:$8 sps:$4 sm:$0xff]   ;;  %v1951_v14 = vld [vmem:[%s2358_s27 + $0x14] ss:$8 sps:$4 sm:$0xff]  }
   0xf   : > { %v1950_v6 = vld [vmem:[%s2358_s27 + $0x104] ss:$8 sps:$4 sm:$0xff]   ;;  %1808 = vmatprep.mubr.msk.bf16.mxu0 %vm629_vm0, %v1947_v5  ;;  %v1948_v13 = vld [vmem:[%s2358_s27 + $0x100] ss:$8 sps:$4 sm:$0xff]   ;;  %v1953_v15 = vld [vmem:[%s2358_s27 + $0x114] ss:$8 sps:$4 sm:$0xff]  }
  0x10   : > { %1824 = vmatprep.mubr.msk.bf16.mxu1 %vm629_vm0, %v1950_v6  ;;  %v1944_v11 = vld [vmem:[%s2953_s1 + $0x40] sm:$0xff]   ;;  %v1955_v16 = vld [vmem:[%s2358_s27 + $0x10] ss:$8 sps:$4 sm:$0xff]   ;;  %v1963_v22 = vld [vmem:[%s2358_s27 + $0x34] ss:$8 sps:$4 sm:$0xff]  }
  0x11   : > { %729 = vmatpush1.bf16.msra.mxu0 %v1937_v2  ;;  %1919 = vmatpush1.bf16.msra.mxu1 %v1937_v2  ;;  %v1956_v17 = vld [vmem:[%s2358_s27 + $0x110] ss:$8 sps:$4 sm:$0xff]   ;;  %v1957_v18 = vld [vmem:[%s2358_s27 + $0x24] ss:$8 sps:$4 sm:$0xff]   ;;  %v1961_v20 = vld [vmem:[%s2358_s27 + $0x20] ss:$8 sps:$4 sm:$0xff]  }
  0x12   : > { %730 = vmatprep.subr.bf16.mxu0 %v2307_v1  ;;  %1911 = vmatprep.subr.bf16.mxu1 %v2307_v1  ;;  %v1959_v19 = vld [vmem:[%s2358_s27 + $0x124] ss:$8 sps:$4 sm:$0xff]   ;;  %v1962_v21 = vld [vmem:[%s2358_s27 + $0x120] ss:$8 sps:$4 sm:$0xff]   ;;  %v1965_v23 = vld [vmem:[%s2358_s27 + $0x134] ss:$8 sps:$4 sm:$0xff]  }
  0x13   : > { %v1967_v24 = vld [vmem:[%s2358_s27 + $0x30] ss:$8 sps:$4 sm:$0xff]   ;;  %v1969_v26 = vld [vmem:[%s2358_s27 + $0x44] ss:$8 sps:$4 sm:$0xff]   ;;  %v1973_v28 = vld [vmem:[%s2358_s27 + $0x40] ss:$8 sps:$4 sm:$0xff]  }
  0x14   : > { %v1968_v25 = vld [vmem:[%s2358_s27 + $0x130] ss:$8 sps:$4 sm:$0xff]   ;;  %v1971_v27 = vld [vmem:[%s2358_s27 + $0x144] ss:$8 sps:$4 sm:$0xff]   ;;  %v1974_v29 = vld [vmem:[%s2358_s27 + $0x140] ss:$8 sps:$4 sm:$0xff]  }
  0x15   : > { %731 = vmatpush1.bf16.msra.mxu0 %v1938_v3  ;;  %1920 = vmatpush1.bf16.msra.mxu1 %v1938_v3  ;;  %v1975_v30 = vld [vmem:[%s2358_s27 + $0x54] ss:$8 sps:$4 sm:$0xff]   ;;  %v1979_v32 = vld [vmem:[%s2358_s27 + $0x50] ss:$8 sps:$4 sm:$0xff]   ;;  %v1981_v34 = vld [vmem:[%s2358_s27 + $0x64] ss:$8 sps:$4 sm:$0xff]  }
  0x16   : > { %732 = vmatprep.subr.bf16.mxu0 %v2307_v1  ;;  %1912 = vmatprep.subr.bf16.mxu1 %v2307_v1  ;;  %v1977_v31 = vld [vmem:[%s2358_s27 + $0x154] ss:$8 sps:$4 sm:$0xff]   ;;  %v1980_v33 = vld [vmem:[%s2358_s27 + $0x150] ss:$8 sps:$4 sm:$0xff]   ;;  %v1983_v35 = vld [vmem:[%s2358_s27 + $0x164] ss:$8 sps:$4 sm:$0xff]  }
  0x17   : > { %v1985_v36 = vld [vmem:[%s2358_s27 + $0x60] ss:$8 sps:$4 sm:$0xff]   ;;  %v1987_v38 = vld [vmem:[%s2358_s27 + $0x74] ss:$8 sps:$4 sm:$0xff]   ;;  %v1991_v40 = vld [vmem:[%s2358_s27 + $0x70] ss:$8 sps:$4 sm:$0xff]  }
  0x18   : > { %v1986_v37 = vld [vmem:[%s2358_s27 + $0x160] ss:$8 sps:$4 sm:$0xff]   ;;  %v1989_v39 = vld [vmem:[%s2358_s27 + $0x174] ss:$8 sps:$4 sm:$0xff]   ;;  %v1992_v41 = vld [vmem:[%s2358_s27 + $0x170] ss:$8 sps:$4 sm:$0xff]  }
  0x19   : > { %733 = vmatpush1.bf16.msra.mxu0 %v1939_v4  ;;  %1921 = vmatpush1.bf16.msra.mxu1 %v1939_v4  ;;  %v1993_v42 = vld [vmem:[%s2358_s27 + $0x84] ss:$8 sps:$4 sm:$0xff]   ;;  %v1997_v44 = vld [vmem:[%s2358_s27 + $0x80] ss:$8 sps:$4 sm:$0xff]   ;;  %v1999_v46 = vld [vmem:[%s2358_s27 + $0x94] ss:$8 sps:$4 sm:$0xff]  }
  0x1a   : > { %734 = vmatprep.subr.bf16.mxu0 %v2307_v1  ;;  %1913 = vmatprep.subr.bf16.mxu1 %v2307_v1  ;;  %v1995_v43 = vld [vmem:[%s2358_s27 + $0x184] ss:$8 sps:$4 sm:$0xff]   ;;  %v1998_v45 = vld [vmem:[%s2358_s27 + $0x180] ss:$8 sps:$4 sm:$0xff]   ;;  %v2001_v47 = vld [vmem:[%s2358_s27 + $0x194] ss:$8 sps:$4 sm:$0xff]  }
  0x1b   : > { %v2003_v48 = vld [vmem:[%s2358_s27 + $0x90] ss:$8 sps:$4 sm:$0xff]   ;;  %v2005_v50 = vld [vmem:[%s2358_s27 + $0xa4] ss:$8 sps:$4 sm:$0xff]   ;;  %v2009_v52 = vld [vmem:[%s2358_s27 + $0xa0] ss:$8 sps:$4 sm:$0xff]  }
  0x1c   : > { %v2004_v49 = vld [vmem:[%s2358_s27 + $0x190] ss:$8 sps:$4 sm:$0xff]   ;;  %v2007_v51 = vld [vmem:[%s2358_s27 + $0x1a4] ss:$8 sps:$4 sm:$0xff]   ;;  %v2010_v53 = vld [vmem:[%s2358_s27 + $0x1a0] ss:$8 sps:$4 sm:$0xff]  }
  0x1d   : > { %735 = vmatpush1.bf16.msra.mxu0 %v1940_v7  ;;  %1922 = vmatpush1.bf16.msra.mxu1 %v1940_v7  ;;  %v2011_v54 = vld [vmem:[%s2358_s27 + $0xb4] ss:$8 sps:$4 sm:$0xff]   ;;  %v2015_v56 = vld [vmem:[%s2358_s27 + $0xb0] ss:$8 sps:$4 sm:$0xff]   ;;  %v2017_v58 = vld [vmem:[%s2358_s27 + $0xc4] ss:$8 sps:$4 sm:$0xff]  }
  0x1e   : > { %736 = vmatprep.subr.bf16.mxu0 %v2307_v1  ;;  %1914 = vmatprep.subr.bf16.mxu1 %v2307_v1  ;;  %v2013_v55 = vld [vmem:[%s2358_s27 + $0x1b4] ss:$8 sps:$4 sm:$0xff]   ;;  %v2016_v57 = vld [vmem:[%s2358_s27 + $0x1b0] ss:$8 sps:$4 sm:$0xff]   ;;  %v2019_v59 = vld [vmem:[%s2358_s27 + $0x1c4] ss:$8 sps:$4 sm:$0xff]  }
  0x1f   : > { %v2021_v60 = vld [vmem:[%s2358_s27 + $0xc0] ss:$8 sps:$4 sm:$0xff]   ;;  %v2023_v62 = vld [vmem:[%s2358_s27 + $0xd4] ss:$8 sps:$4 sm:$0xff]   ;;  %v2027_v0 = vld [vmem:[%s2358_s27 + $0xd0] ss:$8 sps:$4 sm:$0xff]  }
  0x20   : > { %v2022_v61 = vld [vmem:[%s2358_s27 + $0x1c0] ss:$8 sps:$4 sm:$0xff]   ;;  %v2025_v63 = vld [vmem:[%s2358_s27 + $0x1d4] ss:$8 sps:$4 sm:$0xff]   ;;  %v2029_v2 = vld [vmem:[%s2358_s27 + $0xe4] ss:$8 sps:$4 sm:$0xff]  }
  0x21   : > { %737 = vmatpush1.bf16.msra.mxu0 %v1941_v8  ;;  %1923 = vmatpush1.bf16.msra.mxu1 %v1941_v8  ;;  %v2031_v3 = vld [vmem:[%s2358_s27 + $0x1e4] ss:$8 sps:$4 sm:$0xff]   ;;  %v2033_v4 = vld [vmem:[%s2358_s27 + $0xe0] ss:$8 sps:$4 sm:$0xff]   ;;  %v2035_v6 = vld [vmem:[%s2358_s27 + $0xf4] ss:$8 sps:$4 sm:$0xff]  }
  0x22   : > { %738 = vmatprep.subr.bf16.mxu0 %v2307_v1  ;;  %1915 = vmatprep.subr.bf16.mxu1 %v2307_v1  ;;  %v2034_v5 = vld [vmem:[%s2358_s27 + $0x1e0] ss:$8 sps:$4 sm:$0xff]   ;;  %v2037_v7 = vld [vmem:[%s2358_s27 + $0x1f4] ss:$8 sps:$4 sm:$0xff]   ;;  %v2039_v8 = vld [vmem:[%s2358_s27 + $0xf0] ss:$8 sps:$4 sm:$0xff]  }
  0x25   : > { %739 = vmatpush1.bf16.msra.mxu0 %v1942_v9  ;;  %1924 = vmatpush1.bf16.msra.mxu1 %v1942_v9  ;;  %v2040_v9 = vld [vmem:[%s2358_s27 + $0x1f0] ss:$8 sps:$4 sm:$0xff]  }
  0x26   : > { %740 = vmatprep.subr.bf16.mxu0 %v2307_v1  ;;  %1916 = vmatprep.subr.bf16.mxu1 %v2307_v1 }
  0x29   : > { %741 = vmatpush1.bf16.msra.mxu0 %v1943_v10  ;;  %1925 = vmatpush1.bf16.msra.mxu1 %v1943_v10  ;;  %v2477_v10 = vld [vmem:[%s2954_s2] ss:$0 sm:$0xff] }
  0x2a   : > { %756 = vmatprep.subr.bf16.mxu0 %v2307_v1  ;;  %1917 = vmatprep.subr.bf16.mxu1 %v2307_v1  ;;  %v2028_v1 = vld [vmem:[%s2358_s27 + $0x1d0] ss:$8 sps:$4 sm:$0xff]  }
  0x2d   : > { %757 = vmatpush2.bf16.msra.mxu0 %v1944_v11  ;;  %1926 = vmatpush2.bf16.msra.mxu1 %v1944_v11 }
  0x30   : > { %759 = vmatmul.mubr.bf16.vlgmr.msra.gmra.mxu0 %v1945_v12  ;;  %887 = vmatmul.mubr.bf16.vlgmr.msra.gmra.mxu1 %v1948_v13  ;;  %v2482_v12 = vld [vmem:[%s2955_s3] ss:$0 sm:$0xff] }
  0x31   : > { %1809 = vmatprep.mubr.msk.bf16.mxu0 %vm629_vm0, %v1951_v14  ;;  %1825 = vmatprep.mubr.msk.bf16.mxu1 %vm629_vm0, %v1953_v15 }
  0x38   : > { %767 = vmatmul.mubr.bf16.gmra.mxu0 %v1955_v16  ;;  %895 = vmatmul.mubr.bf16.gmra.mxu1 %v1956_v17 }
  0x39   : > { %1810 = vmatprep.mubr.msk.bf16.mxu0 %vm629_vm0, %v1957_v18  ;;  %1826 = vmatprep.mubr.msk.bf16.mxu1 %vm629_vm0, %v1959_v19 }
  0x40   : > { %775 = vmatmul.mubr.bf16.gmra.mxu0 %v1961_v20  ;;  %903 = vmatmul.mubr.bf16.gmra.mxu1 %v1962_v21 }
  0x41   : > { %1811 = vmatprep.mubr.msk.bf16.mxu0 %vm629_vm0, %v1963_v22  ;;  %1827 = vmatprep.mubr.msk.bf16.mxu1 %vm629_vm0, %v1965_v23 }
  0x48   : > { %783 = vmatmul.mubr.bf16.gmra.mxu0 %v1967_v24  ;;  %911 = vmatmul.mubr.bf16.gmra.mxu1 %v1968_v25 }
  0x49   : > { %1812 = vmatprep.mubr.msk.bf16.mxu0 %vm629_vm0, %v1969_v26  ;;  %1828 = vmatprep.mubr.msk.bf16.mxu1 %vm629_vm0, %v1971_v27 }
  0x50   : > { %791 = vmatmul.mubr.bf16.gmra.mxu0 %v1973_v28  ;;  %919 = vmatmul.mubr.bf16.gmra.mxu1 %v1974_v29 }
  0x51   : > { %1813 = vmatprep.mubr.msk.bf16.mxu0 %vm629_vm0, %v1975_v30  ;;  %1829 = vmatprep.mubr.msk.bf16.mxu1 %vm629_vm0, %v1977_v31 }
  0x58   : > { %799 = vmatmul.mubr.bf16.gmra.mxu0 %v1979_v32  ;;  %927 = vmatmul.mubr.bf16.gmra.mxu1 %v1980_v33 }
  0x59   : > { %1814 = vmatprep.mubr.msk.bf16.mxu0 %vm629_vm0, %v1981_v34  ;;  %1830 = vmatprep.mubr.msk.bf16.mxu1 %vm629_vm0, %v1983_v35 }
  0x60   : > { %807 = vmatmul.mubr.bf16.gmra.mxu0 %v1985_v36  ;;  %935 = vmatmul.mubr.bf16.gmra.mxu1 %v1986_v37 }
  0x61   : > { %1815 = vmatprep.mubr.msk.bf16.mxu0 %vm629_vm0, %v1987_v38  ;;  %1831 = vmatprep.mubr.msk.bf16.mxu1 %vm629_vm0, %v1989_v39 }
  0x68   : > { %815 = vmatmul.mubr.bf16.gmra.mxu0 %v1991_v40  ;;  %943 = vmatmul.mubr.bf16.gmra.mxu1 %v1992_v41 }
  0x69   : > { %1816 = vmatprep.mubr.msk.bf16.mxu0 %vm629_vm0, %v1993_v42  ;;  %1832 = vmatprep.mubr.msk.bf16.mxu1 %vm629_vm0, %v1995_v43 }
  0x70   : > { %823 = vmatmul.mubr.bf16.gmra.mxu0 %v1997_v44  ;;  %951 = vmatmul.mubr.bf16.gmra.mxu1 %v1998_v45 }
  0x71   : > { %1817 = vmatprep.mubr.msk.bf16.mxu0 %vm629_vm0, %v1999_v46  ;;  %1833 = vmatprep.mubr.msk.bf16.mxu1 %vm629_vm0, %v2001_v47 }
  0x78   : > { %831 = vmatmul.mubr.bf16.gmra.mxu0 %v2003_v48  ;;  %959 = vmatmul.mubr.bf16.gmra.mxu1 %v2004_v49 }
  0x79   : > { %1818 = vmatprep.mubr.msk.bf16.mxu0 %vm629_vm0, %v2005_v50  ;;  %1834 = vmatprep.mubr.msk.bf16.mxu1 %vm629_vm0, %v2007_v51 }
  0x80   : > { %839 = vmatmul.mubr.bf16.gmra.mxu0 %v2009_v52  ;;  %967 = vmatmul.mubr.bf16.gmra.mxu1 %v2010_v53 }
  0x81   : > { %1819 = vmatprep.mubr.msk.bf16.mxu0 %vm629_vm0, %v2011_v54  ;;  %1835 = vmatprep.mubr.msk.bf16.mxu1 %vm629_vm0, %v2013_v55 }
  0x88   : > { %847 = vmatmul.mubr.bf16.gmra.mxu0 %v2015_v56  ;;  %975 = vmatmul.mubr.bf16.gmra.mxu1 %v2016_v57 }
  0x89   : > { %1820 = vmatprep.mubr.msk.bf16.mxu0 %vm629_vm0, %v2017_v58  ;;  %1836 = vmatprep.mubr.msk.bf16.mxu1 %vm629_vm0, %v2019_v59 }
  0x90   : > { %855 = vmatmul.mubr.bf16.gmra.mxu0 %v2021_v60  ;;  %983 = vmatmul.mubr.bf16.gmra.mxu1 %v2022_v61 }
  0x91   : > { %1821 = vmatprep.mubr.msk.bf16.mxu0 %vm629_vm0, %v2023_v62  ;;  %1837 = vmatprep.mubr.msk.bf16.mxu1 %vm629_vm0, %v2025_v63 }
  0x98   : > { %863 = vmatmul.mubr.bf16.gmra.mxu0 %v2027_v0  ;;  %991 = vmatmul.mubr.bf16.gmra.mxu1 %v2028_v1 }
  0x99   : > { %1822 = vmatprep.mubr.msk.bf16.mxu0 %vm629_vm0, %v2029_v2  ;;  %1838 = vmatprep.mubr.msk.bf16.mxu1 %vm629_vm0, %v2031_v3 }
  0xa0   : > { %871 = vmatmul.mubr.bf16.gmra.mxu0 %v2033_v4  ;;  %999 = vmatmul.mubr.bf16.gmra.mxu1 %v2034_v5 }
  0xa1   : > { %1823 = vmatprep.mubr.msk.bf16.mxu0 %vm629_vm0, %v2035_v6  ;;  %1839 = vmatprep.mubr.msk.bf16.mxu1 %vm629_vm0, %v2037_v7 }
  0xa8   : > { %879 = vmatmul.mubr.bf16.gmra.mxu0 %v2039_v8  ;;  %1007 = vmatmul.mubr.bf16.gmra.mxu1 %v2040_v9 }
  0xf0   : > { %v760_v11 = vpop.f32.mrf.mxu0  ;;  %v888_v13 = vpop.f32.mrf.mxu1 }
  0xf1   : > { %v1022_v14 = vmul.f32 %v2477_v10, %v760_v11  ;;  %v1054_v15 = vmul.f32 %v2477_v10, %v888_v13 }
  0xf2   : > { %v762_v16 = vpop.f32.mrf.mxu0  ;;  %v890_v17 = vpop.f32.mrf.mxu1 }
  0xf3   : > { %v2487_v18 = vadd.f32 %v2482_v12, %v1022_v14  ;;  %v2490_v19 = vadd.f32 %v2482_v12, %v1054_v15 }
  0xf4   : > { %v763_v20 = vpop.f32.mrf.mxu0  ;;  %v891_v21 = vpop.f32.mrf.mxu1 }
  0xf5   : > { %v1842_v22 = vmul.f32 -1.442695, %v2487_v18  ;;  %v1874_v23 = vmul.f32 -1.442695, %v2490_v19  ;;  %v1023_v24 = vmul.f32 %v2477_v10, %v763_v20  ;;  %v1055_v25 = vmul.f32 %v2477_v10, %v891_v21 }
  0xf6   : > { %v765_v26 = vpop.f32.mrf.mxu0  ;;  %v893_v27 = vpop.f32.mrf.mxu1 }
  0xf7   : > { %2041 = vpow2.f32 %v1842_v22  ;;  %v2497_v28 = vadd.f32 %v2482_v12, %v1023_v24  ;;  %v2500_v29 = vadd.f32 %v2482_v12, %v1055_v25 }
  0xf8   : > { %2043 = vpow2.f32 %v1874_v23  ;;  %v768_v30 = vpop.f32.mrf.mxu0  ;;  %v896_v31 = vpop.f32.mrf.mxu1 }
  0xf9   : > { %v1843_v32 = vmul.f32 -1.442695, %v2497_v28  ;;  %v1875_v33 = vmul.f32 -1.442695, %v2500_v29  ;;  %v1024_v34 = vmul.f32 %v2477_v10, %v768_v30  ;;  %v1056_v35 = vmul.f32 %v2477_v10, %v896_v31 }
  0xfa   : > { %v770_v36 = vpop.f32.mrf.mxu0  ;;  %v898_v37 = vpop.f32.mrf.mxu1 }
  0xfb   : > { %2045 = vpow2.f32 %v1843_v32  ;;  %v2507_v38 = vadd.f32 %v2482_v12, %v1024_v34  ;;  %v2510_v39 = vadd.f32 %v2482_v12, %v1056_v35 }
  0xfc   : > { %2047 = vpow2.f32 %v1875_v33  ;;  %v771_v40 = vpop.f32.mrf.mxu0  ;;  %v899_v41 = vpop.f32.mrf.mxu1 }
  0xfd   : > { %v1844_v42 = vmul.f32 -1.442695, %v2507_v38  ;;  %v1876_v43 = vmul.f32 -1.442695, %v2510_v39  ;;  %v1025_v44 = vmul.f32 %v2477_v10, %v771_v40  ;;  %v1057_v45 = vmul.f32 %v2477_v10, %v899_v41 }
  0xfe   : > { %v773_v46 = vpop.f32.mrf.mxu0  ;;  %v901_v47 = vpop.f32.mrf.mxu1 }
  0xff   : > { %2049 = vpow2.f32 %v1844_v42  ;;  %v2517_v48 = vadd.f32 %v2482_v12, %v1025_v44  ;;  %v2520_v49 = vadd.f32 %v2482_v12, %v1057_v45 }
 0x100   : > { %2051 = vpow2.f32 %v1876_v43  ;;  %v776_v50 = vpop.f32.mrf.mxu0  ;;  %v904_v51 = vpop.f32.mrf.mxu1 }
 0x101   : > { %v1845_v52 = vmul.f32 -1.442695, %v2517_v48  ;;  %v1877_v53 = vmul.f32 -1.442695, %v2520_v49  ;;  %v1026_v54 = vmul.f32 %v2477_v10, %v776_v50  ;;  %v1058_v55 = vmul.f32 %v2477_v10, %v904_v51 }
 0x102   : > { %v778_v56 = vpop.f32.mrf.mxu0  ;;  %v906_v57 = vpop.f32.mrf.mxu1 }
 0x103   : > { %2053 = vpow2.f32 %v1845_v52  ;;  %v2527_v58 = vadd.f32 %v2482_v12, %v1026_v54  ;;  %v2530_v59 = vadd.f32 %v2482_v12, %v1058_v55 }
 0x104   : > { %v2042_v60 = vpop.eup %2041  ;;  %2055 = vpow2.f32 %v1877_v53  ;;  %v779_v61 = vpop.f32.mrf.mxu0 }
 0x105   : > { %v907_v62 = vpop.f32.mrf.mxu1  ;;  %v2044_v63 = vpop.eup %2043  ;;  %v1349_v0 = vadd.f32 1.0, %v2042_v60  ;;  %v1846_v1 = vmul.f32 -1.442695, %v2527_v58  ;;  %v1027_v2 = vmul.f32 %v2477_v10, %v779_v61  ;;  %v1878_v4 = vmul.f32 -1.442695, %v2530_v59 }
 0x106   : > { %v1381_v3 = vadd.f32 1.0, %v2044_v63  ;;  %v1059_v5 = vmul.f32 %v2477_v10, %v907_v62  ;;  %v781_v6 = vpop.f32.mrf.mxu0 }
 0x107   : > { %v909_v7 = vpop.f32.mrf.mxu1  ;;  %2057 = vrcp.f32 %v1349_v0  ;;  %v2537_v8 = vadd.f32 %v2482_v12, %v1027_v2 }
 0x108   : > { %v2046_v9 = vpop.eup %2045  ;;  %2059 = vrcp.f32 %v1381_v3  ;;  %v2540_v11 = vadd.f32 %v2482_v12, %v1059_v5  ;;  %v784_v13 = vpop.f32.mrf.mxu0 }
 0x109   : > { %v912_v14 = vpop.f32.mrf.mxu1  ;;  %v2048_v15 = vpop.eup %2047  ;;  %v1350_v16 = vadd.f32 1.0, %v2046_v9  ;;  %2061 = vpow2.f32 %v1846_v1  ;;  %v1847_v17 = vmul.f32 -1.442695, %v2537_v8  ;;  %v1028_v20 = vmul.f32 %v2477_v10, %v784_v13 }
 0x10a   : > { %v1382_v21 = vadd.f32 1.0, %v2048_v15  ;;  %2063 = vpow2.f32 %v1878_v4  ;;  %v1879_v22 = vmul.f32 -1.442695, %v2540_v11  ;;  %v1060_v23 = vmul.f32 %v2477_v10, %v912_v14  ;;  %v786_v24 = vpop.f32.mrf.mxu0 }
 0x10b   : > { %v914_v25 = vpop.f32.mrf.mxu1  ;;  %2065 = vrcp.f32 %v1350_v16  ;;  %v2547_v26 = vadd.f32 %v2482_v12, %v1028_v20 }
 0x10c   : > { %v2050_v27 = vpop.eup %2049  ;;  %2067 = vrcp.f32 %v1382_v21  ;;  %v2550_v30 = vadd.f32 %v2482_v12, %v1060_v23  ;;  %v787_v31 = vpop.f32.mrf.mxu0 }
 0x10d   : > { %v915_v32 = vpop.f32.mrf.mxu1  ;;  %v2052_v33 = vpop.eup %2051  ;;  %v1351_v34 = vadd.f32 1.0, %v2050_v27  ;;  %2069 = vpow2.f32 %v1847_v17  ;;  %v1848_v35 = vmul.f32 -1.442695, %v2547_v26  ;;  %v1029_v36 = vmul.f32 %v2477_v10, %v787_v31 }
 0x10e   : > { %v1383_v37 = vadd.f32 1.0, %v2052_v33  ;;  %2071 = vpow2.f32 %v1879_v22  ;;  %v1880_v40 = vmul.f32 -1.442695, %v2550_v30  ;;  %v1061_v41 = vmul.f32 %v2477_v10, %v915_v32  ;;  %v789_v42 = vpop.f32.mrf.mxu0 }
 0x10f   : > { %v917_v43 = vpop.f32.mrf.mxu1  ;;  %2073 = vrcp.f32 %v1351_v34  ;;  %v2557_v44 = vadd.f32 %v2482_v12, %v1029_v36 }
 0x110   : > { %v2054_v45 = vpop.eup %2053  ;;  %2075 = vrcp.f32 %v1383_v37  ;;  %v2560_v46 = vadd.f32 %v2482_v12, %v1061_v41  ;;  %v792_v47 = vpop.f32.mrf.mxu0 }
 0x111   : > { %v920_v50 = vpop.f32.mrf.mxu1  ;;  %v2056_v51 = vpop.eup %2055  ;;  %v1352_v52 = vadd.f32 1.0, %v2054_v45  ;;  %2077 = vpow2.f32 %v1848_v35  ;;  %v1849_v53 = vmul.f32 -1.442695, %v2557_v44  ;;  %v1030_v54 = vmul.f32 %v2477_v10, %v792_v47 }
 0x112   : > { %v1384_v55 = vadd.f32 1.0, %v2056_v51  ;;  %2079 = vpow2.f32 %v1880_v40  ;;  %v1881_v56 = vmul.f32 -1.442695, %v2560_v46  ;;  %v1062_v57 = vmul.f32 %v2477_v10, %v920_v50  ;;  %v794_v60 = vpop.f32.mrf.mxu0 }
 0x113   : > { %v922_v61 = vpop.f32.mrf.mxu1  ;;  %2081 = vrcp.f32 %v1352_v52  ;;  %v2567_v62 = vadd.f32 %v2482_v12, %v1030_v54 }
 0x114   : > { %v2058_v63 = vpop.eup %2057  ;;  %2083 = vrcp.f32 %v1384_v55  ;;  %v2577_v0 = vadd.f32 %v2482_v12, %v1062_v57  ;;  %v795_v1 = vpop.f32.mrf.mxu0 }
 0x115   : > { %v923_v2 = vpop.f32.mrf.mxu1  ;;  %v2060_v3 = vpop.eup %2059  ;;  %v1541_v4 = vmul.f32 %v2058_v63, %v2487_v18  ;;  %2085 = vpow2.f32 %v1849_v53  ;;  %v1850_v5 = vmul.f32 -1.442695, %v2567_v62  ;;  %v1031_v6 = vmul.f32 %v2477_v10, %v795_v1 }
 0x116   : > { %v2062_v7 = vpop.eup %2061  ;;  %v1573_v9 = vmul.f32 %v2060_v3, %v2490_v19  ;;  %2087 = vpow2.f32 %v1881_v56  ;;  %v1882_v13 = vmul.f32 -1.442695, %v2577_v0  ;;  %v1063_v14 = vmul.f32 %v2477_v10, %v923_v2  ;;  %v797_v15 = vpop.f32.mrf.mxu0 }
 0x117   : > { %v925_v16 = vpop.f32.mrf.mxu1  ;;  %v2064_v17 = vpop.eup %2063  ;;  %1605 = vst [vmem:[%s2574_s22] sm:$0xff] %v1541_v4  ;;  %v1353_v20 = vadd.f32 1.0, %v2062_v7  ;;  %2089 = vpow2.f32 %v1850_v5  ;;  %v2587_v18 = vadd.f32 %v2482_v12, %v1031_v6 }
 0x118   : > { %v2066_v21 = vpop.eup %2065  ;;  %1637 = vst [vmem:[%s2574_s22 + $0x100] sm:$0xff] %v1573_v9  ;;  %v1385_v22 = vadd.f32 1.0, %v2064_v17  ;;  %2091 = vpow2.f32 %v1882_v13  ;;  %v2591_v19 = vadd.f32 %v2482_v12, %v1063_v14  ;;  %v800_v23 = vpop.f32.mrf.mxu0 }
 0x119   : > { %v928_v24 = vpop.f32.mrf.mxu1  ;;  %v2068_v25 = vpop.eup %2067  ;;  %v1542_v27 = vmul.f32 %v2066_v21, %v2497_v28  ;;  %2093 = vrcp.f32 %v1353_v20  ;;  %v1851_v31 = vmul.f32 -1.442695, %v2587_v18  ;;  %v1032_v32 = vmul.f32 %v2477_v10, %v800_v23 }
 0x11a   : > { %v2070_v33 = vpop.eup %2069  ;;  %v1574_v34 = vmul.f32 %v2068_v25, %v2500_v29  ;;  %2095 = vrcp.f32 %v1385_v22  ;;  %v1883_v35 = vmul.f32 -1.442695, %v2591_v19  ;;  %v1064_v36 = vmul.f32 %v2477_v10, %v928_v24  ;;  %v802_v37 = vpop.f32.mrf.mxu0 }
 0x11b   : > { %v930_v40 = vpop.f32.mrf.mxu1  ;;  %v2072_v41 = vpop.eup %2071  ;;  %1606 = vst [vmem:[%s2574_s22 + $0x8] sm:$0xff] %v1542_v27  ;;  %v1354_v42 = vadd.f32 1.0, %v2070_v33  ;;  %2097 = vpow2.f32 %v1851_v31  ;;  %v2601_v28 = vadd.f32 %v2482_v12, %v1032_v32 }
 0x11c   : > { %v2074_v43 = vpop.eup %2073  ;;  %1638 = vst [vmem:[%s2574_s22 + $0x108] sm:$0xff] %v1574_v34  ;;  %v1386_v45 = vadd.f32 1.0, %v2072_v41  ;;  %2099 = vpow2.f32 %v1883_v35  ;;  %v2605_v29 = vadd.f32 %v2482_v12, %v1064_v36  ;;  %v803_v47 = vpop.f32.mrf.mxu0 }
 0x11d   : > { %v931_v50 = vpop.f32.mrf.mxu1  ;;  %v2076_v51 = vpop.eup %2075  ;;  %v1543_v52 = vmul.f32 %v2074_v43, %v2507_v38  ;;  %2101 = vrcp.f32 %v1354_v42  ;;  %v1852_v53 = vmul.f32 -1.442695, %v2601_v28  ;;  %v1033_v54 = vmul.f32 %v2477_v10, %v803_v47 }
 0x11e   : > { %v2078_v55 = vpop.eup %2077  ;;  %v1575_v56 = vmul.f32 %v2076_v51, %v2510_v39  ;;  %2103 = vrcp.f32 %v1386_v45  ;;  %v1884_v57 = vmul.f32 -1.442695, %v2605_v29  ;;  %v1065_v60 = vmul.f32 %v2477_v10, %v931_v50  ;;  %v805_v61 = vpop.f32.mrf.mxu0 }
 0x11f   : > { %v933_v63 = vpop.f32.mrf.mxu1  ;;  %v2080_v1 = vpop.eup %2079  ;;  %1607 = vst [vmem:[%s2574_s22 + $0x10] sm:$0xff] %v1543_v52  ;;  %v1355_v2 = vadd.f32 1.0, %v2078_v55  ;;  %2105 = vpow2.f32 %v1852_v53  ;;  %v2615_v38 = vadd.f32 %v2482_v12, %v1033_v54 }
 0x120   : > { %v2082_v3 = vpop.eup %2081  ;;  %1639 = vst [vmem:[%s2574_s22 + $0x110] sm:$0xff] %v1575_v56  ;;  %v1387_v4 = vadd.f32 1.0, %v2080_v1  ;;  %2107 = vpow2.f32 %v1884_v57  ;;  %v2619_v39 = vadd.f32 %v2482_v12, %v1065_v60  ;;  %v808_v5 = vpop.f32.mrf.mxu0 }
 0x121   : > { %v936_v6 = vpop.f32.mrf.mxu1  ;;  %v2084_v7 = vpop.eup %2083  ;;  %v1544_v9 = vmul.f32 %v2082_v3, %v2517_v48  ;;  %2109 = vrcp.f32 %v1355_v2  ;;  %v1853_v13 = vmul.f32 -1.442695, %v2615_v38  ;;  %v1034_v14 = vmul.f32 %v2477_v10, %v808_v5 }
 0x122   : > { %v2086_v15 = vpop.eup %2085  ;;  %v1576_v16 = vmul.f32 %v2084_v7, %v2520_v49  ;;  %2111 = vrcp.f32 %v1387_v4  ;;  %v1885_v17 = vmul.f32 -1.442695, %v2619_v39  ;;  %v1066_v20 = vmul.f32 %v2477_v10, %v936_v6  ;;  %v810_v21 = vpop.f32.mrf.mxu0 }
 0x123   : > { %v938_v22 = vpop.f32.mrf.mxu1  ;;  %v2088_v23 = vpop.eup %2087  ;;  %1608 = vst [vmem:[%s2574_s22 + $0x18] sm:$0xff] %v1544_v9  ;;  %v1356_v24 = vadd.f32 1.0, %v2086_v15  ;;  %2113 = vpow2.f32 %v1853_v13  ;;  %v2629_v48 = vadd.f32 %v2482_v12, %v1034_v14 }
 0x124   : > { %v2090_v25 = vpop.eup %2089  ;;  %1640 = vst [vmem:[%s2574_s22 + $0x118] sm:$0xff] %v1576_v16  ;;  %v1388_v27 = vadd.f32 1.0, %v2088_v23  ;;  %2115 = vpow2.f32 %v1885_v17  ;;  %v2633_v49 = vadd.f32 %v2482_v12, %v1066_v20  ;;  %v811_v31 = vpop.f32.mrf.mxu0 }
 0x125   : > { %v939_v32 = vpop.f32.mrf.mxu1  ;;  %v2092_v33 = vpop.eup %2091  ;;  %2117 = vrcp.f32 %v1356_v24  ;;  %v1357_v34 = vadd.f32 1.0, %v2090_v25  ;;  %v1854_v35 = vmul.f32 -1.442695, %v2629_v48  ;;  %v1035_v36 = vmul.f32 %v2477_v10, %v811_v31 }
 0x126   : > { %v2094_v37 = vpop.eup %2093  ;;  %2119 = vrcp.f32 %v1388_v27  ;;  %v1389_v40 = vadd.f32 1.0, %v2092_v33  ;;  %v1886_v41 = vmul.f32 -1.442695, %v2633_v49  ;;  %v1067_v42 = vmul.f32 %v2477_v10, %v939_v32  ;;  %v813_v43 = vpop.f32.mrf.mxu0 }
 0x127   : > { %v941_v45 = vpop.f32.mrf.mxu1  ;;  %v2096_v47 = vpop.eup %2095  ;;  %v1545_v50 = vmul.f32 %v2094_v37, %v2527_v58  ;;  %2121 = vrcp.f32 %v1357_v34  ;;  %v2641_v51 = vadd.f32 %v2482_v12, %v1035_v36 }
 0x128   : > { %v2098_v52 = vpop.eup %2097  ;;  %v1577_v53 = vmul.f32 %v2096_v47, %v2530_v59  ;;  %2123 = vrcp.f32 %v1389_v40  ;;  %v2645_v54 = vadd.f32 %v2482_v12, %v1067_v42  ;;  %v816_v55 = vpop.f32.mrf.mxu0 }
 0x129   : > { %v944_v56 = vpop.f32.mrf.mxu1  ;;  %v2100_v57 = vpop.eup %2099  ;;  %1609 = vst [vmem:[%s2574_s22 + $0x20] sm:$0xff] %v1545_v50  ;;  %v1358_v60 = vadd.f32 1.0, %v2098_v52  ;;  %2125 = vpow2.f32 %v1854_v35  ;;  %v1855_v58 = vmul.f32 -1.442695, %v2641_v51  ;;  %v1036_v61 = vmul.f32 %v2477_v10, %v816_v55 }
 0x12a   : > { %v2102_v63 = vpop.eup %2101  ;;  %1641 = vst [vmem:[%s2574_s22 + $0x120] sm:$0xff] %v1577_v53  ;;  %v1390_v1 = vadd.f32 1.0, %v2100_v57  ;;  %2127 = vpow2.f32 %v1886_v41  ;;  %v1887_v59 = vmul.f32 -1.442695, %v2645_v54  ;;  %v1068_v2 = vmul.f32 %v2477_v10, %v944_v56  ;;  %v818_v3 = vpop.f32.mrf.mxu0 }
 0x12b   : > { %v946_v4 = vpop.f32.mrf.mxu1  ;;  %v2104_v5 = vpop.eup %2103  ;;  %v1546_v6 = vmul.f32 %v2102_v63, %v2537_v8  ;;  %2129 = vrcp.f32 %v1358_v60  ;;  %v2655_v7 = vadd.f32 %v2482_v12, %v1036_v61 }
 0x12c   : > { %v2106_v9 = vpop.eup %2105  ;;  %v1578_v13 = vmul.f32 %v2104_v5, %v2540_v11  ;;  %2131 = vrcp.f32 %v1390_v1  ;;  %v2659_v14 = vadd.f32 %v2482_v12, %v1068_v2  ;;  %v819_v15 = vpop.f32.mrf.mxu0 }
 0x12d   : > { %v947_v16 = vpop.f32.mrf.mxu1  ;;  %v2108_v17 = vpop.eup %2107  ;;  %1610 = vst [vmem:[%s2574_s22 + $0x28] sm:$0xff] %v1546_v6  ;;  %v1359_v20 = vadd.f32 1.0, %v2106_v9  ;;  %2133 = vpow2.f32 %v1855_v58  ;;  %v1856_v8 = vmul.f32 -1.442695, %v2655_v7  ;;  %v1037_v21 = vmul.f32 %v2477_v10, %v819_v15 }
 0x12e   : > { %v2110_v22 = vpop.eup %2109  ;;  %1642 = vst [vmem:[%s2574_s22 + $0x128] sm:$0xff] %v1578_v13  ;;  %v1391_v23 = vadd.f32 1.0, %v2108_v17  ;;  %2135 = vpow2.f32 %v1887_v59  ;;  %v1888_v11 = vmul.f32 -1.442695, %v2659_v14  ;;  %v1069_v24 = vmul.f32 %v2477_v10, %v947_v16  ;;  %v821_v25 = vpop.f32.mrf.mxu0 }
 0x12f   : > { %v949_v27 = vpop.f32.mrf.mxu1  ;;  %v2112_v31 = vpop.eup %2111  ;;  %v1547_v32 = vmul.f32 %v2110_v22, %v2547_v26  ;;  %2137 = vrcp.f32 %v1359_v20  ;;  %v2669_v33 = vadd.f32 %v2482_v12, %v1037_v21 }
 0x130   : > { %v2114_v34 = vpop.eup %2113  ;;  %v1579_v35 = vmul.f32 %v2112_v31, %v2550_v30  ;;  %2139 = vrcp.f32 %v1391_v23  ;;  %v2673_v36 = vadd.f32 %v2482_v12, %v1069_v24  ;;  %v824_v37 = vpop.f32.mrf.mxu0 }
 0x131   : > { %v952_v40 = vpop.f32.mrf.mxu1  ;;  %v2116_v41 = vpop.eup %2115  ;;  %1611 = vst [vmem:[%s2574_s22 + $0x30] sm:$0xff] %v1547_v32  ;;  %v1360_v42 = vadd.f32 1.0, %v2114_v34  ;;  %2141 = vpow2.f32 %v1856_v8  ;;  %v1857_v26 = vmul.f32 -1.442695, %v2669_v33  ;;  %v1038_v43 = vmul.f32 %v2477_v10, %v824_v37 }
 0x132   : > { %v2118_v45 = vpop.eup %2117  ;;  %1643 = vst [vmem:[%s2574_s22 + $0x130] sm:$0xff] %v1579_v35  ;;  %v1392_v47 = vadd.f32 1.0, %v2116_v41  ;;  %2143 = vpow2.f32 %v1888_v11  ;;  %v1889_v30 = vmul.f32 -1.442695, %v2673_v36  ;;  %v1070_v50 = vmul.f32 %v2477_v10, %v952_v40  ;;  %v826_v52 = vpop.f32.mrf.mxu0 }
 0x133   : > { %v954_v53 = vpop.f32.mrf.mxu1  ;;  %v2120_v55 = vpop.eup %2119  ;;  %v1548_v56 = vmul.f32 %v2118_v45, %v2557_v44  ;;  %2145 = vrcp.f32 %v1360_v42  ;;  %v2683_v57 = vadd.f32 %v2482_v12, %v1038_v43 }
 0x134   : > { %v2122_v60 = vpop.eup %2121  ;;  %v1580_v58 = vmul.f32 %v2120_v55, %v2560_v46  ;;  %2147 = vrcp.f32 %v1392_v47  ;;  %v2687_v61 = vadd.f32 %v2482_v12, %v1070_v50  ;;  %v827_v63 = vpop.f32.mrf.mxu0 }
 0x135   : > { %v955_v1 = vpop.f32.mrf.mxu1  ;;  %v2124_v59 = vpop.eup %2123  ;;  %1612 = vst [vmem:[%s2574_s22 + $0x38] sm:$0xff] %v1548_v56  ;;  %v1549_v2 = vmul.f32 %v2122_v60, %v2567_v62  ;;  %2149 = vpow2.f32 %v1857_v26  ;;  %v1858_v44 = vmul.f32 -1.442695, %v2683_v57  ;;  %v1039_v3 = vmul.f32 %v2477_v10, %v827_v63 }
 0x136   : > { %v2126_v4 = vpop.eup %2125  ;;  %1644 = vst [vmem:[%s2574_s22 + $0x138] sm:$0xff] %v1580_v58  ;;  %v1581_v46 = vmul.f32 %v2124_v59, %v2577_v0  ;;  %2151 = vpow2.f32 %v1889_v30  ;;  %v1890_v5 = vmul.f32 -1.442695, %v2687_v61  ;;  %v1071_v6 = vmul.f32 %v2477_v10, %v955_v1  ;;  %v829_v9 = vpop.f32.mrf.mxu0 }
 0x137   : > { %v957_v13 = vpop.f32.mrf.mxu1  ;;  %v2128_v15 = vpop.eup %2127  ;;  %1613 = vst [vmem:[%s2574_s22 + $0x40] sm:$0xff] %v1549_v2  ;;  %v1361_v62 = vadd.f32 1.0, %v2126_v4  ;;  %2153 = vpow2.f32 %v1858_v44  ;;  %v2699_v16 = vadd.f32 %v2482_v12, %v1039_v3 }
 0x138   : > { %v2130_v17 = vpop.eup %2129  ;;  %1645 = vst [vmem:[%s2574_s22 + $0x140] sm:$0xff] %v1581_v46  ;;  %v1393_v20 = vadd.f32 1.0, %v2128_v15  ;;  %2155 = vpow2.f32 %v1890_v5  ;;  %v2703_v0 = vadd.f32 %v2482_v12, %v1071_v6  ;;  %v832_v8 = vpop.f32.mrf.mxu0 }
 0x139   : > { %v960_v21 = vpop.f32.mrf.mxu1  ;;  %v2132_v22 = vpop.eup %2131  ;;  %v1550_v23 = vmul.f32 %v2130_v17, %v2587_v18  ;;  %2157 = vrcp.f32 %v1361_v62  ;;  %v1859_v11 = vmul.f32 -1.442695, %v2699_v16  ;;  %v1040_v24 = vmul.f32 %v2477_v10, %v832_v8 }
 0x13a   : > { %v2134_v25 = vpop.eup %2133  ;;  %v1582_v27 = vmul.f32 %v2132_v22, %v2591_v19  ;;  %2159 = vrcp.f32 %v1393_v20  ;;  %v1891_v31 = vmul.f32 -1.442695, %v2703_v0  ;;  %v1072_v32 = vmul.f32 %v2477_v10, %v960_v21  ;;  %v834_v34 = vpop.f32.mrf.mxu0 }
 0x13b   : > { %v962_v35 = vpop.f32.mrf.mxu1  ;;  %v2136_v37 = vpop.eup %2135  ;;  %1614 = vst [vmem:[%s2574_s22 + $0x48] sm:$0xff] %v1550_v23  ;;  %v1362_v40 = vadd.f32 1.0, %v2134_v25  ;;  %2161 = vpow2.f32 %v1859_v11  ;;  %v2713_v18 = vadd.f32 %v2482_v12, %v1040_v24 }
 0x13c   : > { %v2138_v41 = vpop.eup %2137  ;;  %1646 = vst [vmem:[%s2574_s22 + $0x148] sm:$0xff] %v1582_v27  ;;  %v1394_v42 = vadd.f32 1.0, %v2136_v37  ;;  %2163 = vpow2.f32 %v1891_v31  ;;  %v2717_v19 = vadd.f32 %v2482_v12, %v1072_v32  ;;  %v835_v26 = vpop.f32.mrf.mxu0 }
 0x13d   : > { %v963_v43 = vpop.f32.mrf.mxu1  ;;  %v2140_v45 = vpop.eup %2139  ;;  %v1551_v47 = vmul.f32 %v2138_v41, %v2601_v28  ;;  %2165 = vrcp.f32 %v1362_v40  ;;  %v1860_v30 = vmul.f32 -1.442695, %v2713_v18  ;;  %v1041_v50 = vmul.f32 %v2477_v10, %v835_v26 }
 0x13e   : > { %v2142_v52 = vpop.eup %2141  ;;  %v1583_v53 = vmul.f32 %v2140_v45, %v2605_v29  ;;  %2167 = vrcp.f32 %v1394_v42  ;;  %v1892_v55 = vmul.f32 -1.442695, %v2717_v19  ;;  %v1073_v56 = vmul.f32 %v2477_v10, %v963_v43  ;;  %v837_v60 = vpop.f32.mrf.mxu0 }
 0x13f   : > { %v965_v58 = vpop.f32.mrf.mxu1  ;;  %v2144_v63 = vpop.eup %2143  ;;  %1615 = vst [vmem:[%s2574_s22 + $0x50] sm:$0xff] %v1551_v47  ;;  %v1363_v1 = vadd.f32 1.0, %v2142_v52  ;;  %2169 = vpow2.f32 %v1860_v30  ;;  %v2727_v28 = vadd.f32 %v2482_v12, %v1041_v50 }
 0x140   : > { %v2146_v59 = vpop.eup %2145  ;;  %1647 = vst [vmem:[%s2574_s22 + $0x150] sm:$0xff] %v1583_v53  ;;  %v1395_v2 = vadd.f32 1.0, %v2144_v63  ;;  %2171 = vpow2.f32 %v1892_v55  ;;  %v2731_v29 = vadd.f32 %v2482_v12, %v1073_v56  ;;  %v840_v44 = vpop.f32.mrf.mxu0 }
 0x141   : > { %v968_v3 = vpop.f32.mrf.mxu1  ;;  %v2148_v4 = vpop.eup %2147  ;;  %v1552_v46 = vmul.f32 %v2146_v59, %v2615_v38  ;;  %2173 = vrcp.f32 %v1363_v1  ;;  %v1861_v5 = vmul.f32 -1.442695, %v2727_v28  ;;  %v1042_v6 = vmul.f32 %v2477_v10, %v840_v44 }
 0x142   : > { %v2150_v9 = vpop.eup %2149  ;;  %v1584_v13 = vmul.f32 %v2148_v4, %v2619_v39  ;;  %2175 = vrcp.f32 %v1395_v2  ;;  %v1893_v15 = vmul.f32 -1.442695, %v2731_v29  ;;  %v1074_v62 = vmul.f32 %v2477_v10, %v968_v3  ;;  %v842_v17 = vpop.f32.mrf.mxu0 }
 0x143   : > { %v970_v20 = vpop.f32.mrf.mxu1  ;;  %v2152_v8 = vpop.eup %2151  ;;  %1616 = vst [vmem:[%s2574_s22 + $0x58] sm:$0xff] %v1552_v46  ;;  %v1364_v21 = vadd.f32 1.0, %v2150_v9  ;;  %2177 = vpow2.f32 %v1861_v5  ;;  %v2741_v38 = vadd.f32 %v2482_v12, %v1042_v6 }
 0x144   : > { %v2154_v22 = vpop.eup %2153  ;;  %1648 = vst [vmem:[%s2574_s22 + $0x158] sm:$0xff] %v1584_v13  ;;  %v1396_v23 = vadd.f32 1.0, %v2152_v8  ;;  %2179 = vpow2.f32 %v1893_v15  ;;  %v2745_v39 = vadd.f32 %v2482_v12, %v1074_v62  ;;  %v843_v11 = vpop.f32.mrf.mxu0 }
 0x145   : > { %v971_v24 = vpop.f32.mrf.mxu1  ;;  %v2156_v25 = vpop.eup %2155  ;;  %2181 = vrcp.f32 %v1364_v21  ;;  %v1365_v27 = vadd.f32 1.0, %v2154_v22  ;;  %v1862_v31 = vmul.f32 -1.442695, %v2741_v38  ;;  %v1043_v32 = vmul.f32 %v2477_v10, %v843_v11 }
 0x146   : > { %v2158_v34 = vpop.eup %2157  ;;  %2183 = vrcp.f32 %v1396_v23  ;;  %v1397_v35 = vadd.f32 1.0, %v2156_v25  ;;  %v1894_v37 = vmul.f32 -1.442695, %v2745_v39  ;;  %v1075_v40 = vmul.f32 %v2477_v10, %v971_v24  ;;  %v845_v41 = vpop.f32.mrf.mxu0 }
 0x147   : > { %v973_v42 = vpop.f32.mrf.mxu1  ;;  %v2160_v26 = vpop.eup %2159  ;;  %v1553_v43 = vmul.f32 %v2158_v34, %v2629_v48  ;;  %2185 = vrcp.f32 %v1365_v27  ;;  %v2753_v45 = vadd.f32 %v2482_v12, %v1043_v32 }
 0x148   : > { %v2162_v47 = vpop.eup %2161  ;;  %v1585_v30 = vmul.f32 %v2160_v26, %v2633_v49  ;;  %2187 = vrcp.f32 %v1397_v35  ;;  %v2757_v50 = vadd.f32 %v2482_v12, %v1075_v40  ;;  %v848_v52 = vpop.f32.mrf.mxu0 }
 0x149   : > { %v976_v53 = vpop.f32.mrf.mxu1  ;;  %v2164_v55 = vpop.eup %2163  ;;  %1617 = vst [vmem:[%s2574_s22 + $0x60] sm:$0xff] %v1553_v43  ;;  %v1366_v56 = vadd.f32 1.0, %v2162_v47  ;;  %2189 = vpow2.f32 %v1862_v31  ;;  %v1863_v48 = vmul.f32 -1.442695, %v2753_v45  ;;  %v1044_v60 = vmul.f32 %v2477_v10, %v848_v52 }
 0x14a   : > { %v2166_v58 = vpop.eup %2165  ;;  %1649 = vst [vmem:[%s2574_s22 + $0x160] sm:$0xff] %v1585_v30  ;;  %v1398_v63 = vadd.f32 1.0, %v2164_v55  ;;  %2191 = vpow2.f32 %v1894_v37  ;;  %v1895_v49 = vmul.f32 -1.442695, %v2757_v50  ;;  %v1076_v1 = vmul.f32 %v2477_v10, %v976_v53  ;;  %v850_v59 = vpop.f32.mrf.mxu0 }
 0x14b   : > { %v978_v2 = vpop.f32.mrf.mxu1  ;;  %v2168_v44 = vpop.eup %2167  ;;  %v1554_v3 = vmul.f32 %v2166_v58, %v2641_v51  ;;  %2193 = vrcp.f32 %v1366_v56  ;;  %v2767_v4 = vadd.f32 %v2482_v12, %v1044_v60 }
 0x14c   : > { %v2170_v46 = vpop.eup %2169  ;;  %v1586_v5 = vmul.f32 %v2168_v44, %v2645_v54  ;;  %2195 = vrcp.f32 %v1398_v63  ;;  %v2771_v6 = vadd.f32 %v2482_v12, %v1076_v1  ;;  %v851_v9 = vpop.f32.mrf.mxu0  ;;  %v2807_v1 = vld [vmem:[%s2954_s2] ss:$0 sm:$0xff] }
 0x14d   : > { %v979_v13 = vpop.f32.mrf.mxu1  ;;  %v2172_v15 = vpop.eup %2171  ;;  %1618 = vst [vmem:[%s2574_s22 + $0x68] sm:$0xff] %v1554_v3  ;;  %v1367_v62 = vadd.f32 1.0, %v2170_v46  ;;  %2197 = vpow2.f32 %v1863_v48  ;;  %v1864_v51 = vmul.f32 -1.442695, %v2767_v4  ;;  %v1045_v17 = vmul.f32 %v2477_v10, %v851_v9  ;;  %v2818_v9 = vld [vmem:[%s2955_s3] ss:$0 sm:$0xff] }
 0x14e   : > { %v2174_v20 = vpop.eup %2173  ;;  %1650 = vst [vmem:[%s2574_s22 + $0x168] sm:$0xff] %v1586_v5  ;;  %v1399_v8 = vadd.f32 1.0, %v2172_v15  ;;  %2199 = vpow2.f32 %v1895_v49  ;;  %v1896_v54 = vmul.f32 -1.442695, %v2771_v6  ;;  %v1077_v21 = vmul.f32 %v2477_v10, %v979_v13  ;;  %v853_v22 = vpop.f32.mrf.mxu0 }
 0x14f   : > { %v981_v23 = vpop.f32.mrf.mxu1  ;;  %v2176_v11 = vpop.eup %2175  ;;  %v1555_v24 = vmul.f32 %v2174_v20, %v2655_v7  ;;  %2201 = vrcp.f32 %v1367_v62  ;;  %v2781_v25 = vadd.f32 %v2482_v12, %v1045_v17 }
 0x150   : > { %v2178_v27 = vpop.eup %2177  ;;  %v1587_v31 = vmul.f32 %v2176_v11, %v2659_v14  ;;  %2203 = vrcp.f32 %v1399_v8  ;;  %v2785_v32 = vadd.f32 %v2482_v12, %v1077_v21  ;;  %v856_v34 = vpop.f32.mrf.mxu0 }
 0x151   : > { %v984_v35 = vpop.f32.mrf.mxu1  ;;  %v2180_v37 = vpop.eup %2179  ;;  %1619 = vst [vmem:[%s2574_s22 + $0x70] sm:$0xff] %v1555_v24  ;;  %v1368_v40 = vadd.f32 1.0, %v2178_v27  ;;  %2205 = vpow2.f32 %v1864_v51  ;;  %v1865_v7 = vmul.f32 -1.442695, %v2781_v25  ;;  %v1046_v41 = vmul.f32 %v2477_v10, %v856_v34 }
 0x152   : > { %v2182_v42 = vpop.eup %2181  ;;  %1651 = vst [vmem:[%s2574_s22 + $0x170] sm:$0xff] %v1587_v31  ;;  %v1400_v26 = vadd.f32 1.0, %v2180_v37  ;;  %2207 = vpow2.f32 %v1896_v54  ;;  %v1897_v14 = vmul.f32 -1.442695, %v2785_v32  ;;  %v1078_v43 = vmul.f32 %v2477_v10, %v984_v35  ;;  %v858_v47 = vpop.f32.mrf.mxu0 }
 0x153   : > { %v986_v30 = vpop.f32.mrf.mxu1  ;;  %v2184_v52 = vpop.eup %2183  ;;  %v1556_v53 = vmul.f32 %v2182_v42, %v2669_v33  ;;  %2209 = vrcp.f32 %v1368_v40  ;;  %v2795_v55 = vadd.f32 %v2482_v12, %v1046_v41 }
 0x154   : > { %v2186_v56 = vpop.eup %2185  ;;  %v1588_v48 = vmul.f32 %v2184_v52, %v2673_v36  ;;  %2211 = vrcp.f32 %v1400_v26  ;;  %v2799_v60 = vadd.f32 %v2482_v12, %v1078_v43  ;;  %v859_v58 = vpop.f32.mrf.mxu0 }
 0x155   : > { %v987_v63 = vpop.f32.mrf.mxu1  ;;  %v2188_v10 = vpop.eup %2187  ;;  %1620 = vst [vmem:[%s2574_s22 + $0x78] sm:$0xff] %v1556_v53  ;;  %v1557_v49 = vmul.f32 %v2186_v56, %v2683_v57  ;;  %2213 = vpow2.f32 %v1865_v7  ;;  %v1866_v33 = vmul.f32 -1.442695, %v2795_v55  ;;  %v1047_v36 = vmul.f32 %v2807_v1, %v859_v58 }
 0x156   : > { %v2190_v12 = vpop.eup %2189  ;;  %1652 = vst [vmem:[%s2574_s22 + $0x178] sm:$0xff] %v1588_v48  ;;  %v1589_v59 = vmul.f32 %v2188_v10, %v2687_v61  ;;  %2215 = vpow2.f32 %v1897_v14  ;;  %v1898_v2 = vmul.f32 -1.442695, %v2799_v60  ;;  %v1079_v57 = vmul.f32 %v2807_v1, %v987_v63  ;;  %v861_v44 = vpop.f32.mrf.mxu0 }
 0x157   : > { %v989_v3 = vpop.f32.mrf.mxu1  ;;  %v2192_v46 = vpop.eup %2191  ;;  %1621 = vst [vmem:[%s2574_s22 + $0x80] sm:$0xff] %v1557_v49  ;;  %v1369_v5 = vadd.f32 1.0, %v2190_v12  ;;  %2217 = vpow2.f32 %v1866_v33  ;;  %v2821_v13 = vadd.f32 %v2818_v9, %v1047_v36 }
 0x158   : > { %v2194_v61 = vpop.eup %2193  ;;  %1653 = vst [vmem:[%s2574_s22 + $0x180] sm:$0xff] %v1589_v59  ;;  %v1401_v15 = vadd.f32 1.0, %v2192_v46  ;;  %2219 = vpow2.f32 %v1898_v2  ;;  %v2825_v62 = vadd.f32 %v2818_v9, %v1079_v57  ;;  %v864_v51 = vpop.f32.mrf.mxu0 }
 0x159   : > { %v992_v17 = vpop.f32.mrf.mxu1  ;;  %v2196_v20 = vpop.eup %2195  ;;  %v1558_v8 = vmul.f32 %v2194_v61, %v2699_v16  ;;  %2221 = vrcp.f32 %v1369_v5  ;;  %v1867_v54 = vmul.f32 -1.442695, %v2821_v13  ;;  %v1048_v21 = vmul.f32 %v2807_v1, %v864_v51 }
 0x15a   : > { %v2198_v22 = vpop.eup %2197  ;;  %v1590_v23 = vmul.f32 %v2196_v20, %v2703_v0  ;;  %2223 = vrcp.f32 %v1401_v15  ;;  %v1899_v11 = vmul.f32 -1.442695, %v2825_v62  ;;  %v1080_v24 = vmul.f32 %v2807_v1, %v992_v17  ;;  %v866_v27 = vpop.f32.mrf.mxu0 }
 0x15b   : > { %v994_v31 = vpop.f32.mrf.mxu1  ;;  %v2200_v34 = vpop.eup %2199  ;;  %1622 = vst [vmem:[%s2574_s22 + $0x88] sm:$0xff] %v1558_v8  ;;  %v1370_v35 = vadd.f32 1.0, %v2198_v22  ;;  %2225 = vpow2.f32 %v1867_v54  ;;  %v2835_v16 = vadd.f32 %v2818_v9, %v1048_v21 }
 0x15c   : > { %v2202_v37 = vpop.eup %2201  ;;  %1654 = vst [vmem:[%s2574_s22 + $0x188] sm:$0xff] %v1590_v23  ;;  %v1402_v40 = vadd.f32 1.0, %v2200_v34  ;;  %2227 = vpow2.f32 %v1899_v11  ;;  %v2839_v0 = vadd.f32 %v2818_v9, %v1080_v24  ;;  %v867_v7 = vpop.f32.mrf.mxu0 }
 0x15d   : > { %v995_v41 = vpop.f32.mrf.mxu1  ;;  %v2204_v42 = vpop.eup %2203  ;;  %v1559_v26 = vmul.f32 %v2202_v37, %v2713_v18  ;;  %2229 = vrcp.f32 %v1370_v35  ;;  %v1868_v14 = vmul.f32 -1.442695, %v2835_v16  ;;  %v1049_v43 = vmul.f32 %v2807_v1, %v867_v7 }
 0x15e   : > { %v2206_v47 = vpop.eup %2205  ;;  %v1591_v30 = vmul.f32 %v2204_v42, %v2717_v19  ;;  %2231 = vrcp.f32 %v1402_v40  ;;  %v1900_v52 = vmul.f32 -1.442695, %v2839_v0  ;;  %v1081_v53 = vmul.f32 %v2807_v1, %v995_v41  ;;  %v869_v56 = vpop.f32.mrf.mxu0 }
 0x15f   : > { %v997_v48 = vpop.f32.mrf.mxu1  ;;  %v2208_v58 = vpop.eup %2207  ;;  %1623 = vst [vmem:[%s2574_s22 + $0x90] sm:$0xff] %v1559_v26  ;;  %v1371_v63 = vadd.f32 1.0, %v2206_v47  ;;  %2233 = vpow2.f32 %v1868_v14  ;;  %v2849_v18 = vadd.f32 %v2818_v9, %v1049_v43 }
 0x160   : > { %v2210_v10 = vpop.eup %2209  ;;  %1655 = vst [vmem:[%s2574_s22 + $0x190] sm:$0xff] %v1591_v30  ;;  %v1403_v49 = vadd.f32 1.0, %v2208_v58  ;;  %2235 = vpow2.f32 %v1900_v52  ;;  %v2853_v19 = vadd.f32 %v2818_v9, %v1081_v53  ;;  %v872_v33 = vpop.f32.mrf.mxu0 }
 0x161   : > { %v1000_v36 = vpop.f32.mrf.mxu1  ;;  %v2212_v12 = vpop.eup %2211  ;;  %v1560_v59 = vmul.f32 %v2210_v10, %v2727_v28  ;;  %2237 = vrcp.f32 %v1371_v63  ;;  %v1869_v2 = vmul.f32 -1.442695, %v2849_v18  ;;  %v1050_v57 = vmul.f32 %v2807_v1, %v872_v33 }
 0x162   : > { %v2214_v44 = vpop.eup %2213  ;;  %v1592_v3 = vmul.f32 %v2212_v12, %v2731_v29  ;;  %2239 = vrcp.f32 %v1403_v49  ;;  %v1901_v46 = vmul.f32 -1.442695, %v2853_v19  ;;  %v1082_v5 = vmul.f32 %v2807_v1, %v1000_v36  ;;  %v874_v61 = vpop.f32.mrf.mxu0 }
 0x163   : > { %v1002_v15 = vpop.f32.mrf.mxu1  ;;  %v2216_v51 = vpop.eup %2215  ;;  %1624 = vst [vmem:[%s2574_s22 + $0x98] sm:$0xff] %v1560_v59  ;;  %v1372_v17 = vadd.f32 1.0, %v2214_v44  ;;  %2241 = vpow2.f32 %v1869_v2  ;;  %v2863_v28 = vadd.f32 %v2818_v9, %v1050_v57 }
 0x164   : > { %v2218_v20 = vpop.eup %2217  ;;  %1656 = vst [vmem:[%s2574_s22 + $0x198] sm:$0xff] %v1592_v3  ;;  %v1404_v8 = vadd.f32 1.0, %v2216_v51  ;;  %2243 = vpow2.f32 %v1901_v46  ;;  %v2867_v29 = vadd.f32 %v2818_v9, %v1082_v5  ;;  %v875_v54 = vpop.f32.mrf.mxu0 }
 0x165   : > { %v1003_v21 = vpop.f32.mrf.mxu1  ;;  %v2220_v22 = vpop.eup %2219  ;;  %2245 = vrcp.f32 %v1372_v17  ;;  %v1373_v23 = vadd.f32 1.0, %v2218_v20  ;;  %v1870_v11 = vmul.f32 -1.442695, %v2863_v28  ;;  %v1051_v24 = vmul.f32 %v2807_v1, %v875_v54 }
 0x166   : > { %v2222_v27 = vpop.eup %2221  ;;  %2247 = vrcp.f32 %v1404_v8  ;;  %v1405_v31 = vadd.f32 1.0, %v2220_v22  ;;  %v1902_v34 = vmul.f32 -1.442695, %v2867_v29  ;;  %v1083_v35 = vmul.f32 %v2807_v1, %v1003_v21  ;;  %v877_v37 = vpop.f32.mrf.mxu0 }
 0x167   : > { %v1005_v40 = vpop.f32.mrf.mxu1  ;;  %v2224_v7 = vpop.eup %2223  ;;  %v1561_v41 = vmul.f32 %v2222_v27, %v2741_v38  ;;  %2249 = vrcp.f32 %v1373_v23  ;;  %v2875_v42 = vadd.f32 %v2818_v9, %v1051_v24 }
 0x168   : > { %v2226_v26 = vpop.eup %2225  ;;  %v1593_v14 = vmul.f32 %v2224_v7, %v2745_v39  ;;  %2251 = vrcp.f32 %v1405_v31  ;;  %v2879_v43 = vadd.f32 %v2818_v9, %v1083_v35  ;;  %v880_v47 = vpop.f32.mrf.mxu0 }
 0x169   : > { %v1008_v30 = vpop.f32.mrf.mxu1  ;;  %v2228_v52 = vpop.eup %2227  ;;  %1625 = vst [vmem:[%s2574_s22 + $0xa0] sm:$0xff] %v1561_v41  ;;  %v1374_v53 = vadd.f32 1.0, %v2226_v26  ;;  %2253 = vpow2.f32 %v1870_v11  ;;  %v1871_v38 = vmul.f32 -1.442695, %v2875_v42  ;;  %v1052_v56 = vmul.f32 %v2807_v1, %v880_v47 }
 0x16a   : > { %v2230_v48 = vpop.eup %2229  ;;  %1657 = vst [vmem:[%s2574_s22 + $0x1a0] sm:$0xff] %v1593_v14  ;;  %v1406_v58 = vadd.f32 1.0, %v2228_v52  ;;  %2255 = vpow2.f32 %v1902_v34  ;;  %v1903_v39 = vmul.f32 -1.442695, %v2879_v43  ;;  %v1084_v63 = vmul.f32 %v2807_v1, %v1008_v30  ;;  %v882_v10 = vpop.f32.mrf.mxu0 }
 0x16b   : > { %v1010_v49 = vpop.f32.mrf.mxu1  ;;  %v2232_v33 = vpop.eup %2231  ;;  %v1562_v36 = vmul.f32 %v2230_v48, %v2753_v45  ;;  %2257 = vrcp.f32 %v1374_v53  ;;  %v2889_v12 = vadd.f32 %v2818_v9, %v1052_v56 }
 0x16c   : > { %v2234_v59 = vpop.eup %2233  ;;  %v1594_v2 = vmul.f32 %v2232_v33, %v2757_v50  ;;  %2259 = vrcp.f32 %v1406_v58  ;;  %v2893_v57 = vadd.f32 %v2818_v9, %v1084_v63  ;;  %v883_v44 = vpop.f32.mrf.mxu0 }
 0x16d   : > { %v1011_v3 = vpop.f32.mrf.mxu1  ;;  %v2236_v46 = vpop.eup %2235  ;;  %1626 = vst [vmem:[%s2574_s22 + $0xa8] sm:$0xff] %v1562_v36  ;;  %v1375_v5 = vadd.f32 1.0, %v2234_v59  ;;  %2261 = vpow2.f32 %v1871_v38  ;;  %v1872_v45 = vmul.f32 -1.442695, %v2889_v12  ;;  %v1053_v61 = vmul.f32 %v2807_v1, %v883_v44 }
 0x16e   : > { %v2238_v15 = vpop.eup %2237  ;;  %1658 = vst [vmem:[%s2574_s22 + $0x1a8] sm:$0xff] %v1594_v2  ;;  %v1407_v51 = vadd.f32 1.0, %v2236_v46  ;;  %2263 = vpow2.f32 %v1903_v39  ;;  %v1904_v50 = vmul.f32 -1.442695, %v2893_v57  ;;  %v1085_v17 = vmul.f32 %v2807_v1, %v1011_v3  ;;  %v885_v20 = vpop.f32.mrf.mxu0 }
 0x16f   : > { %v1013_v8 = vpop.f32.mrf.mxu1  ;;  %v2240_v54 = vpop.eup %2239  ;;  %v1563_v21 = vmul.f32 %v2238_v15, %v2767_v4  ;;  %2265 = vrcp.f32 %v1375_v5  ;;  %v2903_v22 = vadd.f32 %v2818_v9, %v1053_v61 }
 0x170   : > { %v2242_v23 = vpop.eup %2241  ;;  %v1595_v11 = vmul.f32 %v2240_v54, %v2771_v6  ;;  %2267 = vrcp.f32 %v1407_v51  ;;  %v2907_v24 = vadd.f32 %v2818_v9, %v1085_v17 }
 0x171   : > { %v2244_v27 = vpop.eup %2243  ;;  %1627 = vst [vmem:[%s2574_s22 + $0xb0] sm:$0xff] %v1563_v21  ;;  %v1376_v1 = vadd.f32 1.0, %v2242_v23  ;;  %2269 = vpow2.f32 %v1872_v45  ;;  %v1873_v31 = vmul.f32 -1.442695, %v2903_v22 }
 0x172   : > { %v2246_v34 = vpop.eup %2245  ;;  %1659 = vst [vmem:[%s2574_s22 + $0x1b0] sm:$0xff] %v1595_v11  ;;  %v1408_v4 = vadd.f32 1.0, %v2244_v27  ;;  %2271 = vpow2.f32 %v1904_v50  ;;  %v1905_v35 = vmul.f32 -1.442695, %v2907_v24 }
 0x173   : > { %v2248_v6 = vpop.eup %2247  ;;  %v1564_v37 = vmul.f32 %v2246_v34, %v2781_v25  ;;  %2273 = vrcp.f32 %v1376_v1 }
 0x174   : > { %v2250_v9 = vpop.eup %2249  ;;  %v1596_v40 = vmul.f32 %v2248_v6, %v2785_v32  ;;  %2275 = vrcp.f32 %v1408_v4 }
 0x175   : > { %v2252_v7 = vpop.eup %2251  ;;  %1628 = vst [vmem:[%s2574_s22 + $0xb8] sm:$0xff] %v1564_v37  ;;  %v1565_v41 = vmul.f32 %v2250_v9, %v2795_v55  ;;  %2277 = vpow2.f32 %v1873_v31 }
 0x176   : > { %v2254_v26 = vpop.eup %2253  ;;  %1660 = vst [vmem:[%s2574_s22 + $0x1b8] sm:$0xff] %v1596_v40  ;;  %v1597_v14 = vmul.f32 %v2252_v7, %v2799_v60  ;;  %2279 = vpow2.f32 %v1905_v35 }
 0x177   : > { %v2256_v47 = vpop.eup %2255  ;;  %1629 = vst [vmem:[%s2574_s22 + $0xc0] sm:$0xff] %v1565_v41  ;;  %v1377_v25 = vadd.f32 1.0, %v2254_v26 }
 0x178   : > { %v2258_v30 = vpop.eup %2257  ;;  %1661 = vst [vmem:[%s2574_s22 + $0x1c0] sm:$0xff] %v1597_v14  ;;  %v1409_v52 = vadd.f32 1.0, %v2256_v47 }
 0x179   : > { %v2260_v32 = vpop.eup %2259  ;;  %v1566_v53 = vmul.f32 %v2258_v30, %v2821_v13  ;;  %2281 = vrcp.f32 %v1377_v25 }
 0x17a   : > { %v2262_v38 = vpop.eup %2261  ;;  %v1598_v55 = vmul.f32 %v2260_v32, %v2825_v62  ;;  %2283 = vrcp.f32 %v1409_v52 }
 0x17b   : > { %v2264_v56 = vpop.eup %2263  ;;  %1630 = vst [vmem:[%s2574_s22 + $0xc8] sm:$0xff] %v1566_v53  ;;  %v1378_v60 = vadd.f32 1.0, %v2262_v38 }
 0x17c   : > { %v2266_v48 = vpop.eup %2265  ;;  %1662 = vst [vmem:[%s2574_s22 + $0x1c8] sm:$0xff] %v1598_v55  ;;  %v1410_v58 = vadd.f32 1.0, %v2264_v56 }
 0x17d   : > { %v2268_v39 = vpop.eup %2267  ;;  %v1567_v63 = vmul.f32 %v2266_v48, %v2835_v16  ;;  %2285 = vrcp.f32 %v1378_v60 }
 0x17e   : > { %v2270_v10 = vpop.eup %2269  ;;  %v1599_v13 = vmul.f32 %v2268_v39, %v2839_v0  ;;  %2287 = vrcp.f32 %v1410_v58 }
 0x17f   : > { %v2272_v49 = vpop.eup %2271  ;;  %1631 = vst [vmem:[%s2574_s22 + $0xd0] sm:$0xff] %v1567_v63  ;;  %v1379_v62 = vadd.f32 1.0, %v2270_v10 }
 0x180   : > { %v2274_v33 = vpop.eup %2273  ;;  %1663 = vst [vmem:[%s2574_s22 + $0x1d0] sm:$0xff] %v1599_v13  ;;  %v1411_v36 = vadd.f32 1.0, %v2272_v49 }
 0x181   : > { %v2276_v59 = vpop.eup %2275  ;;  %v1568_v2 = vmul.f32 %v2274_v33, %v2849_v18  ;;  %2289 = vrcp.f32 %v1379_v62 }
 0x182   : > { %v2278_v44 = vpop.eup %2277  ;;  %v1600_v16 = vmul.f32 %v2276_v59, %v2853_v19  ;;  %2291 = vrcp.f32 %v1411_v36 }
 0x183   : > { %v2280_v3 = vpop.eup %2279  ;;  %1632 = vst [vmem:[%s2574_s22 + $0xd8] sm:$0xff] %v1568_v2  ;;  %v1380_v0 = vadd.f32 1.0, %v2278_v44 }
 0x184   : > { %1664 = vst [vmem:[%s2574_s22 + $0x1d8] sm:$0xff] %v1600_v16  ;;  %v1412_v46 = vadd.f32 1.0, %v2280_v3 }
 0x185   : > { %2293 = vrcp.f32 %v1380_v0 }
 0x186   : > { %v2282_v5 = vpop.eup %2281  ;;  %2295 = vrcp.f32 %v1412_v46 }
 0x187   : > { %v2284_v45 = vpop.eup %2283  ;;  %v1569_v18 = vmul.f32 %v2282_v5, %v2863_v28 }
 0x188   : > { %v1601_v61 = vmul.f32 %v2284_v45, %v2867_v29 }
 0x189   : > { %1633 = vst [vmem:[%s2574_s22 + $0xe0] sm:$0xff] %v1569_v18 }
 0x18a   : > { %v2286_v19 = vpop.eup %2285  ;;  %1665 = vst [vmem:[%s2574_s22 + $0x1e0] sm:$0xff] %v1601_v61 }
 0x18b   : > { %v2288_v15 = vpop.eup %2287  ;;  %v1570_v51 = vmul.f32 %v2286_v19, %v2875_v42 }
 0x18c   : > { %v1602_v50 = vmul.f32 %v2288_v15, %v2879_v43 }
 0x18d   : > { %1634 = vst [vmem:[%s2574_s22 + $0xe8] sm:$0xff] %v1570_v51 }
 0x18e   : > { %v2290_v17 = vpop.eup %2289  ;;  %1666 = vst [vmem:[%s2574_s22 + $0x1e8] sm:$0xff] %v1602_v50 }
 0x18f   : > { %v2292_v20 = vpop.eup %2291  ;;  %v1571_v8 = vmul.f32 %v2290_v17, %v2889_v12 }
 0x190   : > { %v1603_v28 = vmul.f32 %v2292_v20, %v2893_v57 }
 0x191   : > { %1635 = vst [vmem:[%s2574_s22 + $0xf0] sm:$0xff] %v1571_v8 }
 0x192   : > { %v2294_v29 = vpop.eup %2293  ;;  %1667 = vst [vmem:[%s2574_s22 + $0x1f0] sm:$0xff] %v1603_v28 }
 0x193   : > { %v2296_v54 = vpop.eup %2295  ;;  %v1572_v21 = vmul.f32 %v2294_v29, %v2903_v22 }
 0x194   : > { %v1604_v23 = vmul.f32 %v2296_v54, %v2907_v24 }
 0x195   : > { %1636 = vst [vmem:[%s2574_s22 + $0xf8] sm:$0xff] %v1572_v21 }
 0x196   : > { %1668 = vst [vmem:[%s2574_s22 + $0x1f8] sm:$0xff] %v1604_v23 }
 0x197 PF: > { %s14_s15 = sadd.s32 1, %s2305_s15  }
 0x198   : > { %p11_p4 = scmp.ge.s32.totalorder %s14_s15, 10  }
 0x19a   :  { %13 = sbr.rel (!%p11_p4) target bundleno = 1 (0x1), region = 66 }

// kernel: effi_b7_forward.16
= control target key start
LH: loop header
LB: loop body
LE: loop exit
PB: predicated region body
PF: predicated region fallthrough
CT: control target
= control target key end

     0   :  { %s2333_s15 = smov 0   ;;  %s2952_s0 = inlined_call_operand.vmem [shape: bf16[1024,144], index: 0, kind: input, shape index: {}]   ;;  %s2953_s1 = inlined_call_operand.vmem [shape: bf16[144,128], index: 1, kind: input, shape index: {}]   ;;  %s2954_s2 = inlined_call_operand.vmem [shape: f32[1,128], index: 2, kind: input, shape index: {}]   ;;  %s2955_s3 = inlined_call_operand.vmem [shape: f32[1,128], index: 3, kind: input, shape index: {}]   ;;  %s2956_s4 = inlined_call_operand.vmem [shape: f32[1024,128], index: 4, kind: output, shape index: {}]  }
   0x1 LB: > { %s1725_s16 = sadd.s32 4294967295, %s2305_s15   ;;  %p1729_p0 = scmp.ge.s32.totalorder %s2305_s15, 1  ;;  %s2305_s15 = sphi %s2333_s15, %s14_s15  }
   0x2   : > { %p164_p1 = scmp.lt.s32.totalorder %s2305_s15, 3 }
   0x4   : > { %p165_p2 = pnand %p1729_p0, %p164_p1 }
   0x5   : > { %s1730_s19 = sshll.u32 (!%p165_p2), %s1725_s16, 6 }
   0x6   : > { %168 = sbr.rel (%p165_p2) target bundleno = 407 (0x197), region = 36  ;;  %p192_p3 = scmp.lt.s32.totalorder (!%p165_p2), %s1730_s19, 127 }
   0xb   : > { %v1936_v0 = vld [vmem:[%s2953_s1 + $0x38] sm:$0xff]   ;;  %v2307_v1 = vmov 0   ;;  %v1937_v2 = vld [vmem:[%s2953_s1 + $0x30] sm:$0xff]   ;;  %s2958_s19 = smov (!%p192_p3, %s1730_s19), 127  ;;  %v1938_v3 = vld [vmem:[%s2953_s1 + $0x28] sm:$0xff]   ;;  %vm629_vm0 = vcmask 130048  }
   0xc   : > { %726 = vmatprep.subr.bf16.mxu0 %v2307_v1  ;;  %1909 = vmatprep.subr.bf16.mxu1 %v2307_v1  ;;  %s1908_s24 = sshll.u32 %s2958_s19, 3  ;;  %v1939_v4 = vld [vmem:[%s2953_s1 + $0x20] sm:$0xff]   ;;  %v1940_v7 = vld [vmem:[%s2953_s1 + $0x18] sm:$0xff]   ;;  %v1941_v8 = vld [vmem:[%s2953_s1 + $0x10] sm:$0xff]  }
   0xd   : > { %727 = vmatpush1.bf16.msra.mxu0 %v1936_v0  ;;  %1918 = vmatpush1.bf16.msra.mxu1 %v1936_v0  ;;  %s2358_s27 = scalar_lea.vmem %s2952_s0, %s1908_s24  ;;  %v1942_v9 = vld [vmem:[%s2953_s1 + $0x8] sm:$0xff]   ;;  %v1943_v10 = vld [vmem:[%s2953_s1] sm:$0xff]   ;;  %s2574_s22 = scalar_lea.vmem %s2956_s4, %s1908_s24 }
   0xe   : > { %728 = vmatprep.subr.bf16.mxu0 %v2307_v1  ;;  %1910 = vmatprep.subr.bf16.mxu1 %v2307_v1  ;;  %v1947_v5 = vld [vmem:[%s2358_s27 + $0x4] ss:$8 sps:$4 sm:$0xff]   ;;  %v1945_v12 = vld [vmem:[%s2358_s27] ss:$8 sps:$4 sm:$0xff]   ;;  %v1951_v14 = vld [vmem:[%s2358_s27 + $0x14] ss:$8 sps:$4 sm:$0xff]  }
   0xf   : > { %v1950_v6 = vld [vmem:[%s2358_s27 + $0x104] ss:$8 sps:$4 sm:$0xff]   ;;  %1808 = vmatprep.mubr.msk.bf16.mxu0 %vm629_vm0, %v1947_v5  ;;  %v1948_v13 = vld [vmem:[%s2358_s27 + $0x100] ss:$8 sps:$4 sm:$0xff]   ;;  %v1953_v15 = vld [vmem:[%s2358_s27 + $0x114] ss:$8 sps:$4 sm:$0xff]  }
  0x10   : > { %1824 = vmatprep.mubr.msk.bf16.mxu1 %vm629_vm0, %v1950_v6  ;;  %v1944_v11 = vld [vmem:[%s2953_s1 + $0x40] sm:$0xff]   ;;  %v1955_v16 = vld [vmem:[%s2358_s27 + $0x10] ss:$8 sps:$4 sm:$0xff]   ;;  %v1963_v22 = vld [vmem:[%s2358_s27 + $0x34] ss:$8 sps:$4 sm:$0xff]  }
  0x11   : > { %729 = vmatpush1.bf16.msra.mxu0 %v1937_v2  ;;  %1919 = vmatpush1.bf16.msra.mxu1 %v1937_v2  ;;  %v1956_v17 = vld [vmem:[%s2358_s27 + $0x110] ss:$8 sps:$4 sm:$0xff]   ;;  %v1957_v18 = vld [vmem:[%s2358_s27 + $0x24] ss:$8 sps:$4 sm:$0xff]   ;;  %v1961_v20 = vld [vmem:[%s2358_s27 + $0x20] ss:$8 sps:$4 sm:$0xff]  }
  0x12   : > { %730 = vmatprep.subr.bf16.mxu0 %v2307_v1  ;;  %1911 = vmatprep.subr.bf16.mxu1 %v2307_v1  ;;  %v1959_v19 = vld [vmem:[%s2358_s27 + $0x124] ss:$8 sps:$4 sm:$0xff]   ;;  %v1962_v21 = vld [vmem:[%s2358_s27 + $0x120] ss:$8 sps:$4 sm:$0xff]   ;;  %v1965_v23 = vld [vmem:[%s2358_s27 + $0x134] ss:$8 sps:$4 sm:$0xff]  }
  0x13   : > { %v1967_v24 = vld [vmem:[%s2358_s27 + $0x30] ss:$8 sps:$4 sm:$0xff]   ;;  %v1969_v26 = vld [vmem:[%s2358_s27 + $0x44] ss:$8 sps:$4 sm:$0xff]   ;;  %v1973_v28 = vld [vmem:[%s2358_s27 + $0x40] ss:$8 sps:$4 sm:$0xff]  }
  0x14   : > { %v1968_v25 = vld [vmem:[%s2358_s27 + $0x130] ss:$8 sps:$4 sm:$0xff]   ;;  %v1971_v27 = vld [vmem:[%s2358_s27 + $0x144] ss:$8 sps:$4 sm:$0xff]   ;;  %v1974_v29 = vld [vmem:[%s2358_s27 + $0x140] ss:$8 sps:$4 sm:$0xff]  }
  0x15   : > { %731 = vmatpush1.bf16.msra.mxu0 %v1938_v3  ;;  %1920 = vmatpush1.bf16.msra.mxu1 %v1938_v3  ;;  %v1975_v30 = vld [vmem:[%s2358_s27 + $0x54] ss:$8 sps:$4 sm:$0xff]   ;;  %v1979_v32 = vld [vmem:[%s2358_s27 + $0x50] ss:$8 sps:$4 sm:$0xff]   ;;  %v1981_v34 = vld [vmem:[%s2358_s27 + $0x64] ss:$8 sps:$4 sm:$0xff]  }
  0x16   : > { %732 = vmatprep.subr.bf16.mxu0 %v2307_v1  ;;  %1912 = vmatprep.subr.bf16.mxu1 %v2307_v1  ;;  %v1977_v31 = vld [vmem:[%s2358_s27 + $0x154] ss:$8 sps:$4 sm:$0xff]   ;;  %v1980_v33 = vld [vmem:[%s2358_s27 + $0x150] ss:$8 sps:$4 sm:$0xff]   ;;  %v1983_v35 = vld [vmem:[%s2358_s27 + $0x164] ss:$8 sps:$4 sm:$0xff]  }
  0x17   : > { %v1985_v36 = vld [vmem:[%s2358_s27 + $0x60] ss:$8 sps:$4 sm:$0xff]   ;;  %v1987_v38 = vld [vmem:[%s2358_s27 + $0x74] ss:$8 sps:$4 sm:$0xff]   ;;  %v1991_v40 = vld [vmem:[%s2358_s27 + $0x70] ss:$8 sps:$4 sm:$0xff]  }
  0x18   : > { %v1986_v37 = vld [vmem:[%s2358_s27 + $0x160] ss:$8 sps:$4 sm:$0xff]   ;;  %v1989_v39 = vld [vmem:[%s2358_s27 + $0x174] ss:$8 sps:$4 sm:$0xff]   ;;  %v1992_v41 = vld [vmem:[%s2358_s27 + $0x170] ss:$8 sps:$4 sm:$0xff]  }
  0x19   : > { %733 = vmatpush1.bf16.msra.mxu0 %v1939_v4  ;;  %1921 = vmatpush1.bf16.msra.mxu1 %v1939_v4  ;;  %v1993_v42 = vld [vmem:[%s2358_s27 + $0x84] ss:$8 sps:$4 sm:$0xff]   ;;  %v1997_v44 = vld [vmem:[%s2358_s27 + $0x80] ss:$8 sps:$4 sm:$0xff]   ;;  %v1999_v46 = vld [vmem:[%s2358_s27 + $0x94] ss:$8 sps:$4 sm:$0xff]  }
  0x1a   : > { %734 = vmatprep.subr.bf16.mxu0 %v2307_v1  ;;  %1913 = vmatprep.subr.bf16.mxu1 %v2307_v1  ;;  %v1995_v43 = vld [vmem:[%s2358_s27 + $0x184] ss:$8 sps:$4 sm:$0xff]   ;;  %v1998_v45 = vld [vmem:[%s2358_s27 + $0x180] ss:$8 sps:$4 sm:$0xff]   ;;  %v2001_v47 = vld [vmem:[%s2358_s27 + $0x194] ss:$8 sps:$4 sm:$0xff]  }
  0x1b   : > { %v2003_v48 = vld [vmem:[%s2358_s27 + $0x90] ss:$8 sps:$4 sm:$0xff]   ;;  %v2005_v50 = vld [vmem:[%s2358_s27 + $0xa4] ss:$8 sps:$4 sm:$0xff]   ;;  %v2009_v52 = vld [vmem:[%s2358_s27 + $0xa0] ss:$8 sps:$4 sm:$0xff]  }
  0x1c   : > { %v2004_v49 = vld [vmem:[%s2358_s27 + $0x190] ss:$8 sps:$4 sm:$0xff]   ;;  %v2007_v51 = vld [vmem:[%s2358_s27 + $0x1a4] ss:$8 sps:$4 sm:$0xff]   ;;  %v2010_v53 = vld [vmem:[%s2358_s27 + $0x1a0] ss:$8 sps:$4 sm:$0xff]  }
  0x1d   : > { %735 = vmatpush1.bf16.msra.mxu0 %v1940_v7  ;;  %1922 = vmatpush1.bf16.msra.mxu1 %v1940_v7  ;;  %v2011_v54 = vld [vmem:[%s2358_s27 + $0xb4] ss:$8 sps:$4 sm:$0xff]   ;;  %v2015_v56 = vld [vmem:[%s2358_s27 + $0xb0] ss:$8 sps:$4 sm:$0xff]   ;;  %v2017_v58 = vld [vmem:[%s2358_s27 + $0xc4] ss:$8 sps:$4 sm:$0xff]  }
  0x1e   : > { %736 = vmatprep.subr.bf16.mxu0 %v2307_v1  ;;  %1914 = vmatprep.subr.bf16.mxu1 %v2307_v1  ;;  %v2013_v55 = vld [vmem:[%s2358_s27 + $0x1b4] ss:$8 sps:$4 sm:$0xff]   ;;  %v2016_v57 = vld [vmem:[%s2358_s27 + $0x1b0] ss:$8 sps:$4 sm:$0xff]   ;;  %v2019_v59 = vld [vmem:[%s2358_s27 + $0x1c4] ss:$8 sps:$4 sm:$0xff]  }
  0x1f   : > { %v2021_v60 = vld [vmem:[%s2358_s27 + $0xc0] ss:$8 sps:$4 sm:$0xff]   ;;  %v2023_v62 = vld [vmem:[%s2358_s27 + $0xd4] ss:$8 sps:$4 sm:$0xff]   ;;  %v2027_v0 = vld [vmem:[%s2358_s27 + $0xd0] ss:$8 sps:$4 sm:$0xff]  }
  0x20   : > { %v2022_v61 = vld [vmem:[%s2358_s27 + $0x1c0] ss:$8 sps:$4 sm:$0xff]   ;;  %v2025_v63 = vld [vmem:[%s2358_s27 + $0x1d4] ss:$8 sps:$4 sm:$0xff]   ;;  %v2029_v2 = vld [vmem:[%s2358_s27 + $0xe4] ss:$8 sps:$4 sm:$0xff]  }
  0x21   : > { %737 = vmatpush1.bf16.msra.mxu0 %v1941_v8  ;;  %1923 = vmatpush1.bf16.msra.mxu1 %v1941_v8  ;;  %v2031_v3 = vld [vmem:[%s2358_s27 + $0x1e4] ss:$8 sps:$4 sm:$0xff]   ;;  %v2033_v4 = vld [vmem:[%s2358_s27 + $0xe0] ss:$8 sps:$4 sm:$0xff]   ;;  %v2035_v6 = vld [vmem:[%s2358_s27 + $0xf4] ss:$8 sps:$4 sm:$0xff]  }
  0x22   : > { %738 = vmatprep.subr.bf16.mxu0 %v2307_v1  ;;  %1915 = vmatprep.subr.bf16.mxu1 %v2307_v1  ;;  %v2034_v5 = vld [vmem:[%s2358_s27 + $0x1e0] ss:$8 sps:$4 sm:$0xff]   ;;  %v2037_v7 = vld [vmem:[%s2358_s27 + $0x1f4] ss:$8 sps:$4 sm:$0xff]   ;;  %v2039_v8 = vld [vmem:[%s2358_s27 + $0xf0] ss:$8 sps:$4 sm:$0xff]  }
  0x25   : > { %739 = vmatpush1.bf16.msra.mxu0 %v1942_v9  ;;  %1924 = vmatpush1.bf16.msra.mxu1 %v1942_v9  ;;  %v2040_v9 = vld [vmem:[%s2358_s27 + $0x1f0] ss:$8 sps:$4 sm:$0xff]  }
  0x26   : > { %740 = vmatprep.subr.bf16.mxu0 %v2307_v1  ;;  %1916 = vmatprep.subr.bf16.mxu1 %v2307_v1 }
  0x29   : > { %741 = vmatpush1.bf16.msra.mxu0 %v1943_v10  ;;  %1925 = vmatpush1.bf16.msra.mxu1 %v1943_v10  ;;  %v2477_v10 = vld [vmem:[%s2954_s2] ss:$0 sm:$0xff] }
  0x2a   : > { %756 = vmatprep.subr.bf16.mxu0 %v2307_v1  ;;  %1917 = vmatprep.subr.bf16.mxu1 %v2307_v1  ;;  %v2028_v1 = vld [vmem:[%s2358_s27 + $0x1d0] ss:$8 sps:$4 sm:$0xff]  }
  0x2d   : > { %757 = vmatpush2.bf16.msra.mxu0 %v1944_v11  ;;  %1926 = vmatpush2.bf16.msra.mxu1 %v1944_v11 }
  0x30   : > { %759 = vmatmul.mubr.bf16.vlgmr.msra.gmra.mxu0 %v1945_v12  ;;  %887 = vmatmul.mubr.bf16.vlgmr.msra.gmra.mxu1 %v1948_v13  ;;  %v2482_v12 = vld [vmem:[%s2955_s3] ss:$0 sm:$0xff] }
  0x31   : > { %1809 = vmatprep.mubr.msk.bf16.mxu0 %vm629_vm0, %v1951_v14  ;;  %1825 = vmatprep.mubr.msk.bf16.mxu1 %vm629_vm0, %v1953_v15 }
  0x38   : > { %767 = vmatmul.mubr.bf16.gmra.mxu0 %v1955_v16  ;;  %895 = vmatmul.mubr.bf16.gmra.mxu1 %v1956_v17 }
  0x39   : > { %1810 = vmatprep.mubr.msk.bf16.mxu0 %vm629_vm0, %v1957_v18  ;;  %1826 = vmatprep.mubr.msk.bf16.mxu1 %vm629_vm0, %v1959_v19 }
  0x40   : > { %775 = vmatmul.mubr.bf16.gmra.mxu0 %v1961_v20  ;;  %903 = vmatmul.mubr.bf16.gmra.mxu1 %v1962_v21 }
  0x41   : > { %1811 = vmatprep.mubr.msk.bf16.mxu0 %vm629_vm0, %v1963_v22  ;;  %1827 = vmatprep.mubr.msk.bf16.mxu1 %vm629_vm0, %v1965_v23 }
  0x48   : > { %783 = vmatmul.mubr.bf16.gmra.mxu0 %v1967_v24  ;;  %911 = vmatmul.mubr.bf16.gmra.mxu1 %v1968_v25 }
  0x49   : > { %1812 = vmatprep.mubr.msk.bf16.mxu0 %vm629_vm0, %v1969_v26  ;;  %1828 = vmatprep.mubr.msk.bf16.mxu1 %vm629_vm0, %v1971_v27 }
  0x50   : > { %791 = vmatmul.mubr.bf16.gmra.mxu0 %v1973_v28  ;;  %919 = vmatmul.mubr.bf16.gmra.mxu1 %v1974_v29 }
  0x51   : > { %1813 = vmatprep.mubr.msk.bf16.mxu0 %vm629_vm0, %v1975_v30  ;;  %1829 = vmatprep.mubr.msk.bf16.mxu1 %vm629_vm0, %v1977_v31 }
  0x58   : > { %799 = vmatmul.mubr.bf16.gmra.mxu0 %v1979_v32  ;;  %927 = vmatmul.mubr.bf16.gmra.mxu1 %v1980_v33 }
  0x59   : > { %1814 = vmatprep.mubr.msk.bf16.mxu0 %vm629_vm0, %v1981_v34  ;;  %1830 = vmatprep.mubr.msk.bf16.mxu1 %vm629_vm0, %v1983_v35 }
  0x60   : > { %807 = vmatmul.mubr.bf16.gmra.mxu0 %v1985_v36  ;;  %935 = vmatmul.mubr.bf16.gmra.mxu1 %v1986_v37 }
  0x61   : > { %1815 = vmatprep.mubr.msk.bf16.mxu0 %vm629_vm0, %v1987_v38  ;;  %1831 = vmatprep.mubr.msk.bf16.mxu1 %vm629_vm0, %v1989_v39 }
  0x68   : > { %815 = vmatmul.mubr.bf16.gmra.mxu0 %v1991_v40  ;;  %943 = vmatmul.mubr.bf16.gmra.mxu1 %v1992_v41 }
  0x69   : > { %1816 = vmatprep.mubr.msk.bf16.mxu0 %vm629_vm0, %v1993_v42  ;;  %1832 = vmatprep.mubr.msk.bf16.mxu1 %vm629_vm0, %v1995_v43 }
  0x70   : > { %823 = vmatmul.mubr.bf16.gmra.mxu0 %v1997_v44  ;;  %951 = vmatmul.mubr.bf16.gmra.mxu1 %v1998_v45 }
  0x71   : > { %1817 = vmatprep.mubr.msk.bf16.mxu0 %vm629_vm0, %v1999_v46  ;;  %1833 = vmatprep.mubr.msk.bf16.mxu1 %vm629_vm0, %v2001_v47 }
  0x78   : > { %831 = vmatmul.mubr.bf16.gmra.mxu0 %v2003_v48  ;;  %959 = vmatmul.mubr.bf16.gmra.mxu1 %v2004_v49 }
  0x79   : > { %1818 = vmatprep.mubr.msk.bf16.mxu0 %vm629_vm0, %v2005_v50  ;;  %1834 = vmatprep.mubr.msk.bf16.mxu1 %vm629_vm0, %v2007_v51 }
  0x80   : > { %839 = vmatmul.mubr.bf16.gmra.mxu0 %v2009_v52  ;;  %967 = vmatmul.mubr.bf16.gmra.mxu1 %v2010_v53 }
  0x81   : > { %1819 = vmatprep.mubr.msk.bf16.mxu0 %vm629_vm0, %v2011_v54  ;;  %1835 = vmatprep.mubr.msk.bf16.mxu1 %vm629_vm0, %v2013_v55 }
  0x88   : > { %847 = vmatmul.mubr.bf16.gmra.mxu0 %v2015_v56  ;;  %975 = vmatmul.mubr.bf16.gmra.mxu1 %v2016_v57 }
  0x89   : > { %1820 = vmatprep.mubr.msk.bf16.mxu0 %vm629_vm0, %v2017_v58  ;;  %1836 = vmatprep.mubr.msk.bf16.mxu1 %vm629_vm0, %v2019_v59 }
  0x90   : > { %855 = vmatmul.mubr.bf16.gmra.mxu0 %v2021_v60  ;;  %983 = vmatmul.mubr.bf16.gmra.mxu1 %v2022_v61 }
  0x91   : > { %1821 = vmatprep.mubr.msk.bf16.mxu0 %vm629_vm0, %v2023_v62  ;;  %1837 = vmatprep.mubr.msk.bf16.mxu1 %vm629_vm0, %v2025_v63 }
  0x98   : > { %863 = vmatmul.mubr.bf16.gmra.mxu0 %v2027_v0  ;;  %991 = vmatmul.mubr.bf16.gmra.mxu1 %v2028_v1 }
  0x99   : > { %1822 = vmatprep.mubr.msk.bf16.mxu0 %vm629_vm0, %v2029_v2  ;;  %1838 = vmatprep.mubr.msk.bf16.mxu1 %vm629_vm0, %v2031_v3 }
  0xa0   : > { %871 = vmatmul.mubr.bf16.gmra.mxu0 %v2033_v4  ;;  %999 = vmatmul.mubr.bf16.gmra.mxu1 %v2034_v5 }
  0xa1   : > { %1823 = vmatprep.mubr.msk.bf16.mxu0 %vm629_vm0, %v2035_v6  ;;  %1839 = vmatprep.mubr.msk.bf16.mxu1 %vm629_vm0, %v2037_v7 }
  0xa8   : > { %879 = vmatmul.mubr.bf16.gmra.mxu0 %v2039_v8  ;;  %1007 = vmatmul.mubr.bf16.gmra.mxu1 %v2040_v9 }
  0xf0   : > { %v760_v11 = vpop.f32.mrf.mxu0  ;;  %v888_v13 = vpop.f32.mrf.mxu1 }
  0xf1   : > { %v1022_v14 = vmul.f32 %v2477_v10, %v760_v11  ;;  %v1054_v15 = vmul.f32 %v2477_v10, %v888_v13 }
  0xf2   : > { %v762_v16 = vpop.f32.mrf.mxu0  ;;  %v890_v17 = vpop.f32.mrf.mxu1 }
  0xf3   : > { %v2487_v18 = vadd.f32 %v2482_v12, %v1022_v14  ;;  %v2490_v19 = vadd.f32 %v2482_v12, %v1054_v15 }
  0xf4   : > { %v763_v20 = vpop.f32.mrf.mxu0  ;;  %v891_v21 = vpop.f32.mrf.mxu1 }
  0xf5   : > { %v1842_v22 = vmul.f32 -1.442695, %v2487_v18  ;;  %v1874_v23 = vmul.f32 -1.442695, %v2490_v19  ;;  %v1023_v24 = vmul.f32 %v2477_v10, %v763_v20  ;;  %v1055_v25 = vmul.f32 %v2477_v10, %v891_v21 }
  0xf6   : > { %v765_v26 = vpop.f32.mrf.mxu0  ;;  %v893_v27 = vpop.f32.mrf.mxu1 }
  0xf7   : > { %2041 = vpow2.f32 %v1842_v22  ;;  %v2497_v28 = vadd.f32 %v2482_v12, %v1023_v24  ;;  %v2500_v29 = vadd.f32 %v2482_v12, %v1055_v25 }
  0xf8   : > { %2043 = vpow2.f32 %v1874_v23  ;;  %v768_v30 = vpop.f32.mrf.mxu0  ;;  %v896_v31 = vpop.f32.mrf.mxu1 }
  0xf9   : > { %v1843_v32 = vmul.f32 -1.442695, %v2497_v28  ;;  %v1875_v33 = vmul.f32 -1.442695, %v2500_v29  ;;  %v1024_v34 = vmul.f32 %v2477_v10, %v768_v30  ;;  %v1056_v35 = vmul.f32 %v2477_v10, %v896_v31 }
  0xfa   : > { %v770_v36 = vpop.f32.mrf.mxu0  ;;  %v898_v37 = vpop.f32.mrf.mxu1 }
  0xfb   : > { %2045 = vpow2.f32 %v1843_v32  ;;  %v2507_v38 = vadd.f32 %v2482_v12, %v1024_v34  ;;  %v2510_v39 = vadd.f32 %v2482_v12, %v1056_v35 }
  0xfc   : > { %2047 = vpow2.f32 %v1875_v33  ;;  %v771_v40 = vpop.f32.mrf.mxu0  ;;  %v899_v41 = vpop.f32.mrf.mxu1 }
  0xfd   : > { %v1844_v42 = vmul.f32 -1.442695, %v2507_v38  ;;  %v1876_v43 = vmul.f32 -1.442695, %v2510_v39  ;;  %v1025_v44 = vmul.f32 %v2477_v10, %v771_v40  ;;  %v1057_v45 = vmul.f32 %v2477_v10, %v899_v41 }
  0xfe   : > { %v773_v46 = vpop.f32.mrf.mxu0  ;;  %v901_v47 = vpop.f32.mrf.mxu1 }
  0xff   : > { %2049 = vpow2.f32 %v1844_v42  ;;  %v2517_v48 = vadd.f32 %v2482_v12, %v1025_v44  ;;  %v2520_v49 = vadd.f32 %v2482_v12, %v1057_v45 }
 0x100   : > { %2051 = vpow2.f32 %v1876_v43  ;;  %v776_v50 = vpop.f32.mrf.mxu0  ;;  %v904_v51 = vpop.f32.mrf.mxu1 }
 0x101   : > { %v1845_v52 = vmul.f32 -1.442695, %v2517_v48  ;;  %v1877_v53 = vmul.f32 -1.442695, %v2520_v49  ;;  %v1026_v54 = vmul.f32 %v2477_v10, %v776_v50  ;;  %v1058_v55 = vmul.f32 %v2477_v10, %v904_v51 }
 0x102   : > { %v778_v56 = vpop.f32.mrf.mxu0  ;;  %v906_v57 = vpop.f32.mrf.mxu1 }
 0x103   : > { %2053 = vpow2.f32 %v1845_v52  ;;  %v2527_v58 = vadd.f32 %v2482_v12, %v1026_v54  ;;  %v2530_v59 = vadd.f32 %v2482_v12, %v1058_v55 }
 0x104   : > { %v2042_v60 = vpop.eup %2041  ;;  %2055 = vpow2.f32 %v1877_v53  ;;  %v779_v61 = vpop.f32.mrf.mxu0 }
 0x105   : > { %v907_v62 = vpop.f32.mrf.mxu1  ;;  %v2044_v63 = vpop.eup %2043  ;;  %v1349_v0 = vadd.f32 1.0, %v2042_v60  ;;  %v1846_v1 = vmul.f32 -1.442695, %v2527_v58  ;;  %v1027_v2 = vmul.f32 %v2477_v10, %v779_v61  ;;  %v1878_v4 = vmul.f32 -1.442695, %v2530_v59 }
 0x106   : > { %v1381_v3 = vadd.f32 1.0, %v2044_v63  ;;  %v1059_v5 = vmul.f32 %v2477_v10, %v907_v62  ;;  %v781_v6 = vpop.f32.mrf.mxu0 }
 0x107   : > { %v909_v7 = vpop.f32.mrf.mxu1  ;;  %2057 = vrcp.f32 %v1349_v0  ;;  %v2537_v8 = vadd.f32 %v2482_v12, %v1027_v2 }
 0x108   : > { %v2046_v9 = vpop.eup %2045  ;;  %2059 = vrcp.f32 %v1381_v3  ;;  %v2540_v11 = vadd.f32 %v2482_v12, %v1059_v5  ;;  %v784_v13 = vpop.f32.mrf.mxu0 }
 0x109   : > { %v912_v14 = vpop.f32.mrf.mxu1  ;;  %v2048_v15 = vpop.eup %2047  ;;  %v1350_v16 = vadd.f32 1.0, %v2046_v9  ;;  %2061 = vpow2.f32 %v1846_v1  ;;  %v1847_v17 = vmul.f32 -1.442695, %v2537_v8  ;;  %v1028_v20 = vmul.f32 %v2477_v10, %v784_v13 }
 0x10a   : > { %v1382_v21 = vadd.f32 1.0, %v2048_v15  ;;  %2063 = vpow2.f32 %v1878_v4  ;;  %v1879_v22 = vmul.f32 -1.442695, %v2540_v11  ;;  %v1060_v23 = vmul.f32 %v2477_v10, %v912_v14  ;;  %v786_v24 = vpop.f32.mrf.mxu0 }
 0x10b   : > { %v914_v25 = vpop.f32.mrf.mxu1  ;;  %2065 = vrcp.f32 %v1350_v16  ;;  %v2547_v26 = vadd.f32 %v2482_v12, %v1028_v20 }
 0x10c   : > { %v2050_v27 = vpop.eup %2049  ;;  %2067 = vrcp.f32 %v1382_v21  ;;  %v2550_v30 = vadd.f32 %v2482_v12, %v1060_v23  ;;  %v787_v31 = vpop.f32.mrf.mxu0 }
 0x10d   : > { %v915_v32 = vpop.f32.mrf.mxu1  ;;  %v2052_v33 = vpop.eup %2051  ;;  %v1351_v34 = vadd.f32 1.0, %v2050_v27  ;;  %2069 = vpow2.f32 %v1847_v17  ;;  %v1848_v35 = vmul.f32 -1.442695, %v2547_v26  ;;  %v1029_v36 = vmul.f32 %v2477_v10, %v787_v31 }
 0x10e   : > { %v1383_v37 = vadd.f32 1.0, %v2052_v33  ;;  %2071 = vpow2.f32 %v1879_v22  ;;  %v1880_v40 = vmul.f32 -1.442695, %v2550_v30  ;;  %v1061_v41 = vmul.f32 %v2477_v10, %v915_v32  ;;  %v789_v42 = vpop.f32.mrf.mxu0 }
 0x10f   : > { %v917_v43 = vpop.f32.mrf.mxu1  ;;  %2073 = vrcp.f32 %v1351_v34  ;;  %v2557_v44 = vadd.f32 %v2482_v12, %v1029_v36 }
 0x110   : > { %v2054_v45 = vpop.eup %2053  ;;  %2075 = vrcp.f32 %v1383_v37  ;;  %v2560_v46 = vadd.f32 %v2482_v12, %v1061_v41  ;;  %v792_v47 = vpop.f32.mrf.mxu0 }
 0x111   : > { %v920_v50 = vpop.f32.mrf.mxu1  ;;  %v2056_v51 = vpop.eup %2055  ;;  %v1352_v52 = vadd.f32 1.0, %v2054_v45  ;;  %2077 = vpow2.f32 %v1848_v35  ;;  %v1849_v53 = vmul.f32 -1.442695, %v2557_v44  ;;  %v1030_v54 = vmul.f32 %v2477_v10, %v792_v47 }
 0x112   : > { %v1384_v55 = vadd.f32 1.0, %v2056_v51  ;;  %2079 = vpow2.f32 %v1880_v40  ;;  %v1881_v56 = vmul.f32 -1.442695, %v2560_v46  ;;  %v1062_v57 = vmul.f32 %v2477_v10, %v920_v50  ;;  %v794_v60 = vpop.f32.mrf.mxu0 }
 0x113   : > { %v922_v61 = vpop.f32.mrf.mxu1  ;;  %2081 = vrcp.f32 %v1352_v52  ;;  %v2567_v62 = vadd.f32 %v2482_v12, %v1030_v54 }
 0x114   : > { %v2058_v63 = vpop.eup %2057  ;;  %2083 = vrcp.f32 %v1384_v55  ;;  %v2577_v0 = vadd.f32 %v2482_v12, %v1062_v57  ;;  %v795_v1 = vpop.f32.mrf.mxu0 }
 0x115   : > { %v923_v2 = vpop.f32.mrf.mxu1  ;;  %v2060_v3 = vpop.eup %2059  ;;  %v1541_v4 = vmul.f32 %v2058_v63, %v2487_v18  ;;  %2085 = vpow2.f32 %v1849_v53  ;;  %v1850_v5 = vmul.f32 -1.442695, %v2567_v62  ;;  %v1031_v6 = vmul.f32 %v2477_v10, %v795_v1 }
 0x116   : > { %v2062_v7 = vpop.eup %2061  ;;  %v1573_v9 = vmul.f32 %v2060_v3, %v2490_v19  ;;  %2087 = vpow2.f32 %v1881_v56  ;;  %v1882_v13 = vmul.f32 -1.442695, %v2577_v0  ;;  %v1063_v14 = vmul.f32 %v2477_v10, %v923_v2  ;;  %v797_v15 = vpop.f32.mrf.mxu0 }
 0x117   : > { %v925_v16 = vpop.f32.mrf.mxu1  ;;  %v2064_v17 = vpop.eup %2063  ;;  %1605 = vst [vmem:[%s2574_s22] sm:$0xff] %v1541_v4  ;;  %v1353_v20 = vadd.f32 1.0, %v2062_v7  ;;  %2089 = vpow2.f32 %v1850_v5  ;;  %v2587_v18 = vadd.f32 %v2482_v12, %v1031_v6 }
 0x118   : > { %v2066_v21 = vpop.eup %2065  ;;  %1637 = vst [vmem:[%s2574_s22 + $0x100] sm:$0xff] %v1573_v9  ;;  %v1385_v22 = vadd.f32 1.0, %v2064_v17  ;;  %2091 = vpow2.f32 %v1882_v13  ;;  %v2591_v19 = vadd.f32 %v2482_v12, %v1063_v14  ;;  %v800_v23 = vpop.f32.mrf.mxu0 }
 0x119   : > { %v928_v24 = vpop.f32.mrf.mxu1  ;;  %v2068_v25 = vpop.eup %2067  ;;  %v1542_v27 = vmul.f32 %v2066_v21, %v2497_v28  ;;  %2093 = vrcp.f32 %v1353_v20  ;;  %v1851_v31 = vmul.f32 -1.442695, %v2587_v18  ;;  %v1032_v32 = vmul.f32 %v2477_v10, %v800_v23 }
 0x11a   : > { %v2070_v33 = vpop.eup %2069  ;;  %v1574_v34 = vmul.f32 %v2068_v25, %v2500_v29  ;;  %2095 = vrcp.f32 %v1385_v22  ;;  %v1883_v35 = vmul.f32 -1.442695, %v2591_v19  ;;  %v1064_v36 = vmul.f32 %v2477_v10, %v928_v24  ;;  %v802_v37 = vpop.f32.mrf.mxu0 }
 0x11b   : > { %v930_v40 = vpop.f32.mrf.mxu1  ;;  %v2072_v41 = vpop.eup %2071  ;;  %1606 = vst [vmem:[%s2574_s22 + $0x8] sm:$0xff] %v1542_v27  ;;  %v1354_v42 = vadd.f32 1.0, %v2070_v33  ;;  %2097 = vpow2.f32 %v1851_v31  ;;  %v2601_v28 = vadd.f32 %v2482_v12, %v1032_v32 }
 0x11c   : > { %v2074_v43 = vpop.eup %2073  ;;  %1638 = vst [vmem:[%s2574_s22 + $0x108] sm:$0xff] %v1574_v34  ;;  %v1386_v45 = vadd.f32 1.0, %v2072_v41  ;;  %2099 = vpow2.f32 %v1883_v35  ;;  %v2605_v29 = vadd.f32 %v2482_v12, %v1064_v36  ;;  %v803_v47 = vpop.f32.mrf.mxu0 }
 0x11d   : > { %v931_v50 = vpop.f32.mrf.mxu1  ;;  %v2076_v51 = vpop.eup %2075  ;;  %v1543_v52 = vmul.f32 %v2074_v43, %v2507_v38  ;;  %2101 = vrcp.f32 %v1354_v42  ;;  %v1852_v53 = vmul.f32 -1.442695, %v2601_v28  ;;  %v1033_v54 = vmul.f32 %v2477_v10, %v803_v47 }
 0x11e   : > { %v2078_v55 = vpop.eup %2077  ;;  %v1575_v56 = vmul.f32 %v2076_v51, %v2510_v39  ;;  %2103 = vrcp.f32 %v1386_v45  ;;  %v1884_v57 = vmul.f32 -1.442695, %v2605_v29  ;;  %v1065_v60 = vmul.f32 %v2477_v10, %v931_v50  ;;  %v805_v61 = vpop.f32.mrf.mxu0 }
 0x11f   : > { %v933_v63 = vpop.f32.mrf.mxu1  ;;  %v2080_v1 = vpop.eup %2079  ;;  %1607 = vst [vmem:[%s2574_s22 + $0x10] sm:$0xff] %v1543_v52  ;;  %v1355_v2 = vadd.f32 1.0, %v2078_v55  ;;  %2105 = vpow2.f32 %v1852_v53  ;;  %v2615_v38 = vadd.f32 %v2482_v12, %v1033_v54 }
 0x120   : > { %v2082_v3 = vpop.eup %2081  ;;  %1639 = vst [vmem:[%s2574_s22 + $0x110] sm:$0xff] %v1575_v56  ;;  %v1387_v4 = vadd.f32 1.0, %v2080_v1  ;;  %2107 = vpow2.f32 %v1884_v57  ;;  %v2619_v39 = vadd.f32 %v2482_v12, %v1065_v60  ;;  %v808_v5 = vpop.f32.mrf.mxu0 }
 0x121   : > { %v936_v6 = vpop.f32.mrf.mxu1  ;;  %v2084_v7 = vpop.eup %2083  ;;  %v1544_v9 = vmul.f32 %v2082_v3, %v2517_v48  ;;  %2109 = vrcp.f32 %v1355_v2  ;;  %v1853_v13 = vmul.f32 -1.442695, %v2615_v38  ;;  %v1034_v14 = vmul.f32 %v2477_v10, %v808_v5 }
 0x122   : > { %v2086_v15 = vpop.eup %2085  ;;  %v1576_v16 = vmul.f32 %v2084_v7, %v2520_v49  ;;  %2111 = vrcp.f32 %v1387_v4  ;;  %v1885_v17 = vmul.f32 -1.442695, %v2619_v39  ;;  %v1066_v20 = vmul.f32 %v2477_v10, %v936_v6  ;;  %v810_v21 = vpop.f32.mrf.mxu0 }
 0x123   : > { %v938_v22 = vpop.f32.mrf.mxu1  ;;  %v2088_v23 = vpop.eup %2087  ;;  %1608 = vst [vmem:[%s2574_s22 + $0x18] sm:$0xff] %v1544_v9  ;;  %v1356_v24 = vadd.f32 1.0, %v2086_v15  ;;  %2113 = vpow2.f32 %v1853_v13  ;;  %v2629_v48 = vadd.f32 %v2482_v12, %v1034_v14 }
 0x124   : > { %v2090_v25 = vpop.eup %2089  ;;  %1640 = vst [vmem:[%s2574_s22 + $0x118] sm:$0xff] %v1576_v16  ;;  %v1388_v27 = vadd.f32 1.0, %v2088_v23  ;;  %2115 = vpow2.f32 %v1885_v17  ;;  %v2633_v49 = vadd.f32 %v2482_v12, %v1066_v20  ;;  %v811_v31 = vpop.f32.mrf.mxu0 }
 0x125   : > { %v939_v32 = vpop.f32.mrf.mxu1  ;;  %v2092_v33 = vpop.eup %2091  ;;  %2117 = vrcp.f32 %v1356_v24  ;;  %v1357_v34 = vadd.f32 1.0, %v2090_v25  ;;  %v1854_v35 = vmul.f32 -1.442695, %v2629_v48  ;;  %v1035_v36 = vmul.f32 %v2477_v10, %v811_v31 }
 0x126   : > { %v2094_v37 = vpop.eup %2093  ;;  %2119 = vrcp.f32 %v1388_v27  ;;  %v1389_v40 = vadd.f32 1.0, %v2092_v33  ;;  %v1886_v41 = vmul.f32 -1.442695, %v2633_v49  ;;  %v1067_v42 = vmul.f32 %v2477_v10, %v939_v32  ;;  %v813_v43 = vpop.f32.mrf.mxu0 }
 0x127   : > { %v941_v45 = vpop.f32.mrf.mxu1  ;;  %v2096_v47 = vpop.eup %2095  ;;  %v1545_v50 = vmul.f32 %v2094_v37, %v2527_v58  ;;  %2121 = vrcp.f32 %v1357_v34  ;;  %v2641_v51 = vadd.f32 %v2482_v12, %v1035_v36 }
 0x128   : > { %v2098_v52 = vpop.eup %2097  ;;  %v1577_v53 = vmul.f32 %v2096_v47, %v2530_v59  ;;  %2123 = vrcp.f32 %v1389_v40  ;;  %v2645_v54 = vadd.f32 %v2482_v12, %v1067_v42  ;;  %v816_v55 = vpop.f32.mrf.mxu0 }
 0x129   : > { %v944_v56 = vpop.f32.mrf.mxu1  ;;  %v2100_v57 = vpop.eup %2099  ;;  %1609 = vst [vmem:[%s2574_s22 + $0x20] sm:$0xff] %v1545_v50  ;;  %v1358_v60 = vadd.f32 1.0, %v2098_v52  ;;  %2125 = vpow2.f32 %v1854_v35  ;;  %v1855_v58 = vmul.f32 -1.442695, %v2641_v51  ;;  %v1036_v61 = vmul.f32 %v2477_v10, %v816_v55 }
 0x12a   : > { %v2102_v63 = vpop.eup %2101  ;;  %1641 = vst [vmem:[%s2574_s22 + $0x120] sm:$0xff] %v1577_v53  ;;  %v1390_v1 = vadd.f32 1.0, %v2100_v57  ;;  %2127 = vpow2.f32 %v1886_v41  ;;  %v1887_v59 = vmul.f32 -1.442695, %v2645_v54  ;;  %v1068_v2 = vmul.f32 %v2477_v10, %v944_v56  ;;  %v818_v3 = vpop.f32.mrf.mxu0 }
 0x12b   : > { %v946_v4 = vpop.f32.mrf.mxu1  ;;  %v2104_v5 = vpop.eup %2103  ;;  %v1546_v6 = vmul.f32 %v2102_v63, %v2537_v8  ;;  %2129 = vrcp.f32 %v1358_v60  ;;  %v2655_v7 = vadd.f32 %v2482_v12, %v1036_v61 }
 0x12c   : > { %v2106_v9 = vpop.eup %2105  ;;  %v1578_v13 = vmul.f32 %v2104_v5, %v2540_v11  ;;  %2131 = vrcp.f32 %v1390_v1  ;;  %v2659_v14 = vadd.f32 %v2482_v12, %v1068_v2  ;;  %v819_v15 = vpop.f32.mrf.mxu0 }
 0x12d   : > { %v947_v16 = vpop.f32.mrf.mxu1  ;;  %v2108_v17 = vpop.eup %2107  ;;  %1610 = vst [vmem:[%s2574_s22 + $0x28] sm:$0xff] %v1546_v6  ;;  %v1359_v20 = vadd.f32 1.0, %v2106_v9  ;;  %2133 = vpow2.f32 %v1855_v58  ;;  %v1856_v8 = vmul.f32 -1.442695, %v2655_v7  ;;  %v1037_v21 = vmul.f32 %v2477_v10, %v819_v15 }
 0x12e   : > { %v2110_v22 = vpop.eup %2109  ;;  %1642 = vst [vmem:[%s2574_s22 + $0x128] sm:$0xff] %v1578_v13  ;;  %v1391_v23 = vadd.f32 1.0, %v2108_v17  ;;  %2135 = vpow2.f32 %v1887_v59  ;;  %v1888_v11 = vmul.f32 -1.442695, %v2659_v14  ;;  %v1069_v24 = vmul.f32 %v2477_v10, %v947_v16  ;;  %v821_v25 = vpop.f32.mrf.mxu0 }
 0x12f   : > { %v949_v27 = vpop.f32.mrf.mxu1  ;;  %v2112_v31 = vpop.eup %2111  ;;  %v1547_v32 = vmul.f32 %v2110_v22, %v2547_v26  ;;  %2137 = vrcp.f32 %v1359_v20  ;;  %v2669_v33 = vadd.f32 %v2482_v12, %v1037_v21 }
 0x130   : > { %v2114_v34 = vpop.eup %2113  ;;  %v1579_v35 = vmul.f32 %v2112_v31, %v2550_v30  ;;  %2139 = vrcp.f32 %v1391_v23  ;;  %v2673_v36 = vadd.f32 %v2482_v12, %v1069_v24  ;;  %v824_v37 = vpop.f32.mrf.mxu0 }
 0x131   : > { %v952_v40 = vpop.f32.mrf.mxu1  ;;  %v2116_v41 = vpop.eup %2115  ;;  %1611 = vst [vmem:[%s2574_s22 + $0x30] sm:$0xff] %v1547_v32  ;;  %v1360_v42 = vadd.f32 1.0, %v2114_v34  ;;  %2141 = vpow2.f32 %v1856_v8  ;;  %v1857_v26 = vmul.f32 -1.442695, %v2669_v33  ;;  %v1038_v43 = vmul.f32 %v2477_v10, %v824_v37 }
 0x132   : > { %v2118_v45 = vpop.eup %2117  ;;  %1643 = vst [vmem:[%s2574_s22 + $0x130] sm:$0xff] %v1579_v35  ;;  %v1392_v47 = vadd.f32 1.0, %v2116_v41  ;;  %2143 = vpow2.f32 %v1888_v11  ;;  %v1889_v30 = vmul.f32 -1.442695, %v2673_v36  ;;  %v1070_v50 = vmul.f32 %v2477_v10, %v952_v40  ;;  %v826_v52 = vpop.f32.mrf.mxu0 }
 0x133   : > { %v954_v53 = vpop.f32.mrf.mxu1  ;;  %v2120_v55 = vpop.eup %2119  ;;  %v1548_v56 = vmul.f32 %v2118_v45, %v2557_v44  ;;  %2145 = vrcp.f32 %v1360_v42  ;;  %v2683_v57 = vadd.f32 %v2482_v12, %v1038_v43 }
 0x134   : > { %v2122_v60 = vpop.eup %2121  ;;  %v1580_v58 = vmul.f32 %v2120_v55, %v2560_v46  ;;  %2147 = vrcp.f32 %v1392_v47  ;;  %v2687_v61 = vadd.f32 %v2482_v12, %v1070_v50  ;;  %v827_v63 = vpop.f32.mrf.mxu0 }
 0x135   : > { %v955_v1 = vpop.f32.mrf.mxu1  ;;  %v2124_v59 = vpop.eup %2123  ;;  %1612 = vst [vmem:[%s2574_s22 + $0x38] sm:$0xff] %v1548_v56  ;;  %v1549_v2 = vmul.f32 %v2122_v60, %v2567_v62  ;;  %2149 = vpow2.f32 %v1857_v26  ;;  %v1858_v44 = vmul.f32 -1.442695, %v2683_v57  ;;  %v1039_v3 = vmul.f32 %v2477_v10, %v827_v63 }
 0x136   : > { %v2126_v4 = vpop.eup %2125  ;;  %1644 = vst [vmem:[%s2574_s22 + $0x138] sm:$0xff] %v1580_v58  ;;  %v1581_v46 = vmul.f32 %v2124_v59, %v2577_v0  ;;  %2151 = vpow2.f32 %v1889_v30  ;;  %v1890_v5 = vmul.f32 -1.442695, %v2687_v61  ;;  %v1071_v6 = vmul.f32 %v2477_v10, %v955_v1  ;;  %v829_v9 = vpop.f32.mrf.mxu0 }
 0x137   : > { %v957_v13 = vpop.f32.mrf.mxu1  ;;  %v2128_v15 = vpop.eup %2127  ;;  %1613 = vst [vmem:[%s2574_s22 + $0x40] sm:$0xff] %v1549_v2  ;;  %v1361_v62 = vadd.f32 1.0, %v2126_v4  ;;  %2153 = vpow2.f32 %v1858_v44  ;;  %v2699_v16 = vadd.f32 %v2482_v12, %v1039_v3 }
 0x138   : > { %v2130_v17 = vpop.eup %2129  ;;  %1645 = vst [vmem:[%s2574_s22 + $0x140] sm:$0xff] %v1581_v46  ;;  %v1393_v20 = vadd.f32 1.0, %v2128_v15  ;;  %2155 = vpow2.f32 %v1890_v5  ;;  %v2703_v0 = vadd.f32 %v2482_v12, %v1071_v6  ;;  %v832_v8 = vpop.f32.mrf.mxu0 }
 0x139   : > { %v960_v21 = vpop.f32.mrf.mxu1  ;;  %v2132_v22 = vpop.eup %2131  ;;  %v1550_v23 = vmul.f32 %v2130_v17, %v2587_v18  ;;  %2157 = vrcp.f32 %v1361_v62  ;;  %v1859_v11 = vmul.f32 -1.442695, %v2699_v16  ;;  %v1040_v24 = vmul.f32 %v2477_v10, %v832_v8 }
 0x13a   : > { %v2134_v25 = vpop.eup %2133  ;;  %v1582_v27 = vmul.f32 %v2132_v22, %v2591_v19  ;;  %2159 = vrcp.f32 %v1393_v20  ;;  %v1891_v31 = vmul.f32 -1.442695, %v2703_v0  ;;  %v1072_v32 = vmul.f32 %v2477_v10, %v960_v21  ;;  %v834_v34 = vpop.f32.mrf.mxu0 }
 0x13b   : > { %v962_v35 = vpop.f32.mrf.mxu1  ;;  %v2136_v37 = vpop.eup %2135  ;;  %1614 = vst [vmem:[%s2574_s22 + $0x48] sm:$0xff] %v1550_v23  ;;  %v1362_v40 = vadd.f32 1.0, %v2134_v25  ;;  %2161 = vpow2.f32 %v1859_v11  ;;  %v2713_v18 = vadd.f32 %v2482_v12, %v1040_v24 }
 0x13c   : > { %v2138_v41 = vpop.eup %2137  ;;  %1646 = vst [vmem:[%s2574_s22 + $0x148] sm:$0xff] %v1582_v27  ;;  %v1394_v42 = vadd.f32 1.0, %v2136_v37  ;;  %2163 = vpow2.f32 %v1891_v31  ;;  %v2717_v19 = vadd.f32 %v2482_v12, %v1072_v32  ;;  %v835_v26 = vpop.f32.mrf.mxu0 }
 0x13d   : > { %v963_v43 = vpop.f32.mrf.mxu1  ;;  %v2140_v45 = vpop.eup %2139  ;;  %v1551_v47 = vmul.f32 %v2138_v41, %v2601_v28  ;;  %2165 = vrcp.f32 %v1362_v40  ;;  %v1860_v30 = vmul.f32 -1.442695, %v2713_v18  ;;  %v1041_v50 = vmul.f32 %v2477_v10, %v835_v26 }
 0x13e   : > { %v2142_v52 = vpop.eup %2141  ;;  %v1583_v53 = vmul.f32 %v2140_v45, %v2605_v29  ;;  %2167 = vrcp.f32 %v1394_v42  ;;  %v1892_v55 = vmul.f32 -1.442695, %v2717_v19  ;;  %v1073_v56 = vmul.f32 %v2477_v10, %v963_v43  ;;  %v837_v60 = vpop.f32.mrf.mxu0 }
 0x13f   : > { %v965_v58 = vpop.f32.mrf.mxu1  ;;  %v2144_v63 = vpop.eup %2143  ;;  %1615 = vst [vmem:[%s2574_s22 + $0x50] sm:$0xff] %v1551_v47  ;;  %v1363_v1 = vadd.f32 1.0, %v2142_v52  ;;  %2169 = vpow2.f32 %v1860_v30  ;;  %v2727_v28 = vadd.f32 %v2482_v12, %v1041_v50 }
 0x140   : > { %v2146_v59 = vpop.eup %2145  ;;  %1647 = vst [vmem:[%s2574_s22 + $0x150] sm:$0xff] %v1583_v53  ;;  %v1395_v2 = vadd.f32 1.0, %v2144_v63  ;;  %2171 = vpow2.f32 %v1892_v55  ;;  %v2731_v29 = vadd.f32 %v2482_v12, %v1073_v56  ;;  %v840_v44 = vpop.f32.mrf.mxu0 }
 0x141   : > { %v968_v3 = vpop.f32.mrf.mxu1  ;;  %v2148_v4 = vpop.eup %2147  ;;  %v1552_v46 = vmul.f32 %v2146_v59, %v2615_v38  ;;  %2173 = vrcp.f32 %v1363_v1  ;;  %v1861_v5 = vmul.f32 -1.442695, %v2727_v28  ;;  %v1042_v6 = vmul.f32 %v2477_v10, %v840_v44 }
 0x142   : > { %v2150_v9 = vpop.eup %2149  ;;  %v1584_v13 = vmul.f32 %v2148_v4, %v2619_v39  ;;  %2175 = vrcp.f32 %v1395_v2  ;;  %v1893_v15 = vmul.f32 -1.442695, %v2731_v29  ;;  %v1074_v62 = vmul.f32 %v2477_v10, %v968_v3  ;;  %v842_v17 = vpop.f32.mrf.mxu0 }
 0x143   : > { %v970_v20 = vpop.f32.mrf.mxu1  ;;  %v2152_v8 = vpop.eup %2151  ;;  %1616 = vst [vmem:[%s2574_s22 + $0x58] sm:$0xff] %v1552_v46  ;;  %v1364_v21 = vadd.f32 1.0, %v2150_v9  ;;  %2177 = vpow2.f32 %v1861_v5  ;;  %v2741_v38 = vadd.f32 %v2482_v12, %v1042_v6 }
 0x144   : > { %v2154_v22 = vpop.eup %2153  ;;  %1648 = vst [vmem:[%s2574_s22 + $0x158] sm:$0xff] %v1584_v13  ;;  %v1396_v23 = vadd.f32 1.0, %v2152_v8  ;;  %2179 = vpow2.f32 %v1893_v15  ;;  %v2745_v39 = vadd.f32 %v2482_v12, %v1074_v62  ;;  %v843_v11 = vpop.f32.mrf.mxu0 }
 0x145   : > { %v971_v24 = vpop.f32.mrf.mxu1  ;;  %v2156_v25 = vpop.eup %2155  ;;  %2181 = vrcp.f32 %v1364_v21  ;;  %v1365_v27 = vadd.f32 1.0, %v2154_v22  ;;  %v1862_v31 = vmul.f32 -1.442695, %v2741_v38  ;;  %v1043_v32 = vmul.f32 %v2477_v10, %v843_v11 }
 0x146   : > { %v2158_v34 = vpop.eup %2157  ;;  %2183 = vrcp.f32 %v1396_v23  ;;  %v1397_v35 = vadd.f32 1.0, %v2156_v25  ;;  %v1894_v37 = vmul.f32 -1.442695, %v2745_v39  ;;  %v1075_v40 = vmul.f32 %v2477_v10, %v971_v24  ;;  %v845_v41 = vpop.f32.mrf.mxu0 }
 0x147   : > { %v973_v42 = vpop.f32.mrf.mxu1  ;;  %v2160_v26 = vpop.eup %2159  ;;  %v1553_v43 = vmul.f32 %v2158_v34, %v2629_v48  ;;  %2185 = vrcp.f32 %v1365_v27  ;;  %v2753_v45 = vadd.f32 %v2482_v12, %v1043_v32 }
 0x148   : > { %v2162_v47 = vpop.eup %2161  ;;  %v1585_v30 = vmul.f32 %v2160_v26, %v2633_v49  ;;  %2187 = vrcp.f32 %v1397_v35  ;;  %v2757_v50 = vadd.f32 %v2482_v12, %v1075_v40  ;;  %v848_v52 = vpop.f32.mrf.mxu0 }
 0x149   : > { %v976_v53 = vpop.f32.mrf.mxu1  ;;  %v2164_v55 = vpop.eup %2163  ;;  %1617 = vst [vmem:[%s2574_s22 + $0x60] sm:$0xff] %v1553_v43  ;;  %v1366_v56 = vadd.f32 1.0, %v2162_v47  ;;  %2189 = vpow2.f32 %v1862_v31  ;;  %v1863_v48 = vmul.f32 -1.442695, %v2753_v45  ;;  %v1044_v60 = vmul.f32 %v2477_v10, %v848_v52 }
 0x14a   : > { %v2166_v58 = vpop.eup %2165  ;;  %1649 = vst [vmem:[%s2574_s22 + $0x160] sm:$0xff] %v1585_v30  ;;  %v1398_v63 = vadd.f32 1.0, %v2164_v55  ;;  %2191 = vpow2.f32 %v1894_v37  ;;  %v1895_v49 = vmul.f32 -1.442695, %v2757_v50  ;;  %v1076_v1 = vmul.f32 %v2477_v10, %v976_v53  ;;  %v850_v59 = vpop.f32.mrf.mxu0 }
 0x14b   : > { %v978_v2 = vpop.f32.mrf.mxu1  ;;  %v2168_v44 = vpop.eup %2167  ;;  %v1554_v3 = vmul.f32 %v2166_v58, %v2641_v51  ;;  %2193 = vrcp.f32 %v1366_v56  ;;  %v2767_v4 = vadd.f32 %v2482_v12, %v1044_v60 }
 0x14c   : > { %v2170_v46 = vpop.eup %2169  ;;  %v1586_v5 = vmul.f32 %v2168_v44, %v2645_v54  ;;  %2195 = vrcp.f32 %v1398_v63  ;;  %v2771_v6 = vadd.f32 %v2482_v12, %v1076_v1  ;;  %v851_v9 = vpop.f32.mrf.mxu0  ;;  %v2807_v1 = vld [vmem:[%s2954_s2] ss:$0 sm:$0xff] }
 0x14d   : > { %v979_v13 = vpop.f32.mrf.mxu1  ;;  %v2172_v15 = vpop.eup %2171  ;;  %1618 = vst [vmem:[%s2574_s22 + $0x68] sm:$0xff] %v1554_v3  ;;  %v1367_v62 = vadd.f32 1.0, %v2170_v46  ;;  %2197 = vpow2.f32 %v1863_v48  ;;  %v1864_v51 = vmul.f32 -1.442695, %v2767_v4  ;;  %v1045_v17 = vmul.f32 %v2477_v10, %v851_v9  ;;  %v2818_v9 = vld [vmem:[%s2955_s3] ss:$0 sm:$0xff] }
 0x14e   : > { %v2174_v20 = vpop.eup %2173  ;;  %1650 = vst [vmem:[%s2574_s22 + $0x168] sm:$0xff] %v1586_v5  ;;  %v1399_v8 = vadd.f32 1.0, %v2172_v15  ;;  %2199 = vpow2.f32 %v1895_v49  ;;  %v1896_v54 = vmul.f32 -1.442695, %v2771_v6  ;;  %v1077_v21 = vmul.f32 %v2477_v10, %v979_v13  ;;  %v853_v22 = vpop.f32.mrf.mxu0 }
 0x14f   : > { %v981_v23 = vpop.f32.mrf.mxu1  ;;  %v2176_v11 = vpop.eup %2175  ;;  %v1555_v24 = vmul.f32 %v2174_v20, %v2655_v7  ;;  %2201 = vrcp.f32 %v1367_v62  ;;  %v2781_v25 = vadd.f32 %v2482_v12, %v1045_v17 }
 0x150   : > { %v2178_v27 = vpop.eup %2177  ;;  %v1587_v31 = vmul.f32 %v2176_v11, %v2659_v14  ;;  %2203 = vrcp.f32 %v1399_v8  ;;  %v2785_v32 = vadd.f32 %v2482_v12, %v1077_v21  ;;  %v856_v34 = vpop.f32.mrf.mxu0 }
 0x151   : > { %v984_v35 = vpop.f32.mrf.mxu1  ;;  %v2180_v37 = vpop.eup %2179  ;;  %1619 = vst [vmem:[%s2574_s22 + $0x70] sm:$0xff] %v1555_v24  ;;  %v1368_v40 = vadd.f32 1.0, %v2178_v27  ;;  %2205 = vpow2.f32 %v1864_v51  ;;  %v1865_v7 = vmul.f32 -1.442695, %v2781_v25  ;;  %v1046_v41 = vmul.f32 %v2477_v10, %v856_v34 }
 0x152   : > { %v2182_v42 = vpop.eup %2181  ;;  %1651 = vst [vmem:[%s2574_s22 + $0x170] sm:$0xff] %v1587_v31  ;;  %v1400_v26 = vadd.f32 1.0, %v2180_v37  ;;  %2207 = vpow2.f32 %v1896_v54  ;;  %v1897_v14 = vmul.f32 -1.442695, %v2785_v32  ;;  %v1078_v43 = vmul.f32 %v2477_v10, %v984_v35  ;;  %v858_v47 = vpop.f32.mrf.mxu0 }
 0x153   : > { %v986_v30 = vpop.f32.mrf.mxu1  ;;  %v2184_v52 = vpop.eup %2183  ;;  %v1556_v53 = vmul.f32 %v2182_v42, %v2669_v33  ;;  %2209 = vrcp.f32 %v1368_v40  ;;  %v2795_v55 = vadd.f32 %v2482_v12, %v1046_v41 }
 0x154   : > { %v2186_v56 = vpop.eup %2185  ;;  %v1588_v48 = vmul.f32 %v2184_v52, %v2673_v36  ;;  %2211 = vrcp.f32 %v1400_v26  ;;  %v2799_v60 = vadd.f32 %v2482_v12, %v1078_v43  ;;  %v859_v58 = vpop.f32.mrf.mxu0 }
 0x155   : > { %v987_v63 = vpop.f32.mrf.mxu1  ;;  %v2188_v10 = vpop.eup %2187  ;;  %1620 = vst [vmem:[%s2574_s22 + $0x78] sm:$0xff] %v1556_v53  ;;  %v1557_v49 = vmul.f32 %v2186_v56, %v2683_v57  ;;  %2213 = vpow2.f32 %v1865_v7  ;;  %v1866_v33 = vmul.f32 -1.442695, %v2795_v55  ;;  %v1047_v36 = vmul.f32 %v2807_v1, %v859_v58 }
 0x156   : > { %v2190_v12 = vpop.eup %2189  ;;  %1652 = vst [vmem:[%s2574_s22 + $0x178] sm:$0xff] %v1588_v48  ;;  %v1589_v59 = vmul.f32 %v2188_v10, %v2687_v61  ;;  %2215 = vpow2.f32 %v1897_v14  ;;  %v1898_v2 = vmul.f32 -1.442695, %v2799_v60  ;;  %v1079_v57 = vmul.f32 %v2807_v1, %v987_v63  ;;  %v861_v44 = vpop.f32.mrf.mxu0 }
 0x157   : > { %v989_v3 = vpop.f32.mrf.mxu1  ;;  %v2192_v46 = vpop.eup %2191  ;;  %1621 = vst [vmem:[%s2574_s22 + $0x80] sm:$0xff] %v1557_v49  ;;  %v1369_v5 = vadd.f32 1.0, %v2190_v12  ;;  %2217 = vpow2.f32 %v1866_v33  ;;  %v2821_v13 = vadd.f32 %v2818_v9, %v1047_v36 }
 0x158   : > { %v2194_v61 = vpop.eup %2193  ;;  %1653 = vst [vmem:[%s2574_s22 + $0x180] sm:$0xff] %v1589_v59  ;;  %v1401_v15 = vadd.f32 1.0, %v2192_v46  ;;  %2219 = vpow2.f32 %v1898_v2  ;;  %v2825_v62 = vadd.f32 %v2818_v9, %v1079_v57  ;;  %v864_v51 = vpop.f32.mrf.mxu0 }
 0x159   : > { %v992_v17 = vpop.f32.mrf.mxu1  ;;  %v2196_v20 = vpop.eup %2195  ;;  %v1558_v8 = vmul.f32 %v2194_v61, %v2699_v16  ;;  %2221 = vrcp.f32 %v1369_v5  ;;  %v1867_v54 = vmul.f32 -1.442695, %v2821_v13  ;;  %v1048_v21 = vmul.f32 %v2807_v1, %v864_v51 }
 0x15a   : > { %v2198_v22 = vpop.eup %2197  ;;  %v1590_v23 = vmul.f32 %v2196_v20, %v2703_v0  ;;  %2223 = vrcp.f32 %v1401_v15  ;;  %v1899_v11 = vmul.f32 -1.442695, %v2825_v62  ;;  %v1080_v24 = vmul.f32 %v2807_v1, %v992_v17  ;;  %v866_v27 = vpop.f32.mrf.mxu0 }
 0x15b   : > { %v994_v31 = vpop.f32.mrf.mxu1  ;;  %v2200_v34 = vpop.eup %2199  ;;  %1622 = vst [vmem:[%s2574_s22 + $0x88] sm:$0xff] %v1558_v8  ;;  %v1370_v35 = vadd.f32 1.0, %v2198_v22  ;;  %2225 = vpow2.f32 %v1867_v54  ;;  %v2835_v16 = vadd.f32 %v2818_v9, %v1048_v21 }
 0x15c   : > { %v2202_v37 = vpop.eup %2201  ;;  %1654 = vst [vmem:[%s2574_s22 + $0x188] sm:$0xff] %v1590_v23  ;;  %v1402_v40 = vadd.f32 1.0, %v2200_v34  ;;  %2227 = vpow2.f32 %v1899_v11  ;;  %v2839_v0 = vadd.f32 %v2818_v9, %v1080_v24  ;;  %v867_v7 = vpop.f32.mrf.mxu0 }
 0x15d   : > { %v995_v41 = vpop.f32.mrf.mxu1  ;;  %v2204_v42 = vpop.eup %2203  ;;  %v1559_v26 = vmul.f32 %v2202_v37, %v2713_v18  ;;  %2229 = vrcp.f32 %v1370_v35  ;;  %v1868_v14 = vmul.f32 -1.442695, %v2835_v16  ;;  %v1049_v43 = vmul.f32 %v2807_v1, %v867_v7 }
 0x15e   : > { %v2206_v47 = vpop.eup %2205  ;;  %v1591_v30 = vmul.f32 %v2204_v42, %v2717_v19  ;;  %2231 = vrcp.f32 %v1402_v40  ;;  %v1900_v52 = vmul.f32 -1.442695, %v2839_v0  ;;  %v1081_v53 = vmul.f32 %v2807_v1, %v995_v41  ;;  %v869_v56 = vpop.f32.mrf.mxu0 }
 0x15f   : > { %v997_v48 = vpop.f32.mrf.mxu1  ;;  %v2208_v58 = vpop.eup %2207  ;;  %1623 = vst [vmem:[%s2574_s22 + $0x90] sm:$0xff] %v1559_v26  ;;  %v1371_v63 = vadd.f32 1.0, %v2206_v47  ;;  %2233 = vpow2.f32 %v1868_v14  ;;  %v2849_v18 = vadd.f32 %v2818_v9, %v1049_v43 }
 0x160   : > { %v2210_v10 = vpop.eup %2209  ;;  %1655 = vst [vmem:[%s2574_s22 + $0x190] sm:$0xff] %v1591_v30  ;;  %v1403_v49 = vadd.f32 1.0, %v2208_v58  ;;  %2235 = vpow2.f32 %v1900_v52  ;;  %v2853_v19 = vadd.f32 %v2818_v9, %v1081_v53  ;;  %v872_v33 = vpop.f32.mrf.mxu0 }
 0x161   : > { %v1000_v36 = vpop.f32.mrf.mxu1  ;;  %v2212_v12 = vpop.eup %2211  ;;  %v1560_v59 = vmul.f32 %v2210_v10, %v2727_v28  ;;  %2237 = vrcp.f32 %v1371_v63  ;;  %v1869_v2 = vmul.f32 -1.442695, %v2849_v18  ;;  %v1050_v57 = vmul.f32 %v2807_v1, %v872_v33 }
 0x162   : > { %v2214_v44 = vpop.eup %2213  ;;  %v1592_v3 = vmul.f32 %v2212_v12, %v2731_v29  ;;  %2239 = vrcp.f32 %v1403_v49  ;;  %v1901_v46 = vmul.f32 -1.442695, %v2853_v19  ;;  %v1082_v5 = vmul.f32 %v2807_v1, %v1000_v36  ;;  %v874_v61 = vpop.f32.mrf.mxu0 }
 0x163   : > { %v1002_v15 = vpop.f32.mrf.mxu1  ;;  %v2216_v51 = vpop.eup %2215  ;;  %1624 = vst [vmem:[%s2574_s22 + $0x98] sm:$0xff] %v1560_v59  ;;  %v1372_v17 = vadd.f32 1.0, %v2214_v44  ;;  %2241 = vpow2.f32 %v1869_v2  ;;  %v2863_v28 = vadd.f32 %v2818_v9, %v1050_v57 }
 0x164   : > { %v2218_v20 = vpop.eup %2217  ;;  %1656 = vst [vmem:[%s2574_s22 + $0x198] sm:$0xff] %v1592_v3  ;;  %v1404_v8 = vadd.f32 1.0, %v2216_v51  ;;  %2243 = vpow2.f32 %v1901_v46  ;;  %v2867_v29 = vadd.f32 %v2818_v9, %v1082_v5  ;;  %v875_v54 = vpop.f32.mrf.mxu0 }
 0x165   : > { %v1003_v21 = vpop.f32.mrf.mxu1  ;;  %v2220_v22 = vpop.eup %2219  ;;  %2245 = vrcp.f32 %v1372_v17  ;;  %v1373_v23 = vadd.f32 1.0, %v2218_v20  ;;  %v1870_v11 = vmul.f32 -1.442695, %v2863_v28  ;;  %v1051_v24 = vmul.f32 %v2807_v1, %v875_v54 }
 0x166   : > { %v2222_v27 = vpop.eup %2221  ;;  %2247 = vrcp.f32 %v1404_v8  ;;  %v1405_v31 = vadd.f32 1.0, %v2220_v22  ;;  %v1902_v34 = vmul.f32 -1.442695, %v2867_v29  ;;  %v1083_v35 = vmul.f32 %v2807_v1, %v1003_v21  ;;  %v877_v37 = vpop.f32.mrf.mxu0 }
 0x167   : > { %v1005_v40 = vpop.f32.mrf.mxu1  ;;  %v2224_v7 = vpop.eup %2223  ;;  %v1561_v41 = vmul.f32 %v2222_v27, %v2741_v38  ;;  %2249 = vrcp.f32 %v1373_v23  ;;  %v2875_v42 = vadd.f32 %v2818_v9, %v1051_v24 }
 0x168   : > { %v2226_v26 = vpop.eup %2225  ;;  %v1593_v14 = vmul.f32 %v2224_v7, %v2745_v39  ;;  %2251 = vrcp.f32 %v1405_v31  ;;  %v2879_v43 = vadd.f32 %v2818_v9, %v1083_v35  ;;  %v880_v47 = vpop.f32.mrf.mxu0 }
 0x169   : > { %v1008_v30 = vpop.f32.mrf.mxu1  ;;  %v2228_v52 = vpop.eup %2227  ;;  %1625 = vst [vmem:[%s2574_s22 + $0xa0] sm:$0xff] %v1561_v41  ;;  %v1374_v53 = vadd.f32 1.0, %v2226_v26  ;;  %2253 = vpow2.f32 %v1870_v11  ;;  %v1871_v38 = vmul.f32 -1.442695, %v2875_v42  ;;  %v1052_v56 = vmul.f32 %v2807_v1, %v880_v47 }
 0x16a   : > { %v2230_v48 = vpop.eup %2229  ;;  %1657 = vst [vmem:[%s2574_s22 + $0x1a0] sm:$0xff] %v1593_v14  ;;  %v1406_v58 = vadd.f32 1.0, %v2228_v52  ;;  %2255 = vpow2.f32 %v1902_v34  ;;  %v1903_v39 = vmul.f32 -1.442695, %v2879_v43  ;;  %v1084_v63 = vmul.f32 %v2807_v1, %v1008_v30  ;;  %v882_v10 = vpop.f32.mrf.mxu0 }
 0x16b   : > { %v1010_v49 = vpop.f32.mrf.mxu1  ;;  %v2232_v33 = vpop.eup %2231  ;;  %v1562_v36 = vmul.f32 %v2230_v48, %v2753_v45  ;;  %2257 = vrcp.f32 %v1374_v53  ;;  %v2889_v12 = vadd.f32 %v2818_v9, %v1052_v56 }
 0x16c   : > { %v2234_v59 = vpop.eup %2233  ;;  %v1594_v2 = vmul.f32 %v2232_v33, %v2757_v50  ;;  %2259 = vrcp.f32 %v1406_v58  ;;  %v2893_v57 = vadd.f32 %v2818_v9, %v1084_v63  ;;  %v883_v44 = vpop.f32.mrf.mxu0 }
 0x16d   : > { %v1011_v3 = vpop.f32.mrf.mxu1  ;;  %v2236_v46 = vpop.eup %2235  ;;  %1626 = vst [vmem:[%s2574_s22 + $0xa8] sm:$0xff] %v1562_v36  ;;  %v1375_v5 = vadd.f32 1.0, %v2234_v59  ;;  %2261 = vpow2.f32 %v1871_v38  ;;  %v1872_v45 = vmul.f32 -1.442695, %v2889_v12  ;;  %v1053_v61 = vmul.f32 %v2807_v1, %v883_v44 }
 0x16e   : > { %v2238_v15 = vpop.eup %2237  ;;  %1658 = vst [vmem:[%s2574_s22 + $0x1a8] sm:$0xff] %v1594_v2  ;;  %v1407_v51 = vadd.f32 1.0, %v2236_v46  ;;  %2263 = vpow2.f32 %v1903_v39  ;;  %v1904_v50 = vmul.f32 -1.442695, %v2893_v57  ;;  %v1085_v17 = vmul.f32 %v2807_v1, %v1011_v3  ;;  %v885_v20 = vpop.f32.mrf.mxu0 }
 0x16f   : > { %v1013_v8 = vpop.f32.mrf.mxu1  ;;  %v2240_v54 = vpop.eup %2239  ;;  %v1563_v21 = vmul.f32 %v2238_v15, %v2767_v4  ;;  %2265 = vrcp.f32 %v1375_v5  ;;  %v2903_v22 = vadd.f32 %v2818_v9, %v1053_v61 }
 0x170   : > { %v2242_v23 = vpop.eup %2241  ;;  %v1595_v11 = vmul.f32 %v2240_v54, %v2771_v6  ;;  %2267 = vrcp.f32 %v1407_v51  ;;  %v2907_v24 = vadd.f32 %v2818_v9, %v1085_v17 }
 0x171   : > { %v2244_v27 = vpop.eup %2243  ;;  %1627 = vst [vmem:[%s2574_s22 + $0xb0] sm:$0xff] %v1563_v21  ;;  %v1376_v1 = vadd.f32 1.0, %v2242_v23  ;;  %2269 = vpow2.f32 %v1872_v45  ;;  %v1873_v31 = vmul.f32 -1.442695, %v2903_v22 }
 0x172   : > { %v2246_v34 = vpop.eup %2245  ;;  %1659 = vst [vmem:[%s2574_s22 + $0x1b0] sm:$0xff] %v1595_v11  ;;  %v1408_v4 = vadd.f32 1.0, %v2244_v27  ;;  %2271 = vpow2.f32 %v1904_v50  ;;  %v1905_v35 = vmul.f32 -1.442695, %v2907_v24 }
 0x173   : > { %v2248_v6 = vpop.eup %2247  ;;  %v1564_v37 = vmul.f32 %v2246_v34, %v2781_v25  ;;  %2273 = vrcp.f32 %v1376_v1 }
 0x174   : > { %v2250_v9 = vpop.eup %2249  ;;  %v1596_v40 = vmul.f32 %v2248_v6, %v2785_v32  ;;  %2275 = vrcp.f32 %v1408_v4 }
 0x175   : > { %v2252_v7 = vpop.eup %2251  ;;  %1628 = vst [vmem:[%s2574_s22 + $0xb8] sm:$0xff] %v1564_v37  ;;  %v1565_v41 = vmul.f32 %v2250_v9, %v2795_v55  ;;  %2277 = vpow2.f32 %v1873_v31 }
 0x176   : > { %v2254_v26 = vpop.eup %2253  ;;  %1660 = vst [vmem:[%s2574_s22 + $0x1b8] sm:$0xff] %v1596_v40  ;;  %v1597_v14 = vmul.f32 %v2252_v7, %v2799_v60  ;;  %2279 = vpow2.f32 %v1905_v35 }
 0x177   : > { %v2256_v47 = vpop.eup %2255  ;;  %1629 = vst [vmem:[%s2574_s22 + $0xc0] sm:$0xff] %v1565_v41  ;;  %v1377_v25 = vadd.f32 1.0, %v2254_v26 }
 0x178   : > { %v2258_v30 = vpop.eup %2257  ;;  %1661 = vst [vmem:[%s2574_s22 + $0x1c0] sm:$0xff] %v1597_v14  ;;  %v1409_v52 = vadd.f32 1.0, %v2256_v47 }
 0x179   : > { %v2260_v32 = vpop.eup %2259  ;;  %v1566_v53 = vmul.f32 %v2258_v30, %v2821_v13  ;;  %2281 = vrcp.f32 %v1377_v25 }
 0x17a   : > { %v2262_v38 = vpop.eup %2261  ;;  %v1598_v55 = vmul.f32 %v2260_v32, %v2825_v62  ;;  %2283 = vrcp.f32 %v1409_v52 }
 0x17b   : > { %v2264_v56 = vpop.eup %2263  ;;  %1630 = vst [vmem:[%s2574_s22 + $0xc8] sm:$0xff] %v1566_v53  ;;  %v1378_v60 = vadd.f32 1.0, %v2262_v38 }
 0x17c   : > { %v2266_v48 = vpop.eup %2265  ;;  %1662 = vst [vmem:[%s2574_s22 + $0x1c8] sm:$0xff] %v1598_v55  ;;  %v1410_v58 = vadd.f32 1.0, %v2264_v56 }
 0x17d   : > { %v2268_v39 = vpop.eup %2267  ;;  %v1567_v63 = vmul.f32 %v2266_v48, %v2835_v16  ;;  %2285 = vrcp.f32 %v1378_v60 }
 0x17e   : > { %v2270_v10 = vpop.eup %2269  ;;  %v1599_v13 = vmul.f32 %v2268_v39, %v2839_v0  ;;  %2287 = vrcp.f32 %v1410_v58 }
 0x17f   : > { %v2272_v49 = vpop.eup %2271  ;;  %1631 = vst [vmem:[%s2574_s22 + $0xd0] sm:$0xff] %v1567_v63  ;;  %v1379_v62 = vadd.f32 1.0, %v2270_v10 }
 0x180   : > { %v2274_v33 = vpop.eup %2273  ;;  %1663 = vst [vmem:[%s2574_s22 + $0x1d0] sm:$0xff] %v1599_v13  ;;  %v1411_v36 = vadd.f32 1.0, %v2272_v49 }
 0x181   : > { %v2276_v59 = vpop.eup %2275  ;;  %v1568_v2 = vmul.f32 %v2274_v33, %v2849_v18  ;;  %2289 = vrcp.f32 %v1379_v62 }
 0x182   : > { %v2278_v44 = vpop.eup %2277  ;;  %v1600_v16 = vmul.f32 %v2276_v59, %v2853_v19  ;;  %2291 = vrcp.f32 %v1411_v36 }
 0x183   : > { %v2280_v3 = vpop.eup %2279  ;;  %1632 = vst [vmem:[%s2574_s22 + $0xd8] sm:$0xff] %v1568_v2  ;;  %v1380_v0 = vadd.f32 1.0, %v2278_v44 }
 0x184   : > { %1664 = vst [vmem:[%s2574_s22 + $0x1d8] sm:$0xff] %v1600_v16  ;;  %v1412_v46 = vadd.f32 1.0, %v2280_v3 }
 0x185   : > { %2293 = vrcp.f32 %v1380_v0 }
 0x186   : > { %v2282_v5 = vpop.eup %2281  ;;  %2295 = vrcp.f32 %v1412_v46 }
 0x187   : > { %v2284_v45 = vpop.eup %2283  ;;  %v1569_v18 = vmul.f32 %v2282_v5, %v2863_v28 }
 0x188   : > { %v1601_v61 = vmul.f32 %v2284_v45, %v2867_v29 }
 0x189   : > { %1633 = vst [vmem:[%s2574_s22 + $0xe0] sm:$0xff] %v1569_v18 }
 0x18a   : > { %v2286_v19 = vpop.eup %2285  ;;  %1665 = vst [vmem:[%s2574_s22 + $0x1e0] sm:$0xff] %v1601_v61 }
 0x18b   : > { %v2288_v15 = vpop.eup %2287  ;;  %v1570_v51 = vmul.f32 %v2286_v19, %v2875_v42 }
 0x18c   : > { %v1602_v50 = vmul.f32 %v2288_v15, %v2879_v43 }
 0x18d   : > { %1634 = vst [vmem:[%s2574_s22 + $0xe8] sm:$0xff] %v1570_v51 }
 0x18e   : > { %v2290_v17 = vpop.eup %2289  ;;  %1666 = vst [vmem:[%s2574_s22 + $0x1e8] sm:$0xff] %v1602_v50 }
 0x18f   : > { %v2292_v20 = vpop.eup %2291  ;;  %v1571_v8 = vmul.f32 %v2290_v17, %v2889_v12 }
 0x190   : > { %v1603_v28 = vmul.f32 %v2292_v20, %v2893_v57 }
 0x191   : > { %1635 = vst [vmem:[%s2574_s22 + $0xf0] sm:$0xff] %v1571_v8 }
 0x192   : > { %v2294_v29 = vpop.eup %2293  ;;  %1667 = vst [vmem:[%s2574_s22 + $0x1f0] sm:$0xff] %v1603_v28 }
 0x193   : > { %v2296_v54 = vpop.eup %2295  ;;  %v1572_v21 = vmul.f32 %v2294_v29, %v2903_v22 }
 0x194   : > { %v1604_v23 = vmul.f32 %v2296_v54, %v2907_v24 }
 0x195   : > { %1636 = vst [vmem:[%s2574_s22 + $0xf8] sm:$0xff] %v1572_v21 }
 0x196   : > { %1668 = vst [vmem:[%s2574_s22 + $0x1f8] sm:$0xff] %v1604_v23 }
 0x197 PF: > { %s14_s15 = sadd.s32 1, %s2305_s15  }
 0x198   : > { %p11_p4 = scmp.ge.s32.totalorder %s14_s15, 4  }
 0x19a   :  { %13 = sbr.rel (!%p11_p4) target bundleno = 1 (0x1), region = 66 }

// kernel: effi_b7_forward.18
= control target key start
LH: loop header
LB: loop body
LE: loop exit
PB: predicated region body
PF: predicated region fallthrough
CT: control target
= control target key end

     0   :  { %vm45_vm0 = vcmask 261120   ;;  %s1165_s0 = inlined_call_operand.vmem [shape: f32[2,64,32], index: 0, kind: input, shape index: {}]   ;;  %s1166_s1 = inlined_call_operand.vmem [shape: f32[2,64,32], index: 1, kind: input, shape index: {}]   ;;  %s1167_s2 = inlined_call_operand.vmem [shape: f32[2,64,32], index: 2, kind: output, shape index: {0}]   ;;  %s1168_s3 = inlined_call_operand.vmem [shape: f32[2,64,32], index: 3, kind: output, shape index: {1}]  }
   0x1   :  { %v490_v0 = vld [vmem:[%s1165_s0] sm:$0xff]  ;;  %v495_v1 = vld [vmem:[%s1165_s0 + $0x8] sm:$0xff]  ;;  %v500_v2 = vld [vmem:[%s1165_s0 + $0x10] sm:$0xff] }
   0x2   :  { %v505_v3 = vld [vmem:[%s1165_s0 + $0x18] sm:$0xff]  ;;  %v46_v4 = vsel %vm45_vm0, %v490_v0, 0.0  ;;  %v47_v5 = vsel %vm45_vm0, %v495_v1, 0.0  ;;  %v49_v6 = vsel %vm45_vm0, %v500_v2, 0.0  ;;  %v516_v7 = vld [vmem:[%s1165_s0 + $0x20] sm:$0xff]  ;;  %v526_v10 = vld [vmem:[%s1166_s1 + $0x8] sm:$0xff] }
   0x3   :  { %v521_v8 = vld [vmem:[%s1166_s1] sm:$0xff]  ;;  %v48_v9 = vadd.f32 %v47_v5, %v46_v4  ;;  %v531_v11 = vld [vmem:[%s1166_s1 + $0x10] sm:$0xff]  ;;  %v536_v12 = vld [vmem:[%s1166_s1 + $0x18] sm:$0xff]  ;;  %v51_v13 = vsel %vm45_vm0, %v505_v3, 0.0  ;;  %v168_v18 = vsel %vm45_vm0, %v526_v10, 0.0  ;;  %v53_v21 = vsel %vm45_vm0, %v516_v7, 0.0 }
   0x4   :  { %v167_v14 = vsel %vm45_vm0, %v521_v8, 0.0  ;;  %v545_v15 = vld [vmem:[%s1165_s0 + $0x28] sm:$0xff]  ;;  %v550_v16 = vld [vmem:[%s1165_s0 + $0x30] sm:$0xff]  ;;  %v170_v19 = vsel %vm45_vm0, %v531_v11, 0.0  ;;  %v559_v20 = vld [vmem:[%s1166_s1 + $0x20] sm:$0xff]  ;;  %v172_v27 = vsel %vm45_vm0, %v536_v12, 0.0 }
   0x5   :  { %v50_v17 = vadd.f32 %v49_v6, %v48_v9  ;;  %v169_v22 = vadd.f32 %v168_v18, %v167_v14  ;;  %v566_v23 = vld [vmem:[%s1165_s0 + $0x40] sm:$0xff]  ;;  %v571_v24 = vld [vmem:[%s1165_s0 + $0x48] sm:$0xff]  ;;  %v583_v28 = vld [vmem:[%s1165_s0 + $0x50] sm:$0xff]  ;;  %v55_v33 = vsel %vm45_vm0, %v545_v15, 0.0  ;;  %v57_v39 = vsel %vm45_vm0, %v550_v16, 0.0 }
   0x6   :  { %v576_v25 = vld [vmem:[%s1166_s1 + $0x28] sm:$0xff]  ;;  %v588_v29 = vld [vmem:[%s1165_s0 + $0x58] sm:$0xff]  ;;  %v67_v30 = vsel %vm45_vm0, %v566_v23, 0.0  ;;  %v68_v31 = vsel %vm45_vm0, %v571_v24, 0.0  ;;  %v604_v35 = vld [vmem:[%s1165_s0 + $0x60] sm:$0xff]  ;;  %v70_v37 = vsel %vm45_vm0, %v583_v28, 0.0 }
   0x7   :  { %v52_v26 = vadd.f32 %v51_v13, %v50_v17  ;;  %v597_v32 = vld [vmem:[%s1165_s0 + $0x38] sm:$0xff]  ;;  %v171_v34 = vadd.f32 %v170_v19, %v169_v22  ;;  %v69_v36 = vadd.f32 %v68_v31, %v67_v30  ;;  %v174_v40 = vsel %vm45_vm0, %v559_v20, 0.0  ;;  %v615_v41 = vld [vmem:[%s1166_s1 + $0x40] sm:$0xff]  ;;  %v620_v42 = vld [vmem:[%s1166_s1 + $0x48] sm:$0xff] }
   0x8   :  { %v625_v43 = vld [vmem:[%s1166_s1 + $0x50] sm:$0xff]  ;;  %v72_v44 = vsel %vm45_vm0, %v588_v29, 0.0  ;;  %v176_v47 = vsel %vm45_vm0, %v576_v25, 0.0  ;;  %v639_v48 = vld [vmem:[%s1165_s0 + $0x68] sm:$0xff]  ;;  %v644_v49 = vld [vmem:[%s1166_s1 + $0x58] sm:$0xff]  ;;  %v188_v51 = vsel %vm45_vm0, %v615_v41, 0.0 }
   0x9   :  { %v54_v38 = vadd.f32 %v53_v21, %v52_v26  ;;  %v632_v45 = vld [vmem:[%s1166_s1 + $0x30] sm:$0xff]  ;;  %v173_v46 = vadd.f32 %v172_v27, %v171_v34  ;;  %v71_v50 = vadd.f32 %v70_v37, %v69_v36  ;;  %v74_v53 = vsel %vm45_vm0, %v604_v35, 0.0  ;;  %v657_v56 = vld [vmem:[%s1166_s1 + $0x38] sm:$0xff]  ;;  %v669_v60 = vld [vmem:[%s1166_s1 + $0x60] sm:$0xff] }
   0xa   :  { %v189_v54 = vsel %vm45_vm0, %v620_v42, 0.0  ;;  %v191_v55 = vsel %vm45_vm0, %v625_v43, 0.0  ;;  %v59_v57 = vsel %vm45_vm0, %v597_v32, 0.0  ;;  %v664_v59 = vld [vmem:[%s1165_s0 + $0x70] sm:$0xff]  ;;  %v178_v4 = vsel %vm45_vm0, %v632_v45, 0.0  ;;  %v680_v13 = vld [vmem:[%s1165_s0 + $0x78] sm:$0xff] }
   0xb   :  { %v56_v52 = vadd.f32 %v55_v33, %v54_v38  ;;  %v175_v58 = vadd.f32 %v174_v40, %v173_v46  ;;  %v73_v61 = vadd.f32 %v72_v44, %v71_v50  ;;  %v190_v62 = vadd.f32 %v189_v54, %v188_v51  ;;  %v685_v14 = vld [vmem:[%s1166_s1 + $0x68] sm:$0xff]  ;;  %v696_v30 = vld [vmem:[%s1166_s1 + $0x70] sm:$0xff]  ;;  %v707_v50 = vld [vmem:[%s1166_s1 + $0x78] sm:$0xff] }
   0xc   :  { %v76_v5 = vsel %vm45_vm0, %v639_v48, 0.0  ;;  %v193_v6 = vsel %vm45_vm0, %v644_v49, 0.0  ;;  %v180_v21 = vsel %vm45_vm0, %v657_v56, 0.0  ;;  %v78_v22 = vsel %vm45_vm0, %v664_v59, 0.0 }
   0xd   :  { %v58_v63 = vadd.f32 %v57_v39, %v56_v52  ;;  %v177_v9 = vadd.f32 %v176_v47, %v175_v58  ;;  %v75_v17 = vadd.f32 %v74_v53, %v73_v61  ;;  %v192_v18 = vadd.f32 %v191_v55, %v190_v62 }
   0xe   :  { %v195_v26 = vsel %vm45_vm0, %v669_v60, 0.0  ;;  %v80_v36 = vsel %vm45_vm0, %v680_v13, 0.0  ;;  %v197_v37 = vsel %vm45_vm0, %v685_v14, 0.0  ;;  %v199_v46 = vsel %vm45_vm0, %v696_v30, 0.0 }
   0xf   :  { %v60_v19 = vadd.f32 %v59_v57, %v58_v63  ;;  %v179_v27 = vadd.f32 %v178_v4, %v177_v9  ;;  %v77_v31 = vadd.f32 %v76_v5, %v75_v17  ;;  %v194_v33 = vadd.f32 %v193_v6, %v192_v18 }
  0x10   :  { %v201_v61 = vsel %vm45_vm0, %v707_v50, 0.0 }
  0x11   :  { %v61_v34 = vrot.slane %v60_v19, 4  ;;  %v181_v38 = vadd.f32 %v180_v21, %v179_v27  ;;  %v79_v39 = vadd.f32 %v78_v22, %v77_v31  ;;  %v196_v40 = vadd.f32 %v195_v26, %v194_v33 }
  0x13   :  { %v62_v44 = vadd.f32 %v61_v34, %v60_v19  ;;  %v182_v47 = vrot.slane %v181_v38, 4  ;;  %v81_v51 = vadd.f32 %v80_v36, %v79_v39  ;;  %v198_v52 = vadd.f32 %v197_v37, %v196_v40 }
  0x15   :  { %v63_v53 = vrot.slane %v62_v44, 2  ;;  %v183_v54 = vadd.f32 %v182_v47, %v181_v38  ;;  %v82_v55 = vrot.slane %v81_v51, 4  ;;  %v200_v57 = vadd.f32 %v199_v46, %v198_v52 }
  0x17   :  { %v64_v58 = vadd.f32 %v63_v53, %v62_v44  ;;  %v184_v62 = vrot.slane %v183_v54, 2  ;;  %v83_v63 = vadd.f32 %v82_v55, %v81_v51  ;;  %v202_v9 = vadd.f32 %v201_v61, %v200_v57 }
  0x19   :  { %v65_v4 = vrot.slane %v64_v58, 1  ;;  %v185_v5 = vadd.f32 %v184_v62, %v183_v54  ;;  %v84_v6 = vrot.slane %v83_v63, 2  ;;  %v203_v22 = vrot.slane %v202_v9, 4 }
  0x1b   :  { %v66_v17 = vadd.f32 %v65_v4, %v64_v58  ;;  %v186_v18 = vrot.slane %v185_v5, 1  ;;  %v85_v21 = vadd.f32 %v84_v6, %v83_v63  ;;  %v204_v38 = vadd.f32 %v203_v22, %v202_v9 }
  0x1d   :  { %v711_v19 = vmul.f32 0.015625, %v66_v17  ;;  %v187_v36 = vadd.f32 %v186_v18, %v185_v5  ;;  %v86_v53 = vrot.slane %v85_v21, 1  ;;  %v205_v58 = vrot.slane %v204_v38, 2 }
  0x1f   :  { %v715_v26 = vsub.f32 %v490_v0, %v711_v19  ;;  %v719_v27 = vsub.f32 %v495_v1, %v711_v19  ;;  %v723_v31 = vsub.f32 %v500_v2, %v711_v19  ;;  %v727_v33 = vsub.f32 %v505_v3, %v711_v19 }
  0x20   :  { %v731_v34 = vsub.f32 %v516_v7, %v711_v19  ;;  %v735_v0 = vsub.f32 %v545_v15, %v711_v19  ;;  %v739_v1 = vsub.f32 %v550_v16, %v711_v19  ;;  %v751_v15 = vsub.f32 %v597_v32, %v711_v19 }
  0x21   :  { %v107_v2 = vmul.f32 %v715_v26, %v715_v26  ;;  %v108_v3 = vmul.f32 %v719_v27, %v719_v27  ;;  %v109_v37 = vmul.f32 %v723_v31, %v723_v31  ;;  %v110_v7 = vmul.f32 %v727_v33, %v727_v33 }
  0x22   :  { %v111_v16 = vmul.f32 %v731_v34, %v731_v34  ;;  %v112_v46 = vmul.f32 %v735_v0, %v735_v0  ;;  %v113_v47 = vmul.f32 %v739_v1, %v739_v1  ;;  %v763_v52 = vmul.f32 0.015625, %v187_v36 }
  0x23   :  { %v123_v39 = vsel %vm45_vm0, %v107_v2, 0.0  ;;  %v124_v40 = vsel %vm45_vm0, %v108_v3, 0.0  ;;  %v126_v44 = vsel %vm45_vm0, %v109_v37, 0.0  ;;  %v128_v32 = vsel %vm45_vm0, %v110_v7, 0.0 }
  0x24   :  { %v125_v51 = vadd.f32 %v124_v40, %v123_v39  ;;  %v114_v54 = vmul.f32 %v751_v15, %v751_v15  ;;  %v130_v57 = vsel %vm45_vm0, %v111_v16, 0.0  ;;  %v770_v61 = vsub.f32 %v521_v8, %v763_v52 }
  0x25   :  { %v774_v62 = vsub.f32 %v526_v10, %v763_v52  ;;  %v778_v63 = vsub.f32 %v531_v11, %v763_v52  ;;  %v782_v4 = vsub.f32 %v536_v12, %v763_v52  ;;  %v132_v6 = vsel %vm45_vm0, %v112_v46, 0.0 }
  0x26   :  { %v127_v55 = vadd.f32 %v126_v44, %v125_v51  ;;  %v134_v9 = vsel %vm45_vm0, %v113_v47, 0.0  ;;  %v788_v8 = vsub.f32 %v559_v20, %v763_v52  ;;  %v792_v10 = vsub.f32 %v576_v25, %v763_v52 }
  0x27   :  { %v227_v11 = vmul.f32 %v770_v61, %v770_v61  ;;  %v228_v12 = vmul.f32 %v774_v62, %v774_v62  ;;  %v229_v17 = vmul.f32 %v778_v63, %v778_v63  ;;  %v802_v22 = vsub.f32 %v632_v45, %v763_v52 }
  0x28   :  { %v129_v5 = vadd.f32 %v128_v32, %v127_v55  ;;  %v230_v20 = vmul.f32 %v782_v4, %v782_v4  ;;  %v87_v36 = vadd.f32 %v86_v53, %v85_v21  ;;  %v808_v25 = vsub.f32 %v657_v56, %v763_v52 }
  0x29   :  { %v231_v2 = vmul.f32 %v788_v8, %v788_v8  ;;  %v243_v3 = vsel %vm45_vm0, %v227_v11, 0.0  ;;  %v244_v37 = vsel %vm45_vm0, %v228_v12, 0.0  ;;  %v246_v45 = vsel %vm45_vm0, %v229_v17, 0.0 }
  0x2a   :  { %v131_v18 = vadd.f32 %v130_v57, %v129_v5  ;;  %v245_v16 = vadd.f32 %v244_v37, %v243_v3  ;;  %v136_v39 = vsel %vm45_vm0, %v114_v54, 0.0  ;;  %v232_v21 = vmul.f32 %v792_v10, %v792_v10 }
  0x2b   :  { %v248_v40 = vsel %vm45_vm0, %v230_v20, 0.0  ;;  %v233_v44 = vmul.f32 %v802_v22, %v802_v22  ;;  %v821_v47 = vmul.f32 0.015625, %v87_v36  ;;  %v234_v51 = vmul.f32 %v808_v25, %v808_v25 }
  0x2c   :  { %v133_v7 = vadd.f32 %v132_v6, %v131_v18  ;;  %v247_v46 = vadd.f32 %v246_v45, %v245_v16  ;;  %v250_v32 = vsel %vm45_vm0, %v231_v2, 0.0  ;;  %v206_v53 = vadd.f32 %v205_v58, %v204_v38 }
  0x2d   :  { %v828_v57 = vsub.f32 %v566_v23, %v821_v47  ;;  %v832_v5 = vsub.f32 %v571_v24, %v821_v47  ;;  %v252_v6 = vsel %vm45_vm0, %v232_v21, 0.0  ;;  %v841_v11 = vsub.f32 %v588_v29, %v821_v47 }
  0x2e   :  { %v135_v56 = vadd.f32 %v134_v9, %v133_v7  ;;  %v249_v54 = vadd.f32 %v248_v40, %v247_v46  ;;  %v837_v9 = vsub.f32 %v583_v28, %v821_v47  ;;  %v845_v38 = vsub.f32 %v604_v35, %v821_v47 }
  0x2f   :  { %v254_v12 = vsel %vm45_vm0, %v233_v44, 0.0  ;;  %v850_v24 = vsub.f32 %v639_v48, %v821_v47  ;;  %v115_v28 = vmul.f32 %v828_v57, %v828_v57  ;;  %v116_v17 = vmul.f32 %v832_v5, %v832_v5 }
  0x30   :  { %v137_v55 = vadd.f32 %v136_v39, %v135_v56  ;;  %v251_v58 = vadd.f32 %v250_v32, %v249_v54  ;;  %v117_v29 = vmul.f32 %v837_v9, %v837_v9  ;;  %v118_v35 = vmul.f32 %v841_v11, %v841_v11 }
  0x31   :  { %v256_v36 = vsel %vm45_vm0, %v234_v51, 0.0  ;;  %v863_v48 = vsub.f32 %v664_v59, %v821_v47  ;;  %v119_v2 = vmul.f32 %v845_v38, %v845_v38  ;;  %v144_v3 = vsel %vm45_vm0, %v115_v28, 0.0 }
  0x32   :  { %v138_v23 = vrot.slane %v137_v55, 4  ;;  %v253_v20 = vadd.f32 %v252_v6, %v251_v58  ;;  %v145_v37 = vsel %vm45_vm0, %v116_v17, 0.0  ;;  %v207_v7 = vrot.slane %v206_v53, 1 }
  0x33   :  { %v146_v39 = vadd.f32 %v145_v37, %v144_v3  ;;  %v147_v21 = vsel %vm45_vm0, %v117_v29, 0.0  ;;  %v872_v40 = vsub.f32 %v680_v13, %v821_v47  ;;  %v120_v59 = vmul.f32 %v850_v24, %v850_v24 }
  0x34   :  { %v139_v18 = vadd.f32 %v138_v23, %v137_v55  ;;  %v255_v45 = vadd.f32 %v254_v12, %v253_v20  ;;  %v149_v56 = vsel %vm45_vm0, %v118_v35, 0.0  ;;  %v121_v51 = vmul.f32 %v863_v48, %v863_v48 }
  0x35   :  { %v148_v32 = vadd.f32 %v147_v21, %v146_v39  ;;  %v151_v55 = vsel %vm45_vm0, %v119_v2, 0.0  ;;  %v208_v54 = vadd.f32 %v207_v7, %v206_v53  ;;  %v122_v13 = vmul.f32 %v872_v40, %v872_v40 }
  0x36   :  { %v140_v16 = vrot.slane %v139_v18, 2  ;;  %v257_v46 = vadd.f32 %v256_v36, %v255_v45  ;;  %v153_v12 = vsel %vm45_vm0, %v120_v59, 0.0 }
  0x37   :  { %v150_v58 = vadd.f32 %v149_v56, %v148_v32  ;;  %v883_v28 = vmul.f32 0.015625, %v208_v54 }
  0x38   :  { %v141_v44 = vadd.f32 %v140_v16, %v139_v18  ;;  %v258_v23 = vrot.slane %v257_v46, 4  ;;  %v155_v18 = vsel %vm45_vm0, %v121_v51, 0.0  ;;  %v157_v16 = vsel %vm45_vm0, %v122_v13, 0.0 }
  0x39   :  { %v152_v35 = vadd.f32 %v151_v55, %v150_v58  ;;  %v888_v20 = vsub.f32 %v615_v41, %v883_v28  ;;  %v892_v53 = vsub.f32 %v620_v42, %v883_v28  ;;  %v896_v36 = vsub.f32 %v625_v43, %v883_v28 }
  0x3a   :  { %v142_v6 = vrot.slane %v141_v44, 1  ;;  %v259_v29 = vadd.f32 %v258_v23, %v257_v46  ;;  %v900_v2 = vsub.f32 %v644_v49, %v883_v28  ;;  %v905_v41 = vsub.f32 %v669_v60, %v883_v28 }
  0x3b   :  { %v154_v7 = vadd.f32 %v153_v12, %v152_v35  ;;  %v235_v42 = vmul.f32 %v888_v20, %v888_v20  ;;  %v236_v49 = vmul.f32 %v892_v53, %v892_v53  ;;  %v237_v21 = vmul.f32 %v896_v36, %v896_v36 }
  0x3c   :  { %v143_v17 = vadd.f32 %v142_v6, %v141_v44  ;;  %v260_v37 = vrot.slane %v259_v29, 2  ;;  %v238_v59 = vmul.f32 %v900_v2, %v900_v2  ;;  %v920_v44 = vsub.f32 %v685_v14, %v883_v28 }
  0x3d   :  { %v156_v43 = vadd.f32 %v155_v18, %v154_v7  ;;  %v924_v46 = vsub.f32 %v696_v30, %v883_v28  ;;  %v264_v51 = vsel %vm45_vm0, %v235_v42, 0.0  ;;  %v265_v32 = vsel %vm45_vm0, %v236_v49, 0.0 }
  0x3e   :  { %v165_v3 = vmul.f32 0.015625, %v143_v17  ;;  %v261_v45 = vadd.f32 %v260_v37, %v259_v29  ;;  %v267_v55 = vsel %vm45_vm0, %v237_v21, 0.0  ;;  %v239_v23 = vmul.f32 %v905_v41, %v905_v41 }
  0x3f   :  { %v158_v60 = vadd.f32 %v157_v16, %v156_v43  ;;  %v266_v58 = vadd.f32 %v265_v32, %v264_v51  ;;  %v269_v13 = vsel %vm45_vm0, %v238_v59, 0.0  ;;  %v240_v30 = vmul.f32 %v920_v44, %v920_v44 }
  0x40   :  { %v909_v39 = vadd.f32 1e-05, %v165_v3  ;;  %v262_v56 = vrot.slane %v261_v45, 1  ;;  %v936_v29 = vsub.f32 %v707_v50, %v883_v28  ;;  %v241_v35 = vmul.f32 %v924_v46, %v924_v46 }
  0x41   :  { %v159_v6 = vrot.slane %v158_v60, 4  ;;  %v268_v17 = vadd.f32 %v267_v55, %v266_v58  ;;  %v271_v7 = vsel %vm45_vm0, %v239_v23, 0.0  ;;  %v273_v16 = vsel %vm45_vm0, %v240_v30, 0.0 }
  0x42   :  { %459 = vrsqrt.f32 %v909_v39  ;;  %v263_v54 = vadd.f32 %v262_v56, %v261_v45  ;;  %v242_v45 = vmul.f32 %v936_v29, %v936_v29  ;;  %v275_v49 = vsel %vm45_vm0, %v241_v35, 0.0 }
  0x43   :  { %v160_v12 = vadd.f32 %v159_v6, %v158_v60  ;;  %v270_v37 = vadd.f32 %v269_v13, %v268_v17  ;;  %vm297_vm1 = vcmp.eq.f32.partialorder %v909_v39, inf  ;;  %vm299_vm3 = vcmp.eq.f32.partialorder %v909_v39, 0.0 }
  0x44   :  { %v285_v14 = vmul.f32 0.015625, %v263_v54  ;;  %v277_v51 = vsel %vm45_vm0, %v242_v45, 0.0  ;;  %v300_v6 = vand.u32 2147483648, %v909_v39 }
  0x45   :  { %v161_v3 = vrot.slane %v160_v12, 2  ;;  %v272_v43 = vadd.f32 %v271_v7, %v270_v37 }
  0x46   :  { %v291_v18 = vadd.f32 1e-05, %v285_v14 }
  0x47   :  { %v162_v42 = vadd.f32 %v161_v3, %v160_v12  ;;  %v274_v21 = vadd.f32 %v273_v16, %v272_v43 }
  0x48   :  { %461 = vrsqrt.f32 %v291_v18  ;;  %vm311_vm2 = vcmp.eq.f32.partialorder %v291_v18, inf  ;;  %vm313_vm4 = vcmp.eq.f32.partialorder %v291_v18, 0.0  ;;  %v314_v14 = vand.u32 2147483648, %v291_v18 }
  0x49   :  { %v163_v50 = vrot.slane %v162_v42, 1  ;;  %v276_v60 = vadd.f32 %v275_v49, %v274_v21 }
  0x4b   :  { %v164_v56 = vadd.f32 %v163_v50, %v162_v42  ;;  %v278_v55 = vadd.f32 %v277_v51, %v276_v60 }
  0x4d   :  { %v166_v32 = vmul.f32 0.015625, %v164_v56  ;;  %v279_v23 = vrot.slane %v278_v55, 4 }
  0x4f   :  { %v460_v59 = vpop.eup %459  ;;  %v950_v58 = vadd.f32 1e-05, %v166_v32  ;;  %v280_v7 = vadd.f32 %v279_v23, %v278_v55 }
  0x50   :  { %v296_v54 = vmul.f32 %v460_v59, %v909_v39  ;;  %v323_v12 = vmul.f32 %v460_v59, %v715_v26  ;;  %v324_v30 = vmul.f32 %v460_v59, %v719_v27  ;;  %v325_v17 = vmul.f32 %v460_v59, %v723_v31 }
  0x51   :  { %v326_v35 = vmul.f32 %v460_v59, %v727_v33  ;;  %v327_v3 = vmul.f32 %v460_v59, %v731_v34  ;;  %v328_v37 = vmul.f32 %v460_v59, %v735_v0  ;;  %v329_v42 = vmul.f32 %v460_v59, %v739_v1 }
  0x52   :  { %v298_v13 = vsel %vm297_vm1, %v909_v39, %v296_v54  ;;  %v330_v45 = vmul.f32 %v460_v59, %v751_v15  ;;  %463 = vrsqrt.f32 %v950_v58  ;;  %v281_v31 = vrot.slane %v280_v7, 2 }
  0x53   :  { %v964_v26 = vsel %vm299_vm3, %v300_v6, %v298_v13  ;;  %vm304_vm5 = vcmp.eq.f32.partialorder %v950_v58, inf  ;;  %vm306_vm6 = vcmp.eq.f32.partialorder %v950_v58, 0.0 }
  0x54   :  { %v282_v50 = vadd.f32 %v281_v31, %v280_v7 }
  0x55   :  { %v462_v16 = vpop.eup %461 }
  0x56   :  { %v310_v27 = vmul.f32 %v462_v16, %v291_v18  ;;  %v387_v33 = vmul.f32 %v462_v16, %v770_v61  ;;  %v388_v34 = vmul.f32 %v462_v16, %v774_v62  ;;  %v389_v0 = vmul.f32 %v462_v16, %v778_v63 }
  0x57   :  { %v390_v43 = vmul.f32 %v462_v16, %v782_v4  ;;  %v391_v1 = vmul.f32 %v462_v16, %v788_v8  ;;  %v392_v15 = vmul.f32 %v462_v16, %v792_v10  ;;  %v394_v31 = vmul.f32 %v462_v16, %v808_v25 }
  0x58   :  { %v312_v49 = vsel %vm311_vm2, %v291_v18, %v310_v27  ;;  %v403_v39 = vmul.f32 %v387_v33, %v964_v26  ;;  %v404_v21 = vmul.f32 %v388_v34, %v964_v26  ;;  %v405_v61 = vmul.f32 %v389_v0, %v964_v26 }
  0x59   :  { %v315_v59 = vsel %vm313_vm4, %v314_v14, %v312_v49  ;;  %v406_v62 = vmul.f32 %v390_v43, %v964_v26  ;;  %v407_v63 = vmul.f32 %v391_v1, %v964_v26  ;;  %v410_v43 = vmul.f32 %v394_v31, %v964_v26 }
  0x5a   :  { %v339_v4 = vmul.f32 %v323_v12, %v315_v59  ;;  %v340_v56 = vmul.f32 %v324_v30, %v315_v59  ;;  %v341_v8 = vmul.f32 %v325_v17, %v315_v59  ;;  %v342_v60 = vmul.f32 %v326_v35, %v315_v59 }
  0x5b   :  { %v343_v10 = vmul.f32 %v327_v3, %v315_v59  ;;  %v344_v51 = vmul.f32 %v328_v37, %v315_v59  ;;  %v345_v32 = vmul.f32 %v329_v42, %v315_v59  ;;  %v346_v55 = vmul.f32 %v330_v45, %v315_v59 }
  0x5c   :  { %v355_v54 = vadd.f32 %v339_v4, %v763_v52  ;;  %v356_v6 = vadd.f32 %v340_v56, %v763_v52  ;;  %v357_v18 = vadd.f32 %v341_v8, %v763_v52  ;;  %v358_v23 = vadd.f32 %v342_v60, %v763_v52 }
  0x5d   :  { %v359_v13 = vadd.f32 %v343_v10, %v763_v52  ;;  %v360_v14 = vadd.f32 %v344_v51, %v763_v52  ;;  %v361_v12 = vadd.f32 %v345_v32, %v763_v52  ;;  %v362_v30 = vadd.f32 %v346_v55, %v763_v52 }
  0x5e   :  { %371 = vst.msk [vmem:[%s1167_s2] sm:$0xff] %vm45_vm0, %v355_v54  ;;  %372 = vst.msk [vmem:[%s1167_s2 + $0x8] sm:$0xff] %vm45_vm0, %v356_v6  ;;  %v283_v52 = vrot.slane %v282_v50, 1  ;;  %v419_v17 = vadd.f32 %v403_v39, %v711_v19  ;;  %v420_v35 = vadd.f32 %v404_v21, %v711_v19  ;;  %v421_v3 = vadd.f32 %v405_v61, %v711_v19 }
  0x5f   :  { %373 = vst.msk [vmem:[%s1167_s2 + $0x10] sm:$0xff] %vm45_vm0, %v357_v18  ;;  %374 = vst.msk [vmem:[%s1167_s2 + $0x18] sm:$0xff] %vm45_vm0, %v358_v23  ;;  %v422_v37 = vadd.f32 %v406_v62, %v711_v19  ;;  %v423_v7 = vadd.f32 %v407_v63, %v711_v19  ;;  %v408_v42 = vmul.f32 %v392_v15, %v964_v26  ;;  %v464_v34 = vpop.eup %463  ;;  %v307_v49 = vand.u32 2147483648, %v950_v58 }
  0x60   :  { %375 = vst.msk [vmem:[%s1167_s2 + $0x20] sm:$0xff] %vm45_vm0, %v359_v13  ;;  %376 = vst.msk [vmem:[%s1167_s2 + $0x28] sm:$0xff] %vm45_vm0, %v360_v14  ;;  %v393_v45 = vmul.f32 %v462_v16, %v802_v22  ;;  %v284_v27 = vadd.f32 %v283_v52, %v282_v50  ;;  %v426_v1 = vadd.f32 %v410_v43, %v711_v19 }
  0x61   :  { %377 = vst.msk [vmem:[%s1167_s2 + $0x30] sm:$0xff] %vm45_vm0, %v361_v12  ;;  %378 = vst.msk [vmem:[%s1167_s2 + $0x38] sm:$0xff] %vm45_vm0, %v362_v30  ;;  %v424_v22 = vadd.f32 %v408_v42, %v711_v19  ;;  %v303_v15 = vmul.f32 %v464_v34, %v950_v58  ;;  %v331_v50 = vmul.f32 %v464_v34, %v828_v57 }
  0x62   :  { %435 = vst.msk [vmem:[%s1168_s3] sm:$0xff] %vm45_vm0, %v419_v17  ;;  %436 = vst.msk [vmem:[%s1168_s3 + $0x8] sm:$0xff] %vm45_vm0, %v420_v35  ;;  %v409_v33 = vmul.f32 %v393_v45, %v964_v26  ;;  %v286_v0 = vmul.f32 0.015625, %v284_v27  ;;  %v332_v39 = vmul.f32 %v464_v34, %v832_v5  ;;  %v334_v21 = vmul.f32 %v464_v34, %v841_v11 }
  0x63   :  { %437 = vst.msk [vmem:[%s1168_s3 + $0x10] sm:$0xff] %vm45_vm0, %v421_v3  ;;  %438 = vst.msk [vmem:[%s1168_s3 + $0x18] sm:$0xff] %vm45_vm0, %v422_v37  ;;  %v305_v26 = vsel %vm304_vm5, %v950_v58, %v303_v15  ;;  %v335_v59 = vmul.f32 %v464_v34, %v845_v38  ;;  %v336_v61 = vmul.f32 %v464_v34, %v850_v24 }
  0x64   :  { %439 = vst.msk [vmem:[%s1168_s3 + $0x20] sm:$0xff] %vm45_vm0, %v423_v7  ;;  %440 = vst.msk [vmem:[%s1168_s3 + $0x28] sm:$0xff] %vm45_vm0, %v424_v22  ;;  %v292_v25 = vadd.f32 1e-05, %v286_v0  ;;  %v425_v16 = vadd.f32 %v409_v33, %v711_v19  ;;  %v333_v19 = vmul.f32 %v464_v34, %v837_v9  ;;  %v337_v62 = vmul.f32 %v464_v34, %v863_v48 }
  0x65   :  { %442 = vst.msk [vmem:[%s1168_s3 + $0x38] sm:$0xff] %vm45_vm0, %v426_v1  ;;  %v338_v63 = vmul.f32 %v464_v34, %v872_v40  ;;  %v308_v56 = vsel %vm306_vm6, %v307_v49, %v305_v26 }
  0x66   :  { %465 = vrsqrt.f32 %v292_v25  ;;  %441 = vst.msk [vmem:[%s1168_s3 + $0x30] sm:$0xff] %vm45_vm0, %v425_v16  ;;  %vm318_vm7 = vcmp.eq.f32.partialorder %v292_v25, inf  ;;  %vm320_vm8 = vcmp.eq.f32.partialorder %v292_v25, 0.0  ;;  %v321_v58 = vand.u32 2147483648, %v292_v25 }
  0x73   :  { %v466_v4 = vpop.eup %465 }
  0x74   :  { %v317_v57 = vmul.f32 %v466_v4, %v292_v25  ;;  %v395_v5 = vmul.f32 %v466_v4, %v888_v20  ;;  %v396_v9 = vmul.f32 %v466_v4, %v892_v53  ;;  %v397_v11 = vmul.f32 %v466_v4, %v896_v36 }
  0x75   :  { %v398_v38 = vmul.f32 %v466_v4, %v900_v2  ;;  %v399_v24 = vmul.f32 %v466_v4, %v905_v41  ;;  %v400_v48 = vmul.f32 %v466_v4, %v920_v44  ;;  %v401_v40 = vmul.f32 %v466_v4, %v924_v46 }
  0x76   :  { %v319_v8 = vsel %vm318_vm7, %v292_v25, %v317_v57  ;;  %v411_v60 = vmul.f32 %v395_v5, %v308_v56  ;;  %v412_v10 = vmul.f32 %v396_v9, %v308_v56  ;;  %v413_v51 = vmul.f32 %v397_v11, %v308_v56 }
  0x77   :  { %v322_v32 = vsel %vm320_vm8, %v321_v58, %v319_v8  ;;  %v414_v55 = vmul.f32 %v398_v38, %v308_v56  ;;  %v415_v54 = vmul.f32 %v399_v24, %v308_v56  ;;  %v416_v20 = vmul.f32 %v400_v48, %v308_v56 }
  0x78   :  { %v347_v6 = vmul.f32 %v331_v50, %v322_v32  ;;  %v348_v53 = vmul.f32 %v332_v39, %v322_v32  ;;  %v349_v18 = vmul.f32 %v333_v19, %v322_v32  ;;  %v350_v36 = vmul.f32 %v334_v21, %v322_v32 }
  0x79   :  { %v351_v23 = vmul.f32 %v335_v59, %v322_v32  ;;  %v352_v2 = vmul.f32 %v336_v61, %v322_v32  ;;  %v353_v13 = vmul.f32 %v337_v62, %v322_v32  ;;  %v354_v41 = vmul.f32 %v338_v63, %v322_v32 }
  0x7a   :  { %v363_v44 = vadd.f32 %v347_v6, %v883_v28  ;;  %v364_v46 = vadd.f32 %v348_v53, %v883_v28  ;;  %v365_v14 = vadd.f32 %v349_v18, %v883_v28  ;;  %v366_v12 = vadd.f32 %v350_v36, %v883_v28 }
  0x7b   :  { %v367_v30 = vadd.f32 %v351_v23, %v883_v28  ;;  %v368_v52 = vadd.f32 %v352_v2, %v883_v28  ;;  %v369_v17 = vadd.f32 %v353_v13, %v883_v28  ;;  %v370_v35 = vadd.f32 %v354_v41, %v883_v28 }
  0x7c   :  { %379 = vst.msk [vmem:[%s1167_s2 + $0x40] sm:$0xff] %vm45_vm0, %v363_v44  ;;  %380 = vst.msk [vmem:[%s1167_s2 + $0x48] sm:$0xff] %vm45_vm0, %v364_v46  ;;  %v427_v28 = vadd.f32 %v411_v60, %v821_v47  ;;  %v428_v3 = vadd.f32 %v412_v10, %v821_v47  ;;  %v429_v37 = vadd.f32 %v413_v51, %v821_v47 }
  0x7d   :  { %381 = vst.msk [vmem:[%s1167_s2 + $0x50] sm:$0xff] %vm45_vm0, %v365_v14  ;;  %382 = vst.msk [vmem:[%s1167_s2 + $0x58] sm:$0xff] %vm45_vm0, %v366_v12  ;;  %v430_v7 = vadd.f32 %v414_v55, %v821_v47  ;;  %v431_v42 = vadd.f32 %v415_v54, %v821_v47  ;;  %v432_v45 = vadd.f32 %v416_v20, %v821_v47 }
  0x7e   :  { %383 = vst.msk [vmem:[%s1167_s2 + $0x60] sm:$0xff] %vm45_vm0, %v367_v30  ;;  %384 = vst.msk [vmem:[%s1167_s2 + $0x68] sm:$0xff] %vm45_vm0, %v368_v52  ;;  %v417_v27 = vmul.f32 %v401_v40, %v308_v56  ;;  %v402_v31 = vmul.f32 %v466_v4, %v936_v29 }
  0x7f   :  { %385 = vst.msk [vmem:[%s1167_s2 + $0x70] sm:$0xff] %vm45_vm0, %v369_v17  ;;  %386 = vst.msk [vmem:[%s1167_s2 + $0x78] sm:$0xff] %vm45_vm0, %v370_v35 }
  0x80   :  { %443 = vst.msk [vmem:[%s1168_s3 + $0x40] sm:$0xff] %vm45_vm0, %v427_v28  ;;  %444 = vst.msk [vmem:[%s1168_s3 + $0x48] sm:$0xff] %vm45_vm0, %v428_v3  ;;  %v433_v29 = vadd.f32 %v417_v27, %v821_v47  ;;  %v418_v22 = vmul.f32 %v402_v31, %v308_v56 }
  0x81   :  { %445 = vst.msk [vmem:[%s1168_s3 + $0x50] sm:$0xff] %vm45_vm0, %v429_v37  ;;  %446 = vst.msk [vmem:[%s1168_s3 + $0x58] sm:$0xff] %vm45_vm0, %v430_v7 }
  0x82   :  { %447 = vst.msk [vmem:[%s1168_s3 + $0x60] sm:$0xff] %vm45_vm0, %v431_v42  ;;  %448 = vst.msk [vmem:[%s1168_s3 + $0x68] sm:$0xff] %vm45_vm0, %v432_v45  ;;  %v434_v33 = vadd.f32 %v418_v22, %v821_v47 }
  0x83   :  { %449 = vst.msk [vmem:[%s1168_s3 + $0x70] sm:$0xff] %vm45_vm0, %v433_v29 }
  0x84   :  { %450 = vst.msk [vmem:[%s1168_s3 + $0x78] sm:$0xff] %vm45_vm0, %v434_v33 }

// kernel: effi_b7_forward.17
= control target key start
LH: loop header
LB: loop body
LE: loop exit
PB: predicated region body
PF: predicated region fallthrough
CT: control target
= control target key end

     0   :  { %v1169_v0 = vmov 0   ;;  %vm302_vm0 = vcmask 719872   ;;  %vm351_vm1 = vcmask 1043456   ;;  %s1675_s1 = inlined_call_operand.vmem [shape: bf16[216,128], index: 1, kind: input, shape index: {}]   ;;  %s1676_s0 = inlined_call_operand.vmem [shape: bf16[256,216], index: 0, kind: input, shape index: {}]   ;;  %s1677_s2 = inlined_call_operand.vmem [shape: f32[1,128], index: 2, kind: input, shape index: {}]   ;;  %s1678_s3 = inlined_call_operand.vmem [shape: f32[1,128], index: 3, kind: input, shape index: {}]   ;;  %s1679_s4 = inlined_call_operand.vmem [shape: f32[256,128], index: 4, kind: output, shape index: {}]  }
   0x1   :  { %355 = vmatprep.subr.bf16.mxu0 %v1169_v0  ;;  %950 = vmatprep.subr.bf16.mxu1 %v1169_v0  ;;  %v979_v1 = vld [vmem:[%s1675_s1 + $0x38] sm:$0xff]   ;;  %v980_v2 = vld [vmem:[%s1675_s1 + $0x30] sm:$0xff]   ;;  %v981_v3 = vld [vmem:[%s1675_s1 + $0x28] sm:$0xff]  }
   0x2   :  { %356 = vmatpush1.bf16.msra.mxu0 %v979_v1  ;;  %964 = vmatpush1.bf16.msra.mxu1 %v979_v1  ;;  %v982_v4 = vld [vmem:[%s1675_s1 + $0x20] sm:$0xff]   ;;  %v983_v5 = vld [vmem:[%s1675_s1 + $0x18] sm:$0xff]   ;;  %v984_v8 = vld [vmem:[%s1675_s1 + $0x10] sm:$0xff]  }
   0x3   :  { %357 = vmatprep.subr.bf16.mxu0 %v1169_v0  ;;  %951 = vmatprep.subr.bf16.mxu1 %v1169_v0  ;;  %v995_v6 = vld [vmem:[%s1676_s0 + $0x4] ss:$8 sps:$4 sm:$0xff]   ;;  %v987_v11 = vld [vmem:[%s1675_s1 + $0x68] ss:$0 sps:$4 sm:$0xff]   ;;  %v989_v14 = vld [vmem:[%s1675_s1 + $0x58] sm:$0xff]  }
   0x4   :  { %900 = vmatprep.mubr.msk.bf16.mxu0 %vm302_vm0, %v995_v6  ;;  %v998_v7 = vld [vmem:[%s1676_s0 + $0x84] ss:$8 sps:$4 sm:$0xff]   ;;  %v353_v12 = vsel %vm351_vm1, %v987_v11, 0  ;;  %v990_v15 = vld [vmem:[%s1675_s1 + $0x50] sm:$0xff]   ;;  %v993_v18 = vld [vmem:[%s1676_s0] ss:$8 sps:$4 sm:$0xff]  }
   0x5   :  { %908 = vmatprep.mubr.msk.bf16.mxu1 %vm302_vm0, %v998_v7  ;;  %v985_v9 = vld [vmem:[%s1675_s1 + $0x8] sm:$0xff]   ;;  %v986_v10 = vld [vmem:[%s1675_s1] sm:$0xff]   ;;  %v999_v20 = vld [vmem:[%s1676_s0 + $0x14] ss:$8 sps:$4 sm:$0xff]  }
   0x6   :  { %358 = vmatpush1.bf16.msra.mxu0 %v980_v2  ;;  %965 = vmatpush1.bf16.msra.mxu1 %v980_v2  ;;  %v988_v13 = vld [vmem:[%s1675_s1 + $0x60] sm:$0xff]   ;;  %v991_v16 = vld [vmem:[%s1675_s1 + $0x48] sm:$0xff]   ;;  %v1001_v21 = vld [vmem:[%s1676_s0 + $0x94] ss:$8 sps:$4 sm:$0xff]  }
   0x7   :  { %359 = vmatprep.subr.bf16.mxu0 %v1169_v0  ;;  %952 = vmatprep.subr.bf16.mxu1 %v1169_v0  ;;  %v992_v17 = vld [vmem:[%s1675_s1 + $0x40] sm:$0xff]   ;;  %v1003_v22 = vld [vmem:[%s1676_s0 + $0x10] ss:$8 sps:$4 sm:$0xff]   ;;  %v1011_v28 = vld [vmem:[%s1676_s0 + $0x34] ss:$8 sps:$4 sm:$0xff]  }
   0x8   :  { %v996_v19 = vld [vmem:[%s1676_s0 + $0x80] ss:$8 sps:$4 sm:$0xff]   ;;  %v1004_v23 = vld [vmem:[%s1676_s0 + $0x90] ss:$8 sps:$4 sm:$0xff]   ;;  %v1005_v24 = vld [vmem:[%s1676_s0 + $0x24] ss:$8 sps:$4 sm:$0xff]  }
   0x9   :  { %v1007_v25 = vld [vmem:[%s1676_s0 + $0xa4] ss:$8 sps:$4 sm:$0xff]   ;;  %v1009_v26 = vld [vmem:[%s1676_s0 + $0x20] ss:$8 sps:$4 sm:$0xff]   ;;  %v1013_v29 = vld [vmem:[%s1676_s0 + $0xb4] ss:$8 sps:$4 sm:$0xff]  }
   0xa   :  { %360 = vmatpush1.bf16.msra.mxu0 %v981_v3  ;;  %966 = vmatpush1.bf16.msra.mxu1 %v981_v3  ;;  %v1010_v27 = vld [vmem:[%s1676_s0 + $0xa0] ss:$8 sps:$4 sm:$0xff]   ;;  %v1015_v30 = vld [vmem:[%s1676_s0 + $0x30] ss:$8 sps:$4 sm:$0xff]   ;;  %v1017_v32 = vld [vmem:[%s1676_s0 + $0x44] ss:$8 sps:$4 sm:$0xff]  }
   0xb   :  { %361 = vmatprep.subr.bf16.mxu0 %v1169_v0  ;;  %953 = vmatprep.subr.bf16.mxu1 %v1169_v0  ;;  %v1016_v31 = vld [vmem:[%s1676_s0 + $0xb0] ss:$8 sps:$4 sm:$0xff]   ;;  %v1019_v33 = vld [vmem:[%s1676_s0 + $0xc4] ss:$8 sps:$4 sm:$0xff]   ;;  %v1021_v34 = vld [vmem:[%s1676_s0 + $0x40] ss:$8 sps:$4 sm:$0xff]  }
   0xc   :  { %v1022_v35 = vld [vmem:[%s1676_s0 + $0xc0] ss:$8 sps:$4 sm:$0xff]   ;;  %v1023_v36 = vld [vmem:[%s1676_s0 + $0x54] ss:$8 sps:$4 sm:$0xff]   ;;  %v1027_v38 = vld [vmem:[%s1676_s0 + $0x50] ss:$8 sps:$4 sm:$0xff]  }
   0xd   :  { %v1025_v37 = vld [vmem:[%s1676_s0 + $0xd4] ss:$8 sps:$4 sm:$0xff]   ;;  %v1028_v39 = vld [vmem:[%s1676_s0 + $0xd0] ss:$8 sps:$4 sm:$0xff]   ;;  %v1029_v40 = vld [vmem:[%s1676_s0 + $0x64] ss:$8 sps:$4 sm:$0xff]  }
   0xe   :  { %362 = vmatpush1.bf16.msra.mxu0 %v982_v4  ;;  %967 = vmatpush1.bf16.msra.mxu1 %v982_v4  ;;  %v1031_v41 = vld [vmem:[%s1676_s0 + $0xe4] ss:$8 sps:$4 sm:$0xff]   ;;  %v1033_v42 = vld [vmem:[%s1676_s0 + $0x60] ss:$8 sps:$4 sm:$0xff]   ;;  %v1035_v44 = vld [vmem:[%s1676_s0 + $0x74] ss:$8 sps:$4 sm:$0xff]  }
   0xf   :  { %363 = vmatprep.subr.bf16.mxu0 %v1169_v0  ;;  %954 = vmatprep.subr.bf16.mxu1 %v1169_v0  ;;  %v1034_v43 = vld [vmem:[%s1676_s0 + $0xe0] ss:$8 sps:$4 sm:$0xff]   ;;  %v1037_v45 = vld [vmem:[%s1676_s0 + $0xf4] ss:$8 sps:$4 sm:$0xff]   ;;  %v1039_v46 = vld [vmem:[%s1676_s0 + $0x70] ss:$8 sps:$4 sm:$0xff]  }
  0x10   :  { %v1040_v47 = vld [vmem:[%s1676_s0 + $0xf0] ss:$8 sps:$4 sm:$0xff]   ;;  %v1380_v48 = vld [vmem:[%s1677_s2] ss:$0 sm:$0xff] }
  0x11   :  { %v1385_v50 = vld [vmem:[%s1678_s3] ss:$0 sm:$0xff] }
  0x12   :  { %364 = vmatpush1.bf16.msra.mxu0 %v983_v5  ;;  %968 = vmatpush1.bf16.msra.mxu1 %v983_v5 }
  0x13   :  { %365 = vmatprep.subr.bf16.mxu0 %v1169_v0  ;;  %955 = vmatprep.subr.bf16.mxu1 %v1169_v0 }
  0x16   :  { %366 = vmatpush1.bf16.msra.mxu0 %v984_v8  ;;  %969 = vmatpush1.bf16.msra.mxu1 %v984_v8 }
  0x17   :  { %367 = vmatprep.subr.bf16.mxu0 %v1169_v0  ;;  %956 = vmatprep.subr.bf16.mxu1 %v1169_v0 }
  0x1a   :  { %368 = vmatpush1.bf16.msra.mxu0 %v985_v9  ;;  %970 = vmatpush1.bf16.msra.mxu1 %v985_v9 }
  0x1b   :  { %369 = vmatprep.subr.bf16.mxu0 %v1169_v0  ;;  %957 = vmatprep.subr.bf16.mxu1 %v1169_v0 }
  0x1e   :  { %370 = vmatpush1.bf16.msra.mxu0 %v986_v10  ;;  %971 = vmatpush1.bf16.msra.mxu1 %v986_v10 }
  0x1f   :  { %375 = vmatprep.subr.bf16.mxu0 %v1169_v0  ;;  %958 = vmatprep.subr.bf16.mxu1 %v1169_v0 }
  0x22   :  { %376 = vmatpush2.bf16.msra.mxu0 %v353_v12  ;;  %972 = vmatpush2.bf16.msra.mxu1 %v353_v12 }
  0x23   :  { %377 = vmatprep.subr.bf16.mxu0 %v1169_v0  ;;  %959 = vmatprep.subr.bf16.mxu1 %v1169_v0 }
  0x26   :  { %378 = vmatpush2.bf16.msra.mxu0 %v988_v13  ;;  %973 = vmatpush2.bf16.msra.mxu1 %v988_v13 }
  0x27   :  { %379 = vmatprep.subr.bf16.mxu0 %v1169_v0  ;;  %960 = vmatprep.subr.bf16.mxu1 %v1169_v0 }
  0x2a   :  { %380 = vmatpush2.bf16.msra.mxu0 %v989_v14  ;;  %974 = vmatpush2.bf16.msra.mxu1 %v989_v14 }
  0x2b   :  { %381 = vmatprep.subr.bf16.mxu0 %v1169_v0  ;;  %961 = vmatprep.subr.bf16.mxu1 %v1169_v0 }
  0x2e   :  { %382 = vmatpush2.bf16.msra.mxu0 %v990_v15  ;;  %975 = vmatpush2.bf16.msra.mxu1 %v990_v15 }
  0x2f   :  { %383 = vmatprep.subr.bf16.mxu0 %v1169_v0  ;;  %962 = vmatprep.subr.bf16.mxu1 %v1169_v0 }
  0x32   :  { %384 = vmatpush2.bf16.msra.mxu0 %v991_v16  ;;  %976 = vmatpush2.bf16.msra.mxu1 %v991_v16 }
  0x33   :  { %385 = vmatprep.subr.bf16.mxu0 %v1169_v0  ;;  %963 = vmatprep.subr.bf16.mxu1 %v1169_v0 }
  0x36   :  { %386 = vmatpush2.bf16.msra.mxu0 %v992_v17  ;;  %977 = vmatpush2.bf16.msra.mxu1 %v992_v17 }
  0x39   :  { %388 = vmatmul.mubr.bf16.vlgmr.msra.gmra.mxu0 %v993_v18  ;;  %452 = vmatmul.mubr.bf16.vlgmr.msra.gmra.mxu1 %v996_v19 }
  0x3a   :  { %901 = vmatprep.mubr.msk.bf16.mxu0 %vm302_vm0, %v999_v20  ;;  %909 = vmatprep.mubr.msk.bf16.mxu1 %vm302_vm0, %v1001_v21 }
  0x41   :  { %396 = vmatmul.mubr.bf16.gmra.mxu0 %v1003_v22  ;;  %460 = vmatmul.mubr.bf16.gmra.mxu1 %v1004_v23 }
  0x42   :  { %902 = vmatprep.mubr.msk.bf16.mxu0 %vm302_vm0, %v1005_v24  ;;  %910 = vmatprep.mubr.msk.bf16.mxu1 %vm302_vm0, %v1007_v25 }
  0x49   :  { %404 = vmatmul.mubr.bf16.gmra.mxu0 %v1009_v26  ;;  %468 = vmatmul.mubr.bf16.gmra.mxu1 %v1010_v27 }
  0x4a   :  { %903 = vmatprep.mubr.msk.bf16.mxu0 %vm302_vm0, %v1011_v28  ;;  %911 = vmatprep.mubr.msk.bf16.mxu1 %vm302_vm0, %v1013_v29 }
  0x51   :  { %412 = vmatmul.mubr.bf16.gmra.mxu0 %v1015_v30  ;;  %476 = vmatmul.mubr.bf16.gmra.mxu1 %v1016_v31 }
  0x52   :  { %904 = vmatprep.mubr.msk.bf16.mxu0 %vm302_vm0, %v1017_v32  ;;  %912 = vmatprep.mubr.msk.bf16.mxu1 %vm302_vm0, %v1019_v33 }
  0x59   :  { %420 = vmatmul.mubr.bf16.gmra.mxu0 %v1021_v34  ;;  %484 = vmatmul.mubr.bf16.gmra.mxu1 %v1022_v35 }
  0x5a   :  { %905 = vmatprep.mubr.msk.bf16.mxu0 %vm302_vm0, %v1023_v36  ;;  %913 = vmatprep.mubr.msk.bf16.mxu1 %vm302_vm0, %v1025_v37 }
  0x61   :  { %428 = vmatmul.mubr.bf16.gmra.mxu0 %v1027_v38  ;;  %492 = vmatmul.mubr.bf16.gmra.mxu1 %v1028_v39 }
  0x62   :  { %906 = vmatprep.mubr.msk.bf16.mxu0 %vm302_vm0, %v1029_v40  ;;  %914 = vmatprep.mubr.msk.bf16.mxu1 %vm302_vm0, %v1031_v41 }
  0x69   :  { %436 = vmatmul.mubr.bf16.gmra.mxu0 %v1033_v42  ;;  %500 = vmatmul.mubr.bf16.gmra.mxu1 %v1034_v43 }
  0x6a   :  { %907 = vmatprep.mubr.msk.bf16.mxu0 %vm302_vm0, %v1035_v44  ;;  %915 = vmatprep.mubr.msk.bf16.mxu1 %vm302_vm0, %v1037_v45 }
  0x71   :  { %444 = vmatmul.mubr.bf16.gmra.mxu0 %v1039_v46  ;;  %508 = vmatmul.mubr.bf16.gmra.mxu1 %v1040_v47 }
  0xf9   :  { %v389_v49 = vpop.f32.mrf.mxu0  ;;  %v453_v51 = vpop.f32.mrf.mxu1 }
  0xfa   :  { %v523_v52 = vmul.f32 %v1380_v48, %v389_v49  ;;  %v539_v53 = vmul.f32 %v1380_v48, %v453_v51 }
  0xfb   :  { %v391_v54 = vpop.f32.mrf.mxu0  ;;  %v455_v55 = vpop.f32.mrf.mxu1 }
  0xfc   :  { %v1390_v56 = vadd.f32 %v1385_v50, %v523_v52  ;;  %v1393_v57 = vadd.f32 %v1385_v50, %v539_v53 }
  0xfd   :  { %v392_v58 = vpop.f32.mrf.mxu0  ;;  %v456_v59 = vpop.f32.mrf.mxu1 }
  0xfe   :  { %v918_v60 = vmul.f32 -1.442695, %v1390_v56  ;;  %v934_v61 = vmul.f32 -1.442695, %v1393_v57  ;;  %v524_v62 = vmul.f32 %v1380_v48, %v392_v58  ;;  %v540_v63 = vmul.f32 %v1380_v48, %v456_v59 }
  0xff   :  { %v394_v0 = vpop.f32.mrf.mxu0  ;;  %v458_v1 = vpop.f32.mrf.mxu1 }
 0x100   :  { %1041 = vpow2.f32 %v918_v60  ;;  %v1400_v2 = vadd.f32 %v1385_v50, %v524_v62  ;;  %v1403_v3 = vadd.f32 %v1385_v50, %v540_v63 }
 0x101   :  { %1043 = vpow2.f32 %v934_v61  ;;  %v397_v4 = vpop.f32.mrf.mxu0  ;;  %v461_v5 = vpop.f32.mrf.mxu1 }
 0x102   :  { %v919_v6 = vmul.f32 -1.442695, %v1400_v2  ;;  %v935_v7 = vmul.f32 -1.442695, %v1403_v3  ;;  %v525_v8 = vmul.f32 %v1380_v48, %v397_v4  ;;  %v541_v9 = vmul.f32 %v1380_v48, %v461_v5 }
 0x103   :  { %v399_v10 = vpop.f32.mrf.mxu0  ;;  %v463_v11 = vpop.f32.mrf.mxu1 }
 0x104   :  { %1045 = vpow2.f32 %v919_v6  ;;  %v1410_v12 = vadd.f32 %v1385_v50, %v525_v8  ;;  %v1413_v13 = vadd.f32 %v1385_v50, %v541_v9 }
 0x105   :  { %1047 = vpow2.f32 %v935_v7  ;;  %v400_v14 = vpop.f32.mrf.mxu0  ;;  %v464_v15 = vpop.f32.mrf.mxu1 }
 0x106   :  { %v920_v16 = vmul.f32 -1.442695, %v1410_v12  ;;  %v936_v17 = vmul.f32 -1.442695, %v1413_v13  ;;  %v526_v18 = vmul.f32 %v1380_v48, %v400_v14  ;;  %v542_v19 = vmul.f32 %v1380_v48, %v464_v15 }
 0x107   :  { %v402_v20 = vpop.f32.mrf.mxu0  ;;  %v466_v21 = vpop.f32.mrf.mxu1 }
 0x108   :  { %1049 = vpow2.f32 %v920_v16  ;;  %v1420_v22 = vadd.f32 %v1385_v50, %v526_v18  ;;  %v1423_v23 = vadd.f32 %v1385_v50, %v542_v19 }
 0x109   :  { %1051 = vpow2.f32 %v936_v17  ;;  %v405_v24 = vpop.f32.mrf.mxu0  ;;  %v469_v25 = vpop.f32.mrf.mxu1 }
 0x10a   :  { %v921_v26 = vmul.f32 -1.442695, %v1420_v22  ;;  %v937_v27 = vmul.f32 -1.442695, %v1423_v23  ;;  %v527_v28 = vmul.f32 %v1380_v48, %v405_v24  ;;  %v543_v29 = vmul.f32 %v1380_v48, %v469_v25 }
 0x10b   :  { %v407_v30 = vpop.f32.mrf.mxu0  ;;  %v471_v31 = vpop.f32.mrf.mxu1 }
 0x10c   :  { %1053 = vpow2.f32 %v921_v26  ;;  %v1430_v32 = vadd.f32 %v1385_v50, %v527_v28  ;;  %v1433_v33 = vadd.f32 %v1385_v50, %v543_v29 }
 0x10d   :  { %v1042_v34 = vpop.eup %1041  ;;  %1055 = vpow2.f32 %v937_v27  ;;  %v408_v35 = vpop.f32.mrf.mxu0 }
 0x10e   :  { %v472_v36 = vpop.f32.mrf.mxu1  ;;  %v1044_v37 = vpop.eup %1043  ;;  %v690_v38 = vadd.f32 1.0, %v1042_v34  ;;  %v922_v39 = vmul.f32 -1.442695, %v1430_v32  ;;  %v528_v40 = vmul.f32 %v1380_v48, %v408_v35  ;;  %v938_v42 = vmul.f32 -1.442695, %v1433_v33 }
 0x10f   :  { %v706_v41 = vadd.f32 1.0, %v1044_v37  ;;  %v544_v43 = vmul.f32 %v1380_v48, %v472_v36  ;;  %v410_v44 = vpop.f32.mrf.mxu0 }
 0x110   :  { %v474_v45 = vpop.f32.mrf.mxu1  ;;  %1057 = vrcp.f32 %v690_v38  ;;  %v1440_v46 = vadd.f32 %v1385_v50, %v528_v40 }
 0x111   :  { %v1046_v47 = vpop.eup %1045  ;;  %1059 = vrcp.f32 %v706_v41  ;;  %v1443_v49 = vadd.f32 %v1385_v50, %v544_v43  ;;  %v413_v51 = vpop.f32.mrf.mxu0 }
 0x112   :  { %v477_v52 = vpop.f32.mrf.mxu1  ;;  %v1048_v53 = vpop.eup %1047  ;;  %v691_v54 = vadd.f32 1.0, %v1046_v47  ;;  %1061 = vpow2.f32 %v922_v39  ;;  %v923_v55 = vmul.f32 -1.442695, %v1440_v46  ;;  %v529_v58 = vmul.f32 %v1380_v48, %v413_v51 }
 0x113   :  { %v707_v59 = vadd.f32 1.0, %v1048_v53  ;;  %1063 = vpow2.f32 %v938_v42  ;;  %v939_v60 = vmul.f32 -1.442695, %v1443_v49  ;;  %v545_v61 = vmul.f32 %v1380_v48, %v477_v52  ;;  %v415_v62 = vpop.f32.mrf.mxu0 }
 0x114   :  { %v479_v63 = vpop.f32.mrf.mxu1  ;;  %1065 = vrcp.f32 %v691_v54  ;;  %v1450_v0 = vadd.f32 %v1385_v50, %v529_v58 }
 0x115   :  { %v1050_v1 = vpop.eup %1049  ;;  %1067 = vrcp.f32 %v707_v59  ;;  %v1453_v4 = vadd.f32 %v1385_v50, %v545_v61  ;;  %v416_v5 = vpop.f32.mrf.mxu0 }
 0x116   :  { %v480_v6 = vpop.f32.mrf.mxu1  ;;  %v1052_v7 = vpop.eup %1051  ;;  %v692_v8 = vadd.f32 1.0, %v1050_v1  ;;  %1069 = vpow2.f32 %v923_v55  ;;  %v924_v9 = vmul.f32 -1.442695, %v1450_v0  ;;  %v530_v10 = vmul.f32 %v1380_v48, %v416_v5 }
 0x117   :  { %v708_v11 = vadd.f32 1.0, %v1052_v7  ;;  %1071 = vpow2.f32 %v939_v60  ;;  %v940_v14 = vmul.f32 -1.442695, %v1453_v4  ;;  %v546_v15 = vmul.f32 %v1380_v48, %v480_v6  ;;  %v418_v16 = vpop.f32.mrf.mxu0 }
 0x118   :  { %v482_v17 = vpop.f32.mrf.mxu1  ;;  %1073 = vrcp.f32 %v692_v8  ;;  %v1460_v18 = vadd.f32 %v1385_v50, %v530_v10 }
 0x119   :  { %v1054_v19 = vpop.eup %1053  ;;  %1075 = vrcp.f32 %v708_v11  ;;  %v1463_v20 = vadd.f32 %v1385_v50, %v546_v15  ;;  %v421_v21 = vpop.f32.mrf.mxu0 }
 0x11a   :  { %v485_v24 = vpop.f32.mrf.mxu1  ;;  %v1056_v25 = vpop.eup %1055  ;;  %v693_v26 = vadd.f32 1.0, %v1054_v19  ;;  %1077 = vpow2.f32 %v924_v9  ;;  %v925_v27 = vmul.f32 -1.442695, %v1460_v18  ;;  %v531_v28 = vmul.f32 %v1380_v48, %v421_v21 }
 0x11b   :  { %v709_v29 = vadd.f32 1.0, %v1056_v25  ;;  %1079 = vpow2.f32 %v940_v14  ;;  %v941_v30 = vmul.f32 -1.442695, %v1463_v20  ;;  %v547_v31 = vmul.f32 %v1380_v48, %v485_v24  ;;  %v423_v34 = vpop.f32.mrf.mxu0 }
 0x11c   :  { %v487_v35 = vpop.f32.mrf.mxu1  ;;  %1081 = vrcp.f32 %v693_v26  ;;  %v1470_v36 = vadd.f32 %v1385_v50, %v531_v28 }
 0x11d   :  { %v1058_v37 = vpop.eup %1057  ;;  %1083 = vrcp.f32 %v709_v29  ;;  %v1473_v38 = vadd.f32 %v1385_v50, %v547_v31  ;;  %v424_v39 = vpop.f32.mrf.mxu0 }
 0x11e   :  { %v488_v40 = vpop.f32.mrf.mxu1  ;;  %v1060_v41 = vpop.eup %1059  ;;  %v786_v42 = vmul.f32 %v1058_v37, %v1390_v56  ;;  %1085 = vpow2.f32 %v925_v27  ;;  %v926_v43 = vmul.f32 -1.442695, %v1470_v36  ;;  %v532_v44 = vmul.f32 %v1380_v48, %v424_v39 }
 0x11f   :  { %v1062_v45 = vpop.eup %1061  ;;  %v802_v47 = vmul.f32 %v1060_v41, %v1393_v57  ;;  %1087 = vpow2.f32 %v941_v30  ;;  %v942_v51 = vmul.f32 -1.442695, %v1473_v38  ;;  %v548_v52 = vmul.f32 %v1380_v48, %v488_v40  ;;  %v426_v53 = vpop.f32.mrf.mxu0 }
 0x120   :  { %v490_v54 = vpop.f32.mrf.mxu1  ;;  %v1064_v55 = vpop.eup %1063  ;;  %818 = vst [vmem:[%s1679_s4] sm:$0xff] %v786_v42  ;;  %v694_v56 = vadd.f32 1.0, %v1062_v45  ;;  %1089 = vpow2.f32 %v926_v43  ;;  %v1485_v58 = vadd.f32 %v1385_v50, %v532_v44 }
 0x121   :  { %v1066_v59 = vpop.eup %1065  ;;  %834 = vst [vmem:[%s1679_s4 + $0x80] sm:$0xff] %v802_v47  ;;  %v710_v57 = vadd.f32 1.0, %v1064_v55  ;;  %1091 = vpow2.f32 %v942_v51  ;;  %v1491_v60 = vadd.f32 %v1385_v50, %v548_v52  ;;  %v429_v61 = vpop.f32.mrf.mxu0 }
 0x122   :  { %v493_v62 = vpop.f32.mrf.mxu1  ;;  %v1068_v63 = vpop.eup %1067  ;;  %v787_v1 = vmul.f32 %v1066_v59, %v1400_v2  ;;  %1093 = vrcp.f32 %v694_v56  ;;  %v927_v5 = vmul.f32 -1.442695, %v1485_v58  ;;  %v533_v6 = vmul.f32 %v1380_v48, %v429_v61 }
 0x123   :  { %v1070_v7 = vpop.eup %1069  ;;  %v803_v8 = vmul.f32 %v1068_v63, %v1403_v3  ;;  %1095 = vrcp.f32 %v710_v57  ;;  %v943_v9 = vmul.f32 -1.442695, %v1491_v60  ;;  %v549_v10 = vmul.f32 %v1380_v48, %v493_v62  ;;  %v431_v11 = vpop.f32.mrf.mxu0 }
 0x124   :  { %v495_v14 = vpop.f32.mrf.mxu1  ;;  %v1072_v15 = vpop.eup %1071  ;;  %819 = vst [vmem:[%s1679_s4 + $0x8] sm:$0xff] %v787_v1  ;;  %v695_v2 = vadd.f32 1.0, %v1070_v7  ;;  %1097 = vpow2.f32 %v927_v5  ;;  %v1503_v16 = vadd.f32 %v1385_v50, %v533_v6 }
 0x125   :  { %v1074_v17 = vpop.eup %1073  ;;  %835 = vst [vmem:[%s1679_s4 + $0x88] sm:$0xff] %v803_v8  ;;  %v711_v3 = vadd.f32 1.0, %v1072_v15  ;;  %1099 = vpow2.f32 %v943_v9  ;;  %v1509_v19 = vadd.f32 %v1385_v50, %v549_v10  ;;  %v432_v21 = vpop.f32.mrf.mxu0 }
 0x126   :  { %v496_v24 = vpop.f32.mrf.mxu1  ;;  %v1076_v25 = vpop.eup %1075  ;;  %v788_v26 = vmul.f32 %v1074_v17, %v1410_v12  ;;  %1101 = vrcp.f32 %v695_v2  ;;  %v928_v27 = vmul.f32 -1.442695, %v1503_v16  ;;  %v534_v28 = vmul.f32 %v1380_v48, %v432_v21 }
 0x127   :  { %v1078_v29 = vpop.eup %1077  ;;  %v804_v30 = vmul.f32 %v1076_v25, %v1413_v13  ;;  %1103 = vrcp.f32 %v711_v3  ;;  %v944_v31 = vmul.f32 -1.442695, %v1509_v19  ;;  %v550_v34 = vmul.f32 %v1380_v48, %v496_v24  ;;  %v434_v35 = vpop.f32.mrf.mxu0 }
 0x128   :  { %v498_v37 = vpop.f32.mrf.mxu1  ;;  %v1080_v39 = vpop.eup %1079  ;;  %820 = vst [vmem:[%s1679_s4 + $0x10] sm:$0xff] %v788_v26  ;;  %v696_v12 = vadd.f32 1.0, %v1078_v29  ;;  %1105 = vpow2.f32 %v928_v27  ;;  %v1521_v40 = vadd.f32 %v1385_v50, %v534_v28 }
 0x129   :  { %v1082_v41 = vpop.eup %1081  ;;  %836 = vst [vmem:[%s1679_s4 + $0x90] sm:$0xff] %v804_v30  ;;  %v712_v13 = vadd.f32 1.0, %v1080_v39  ;;  %1107 = vpow2.f32 %v944_v31  ;;  %v1527_v42 = vadd.f32 %v1385_v50, %v550_v34  ;;  %v437_v43 = vpop.f32.mrf.mxu0 }
 0x12a   :  { %v501_v44 = vpop.f32.mrf.mxu1  ;;  %v1084_v45 = vpop.eup %1083  ;;  %v789_v47 = vmul.f32 %v1082_v41, %v1420_v22  ;;  %1109 = vrcp.f32 %v696_v12  ;;  %v929_v51 = vmul.f32 -1.442695, %v1521_v40  ;;  %v535_v52 = vmul.f32 %v1380_v48, %v437_v43 }
 0x12b   :  { %v1086_v53 = vpop.eup %1085  ;;  %v805_v54 = vmul.f32 %v1084_v45, %v1423_v23  ;;  %1111 = vrcp.f32 %v712_v13  ;;  %v945_v55 = vmul.f32 -1.442695, %v1527_v42  ;;  %v551_v56 = vmul.f32 %v1380_v48, %v501_v44  ;;  %v439_v59 = vpop.f32.mrf.mxu0 }
 0x12c   :  { %v503_v57 = vpop.f32.mrf.mxu1  ;;  %v1088_v61 = vpop.eup %1087  ;;  %821 = vst [vmem:[%s1679_s4 + $0x18] sm:$0xff] %v789_v47  ;;  %v697_v22 = vadd.f32 1.0, %v1086_v53  ;;  %1113 = vpow2.f32 %v929_v51  ;;  %v1539_v62 = vadd.f32 %v1385_v50, %v535_v52 }
 0x12d   :  { %v1090_v63 = vpop.eup %1089  ;;  %837 = vst [vmem:[%s1679_s4 + $0x98] sm:$0xff] %v805_v54  ;;  %v713_v23 = vadd.f32 1.0, %v1088_v61  ;;  %1115 = vpow2.f32 %v945_v55  ;;  %v1545_v1 = vadd.f32 %v1385_v50, %v551_v56  ;;  %v440_v5 = vpop.f32.mrf.mxu0 }
 0x12e   :  { %v504_v6 = vpop.f32.mrf.mxu1  ;;  %v1092_v7 = vpop.eup %1091  ;;  %1117 = vrcp.f32 %v697_v22  ;;  %v698_v8 = vadd.f32 1.0, %v1090_v63  ;;  %v930_v9 = vmul.f32 -1.442695, %v1539_v62  ;;  %v536_v10 = vmul.f32 %v1380_v48, %v440_v5 }
 0x12f   :  { %v1094_v11 = vpop.eup %1093  ;;  %1119 = vrcp.f32 %v713_v23  ;;  %v714_v14 = vadd.f32 1.0, %v1092_v7  ;;  %v946_v15 = vmul.f32 -1.442695, %v1545_v1  ;;  %v552_v2 = vmul.f32 %v1380_v48, %v504_v6  ;;  %v442_v17 = vpop.f32.mrf.mxu0 }
 0x130   :  { %v506_v3 = vpop.f32.mrf.mxu1  ;;  %v1096_v21 = vpop.eup %1095  ;;  %v790_v24 = vmul.f32 %v1094_v11, %v1430_v32  ;;  %1121 = vrcp.f32 %v698_v8  ;;  %v1553_v25 = vadd.f32 %v1385_v50, %v536_v10 }
 0x131   :  { %v1098_v26 = vpop.eup %1097  ;;  %v806_v27 = vmul.f32 %v1096_v21, %v1433_v33  ;;  %1123 = vrcp.f32 %v714_v14  ;;  %v1557_v28 = vadd.f32 %v1385_v50, %v552_v2  ;;  %v445_v29 = vpop.f32.mrf.mxu0 }
 0x132   :  { %v509_v30 = vpop.f32.mrf.mxu1  ;;  %v1100_v31 = vpop.eup %1099  ;;  %822 = vst [vmem:[%s1679_s4 + $0x20] sm:$0xff] %v790_v24  ;;  %v699_v34 = vadd.f32 1.0, %v1098_v26  ;;  %1125 = vpow2.f32 %v930_v9  ;;  %v931_v32 = vmul.f32 -1.442695, %v1553_v25  ;;  %v537_v35 = vmul.f32 %v1380_v48, %v445_v29 }
 0x133   :  { %v1102_v37 = vpop.eup %1101  ;;  %838 = vst [vmem:[%s1679_s4 + $0xa0] sm:$0xff] %v806_v27  ;;  %v715_v33 = vadd.f32 1.0, %v1100_v31  ;;  %1127 = vpow2.f32 %v946_v15  ;;  %v947_v39 = vmul.f32 -1.442695, %v1557_v28  ;;  %v553_v12 = vmul.f32 %v1380_v48, %v509_v30  ;;  %v447_v41 = vpop.f32.mrf.mxu0 }
 0x134   :  { %v511_v13 = vpop.f32.mrf.mxu1  ;;  %v1104_v43 = vpop.eup %1103  ;;  %v791_v44 = vmul.f32 %v1102_v37, %v1440_v46  ;;  %1129 = vrcp.f32 %v699_v34  ;;  %v1571_v45 = vadd.f32 %v1385_v50, %v537_v35 }
 0x135   :  { %v1106_v47 = vpop.eup %1105  ;;  %v807_v51 = vmul.f32 %v1104_v43, %v1443_v49  ;;  %1131 = vrcp.f32 %v715_v33  ;;  %v1575_v52 = vadd.f32 %v1385_v50, %v553_v12  ;;  %v448_v53 = vpop.f32.mrf.mxu0 }
 0x136   :  { %v512_v54 = vpop.f32.mrf.mxu1  ;;  %v1108_v55 = vpop.eup %1107  ;;  %823 = vst [vmem:[%s1679_s4 + $0x28] sm:$0xff] %v791_v44  ;;  %v700_v56 = vadd.f32 1.0, %v1106_v47  ;;  %1133 = vpow2.f32 %v931_v32  ;;  %v932_v46 = vmul.f32 -1.442695, %v1571_v45  ;;  %v538_v59 = vmul.f32 %v1380_v48, %v448_v53 }
 0x137   :  { %v1110_v57 = vpop.eup %1109  ;;  %839 = vst [vmem:[%s1679_s4 + $0xa8] sm:$0xff] %v807_v51  ;;  %v716_v49 = vadd.f32 1.0, %v1108_v55  ;;  %1135 = vpow2.f32 %v947_v39  ;;  %v948_v61 = vmul.f32 -1.442695, %v1575_v52  ;;  %v554_v22 = vmul.f32 %v1380_v48, %v512_v54  ;;  %v450_v63 = vpop.f32.mrf.mxu0 }
 0x138   :  { %v514_v23 = vpop.f32.mrf.mxu1  ;;  %v1112_v5 = vpop.eup %1111  ;;  %v792_v6 = vmul.f32 %v1110_v57, %v1450_v0  ;;  %1137 = vrcp.f32 %v700_v56  ;;  %v1589_v7 = vadd.f32 %v1385_v50, %v538_v59 }
 0x139   :  { %v1114_v8 = vpop.eup %1113  ;;  %v808_v9 = vmul.f32 %v1112_v5, %v1453_v4  ;;  %1139 = vrcp.f32 %v716_v49  ;;  %v1593_v10 = vadd.f32 %v1385_v50, %v554_v22 }
 0x13a   :  { %v1116_v11 = vpop.eup %1115  ;;  %824 = vst [vmem:[%s1679_s4 + $0x30] sm:$0xff] %v792_v6  ;;  %v701_v48 = vadd.f32 1.0, %v1114_v8  ;;  %1141 = vpow2.f32 %v932_v46  ;;  %v933_v0 = vmul.f32 -1.442695, %v1589_v7 }
 0x13b   :  { %v1118_v14 = vpop.eup %1117  ;;  %840 = vst [vmem:[%s1679_s4 + $0xb0] sm:$0xff] %v808_v9  ;;  %v717_v15 = vadd.f32 1.0, %v1116_v11  ;;  %1143 = vpow2.f32 %v948_v61  ;;  %v949_v4 = vmul.f32 -1.442695, %v1593_v10 }
 0x13c   :  { %v1120_v50 = vpop.eup %1119  ;;  %v793_v2 = vmul.f32 %v1118_v14, %v1460_v18  ;;  %1145 = vrcp.f32 %v701_v48 }
 0x13d   :  { %v1122_v17 = vpop.eup %1121  ;;  %v809_v3 = vmul.f32 %v1120_v50, %v1463_v20  ;;  %1147 = vrcp.f32 %v717_v15 }
 0x13e   :  { %v1124_v21 = vpop.eup %1123  ;;  %825 = vst [vmem:[%s1679_s4 + $0x38] sm:$0xff] %v793_v2  ;;  %v794_v24 = vmul.f32 %v1122_v17, %v1470_v36  ;;  %1149 = vpow2.f32 %v933_v0 }
 0x13f   :  { %v1126_v26 = vpop.eup %1125  ;;  %841 = vst [vmem:[%s1679_s4 + $0xb8] sm:$0xff] %v809_v3  ;;  %v810_v18 = vmul.f32 %v1124_v21, %v1473_v38  ;;  %1151 = vpow2.f32 %v949_v4 }
 0x140   :  { %v1128_v27 = vpop.eup %1127  ;;  %826 = vst [vmem:[%s1679_s4 + $0x40] sm:$0xff] %v794_v24  ;;  %v702_v20 = vadd.f32 1.0, %v1126_v26 }
 0x141   :  { %v1130_v29 = vpop.eup %1129  ;;  %842 = vst [vmem:[%s1679_s4 + $0xc0] sm:$0xff] %v810_v18  ;;  %v718_v36 = vadd.f32 1.0, %v1128_v27 }
 0x142   :  { %v1132_v30 = vpop.eup %1131  ;;  %v795_v31 = vmul.f32 %v1130_v29, %v1485_v58  ;;  %1153 = vrcp.f32 %v702_v20 }
 0x143   :  { %v1134_v34 = vpop.eup %1133  ;;  %v811_v38 = vmul.f32 %v1132_v30, %v1491_v60  ;;  %1155 = vrcp.f32 %v718_v36 }
 0x144   :  { %v1136_v32 = vpop.eup %1135  ;;  %827 = vst [vmem:[%s1679_s4 + $0x48] sm:$0xff] %v795_v31  ;;  %v703_v35 = vadd.f32 1.0, %v1134_v34 }
 0x145   :  { %v1138_v37 = vpop.eup %1137  ;;  %843 = vst [vmem:[%s1679_s4 + $0xc8] sm:$0xff] %v811_v38  ;;  %v719_v33 = vadd.f32 1.0, %v1136_v32 }
 0x146   :  { %v1140_v39 = vpop.eup %1139  ;;  %v796_v58 = vmul.f32 %v1138_v37, %v1503_v16  ;;  %1157 = vrcp.f32 %v703_v35 }
 0x147   :  { %v1142_v12 = vpop.eup %1141  ;;  %v812_v60 = vmul.f32 %v1140_v39, %v1509_v19  ;;  %1159 = vrcp.f32 %v719_v33 }
 0x148   :  { %v1144_v41 = vpop.eup %1143  ;;  %828 = vst [vmem:[%s1679_s4 + $0x50] sm:$0xff] %v796_v58  ;;  %v704_v13 = vadd.f32 1.0, %v1142_v12 }
 0x149   :  { %v1146_v43 = vpop.eup %1145  ;;  %844 = vst [vmem:[%s1679_s4 + $0xd0] sm:$0xff] %v812_v60  ;;  %v720_v44 = vadd.f32 1.0, %v1144_v41 }
 0x14a   :  { %v1148_v47 = vpop.eup %1147  ;;  %v797_v16 = vmul.f32 %v1146_v43, %v1521_v40  ;;  %1161 = vrcp.f32 %v704_v13 }
 0x14b   :  { %v1150_v51 = vpop.eup %1149  ;;  %v813_v19 = vmul.f32 %v1148_v47, %v1527_v42  ;;  %1163 = vrcp.f32 %v720_v44 }
 0x14c   :  { %v1152_v53 = vpop.eup %1151  ;;  %829 = vst [vmem:[%s1679_s4 + $0x58] sm:$0xff] %v797_v16  ;;  %v705_v54 = vadd.f32 1.0, %v1150_v51 }
 0x14d   :  { %845 = vst [vmem:[%s1679_s4 + $0xd8] sm:$0xff] %v813_v19  ;;  %v721_v55 = vadd.f32 1.0, %v1152_v53 }
 0x14e   :  { %1165 = vrcp.f32 %v705_v54 }
 0x14f   :  { %v1154_v56 = vpop.eup %1153  ;;  %1167 = vrcp.f32 %v721_v55 }
 0x150   :  { %v1156_v40 = vpop.eup %1155  ;;  %v798_v46 = vmul.f32 %v1154_v56, %v1539_v62 }
 0x151   :  { %v814_v42 = vmul.f32 %v1156_v40, %v1545_v1 }
 0x152   :  { %830 = vst [vmem:[%s1679_s4 + $0x60] sm:$0xff] %v798_v46 }
 0x153   :  { %v1158_v59 = vpop.eup %1157  ;;  %846 = vst [vmem:[%s1679_s4 + $0xe0] sm:$0xff] %v814_v42 }
 0x154   :  { %v1160_v57 = vpop.eup %1159  ;;  %v799_v49 = vmul.f32 %v1158_v59, %v1553_v25 }
 0x155   :  { %v815_v61 = vmul.f32 %v1160_v57, %v1557_v28 }
 0x156   :  { %831 = vst [vmem:[%s1679_s4 + $0x68] sm:$0xff] %v799_v49 }
 0x157   :  { %v1162_v62 = vpop.eup %1161  ;;  %847 = vst [vmem:[%s1679_s4 + $0xe8] sm:$0xff] %v815_v61 }
 0x158   :  { %v1164_v1 = vpop.eup %1163  ;;  %v800_v22 = vmul.f32 %v1162_v62, %v1571_v45 }
 0x159   :  { %v816_v63 = vmul.f32 %v1164_v1, %v1575_v52 }
 0x15a   :  { %832 = vst [vmem:[%s1679_s4 + $0x70] sm:$0xff] %v800_v22 }
 0x15b   :  { %v1166_v25 = vpop.eup %1165  ;;  %848 = vst [vmem:[%s1679_s4 + $0xf0] sm:$0xff] %v816_v63 }
 0x15c   :  { %v1168_v28 = vpop.eup %1167  ;;  %v801_v23 = vmul.f32 %v1166_v25, %v1589_v7 }
 0x15d   :  { %v817_v5 = vmul.f32 %v1168_v28, %v1593_v10 }
 0x15e   :  { %833 = vst [vmem:[%s1679_s4 + $0x78] sm:$0xff] %v801_v23 }
 0x15f   :  { %849 = vst [vmem:[%s1679_s4 + $0xf8] sm:$0xff] %v817_v5 }

// kernel: effi_b7_forward.19
= control target key start
LH: loop header
LB: loop body
LE: loop exit
PB: predicated region body
PF: predicated region fallthrough
CT: control target
= control target key end

     0   :  { %vm314_vm0 = vcmask 261120   ;;  %s1340_s1 = inlined_call_operand.vmem [shape: bf16[288,128], index: 1, kind: input, shape index: {}]   ;;  %s1341_s0 = inlined_call_operand.vmem [shape: bf16[128,288], index: 0, kind: input, shape index: {}]   ;;  %s1342_s2 = inlined_call_operand.vmem [shape: f32[1,128], index: 2, kind: input, shape index: {}]   ;;  %s1343_s3 = inlined_call_operand.vmem [shape: f32[1,128], index: 3, kind: input, shape index: {}]   ;;  %s1344_s4 = inlined_call_operand.vmem [shape: f32[128,128], index: 4, kind: output, shape index: {}]  }
   0x1   :  { %v889_v0 = vld [vmem:[%s1340_s1 + $0x78] sm:$0xff]   ;;  %v891_v2 = vld [vmem:[%s1340_s1 + $0x70] sm:$0xff]   ;;  %v893_v4 = vld [vmem:[%s1340_s1 + $0x68] sm:$0xff]  }
   0x2   :  { %v890_v1 = vld [vmem:[%s1340_s1 + $0x38] sm:$0xff]   ;;  %779 = vmatprep.subr.bf16.mxu0 %v889_v0  ;;  %873 = vmatprep.subr.bf16.mxu1 %v889_v0  ;;  %v892_v3 = vld [vmem:[%s1340_s1 + $0x30] sm:$0xff]   ;;  %v894_v5 = vld [vmem:[%s1340_s1 + $0x28] sm:$0xff]  }
   0x3   :  { %780 = vmatpush3.bf16.msra.mxu0 %v890_v1  ;;  %881 = vmatpush3.bf16.msra.mxu1 %v890_v1  ;;  %v895_v6 = vld [vmem:[%s1340_s1 + $0x60] sm:$0xff]   ;;  %v897_v8 = vld [vmem:[%s1340_s1 + $0x58] sm:$0xff]   ;;  %v899_v10 = vld [vmem:[%s1340_s1 + $0x50] sm:$0xff]  }
   0x4   :  { %781 = vmatprep.subr.bf16.mxu0 %v891_v2  ;;  %874 = vmatprep.subr.bf16.mxu1 %v891_v2  ;;  %v896_v7 = vld [vmem:[%s1340_s1 + $0x20] sm:$0xff]   ;;  %v898_v9 = vld [vmem:[%s1340_s1 + $0x18] sm:$0xff]   ;;  %v900_v13 = vld [vmem:[%s1340_s1 + $0x10] sm:$0xff]  }
   0x5   :  { %v907_v11 = vld [vmem:[%s1341_s0 + $0x4] ss:$12 sps:$4 sm:$0xff]   ;;  %v910_v12 = vld [vmem:[%s1341_s0 + $0x94] ss:$12 sps:$4 sm:$0xff]   ;;  %v901_v14 = vld [vmem:[%s1340_s1 + $0x48] sm:$0xff]  }
   0x6   :  { %371 = vmatprep.mubr.bf16.mxu0 %v907_v11  ;;  %419 = vmatprep.mubr.bf16.mxu1 %v910_v12  ;;  %v902_v15 = vld [vmem:[%s1340_s1 + $0x8] sm:$0xff]   ;;  %v903_v16 = vld [vmem:[%s1340_s1 + $0x40] sm:$0xff]   ;;  %v908_v20 = vld [vmem:[%s1341_s0 + $0x90] ss:$12 sps:$4 sm:$0xff]  }
   0x7   :  { %782 = vmatpush3.bf16.msra.mxu0 %v892_v3  ;;  %882 = vmatpush3.bf16.msra.mxu1 %v892_v3  ;;  %v904_v17 = vld [vmem:[%s1340_s1] sm:$0xff]   ;;  %v911_v19 = vld [vmem:[%s1340_s1 + $0x88] sm:$0xff]   ;;  %v922_v28 = vld [vmem:[%s1341_s0 + $0x30] ss:$12 sps:$4 sm:$0xff]  }
   0x8   :  { %783 = vmatprep.subr.bf16.mxu0 %v893_v4  ;;  %875 = vmatprep.subr.bf16.mxu1 %v893_v4  ;;  %v905_v18 = vld [vmem:[%s1341_s0] ss:$12 sps:$4 sm:$0xff]   ;;  %v912_v21 = vld [vmem:[%s1341_s0 + $0x1c] ss:$12 sps:$4 sm:$0xff]   ;;  %v916_v24 = vld [vmem:[%s1341_s0 + $0x18] ss:$12 sps:$4 sm:$0xff]  }
   0x9   :  { %v914_v22 = vld [vmem:[%s1341_s0 + $0xac] ss:$12 sps:$4 sm:$0xff]   ;;  %v918_v23 = vld [vmem:[%s1340_s1 + $0x80] sm:$0xff]   ;;  %v917_v25 = vld [vmem:[%s1341_s0 + $0xa8] ss:$12 sps:$4 sm:$0xff]  }
   0xa   :  { %v919_v26 = vld [vmem:[%s1341_s0 + $0x34] ss:$12 sps:$4 sm:$0xff]   ;;  %v924_v30 = vld [vmem:[%s1341_s0 + $0x4c] ss:$12 sps:$4 sm:$0xff]   ;;  %v928_v33 = vld [vmem:[%s1341_s0 + $0x50] ss:$12 sps:$4 sm:$0xff]  }
   0xb   :  { %784 = vmatpush3.bf16.msra.mxu0 %v894_v5  ;;  %883 = vmatpush3.bf16.msra.mxu1 %v894_v5  ;;  %v921_v27 = vld [vmem:[%s1341_s0 + $0x8] ss:$12 sps:$4 sm:$0xff]   ;;  %v923_v29 = vld [vmem:[%s1341_s0 + $0x20] ss:$12 sps:$4 sm:$0xff]   ;;  %v926_v31 = vld [vmem:[%s1341_s0 + $0x38] ss:$12 sps:$4 sm:$0xff]  }
   0xc   :  { %785 = vmatprep.subr.bf16.mxu0 %v895_v6  ;;  %876 = vmatprep.subr.bf16.mxu1 %v895_v6  ;;  %v927_v32 = vld [vmem:[%s1341_s0 + $0x48] ss:$12 sps:$4 sm:$0xff]   ;;  %v929_v34 = vld [vmem:[%s1341_s0 + $0x64] ss:$12 sps:$4 sm:$0xff]   ;;  %v932_v36 = vld [vmem:[%s1341_s0 + $0x60] ss:$12 sps:$4 sm:$0xff]  }
   0xd   :  { %v931_v35 = vld [vmem:[%s1341_s0 + $0x68] ss:$12 sps:$4 sm:$0xff]   ;;  %v933_v37 = vld [vmem:[%s1341_s0 + $0x80] ss:$12 sps:$4 sm:$0xff]   ;;  %v936_v39 = vld [vmem:[%s1341_s0 + $0x98] ss:$12 sps:$4 sm:$0xff]  }
   0xe   :  { %v934_v38 = vld [vmem:[%s1341_s0 + $0x7c] ss:$12 sps:$4 sm:$0xff]   ;;  %v937_v40 = vld [vmem:[%s1341_s0 + $0x78] ss:$12 sps:$4 sm:$0xff]   ;;  %v1181_v61 = vld [vmem:[%s1342_s2] ss:$0 sm:$0xff] }
   0xf   :  { %786 = vmatpush3.bf16.msra.mxu0 %v896_v7  ;;  %884 = vmatpush3.bf16.msra.mxu1 %v896_v7  ;;  %v938_v41 = vld [vmem:[%s1341_s0 + $0xb0] ss:$12 sps:$4 sm:$0xff]   ;;  %v1186_v0 = vld [vmem:[%s1343_s3] ss:$0 sm:$0xff] }
  0x10   :  { %787 = vmatprep.subr.bf16.mxu0 %v897_v8  ;;  %877 = vmatprep.subr.bf16.mxu1 %v897_v8 }
  0x13   :  { %788 = vmatpush3.bf16.msra.mxu0 %v898_v9  ;;  %885 = vmatpush3.bf16.msra.mxu1 %v898_v9 }
  0x14   :  { %789 = vmatprep.subr.bf16.mxu0 %v899_v10  ;;  %878 = vmatprep.subr.bf16.mxu1 %v899_v10 }
  0x17   :  { %790 = vmatpush3.bf16.msra.mxu0 %v900_v13  ;;  %886 = vmatpush3.bf16.msra.mxu1 %v900_v13 }
  0x18   :  { %791 = vmatprep.subr.bf16.mxu0 %v901_v14  ;;  %879 = vmatprep.subr.bf16.mxu1 %v901_v14 }
  0x1b   :  { %792 = vmatpush3.bf16.msra.mxu0 %v902_v15  ;;  %887 = vmatpush3.bf16.msra.mxu1 %v902_v15 }
  0x1c   :  { %793 = vmatprep.subr.bf16.mxu0 %v903_v16  ;;  %880 = vmatprep.subr.bf16.mxu1 %v903_v16 }
  0x1f   :  { %794 = vmatpush3.bf16.msra.mxu0 %v904_v17  ;;  %888 = vmatpush3.bf16.msra.mxu1 %v904_v17 }
  0x20   :  { %853 = vmatprep.subr.bf16.mxu1 %v911_v19 }
  0x22   :  { %372 = vmatmul.mubr.bf16.vlgmr.msra.gmra.mxu0 %v905_v18  ;;  %420 = vmatmul.mubr.bf16.vlgmr.msra.gmra.mxu1 %v908_v20 }
  0x23   :  { %854 = vmatpush3.bf16.msra.mxu1 %v911_v19  ;;  %379 = vmatprep.mubr.bf16.mxu0 %v912_v21 }
  0x24   :  { %427 = vmatprep.mubr.bf16.mxu1 %v914_v22  ;;  %855 = vmatprep.subr.bf16.mxu1 %v918_v23 }
  0x27   :  { %856 = vmatpush3.bf16.msra.mxu1 %v918_v23 }
  0x2a   :  { %380 = vmatmul.mubr.bf16.gmra.mxu0 %v916_v24  ;;  %428 = vmatmul.mubr.bf16.gmra.mxu1 %v917_v25 }
  0x2b   :  { %387 = vmatprep.mubr.bf16.mxu0 %v919_v26  ;;  %857 = vmatprep.mubr.msk.bf16.mxu1 %vm314_vm0, %v921_v27 }
  0x32   :  { %388 = vmatmul.mubr.bf16.gmra.mxu0 %v922_v28  ;;  %858 = vmatmul.mubr.msk.bf16.vlgmr.msra.gmra.mxu1 %vm314_vm0, %v923_v29 }
  0x33   :  { %395 = vmatprep.mubr.bf16.mxu0 %v924_v30  ;;  %861 = vmatprep.mubr.msk.bf16.mxu1 %vm314_vm0, %v926_v31 }
  0x3a   :  { %396 = vmatmul.mubr.bf16.gmra.mxu0 %v927_v32  ;;  %862 = vmatmul.mubr.msk.bf16.gmra.mxu1 %vm314_vm0, %v928_v33 }
  0x3b   :  { %403 = vmatprep.mubr.bf16.mxu0 %v929_v34  ;;  %865 = vmatprep.mubr.msk.bf16.mxu1 %vm314_vm0, %v931_v35 }
  0x42   :  { %404 = vmatmul.mubr.bf16.gmra.mxu0 %v932_v36  ;;  %866 = vmatmul.mubr.msk.bf16.gmra.mxu1 %vm314_vm0, %v933_v37 }
  0x43   :  { %411 = vmatprep.mubr.bf16.mxu0 %v934_v38  ;;  %869 = vmatprep.mubr.msk.bf16.mxu1 %vm314_vm0, %v936_v39 }
  0x4a   :  { %412 = vmatmul.mubr.bf16.gmra.mxu0 %v937_v40  ;;  %870 = vmatmul.mubr.msk.bf16.gmra.mxu1 %vm314_vm0, %v938_v41 }
  0xe2   :  { %v795_v42 = vpop.f32.mrf.mxu0  ;;  %v1162_v43 = vpop.f32.mrf.mxu1 }
  0xe4   :  { %v796_v44 = vpop.f32.mrf.mxu0  ;;  %v1164_v45 = vpop.f32.mrf.mxu1 }
  0xe5   :  { %v797_v62 = vadd.f32 %v796_v44, %v795_v42 }
  0xe6   :  { %v798_v46 = vpop.f32.mrf.mxu0  ;;  %v1166_v47 = vpop.f32.mrf.mxu1 }
  0xe8   :  { %v799_v48 = vpop.f32.mrf.mxu0  ;;  %v1168_v49 = vpop.f32.mrf.mxu1 }
  0xe9   :  { %v800_v11 = vadd.f32 %v799_v48, %v798_v46 }
  0xea   :  { %v801_v50 = vpop.f32.mrf.mxu0  ;;  %v1170_v51 = vpop.f32.mrf.mxu1 }
  0xec   :  { %v802_v52 = vpop.f32.mrf.mxu0  ;;  %v1172_v53 = vpop.f32.mrf.mxu1 }
  0xed   :  { %v803_v58 = vadd.f32 %v802_v52, %v801_v50 }
  0xee   :  { %v804_v54 = vpop.f32.mrf.mxu0  ;;  %v1174_v55 = vpop.f32.mrf.mxu1 }
  0xf0   :  { %v805_v56 = vpop.f32.mrf.mxu0  ;;  %v1176_v57 = vpop.f32.mrf.mxu1 }
  0xf1   :  { %v806_v3 = vadd.f32 %v805_v56, %v804_v54 }
  0xf2   :  { %v807_v59 = vpop.f32.mrf.mxu0  ;;  %v859_v60 = vpop.f32.mrf.mxu1 }
  0xf3   :  { %v479_v63 = vadd.f32 %v859_v60, %v803_v58 }
  0xf4   :  { %v808_v1 = vpop.f32.mrf.mxu0  ;;  %v470_v2 = vpop.f32.mrf.mxu1 }
  0xf5   :  { %v542_v4 = vmul.f32 %v1181_v61, %v479_v63  ;;  %v471_v5 = vadd.f32 %v797_v62, %v470_v2  ;;  %v809_v20 = vadd.f32 %v808_v1, %v807_v59 }
  0xf6   :  { %v810_v6 = vpop.f32.mrf.mxu0  ;;  %v860_v7 = vpop.f32.mrf.mxu1 }
  0xf7   :  { %v1190_v8 = vadd.f32 %v1186_v0, %v542_v4  ;;  %v540_v9 = vmul.f32 %v1181_v61, %v471_v5  ;;  %v482_v10 = vadd.f32 %v860_v7, %v806_v3  ;;  %v839_v5 = vadd.f32 %v1172_v53, %v1170_v51 }
  0xf8   :  { %v811_v12 = vpop.f32.mrf.mxu0  ;;  %v473_v13 = vpop.f32.mrf.mxu1  ;;  %v833_v51 = vadd.f32 %v1164_v45, %v1162_v43  ;;  %v842_v53 = vadd.f32 %v1176_v57, %v1174_v55 }
  0xf9   :  { %v765_v14 = vmul.f32 -1.442695, %v1190_v8  ;;  %v1195_v15 = vadd.f32 %v1186_v0, %v540_v9  ;;  %v543_v16 = vmul.f32 %v1181_v61, %v482_v10  ;;  %v474_v17 = vadd.f32 %v800_v11, %v473_v13 }
  0xfa   :  { %v813_v18 = vpop.f32.mrf.mxu0  ;;  %v863_v19 = vpop.f32.mrf.mxu1  ;;  %v812_v32 = vadd.f32 %v811_v12, %v810_v6 }
  0xfb   :  { %939 = vpow2.f32 %v765_v14  ;;  %v763_v21 = vmul.f32 -1.442695, %v1195_v15  ;;  %v1200_v22 = vadd.f32 %v1186_v0, %v543_v16  ;;  %v541_v23 = vmul.f32 %v1181_v61, %v474_v17 }
  0xfc   :  { %v814_v24 = vpop.f32.mrf.mxu0  ;;  %v486_v25 = vpop.f32.mrf.mxu1 }
  0xfd   :  { %941 = vpow2.f32 %v763_v21  ;;  %v766_v26 = vmul.f32 -1.442695, %v1200_v22  ;;  %v815_v27 = vadd.f32 %v814_v24, %v813_v18  ;;  %v487_v28 = vadd.f32 %v809_v20, %v486_v25 }
  0xfe   :  { %v1205_v29 = vadd.f32 %v1186_v0, %v541_v23  ;;  %v816_v30 = vpop.f32.mrf.mxu0  ;;  %v864_v31 = vpop.f32.mrf.mxu1 }
  0xff   :  { %943 = vpow2.f32 %v766_v26  ;;  %v495_v33 = vadd.f32 %v863_v19, %v815_v27  ;;  %v544_v34 = vmul.f32 %v1181_v61, %v487_v28 }
 0x100   :  { %v764_v35 = vmul.f32 -1.442695, %v1205_v29  ;;  %v817_v36 = vpop.f32.mrf.mxu0  ;;  %v489_v37 = vpop.f32.mrf.mxu1 }
 0x101   :  { %v546_v38 = vmul.f32 %v1181_v61, %v495_v33  ;;  %v1211_v39 = vadd.f32 %v1186_v0, %v544_v34  ;;  %v818_v40 = vadd.f32 %v817_v36, %v816_v30  ;;  %v490_v41 = vadd.f32 %v812_v32, %v489_v37 }
 0x102   :  { %945 = vpow2.f32 %v764_v35  ;;  %v819_v42 = vpop.f32.mrf.mxu0  ;;  %v867_v44 = vpop.f32.mrf.mxu1  ;;  %v836_v30 = vadd.f32 %v1168_v49, %v1166_v47 }
 0x103   :  { %v1214_v46 = vadd.f32 %v1186_v0, %v546_v38  ;;  %v767_v48 = vmul.f32 -1.442695, %v1211_v39  ;;  %v498_v50 = vadd.f32 %v864_v31, %v818_v40  ;;  %v545_v52 = vmul.f32 %v1181_v61, %v490_v41 }
 0x104   :  { %v820_v54 = vpop.f32.mrf.mxu0  ;;  %v502_v56 = vpop.f32.mrf.mxu1 }
 0x105   :  { %v769_v58 = vmul.f32 -1.442695, %v1214_v46  ;;  %947 = vpow2.f32 %v767_v48  ;;  %v547_v59 = vmul.f32 %v1181_v61, %v498_v50  ;;  %v1221_v60 = vadd.f32 %v1186_v0, %v545_v52 }
 0x106   :  { %v821_v62 = vadd.f32 %v820_v54, %v819_v42  ;;  %v822_v63 = vpop.f32.mrf.mxu0  ;;  %v868_v1 = vpop.f32.mrf.mxu1 }
 0x107   :  { %949 = vpow2.f32 %v769_v58  ;;  %v1224_v2 = vadd.f32 %v1186_v0, %v547_v59  ;;  %v768_v3 = vmul.f32 -1.442695, %v1221_v60 }
 0x108   :  { %v940_v4 = vpop.eup %939  ;;  %v503_v6 = vadd.f32 %v821_v62, %v502_v56  ;;  %v823_v7 = vpop.f32.mrf.mxu0 }
 0x109   :  { %v505_v9 = vpop.f32.mrf.mxu1  ;;  %v629_v10 = vadd.f32 1.0, %v940_v4  ;;  %v770_v11 = vmul.f32 -1.442695, %v1224_v2  ;;  %951 = vpow2.f32 %v768_v3  ;;  %v824_v12 = vadd.f32 %v823_v7, %v822_v63 }
 0x10a   :  { %v942_v13 = vpop.eup %941  ;;  %v548_v14 = vmul.f32 %v1181_v61, %v503_v6  ;;  %v825_v16 = vpop.f32.mrf.mxu0 }
 0x10b   :  { %v871_v17 = vpop.f32.mrf.mxu1  ;;  %953 = vrcp.f32 %v629_v10  ;;  %v627_v18 = vadd.f32 1.0, %v942_v13  ;;  %v506_v19 = vadd.f32 %v824_v12, %v505_v9 }
 0x10c   :  { %v527_v20 = vadd.f32 %v871_v17, %v839_v5  ;;  %v944_v21 = vpop.eup %943  ;;  %955 = vpow2.f32 %v770_v11  ;;  %v1236_v23 = vadd.f32 %v1186_v0, %v548_v14  ;;  %v826_v24 = vpop.f32.mrf.mxu0 }
 0x10d   :  { %v518_v25 = vpop.f32.mrf.mxu1  ;;  %957 = vrcp.f32 %v627_v18  ;;  %v630_v26 = vadd.f32 1.0, %v944_v21  ;;  %v549_v27 = vmul.f32 %v1181_v61, %v506_v19  ;;  %v827_v45 = vadd.f32 %v826_v24, %v825_v16 }
 0x10e   :  { %v554_v28 = vmul.f32 %v1181_v61, %v527_v20  ;;  %v771_v43 = vmul.f32 -1.442695, %v1236_v23  ;;  %v519_v31 = vadd.f32 %v833_v51, %v518_v25  ;;  %v828_v55 = vpop.f32.mrf.mxu0 }
 0x10f   :  { %v872_v57 = vpop.f32.mrf.mxu1  ;;  %v946_v32 = vpop.eup %945  ;;  %959 = vrcp.f32 %v630_v26  ;;  %v1244_v33 = vadd.f32 %v1186_v0, %v549_v27  ;;  %v511_v37 = vadd.f32 %v867_v44, %v827_v45 }
 0x110   :  { %v1247_v34 = vadd.f32 %v1186_v0, %v554_v28  ;;  %v530_v35 = vadd.f32 %v872_v57, %v842_v53  ;;  %v628_v36 = vadd.f32 1.0, %v946_v32  ;;  %961 = vpow2.f32 %v771_v43  ;;  %v829_v49 = vpop.f32.mrf.mxu0 }
 0x111   :  { %v552_v47 = vmul.f32 %v1181_v61, %v519_v31  ;;  %v521_v38 = vpop.f32.mrf.mxu1  ;;  %v772_v40 = vmul.f32 -1.442695, %v1244_v33  ;;  %v830_v48 = vadd.f32 %v829_v49, %v828_v55  ;;  %v550_v52 = vmul.f32 %v1181_v61, %v511_v37 }
 0x112   :  { %v777_v41 = vmul.f32 -1.442695, %v1247_v34  ;;  %v555_v42 = vmul.f32 %v1181_v61, %v530_v35  ;;  %v948_v50 = vpop.eup %947  ;;  %963 = vrcp.f32 %v628_v36  ;;  %v522_v56 = vadd.f32 %v836_v30, %v521_v38 }
 0x113   :  { %v1255_v54 = vadd.f32 %v1186_v0, %v552_v47  ;;  %v631_v44 = vadd.f32 1.0, %v948_v50  ;;  %965 = vpow2.f32 %v772_v40  ;;  %v514_v59 = vadd.f32 %v868_v1, %v830_v48 }
 0x114   :  { %v1258_v58 = vadd.f32 %v1186_v0, %v555_v42  ;;  %v950_v62 = vpop.eup %949  ;;  %967 = vpow2.f32 %v777_v41  ;;  %v1261_v63 = vadd.f32 %v1186_v0, %v550_v52  ;;  %v553_v4 = vmul.f32 %v1181_v61, %v522_v56 }
 0x115   :  { %v775_v3 = vmul.f32 -1.442695, %v1255_v54  ;;  %v633_v5 = vadd.f32 1.0, %v950_v62  ;;  %969 = vrcp.f32 %v631_v44  ;;  %v551_v6 = vmul.f32 %v1181_v61, %v514_v59 }
 0x116   :  { %v952_v7 = vpop.eup %951  ;;  %v773_v9 = vmul.f32 -1.442695, %v1261_v63  ;;  %v778_v10 = vmul.f32 -1.442695, %v1258_v58  ;;  %v1269_v1 = vadd.f32 %v1186_v0, %v553_v4 }
 0x117   :  { %971 = vpow2.f32 %v775_v3  ;;  %v632_v11 = vadd.f32 1.0, %v952_v7  ;;  %v1272_v12 = vadd.f32 %v1186_v0, %v551_v6 }
 0x118   :  { %973 = vrcp.f32 %v633_v5  ;;  %v954_v13 = vpop.eup %953  ;;  %v776_v17 = vmul.f32 -1.442695, %v1269_v1 }
 0x119   :  { %975 = vpow2.f32 %v773_v9  ;;  %v956_v14 = vpop.eup %955  ;;  %v677_v16 = vmul.f32 %v954_v13, %v1190_v8  ;;  %v774_v61 = vmul.f32 -1.442695, %v1272_v12 }
 0x11a   :  { %977 = vrcp.f32 %v632_v11  ;;  %v958_v18 = vpop.eup %957  ;;  %v634_v19 = vadd.f32 1.0, %v956_v14 }
 0x11b   :  { %979 = vpow2.f32 %v778_v10  ;;  %693 = vst [vmem:[%s1344_s4 + $0x10] sm:$0xff] %v677_v16  ;;  %v675_v0 = vmul.f32 %v958_v18, %v1195_v15 }
 0x11c   :  { %981 = vpow2.f32 %v774_v61  ;;  %v960_v20 = vpop.eup %959 }
 0x11d   :  { %983 = vrcp.f32 %v634_v19  ;;  %v962_v21 = vpop.eup %961  ;;  %691 = vst [vmem:[%s1344_s4] sm:$0xff] %v675_v0  ;;  %v678_v8 = vmul.f32 %v960_v20, %v1200_v22 }
 0x11e   :  { %985 = vpow2.f32 %v776_v17  ;;  %v635_v51 = vadd.f32 1.0, %v962_v21 }
 0x11f   :  { %v964_v53 = vpop.eup %963  ;;  %694 = vst [vmem:[%s1344_s4 + $0x18] sm:$0xff] %v678_v8 }
 0x120   :  { %v966_v24 = vpop.eup %965  ;;  %v676_v15 = vmul.f32 %v964_v53, %v1205_v29  ;;  %987 = vrcp.f32 %v635_v51 }
 0x121   :  { %v968_v25 = vpop.eup %967  ;;  %v636_v26 = vadd.f32 1.0, %v966_v24 }
 0x122   :  { %v970_v27 = vpop.eup %969  ;;  %692 = vst [vmem:[%s1344_s4 + $0x8] sm:$0xff] %v676_v15  ;;  %v641_v28 = vadd.f32 1.0, %v968_v25 }
 0x123   :  { %v679_v30 = vmul.f32 %v970_v27, %v1211_v39  ;;  %989 = vrcp.f32 %v636_v26 }
 0x124   :  { %v972_v22 = vpop.eup %971  ;;  %991 = vrcp.f32 %v641_v28 }
 0x125   :  { %v974_v43 = vpop.eup %973  ;;  %v639_v45 = vadd.f32 1.0, %v972_v22  ;;  %695 = vst [vmem:[%s1344_s4 + $0x20] sm:$0xff] %v679_v30 }
 0x126   :  { %v976_v31 = vpop.eup %975  ;;  %v681_v55 = vmul.f32 %v974_v43, %v1214_v46 }
 0x127   :  { %v978_v29 = vpop.eup %977  ;;  %v637_v57 = vadd.f32 1.0, %v976_v31  ;;  %993 = vrcp.f32 %v639_v45 }
 0x128   :  { %v980_v32 = vpop.eup %979  ;;  %697 = vst [vmem:[%s1344_s4 + $0x30] sm:$0xff] %v681_v55  ;;  %v680_v39 = vmul.f32 %v978_v29, %v1221_v60 }
 0x129   :  { %v982_v35 = vpop.eup %981  ;;  %995 = vrcp.f32 %v637_v57  ;;  %v642_v36 = vadd.f32 1.0, %v980_v32 }
 0x12a   :  { %v984_v37 = vpop.eup %983  ;;  %696 = vst [vmem:[%s1344_s4 + $0x28] sm:$0xff] %v680_v39  ;;  %v638_v46 = vadd.f32 1.0, %v982_v35 }
 0x12b   :  { %v986_v47 = vpop.eup %985  ;;  %v682_v49 = vmul.f32 %v984_v37, %v1224_v2  ;;  %997 = vrcp.f32 %v642_v36 }
 0x12c   :  { %999 = vrcp.f32 %v638_v46  ;;  %v640_v38 = vadd.f32 1.0, %v986_v47 }
 0x12d   :  { %698 = vst [vmem:[%s1344_s4 + $0x38] sm:$0xff] %v682_v49  ;;  %v988_v60 = vpop.eup %987 }
 0x12e   :  { %1001 = vrcp.f32 %v640_v38  ;;  %v683_v40 = vmul.f32 %v988_v60, %v1236_v23 }
 0x130   :  { %v990_v41 = vpop.eup %989  ;;  %699 = vst [vmem:[%s1344_s4 + $0x40] sm:$0xff] %v683_v40 }
 0x131   :  { %v992_v42 = vpop.eup %991  ;;  %v684_v48 = vmul.f32 %v990_v41, %v1244_v33 }
 0x132   :  { %v689_v2 = vmul.f32 %v992_v42, %v1247_v34 }
 0x133   :  { %700 = vst [vmem:[%s1344_s4 + $0x48] sm:$0xff] %v684_v48 }
 0x134   :  { %v994_v50 = vpop.eup %993  ;;  %705 = vst [vmem:[%s1344_s4 + $0x70] sm:$0xff] %v689_v2 }
 0x135   :  { %v687_v23 = vmul.f32 %v994_v50, %v1255_v54 }
 0x136   :  { %v996_v52 = vpop.eup %995 }
 0x137   :  { %v685_v56 = vmul.f32 %v996_v52, %v1261_v63  ;;  %703 = vst [vmem:[%s1344_s4 + $0x60] sm:$0xff] %v687_v23 }
 0x138   :  { %v998_v33 = vpop.eup %997 }
 0x139   :  { %v1000_v34 = vpop.eup %999  ;;  %701 = vst [vmem:[%s1344_s4 + $0x50] sm:$0xff] %v685_v56  ;;  %v690_v44 = vmul.f32 %v998_v33, %v1258_v58 }
 0x13a   :  { %v686_v59 = vmul.f32 %v1000_v34, %v1272_v12 }
 0x13b   :  { %v1002_v62 = vpop.eup %1001  ;;  %706 = vst [vmem:[%s1344_s4 + $0x78] sm:$0xff] %v690_v44 }
 0x13c   :  { %702 = vst [vmem:[%s1344_s4 + $0x58] sm:$0xff] %v686_v59  ;;  %v688_v54 = vmul.f32 %v1002_v62, %v1269_v1 }
 0x13e   :  { %704 = vst [vmem:[%s1344_s4 + $0x68] sm:$0xff] %v688_v54 }

// kernel: effi_b7_forward.20
= control target key start
LH: loop header
LB: loop body
LE: loop exit
PB: predicated region body
PF: predicated region fallthrough
CT: control target
= control target key end

     0   :  { %v1104_v0 = vmov 0   ;;  %vm418_vm0 = vcmask 392192   ;;  %s1472_s1 = inlined_call_operand.vmem [shape: bf16[432,128], index: 1, kind: input, shape index: {}]   ;;  %s1473_s0 = inlined_call_operand.vmem [shape: bf16[128,432], index: 0, kind: input, shape index: {}]   ;;  %s1474_s2 = inlined_call_operand.vmem [shape: f32[1,128], index: 2, kind: input, shape index: {}]   ;;  %s1475_s3 = inlined_call_operand.vmem [shape: f32[1,128], index: 3, kind: input, shape index: {}]   ;;  %s1476_s4 = inlined_call_operand.vmem [shape: f32[128,128], index: 4, kind: output, shape index: {}]  }
   0x1   :  { %540 = vmatprep.subr.bf16.mxu1 %v1104_v0  ;;  %v965_v1 = vld [vmem:[%s1472_s1 + $0xb8] sm:$0xff]   ;;  %v968_v4 = vld [vmem:[%s1472_s1 + $0xb0] sm:$0xff]   ;;  %v971_v7 = vld [vmem:[%s1472_s1 + $0xa8] sm:$0xff]  }
   0x2   :  { %v966_v2 = vld [vmem:[%s1472_s1 + $0x78] sm:$0xff]   ;;  %541 = vmatpush1.bf16.msra.mxu1 %v965_v1  ;;  %v969_v5 = vld [vmem:[%s1472_s1 + $0x70] sm:$0xff]   ;;  %v972_v8 = vld [vmem:[%s1472_s1 + $0x68] sm:$0xff]  }
   0x3   :  { %v967_v3 = vld [vmem:[%s1472_s1 + $0x38] sm:$0xff]   ;;  %900 = vmatprep.subr.bf16.mxu0 %v966_v2  ;;  %542 = vmatprep.subr.bf16.mxu1 %v1104_v0  ;;  %v970_v6 = vld [vmem:[%s1472_s1 + $0x30] sm:$0xff]   ;;  %v973_v9 = vld [vmem:[%s1472_s1 + $0x28] sm:$0xff]  }
   0x4   :  { %901 = vmatpush3.bf16.msra.mxu0 %v967_v3  ;;  %v974_v10 = vld [vmem:[%s1472_s1 + $0xa0] sm:$0xff]   ;;  %v978_v13 = vld [vmem:[%s1472_s1 + $0x58] sm:$0xff]   ;;  %v981_v16 = vld [vmem:[%s1472_s1 + $0x50] sm:$0xff]  }
   0x5   :  { %902 = vmatprep.subr.bf16.mxu0 %v969_v5  ;;  %v975_v11 = vld [vmem:[%s1472_s1 + $0x60] sm:$0xff]   ;;  %v977_v14 = vld [vmem:[%s1472_s1 + $0x98] sm:$0xff]   ;;  %v980_v17 = vld [vmem:[%s1472_s1 + $0x90] sm:$0xff]  }
   0x6   :  { %543 = vmatpush1.bf16.msra.mxu1 %v968_v4  ;;  %v976_v12 = vld [vmem:[%s1472_s1 + $0x20] sm:$0xff]   ;;  %v979_v15 = vld [vmem:[%s1472_s1 + $0x18] sm:$0xff]   ;;  %v982_v18 = vld [vmem:[%s1472_s1 + $0x10] sm:$0xff]  }
   0x7   :  { %544 = vmatprep.subr.bf16.mxu1 %v1104_v0  ;;  %v984_v19 = vld [vmem:[%s1472_s1 + $0x48] sm:$0xff]   ;;  %v987_v22 = vld [vmem:[%s1472_s1 + $0x40] sm:$0xff]   ;;  %v992_v26 = vld [vmem:[%s1472_s1 + $0xd0] sm:$0xff]  }
   0x8   :  { %903 = vmatpush3.bf16.msra.mxu0 %v970_v6  ;;  %v983_v20 = vld [vmem:[%s1472_s1 + $0x88] sm:$0xff]   ;;  %v991_v23 = vld [vmem:[%s1473_s0 + $0x4] ss:$16 sps:$4 sm:$0xff]   ;;  %v989_v28 = vld [vmem:[%s1473_s0] ss:$16 sps:$4 sm:$0xff]  }
   0x9   :  { %904 = vmatprep.subr.bf16.mxu0 %v972_v8  ;;  %v985_v21 = vld [vmem:[%s1472_s1 + $0x8] sm:$0xff]   ;;  %v986_v24 = vld [vmem:[%s1472_s1 + $0x80] sm:$0xff]   ;;  %475 = vmatprep.mubr.bf16.mxu0 %v991_v23 }
   0xa   :  { %545 = vmatpush1.bf16.msra.mxu1 %v971_v7  ;;  %v988_v25 = vld [vmem:[%s1472_s1] sm:$0xff]   ;;  %v1000_v27 = vld [vmem:[%s1473_s0 + $0xc] ss:$16 sps:$4 sm:$0xff]   ;;  %v998_v34 = vld [vmem:[%s1473_s0 + $0x8] ss:$16 sps:$4 sm:$0xff]  }
   0xb   :  { %546 = vmatprep.subr.bf16.mxu1 %v1104_v0  ;;  %v994_v29 = vld [vmem:[%s1473_s0 + $0x24] ss:$16 sps:$4 sm:$0xff]   ;;  %874 = vmatprep.mubr.msk.bf16.mxu1 %vm418_vm0, %v1000_v27  ;;  %v993_v30 = vld [vmem:[%s1472_s1 + $0xc8] sm:$0xff]   ;;  %v997_v32 = vld [vmem:[%s1473_s0 + $0x20] ss:$16 sps:$4 sm:$0xff]  }
   0xc   :  { %905 = vmatpush3.bf16.msra.mxu0 %v973_v9  ;;  %v996_v31 = vld [vmem:[%s1472_s1 + $0xc0] sm:$0xff]   ;;  %v1004_v35 = vld [vmem:[%s1473_s0 + $0x2c] ss:$16 sps:$4 sm:$0xff]   ;;  %v1006_v38 = vld [vmem:[%s1473_s0 + $0x28] ss:$16 sps:$4 sm:$0xff]  }
   0xd   :  { %906 = vmatprep.subr.bf16.mxu0 %v975_v11  ;;  %v1001_v33 = vld [vmem:[%s1473_s0 + $0x44] ss:$16 sps:$4 sm:$0xff]   ;;  %v1003_v36 = vld [vmem:[%s1473_s0 + $0x40] ss:$16 sps:$4 sm:$0xff]   ;;  %v1010_v39 = vld [vmem:[%s1473_s0 + $0x4c] ss:$16 sps:$4 sm:$0xff]  }
   0xe   :  { %547 = vmatpush1.bf16.msra.mxu1 %v974_v10  ;;  %v1007_v37 = vld [vmem:[%s1473_s0 + $0x64] ss:$16 sps:$4 sm:$0xff]   ;;  %v1009_v40 = vld [vmem:[%s1473_s0 + $0x60] ss:$16 sps:$4 sm:$0xff]   ;;  %v1012_v42 = vld [vmem:[%s1473_s0 + $0x48] ss:$16 sps:$4 sm:$0xff]  }
   0xf   :  { %548 = vmatprep.subr.bf16.mxu1 %v1104_v0  ;;  %v1013_v41 = vld [vmem:[%s1473_s0 + $0x84] ss:$16 sps:$4 sm:$0xff]   ;;  %v1016_v43 = vld [vmem:[%s1473_s0 + $0x6c] ss:$16 sps:$4 sm:$0xff]   ;;  %v1015_v44 = vld [vmem:[%s1473_s0 + $0x80] ss:$16 sps:$4 sm:$0xff]  }
  0x10   :  { %907 = vmatpush3.bf16.msra.mxu0 %v976_v12  ;;  %v1019_v45 = vld [vmem:[%s1473_s0 + $0xa4] ss:$16 sps:$4 sm:$0xff]   ;;  %v1018_v46 = vld [vmem:[%s1473_s0 + $0x68] ss:$16 sps:$4 sm:$0xff]   ;;  %v1022_v47 = vld [vmem:[%s1473_s0 + $0x8c] ss:$16 sps:$4 sm:$0xff]  }
  0x11   :  { %908 = vmatprep.subr.bf16.mxu0 %v978_v13  ;;  %v1021_v48 = vld [vmem:[%s1473_s0 + $0xa0] ss:$16 sps:$4 sm:$0xff]   ;;  %v1025_v49 = vld [vmem:[%s1473_s0 + $0xc4] ss:$16 sps:$4 sm:$0xff]   ;;  %v1024_v50 = vld [vmem:[%s1473_s0 + $0x88] ss:$16 sps:$4 sm:$0xff]  }
  0x12   :  { %549 = vmatpush1.bf16.msra.mxu1 %v977_v14  ;;  %v1028_v51 = vld [vmem:[%s1473_s0 + $0xac] ss:$16 sps:$4 sm:$0xff]   ;;  %v1027_v52 = vld [vmem:[%s1473_s0 + $0xc0] ss:$16 sps:$4 sm:$0xff]   ;;  %v1031_v53 = vld [vmem:[%s1473_s0 + $0xe4] ss:$16 sps:$4 sm:$0xff]  }
  0x13   :  { %550 = vmatprep.subr.bf16.mxu1 %v1104_v0  ;;  %v1030_v54 = vld [vmem:[%s1473_s0 + $0xa8] ss:$16 sps:$4 sm:$0xff]   ;;  %v1034_v55 = vld [vmem:[%s1473_s0 + $0xcc] ss:$16 sps:$4 sm:$0xff]   ;;  %v1033_v56 = vld [vmem:[%s1473_s0 + $0xe0] ss:$16 sps:$4 sm:$0xff]  }
  0x14   :  { %909 = vmatpush3.bf16.msra.mxu0 %v979_v15  ;;  %v1036_v57 = vld [vmem:[%s1473_s0 + $0xc8] ss:$16 sps:$4 sm:$0xff]   ;;  %v1037_v58 = vld [vmem:[%s1473_s0 + $0xec] ss:$16 sps:$4 sm:$0xff]   ;;  %v1329_v4 = vld [vmem:[%s1474_s2] ss:$0 sm:$0xff] }
  0x15   :  { %910 = vmatprep.subr.bf16.mxu0 %v981_v16  ;;  %v1039_v59 = vld [vmem:[%s1473_s0 + $0xe8] ss:$16 sps:$4 sm:$0xff]   ;;  %v1334_v6 = vld [vmem:[%s1475_s3] ss:$0 sm:$0xff] }
  0x16   :  { %551 = vmatpush1.bf16.msra.mxu1 %v980_v17 }
  0x17   :  { %552 = vmatprep.subr.bf16.mxu1 %v1104_v0 }
  0x18   :  { %911 = vmatpush3.bf16.msra.mxu0 %v982_v18 }
  0x19   :  { %912 = vmatprep.subr.bf16.mxu0 %v984_v19 }
  0x1a   :  { %553 = vmatpush1.bf16.msra.mxu1 %v983_v20 }
  0x1b   :  { %554 = vmatprep.subr.bf16.mxu1 %v1104_v0 }
  0x1c   :  { %913 = vmatpush3.bf16.msra.mxu0 %v985_v21 }
  0x1d   :  { %914 = vmatprep.subr.bf16.mxu0 %v987_v22 }
  0x1e   :  { %555 = vmatpush1.bf16.msra.mxu1 %v986_v24 }
  0x1f   :  { %566 = vmatprep.subr.bf16.mxu1 %v1104_v0 }
  0x20   :  { %915 = vmatpush3.bf16.msra.mxu0 %v988_v25 }
  0x22   :  { %567 = vmatpush2.bf16.msra.mxu1 %v992_v26 }
  0x23   :  { %476 = vmatmul.mubr.bf16.vlgmr.msra.gmra.mxu0 %v989_v28  ;;  %568 = vmatprep.subr.bf16.mxu1 %v1104_v0 }
  0x24   :  { %483 = vmatprep.mubr.bf16.mxu0 %v994_v29 }
  0x26   :  { %569 = vmatpush2.bf16.msra.mxu1 %v993_v30 }
  0x27   :  { %570 = vmatprep.subr.bf16.mxu1 %v1104_v0 }
  0x2a   :  { %571 = vmatpush2.bf16.msra.mxu1 %v996_v31 }
  0x2b   :  { %484 = vmatmul.mubr.bf16.gmra.mxu0 %v997_v32 }
  0x2c   :  { %491 = vmatprep.mubr.bf16.mxu0 %v1001_v33 }
  0x2d   :  { %573 = vmatmul.mubr.bf16.vlgmr.msra.gmra.mxu1 %v998_v34 }
  0x2e   :  { %875 = vmatprep.mubr.msk.bf16.mxu1 %vm418_vm0, %v1004_v35 }
  0x33   :  { %492 = vmatmul.mubr.bf16.gmra.mxu0 %v1003_v36 }
  0x34   :  { %499 = vmatprep.mubr.bf16.mxu0 %v1007_v37 }
  0x35   :  { %581 = vmatmul.mubr.bf16.gmra.mxu1 %v1006_v38 }
  0x36   :  { %876 = vmatprep.mubr.msk.bf16.mxu1 %vm418_vm0, %v1010_v39 }
  0x3b   :  { %500 = vmatmul.mubr.bf16.gmra.mxu0 %v1009_v40 }
  0x3c   :  { %507 = vmatprep.mubr.bf16.mxu0 %v1013_v41 }
  0x3d   :  { %589 = vmatmul.mubr.bf16.gmra.mxu1 %v1012_v42 }
  0x3e   :  { %877 = vmatprep.mubr.msk.bf16.mxu1 %vm418_vm0, %v1016_v43 }
  0x43   :  { %508 = vmatmul.mubr.bf16.gmra.mxu0 %v1015_v44 }
  0x44   :  { %515 = vmatprep.mubr.bf16.mxu0 %v1019_v45 }
  0x45   :  { %597 = vmatmul.mubr.bf16.gmra.mxu1 %v1018_v46 }
  0x46   :  { %878 = vmatprep.mubr.msk.bf16.mxu1 %vm418_vm0, %v1022_v47 }
  0x4b   :  { %516 = vmatmul.mubr.bf16.gmra.mxu0 %v1021_v48 }
  0x4c   :  { %523 = vmatprep.mubr.bf16.mxu0 %v1025_v49 }
  0x4d   :  { %605 = vmatmul.mubr.bf16.gmra.mxu1 %v1024_v50 }
  0x4e   :  { %879 = vmatprep.mubr.msk.bf16.mxu1 %vm418_vm0, %v1028_v51 }
  0x53   :  { %524 = vmatmul.mubr.bf16.gmra.mxu0 %v1027_v52 }
  0x54   :  { %531 = vmatprep.mubr.bf16.mxu0 %v1031_v53 }
  0x55   :  { %613 = vmatmul.mubr.bf16.gmra.mxu1 %v1030_v54 }
  0x56   :  { %880 = vmatprep.mubr.msk.bf16.mxu1 %vm418_vm0, %v1034_v55 }
  0x5b   :  { %532 = vmatmul.mubr.bf16.gmra.mxu0 %v1033_v56 }
  0x5d   :  { %621 = vmatmul.mubr.bf16.gmra.mxu1 %v1036_v57 }
  0x5e   :  { %881 = vmatprep.mubr.msk.bf16.mxu1 %vm418_vm0, %v1037_v58 }
  0x65   :  { %629 = vmatmul.mubr.bf16.gmra.mxu1 %v1039_v59 }
  0xe3   :  { %v916_v60 = vpop.f32.mrf.mxu0 }
  0xe5   :  { %v917_v61 = vpop.f32.mrf.mxu0 }
  0xe6   :  { %v918_v1 = vadd.f32 %v917_v61, %v916_v60 }
  0xe7   :  { %v919_v62 = vpop.f32.mrf.mxu0 }
  0xe9   :  { %v920_v63 = vpop.f32.mrf.mxu0 }
  0xea   :  { %v921_v9 = vadd.f32 %v920_v63, %v919_v62 }
  0xeb   :  { %v922_v0 = vpop.f32.mrf.mxu0 }
  0xed   :  { %v923_v2 = vpop.f32.mrf.mxu0  ;;  %v574_v3 = vpop.f32.mrf.mxu1 }
  0xee   :  { %v575_v5 = vadd.f32 %v918_v1, %v574_v3  ;;  %v924_v17 = vadd.f32 %v923_v2, %v922_v0 }
  0xef   :  { %v925_v7 = vpop.f32.mrf.mxu0  ;;  %v576_v8 = vpop.f32.mrf.mxu1 }
  0xf0   :  { %v644_v10 = vmul.f32 %v1329_v4, %v575_v5 }
  0xf1   :  { %v926_v11 = vpop.f32.mrf.mxu0  ;;  %v577_v12 = vpop.f32.mrf.mxu1 }
  0xf2   :  { %v1338_v13 = vadd.f32 %v1334_v6, %v644_v10  ;;  %v578_v14 = vadd.f32 %v921_v9, %v577_v12  ;;  %v927_v26 = vadd.f32 %v926_v11, %v925_v7 }
  0xf3   :  { %v928_v15 = vpop.f32.mrf.mxu0  ;;  %v579_v16 = vpop.f32.mrf.mxu1 }
  0xf4   :  { %v884_v18 = vmul.f32 -1.442695, %v1338_v13  ;;  %v645_v19 = vmul.f32 %v1329_v4, %v578_v14 }
  0xf5   :  { %v929_v20 = vpop.f32.mrf.mxu0  ;;  %v582_v21 = vpop.f32.mrf.mxu1 }
  0xf6   :  { %1040 = vpow2.f32 %v884_v18  ;;  %v1343_v22 = vadd.f32 %v1334_v6, %v645_v19  ;;  %v583_v23 = vadd.f32 %v924_v17, %v582_v21  ;;  %v930_v35 = vadd.f32 %v929_v20, %v928_v15 }
  0xf7   :  { %v931_v24 = vpop.f32.mrf.mxu0  ;;  %v584_v25 = vpop.f32.mrf.mxu1 }
  0xf8   :  { %v885_v27 = vmul.f32 -1.442695, %v1343_v22  ;;  %v646_v28 = vmul.f32 %v1329_v4, %v583_v23 }
  0xf9   :  { %v932_v29 = vpop.f32.mrf.mxu0  ;;  %v585_v30 = vpop.f32.mrf.mxu1 }
  0xfa   :  { %1042 = vpow2.f32 %v885_v27  ;;  %v1348_v31 = vadd.f32 %v1334_v6, %v646_v28  ;;  %v586_v32 = vadd.f32 %v927_v26, %v585_v30  ;;  %v933_v44 = vadd.f32 %v932_v29, %v931_v24 }
  0xfb   :  { %v934_v33 = vpop.f32.mrf.mxu0  ;;  %v587_v34 = vpop.f32.mrf.mxu1 }
  0xfc   :  { %v886_v36 = vmul.f32 -1.442695, %v1348_v31  ;;  %v647_v37 = vmul.f32 %v1329_v4, %v586_v32 }
  0xfd   :  { %v935_v38 = vpop.f32.mrf.mxu0  ;;  %v590_v39 = vpop.f32.mrf.mxu1 }
  0xfe   :  { %1044 = vpow2.f32 %v886_v36  ;;  %v1353_v40 = vadd.f32 %v1334_v6, %v647_v37  ;;  %v591_v41 = vadd.f32 %v930_v35, %v590_v39  ;;  %v936_v55 = vadd.f32 %v935_v38, %v934_v33 }
  0xff   :  { %v937_v42 = vpop.f32.mrf.mxu0  ;;  %v592_v43 = vpop.f32.mrf.mxu1 }
 0x100   :  { %v887_v45 = vmul.f32 -1.442695, %v1353_v40  ;;  %v648_v46 = vmul.f32 %v1329_v4, %v591_v41 }
 0x101   :  { %v938_v47 = vpop.f32.mrf.mxu0  ;;  %v593_v48 = vpop.f32.mrf.mxu1 }
 0x102   :  { %1046 = vpow2.f32 %v887_v45  ;;  %v1358_v49 = vadd.f32 %v1334_v6, %v648_v46  ;;  %v594_v50 = vadd.f32 %v933_v44, %v593_v48  ;;  %v939_v2 = vadd.f32 %v938_v47, %v937_v42 }
 0x103   :  { %v1041_v51 = vpop.eup %1040  ;;  %v940_v52 = vpop.f32.mrf.mxu0 }
 0x104   :  { %v595_v53 = vpop.f32.mrf.mxu1  ;;  %v731_v54 = vadd.f32 1.0, %v1041_v51  ;;  %v888_v56 = vmul.f32 -1.442695, %v1358_v49  ;;  %v649_v57 = vmul.f32 %v1329_v4, %v594_v50 }
 0x105   :  { %v941_v58 = vpop.f32.mrf.mxu0 }
 0x106   :  { %v598_v59 = vpop.f32.mrf.mxu1  ;;  %1048 = vrcp.f32 %v731_v54  ;;  %v1363_v60 = vadd.f32 %v1334_v6, %v649_v57  ;;  %v942_v16 = vadd.f32 %v941_v58, %v940_v52 }
 0x107   :  { %v599_v61 = vadd.f32 %v936_v55, %v598_v59  ;;  %v1043_v62 = vpop.eup %1042  ;;  %1050 = vpow2.f32 %v888_v56  ;;  %v943_v63 = vpop.f32.mrf.mxu0 }
 0x108   :  { %v600_v0 = vpop.f32.mrf.mxu1  ;;  %v732_v1 = vadd.f32 1.0, %v1043_v62  ;;  %v889_v3 = vmul.f32 -1.442695, %v1363_v60 }
 0x109   :  { %v650_v5 = vmul.f32 %v1329_v4, %v599_v61  ;;  %v944_v7 = vpop.f32.mrf.mxu0 }
 0x10a   :  { %v601_v8 = vpop.f32.mrf.mxu1  ;;  %1052 = vrcp.f32 %v732_v1  ;;  %v945_v28 = vadd.f32 %v944_v7, %v943_v63 }
 0x10b   :  { %v1368_v9 = vadd.f32 %v1334_v6, %v650_v5  ;;  %v602_v10 = vadd.f32 %v939_v2, %v601_v8  ;;  %v1045_v11 = vpop.eup %1044  ;;  %1054 = vpow2.f32 %v889_v3  ;;  %v946_v12 = vpop.f32.mrf.mxu0 }
 0x10c   :  { %v603_v14 = vpop.f32.mrf.mxu1  ;;  %v733_v15 = vadd.f32 1.0, %v1045_v11 }
 0x10d   :  { %v890_v17 = vmul.f32 -1.442695, %v1368_v9  ;;  %v651_v18 = vmul.f32 %v1329_v4, %v602_v10  ;;  %v947_v19 = vpop.f32.mrf.mxu0 }
 0x10e   :  { %v606_v20 = vpop.f32.mrf.mxu1  ;;  %1056 = vrcp.f32 %v733_v15  ;;  %v948_v42 = vadd.f32 %v947_v19, %v946_v12 }
 0x10f   :  { %v1373_v21 = vadd.f32 %v1334_v6, %v651_v18  ;;  %v607_v23 = vadd.f32 %v942_v16, %v606_v20  ;;  %v1047_v24 = vpop.eup %1046  ;;  %1058 = vpow2.f32 %v890_v17  ;;  %v949_v25 = vpop.f32.mrf.mxu0 }
 0x110   :  { %v608_v26 = vpop.f32.mrf.mxu1  ;;  %v734_v27 = vadd.f32 1.0, %v1047_v24 }
 0x111   :  { %v891_v29 = vmul.f32 -1.442695, %v1373_v21  ;;  %v652_v30 = vmul.f32 %v1329_v4, %v607_v23  ;;  %v950_v32 = vpop.f32.mrf.mxu0 }
 0x112   :  { %v609_v33 = vpop.f32.mrf.mxu1  ;;  %1060 = vrcp.f32 %v734_v27  ;;  %v951_v55 = vadd.f32 %v950_v32, %v949_v25 }
 0x113   :  { %v1378_v34 = vadd.f32 %v1334_v6, %v652_v30  ;;  %v610_v35 = vadd.f32 %v945_v28, %v609_v33  ;;  %v1049_v36 = vpop.eup %1048  ;;  %1062 = vpow2.f32 %v891_v29  ;;  %v952_v37 = vpop.f32.mrf.mxu0 }
 0x114   :  { %v611_v38 = vpop.f32.mrf.mxu1  ;;  %v1051_v39 = vpop.eup %1050  ;;  %v779_v41 = vmul.f32 %v1049_v36, %v1338_v13 }
 0x115   :  { %v892_v43 = vmul.f32 -1.442695, %v1378_v34  ;;  %v653_v44 = vmul.f32 %v1329_v4, %v610_v35  ;;  %v735_v45 = vadd.f32 1.0, %v1051_v39  ;;  %v953_v46 = vpop.f32.mrf.mxu0 }
 0x116   :  { %v614_v47 = vpop.f32.mrf.mxu1  ;;  %795 = vst [vmem:[%s1476_s4] sm:$0xff] %v779_v41  ;;  %v954_v5 = vadd.f32 %v953_v46, %v952_v37 }
 0x117   :  { %1064 = vpow2.f32 %v892_v43  ;;  %v1387_v48 = vadd.f32 %v1334_v6, %v653_v44  ;;  %v615_v50 = vadd.f32 %v948_v42, %v614_v47  ;;  %v1053_v51 = vpop.eup %1052  ;;  %v955_v13 = vpop.f32.mrf.mxu0 }
 0x118   :  { %1066 = vrcp.f32 %v735_v45  ;;  %v616_v52 = vpop.f32.mrf.mxu1  ;;  %v1055_v53 = vpop.eup %1054  ;;  %v780_v54 = vmul.f32 %v1053_v51, %v1343_v22 }
 0x119   :  { %v893_v56 = vmul.f32 -1.442695, %v1387_v48  ;;  %v654_v57 = vmul.f32 %v1329_v4, %v615_v50  ;;  %v736_v58 = vadd.f32 1.0, %v1055_v53  ;;  %v956_v59 = vpop.f32.mrf.mxu0 }
 0x11a   :  { %v617_v61 = vpop.f32.mrf.mxu1  ;;  %796 = vst [vmem:[%s1476_s4 + $0x8] sm:$0xff] %v780_v54  ;;  %v957_v19 = vadd.f32 %v956_v59, %v955_v13 }
 0x11b   :  { %1068 = vpow2.f32 %v893_v56  ;;  %v1396_v62 = vadd.f32 %v1334_v6, %v654_v57  ;;  %v618_v63 = vadd.f32 %v951_v55, %v617_v61  ;;  %v1057_v0 = vpop.eup %1056  ;;  %v958_v22 = vpop.f32.mrf.mxu0 }
 0x11c   :  { %1070 = vrcp.f32 %v736_v58  ;;  %v619_v1 = vpop.f32.mrf.mxu1  ;;  %v1059_v2 = vpop.eup %1058  ;;  %v781_v3 = vmul.f32 %v1057_v0, %v1348_v31 }
 0x11d   :  { %v894_v7 = vmul.f32 -1.442695, %v1396_v62  ;;  %v655_v8 = vmul.f32 %v1329_v4, %v618_v63  ;;  %v737_v10 = vadd.f32 1.0, %v1059_v2  ;;  %v959_v11 = vpop.f32.mrf.mxu0 }
 0x11e   :  { %v622_v12 = vpop.f32.mrf.mxu1  ;;  %797 = vst [vmem:[%s1476_s4 + $0x10] sm:$0xff] %v781_v3  ;;  %v960_v33 = vadd.f32 %v959_v11, %v958_v22 }
 0x11f   :  { %1072 = vpow2.f32 %v894_v7  ;;  %v1405_v14 = vadd.f32 %v1334_v6, %v655_v8  ;;  %v623_v15 = vadd.f32 %v954_v5, %v622_v12  ;;  %v1061_v16 = vpop.eup %1060  ;;  %v961_v25 = vpop.f32.mrf.mxu0 }
 0x120   :  { %1074 = vrcp.f32 %v737_v10  ;;  %v624_v31 = vpop.f32.mrf.mxu1  ;;  %v1063_v17 = vpop.eup %1062  ;;  %v782_v18 = vmul.f32 %v1061_v16, %v1353_v40 }
 0x121   :  { %v895_v20 = vmul.f32 -1.442695, %v1405_v14  ;;  %v656_v23 = vmul.f32 %v1329_v4, %v623_v15  ;;  %v738_v24 = vadd.f32 1.0, %v1063_v17  ;;  %v962_v38 = vpop.f32.mrf.mxu0 }
 0x122   :  { %v625_v26 = vpop.f32.mrf.mxu1  ;;  %798 = vst [vmem:[%s1476_s4 + $0x18] sm:$0xff] %v782_v18  ;;  %v963_v47 = vadd.f32 %v962_v38, %v961_v25 }
 0x123   :  { %1076 = vpow2.f32 %v895_v20  ;;  %v1414_v27 = vadd.f32 %v1334_v6, %v656_v23  ;;  %v626_v28 = vadd.f32 %v957_v19, %v625_v26 }
 0x124   :  { %v1065_v29 = vpop.eup %1064  ;;  %1078 = vrcp.f32 %v738_v24  ;;  %v627_v40 = vpop.f32.mrf.mxu1 }
 0x125   :  { %v1067_v30 = vpop.eup %1066  ;;  %v739_v32 = vadd.f32 1.0, %v1065_v29  ;;  %v896_v35 = vmul.f32 -1.442695, %v1414_v27  ;;  %v657_v36 = vmul.f32 %v1329_v4, %v626_v28 }
 0x126   :  { %v783_v37 = vmul.f32 %v1067_v30, %v1358_v49  ;;  %v630_v39 = vpop.f32.mrf.mxu1 }
 0x127   :  { %1080 = vrcp.f32 %v739_v32  ;;  %v1420_v41 = vadd.f32 %v1334_v6, %v657_v36  ;;  %v631_v42 = vadd.f32 %v960_v33, %v630_v39 }
 0x128   :  { %v1069_v43 = vpop.eup %1068  ;;  %799 = vst [vmem:[%s1476_s4 + $0x20] sm:$0xff] %v783_v37  ;;  %1082 = vpow2.f32 %v896_v35  ;;  %v632_v44 = vpop.f32.mrf.mxu1 }
 0x129   :  { %v1071_v45 = vpop.eup %1070  ;;  %v740_v46 = vadd.f32 1.0, %v1069_v43  ;;  %v897_v50 = vmul.f32 -1.442695, %v1420_v41  ;;  %v658_v49 = vmul.f32 %v1329_v4, %v631_v42 }
 0x12a   :  { %v784_v51 = vmul.f32 %v1071_v45, %v1363_v60  ;;  %v633_v13 = vpop.f32.mrf.mxu1 }
 0x12b   :  { %1084 = vrcp.f32 %v740_v46  ;;  %v681_v52 = vadd.f32 %v1334_v6, %v658_v49  ;;  %v634_v53 = vadd.f32 %v963_v47, %v633_v13 }
 0x12c   :  { %v1073_v54 = vpop.eup %1072  ;;  %800 = vst [vmem:[%s1476_s4 + $0x28] sm:$0xff] %v784_v51  ;;  %1086 = vpow2.f32 %v897_v50  ;;  %v635_v55 = vpop.f32.mrf.mxu1 }
 0x12d   :  { %v1075_v56 = vpop.eup %1074  ;;  %v741_v57 = vadd.f32 1.0, %v1073_v54  ;;  %v898_v58 = vmul.f32 -1.442695, %v681_v52  ;;  %v659_v59 = vmul.f32 %v1329_v4, %v634_v53 }
 0x12e   :  { %v785_v61 = vmul.f32 %v1075_v56, %v1368_v9 }
 0x12f   :  { %1088 = vrcp.f32 %v741_v57  ;;  %v682_v60 = vadd.f32 %v1334_v6, %v659_v59 }
 0x130   :  { %v1077_v63 = vpop.eup %1076  ;;  %801 = vst [vmem:[%s1476_s4 + $0x30] sm:$0xff] %v785_v61  ;;  %1090 = vpow2.f32 %v898_v58 }
 0x131   :  { %v1079_v0 = vpop.eup %1078  ;;  %v742_v22 = vadd.f32 1.0, %v1077_v63  ;;  %v899_v1 = vmul.f32 -1.442695, %v682_v60 }
 0x132   :  { %v786_v2 = vmul.f32 %v1079_v0, %v1373_v21 }
 0x133   :  { %1092 = vrcp.f32 %v742_v22 }
 0x134   :  { %v1081_v3 = vpop.eup %1080  ;;  %802 = vst [vmem:[%s1476_s4 + $0x38] sm:$0xff] %v786_v2  ;;  %1094 = vpow2.f32 %v899_v1 }
 0x135   :  { %v1083_v4 = vpop.eup %1082  ;;  %v787_v6 = vmul.f32 %v1081_v3, %v1378_v34 }
 0x136   :  { %v743_v9 = vadd.f32 1.0, %v1083_v4 }
 0x137   :  { %803 = vst [vmem:[%s1476_s4 + $0x40] sm:$0xff] %v787_v6 }
 0x138   :  { %v1085_v5 = vpop.eup %1084  ;;  %1096 = vrcp.f32 %v743_v9 }
 0x139   :  { %v1087_v7 = vpop.eup %1086  ;;  %v788_v21 = vmul.f32 %v1085_v5, %v1387_v48 }
 0x13a   :  { %v744_v8 = vadd.f32 1.0, %v1087_v7 }
 0x13b   :  { %804 = vst [vmem:[%s1476_s4 + $0x48] sm:$0xff] %v788_v21 }
 0x13c   :  { %v1089_v10 = vpop.eup %1088  ;;  %1098 = vrcp.f32 %v744_v8 }
 0x13d   :  { %v1091_v11 = vpop.eup %1090  ;;  %v789_v34 = vmul.f32 %v1089_v10, %v1396_v62 }
 0x13e   :  { %v745_v12 = vadd.f32 1.0, %v1091_v11 }
 0x13f   :  { %805 = vst [vmem:[%s1476_s4 + $0x50] sm:$0xff] %v789_v34 }
 0x140   :  { %v1093_v15 = vpop.eup %1092  ;;  %1100 = vrcp.f32 %v745_v12 }
 0x141   :  { %v1095_v16 = vpop.eup %1094  ;;  %v790_v48 = vmul.f32 %v1093_v15, %v1405_v14 }
 0x142   :  { %v746_v31 = vadd.f32 1.0, %v1095_v16 }
 0x143   :  { %806 = vst [vmem:[%s1476_s4 + $0x58] sm:$0xff] %v790_v48 }
 0x144   :  { %1102 = vrcp.f32 %v746_v31 }
 0x145   :  { %v1097_v17 = vpop.eup %1096 }
 0x146   :  { %v791_v18 = vmul.f32 %v1097_v17, %v1414_v27 }
 0x148   :  { %807 = vst [vmem:[%s1476_s4 + $0x60] sm:$0xff] %v791_v18 }
 0x149   :  { %v1099_v62 = vpop.eup %1098 }
 0x14a   :  { %v792_v19 = vmul.f32 %v1099_v62, %v1420_v41 }
 0x14c   :  { %808 = vst [vmem:[%s1476_s4 + $0x68] sm:$0xff] %v792_v19 }
 0x14d   :  { %v1101_v14 = vpop.eup %1100 }
 0x14e   :  { %v793_v20 = vmul.f32 %v1101_v14, %v681_v52 }
 0x150   :  { %809 = vst [vmem:[%s1476_s4 + $0x70] sm:$0xff] %v793_v20 }
 0x151   :  { %v1103_v23 = vpop.eup %1102 }
 0x152   :  { %v794_v24 = vmul.f32 %v1103_v23, %v682_v60 }
 0x154   :  { %810 = vst [vmem:[%s1476_s4 + $0x78] sm:$0xff] %v794_v24 }

// kernel: effi_b7_forward.21
= control target key start
LH: loop header
LB: loop body
LE: loop exit
PB: predicated region body
PF: predicated region fallthrough
CT: control target
= control target key end

     0   :  { %vm368_vm0 = vcmask 523264   ;;  %s955_s1 = inlined_call_operand.vmem [shape: bf16[576,128], index: 1, kind: input, shape index: {}]   ;;  %s956_s0 = inlined_call_operand.vmem [shape: bf16[32,576], index: 0, kind: input, shape index: {}]   ;;  %s957_s2 = inlined_call_operand.vmem [shape: f32[1,128], index: 2, kind: input, shape index: {}]   ;;  %s958_s3 = inlined_call_operand.vmem [shape: f32[1,128], index: 3, kind: input, shape index: {}]   ;;  %s959_s4 = inlined_call_operand.vmem [shape: f32[32,128], index: 4, kind: output, shape index: {}]  }
   0x1   :  { %v708_v0 = vld [vmem:[%s955_s1 + $0x78] sm:$0xff]   ;;  %v712_v4 = vld [vmem:[%s955_s1 + $0x70] sm:$0xff]   ;;  %v716_v8 = vld [vmem:[%s955_s1 + $0x68] sm:$0xff]  }
   0x2   :  { %v709_v1 = vld [vmem:[%s955_s1 + $0xf8] sm:$0xff]   ;;  %634 = vmatprep.subr.bf16.mxu0 %v708_v0  ;;  %v713_v5 = vld [vmem:[%s955_s1 + $0xf0] sm:$0xff]   ;;  %v717_v9 = vld [vmem:[%s955_s1 + $0xe8] sm:$0xff]  }
   0x3   :  { %v710_v2 = vld [vmem:[%s955_s1 + $0x38] sm:$0xff]   ;;  %662 = vmatprep.subr.bf16.mxu1 %v709_v1  ;;  %v714_v6 = vld [vmem:[%s955_s1 + $0x30] sm:$0xff]   ;;  %v718_v10 = vld [vmem:[%s955_s1 + $0x28] sm:$0xff]  }
   0x4   :  { %v711_v3 = vld [vmem:[%s955_s1 + $0xb8] sm:$0xff]   ;;  %635 = vmatpush3.bf16.msra.mxu0 %v710_v2  ;;  %v715_v7 = vld [vmem:[%s955_s1 + $0xb0] sm:$0xff]   ;;  %v719_v11 = vld [vmem:[%s955_s1 + $0xa8] sm:$0xff]  }
   0x5   :  { %663 = vmatpush3.bf16.msra.mxu1 %v711_v3  ;;  %636 = vmatprep.subr.bf16.mxu0 %v712_v4  ;;  %v720_v12 = vld [vmem:[%s955_s1 + $0x60] sm:$0xff]   ;;  %v724_v16 = vld [vmem:[%s955_s1 + $0x58] sm:$0xff]   ;;  %v728_v20 = vld [vmem:[%s955_s1 + $0x50] sm:$0xff]  }
   0x6   :  { %664 = vmatprep.subr.bf16.mxu1 %v713_v5  ;;  %v721_v13 = vld [vmem:[%s955_s1 + $0xe0] sm:$0xff]   ;;  %v725_v17 = vld [vmem:[%s955_s1 + $0xd8] sm:$0xff]   ;;  %v729_v21 = vld [vmem:[%s955_s1 + $0xd0] sm:$0xff]  }
   0x7   :  { %v722_v14 = vld [vmem:[%s955_s1 + $0x20] sm:$0xff]   ;;  %v726_v18 = vld [vmem:[%s955_s1 + $0x18] sm:$0xff]   ;;  %v730_v22 = vld [vmem:[%s955_s1 + $0x10] sm:$0xff]  }
   0x8   :  { %637 = vmatpush3.bf16.msra.mxu0 %v714_v6  ;;  %v723_v15 = vld [vmem:[%s955_s1 + $0xa0] sm:$0xff]   ;;  %v727_v19 = vld [vmem:[%s955_s1 + $0x98] sm:$0xff]   ;;  %v731_v23 = vld [vmem:[%s955_s1 + $0x90] sm:$0xff]  }
   0x9   :  { %665 = vmatpush3.bf16.msra.mxu1 %v715_v7  ;;  %638 = vmatprep.subr.bf16.mxu0 %v716_v8  ;;  %v732_v24 = vld [vmem:[%s955_s1 + $0x48] sm:$0xff]   ;;  %v736_v28 = vld [vmem:[%s955_s1 + $0x40] sm:$0xff]   ;;  %v746_v36 = vld [vmem:[%s955_s1 + $0x118] sm:$0xff]  }
   0xa   :  { %666 = vmatprep.subr.bf16.mxu1 %v717_v9  ;;  %v733_v25 = vld [vmem:[%s955_s1 + $0xc8] sm:$0xff]   ;;  %v737_v29 = vld [vmem:[%s955_s1 + $0xc0] sm:$0xff]   ;;  %v747_v37 = vld [vmem:[%s955_s1 + $0x110] sm:$0xff]  }
   0xb   :  { %v734_v26 = vld [vmem:[%s955_s1 + $0x8] sm:$0xff]   ;;  %v738_v30 = vld [vmem:[%s955_s1] sm:$0xff]  }
   0xc   :  { %639 = vmatpush3.bf16.msra.mxu0 %v718_v10  ;;  %v735_v27 = vld [vmem:[%s955_s1 + $0x88] sm:$0xff]   ;;  %v739_v31 = vld [vmem:[%s955_s1 + $0x80] sm:$0xff]  }
   0xd   :  { %667 = vmatpush3.bf16.msra.mxu1 %v719_v11  ;;  %640 = vmatprep.subr.bf16.mxu0 %v720_v12  ;;  %v740_v32 = vld [vmem:[%s956_s0] ss:$20 sps:$4 sm:$0xff]   ;;  %v742_v33 = vld [vmem:[%s956_s0 + $0x4] ss:$20 sps:$4 sm:$0xff]   ;;  %v743_v34 = vld [vmem:[%s956_s0 + $0x8] ss:$20 sps:$4 sm:$0xff]  }
   0xe   :  { %668 = vmatprep.subr.bf16.mxu1 %v721_v13  ;;  %v745_v35 = vld [vmem:[%s956_s0 + $0xc] ss:$20 sps:$4 sm:$0xff]   ;;  %407 = vmatprep.mubr.bf16.mxu0 %v742_v33  ;;  %v750_v39 = vld [vmem:[%s956_s0 + $0x34] ss:$20 sps:$4 sm:$0xff]   ;;  %v753_v42 = vld [vmem:[%s956_s0 + $0x30] ss:$20 sps:$4 sm:$0xff]  }
   0xf   :  { %456 = vmatprep.mubr.bf16.mxu1 %v745_v35  ;;  %v748_v38 = vld [vmem:[%s956_s0 + $0x2c] ss:$20 sps:$4 sm:$0xff]   ;;  %v752_v40 = vld [vmem:[%s956_s0 + $0x28] ss:$20 sps:$4 sm:$0xff]   ;;  %v756_v43 = vld [vmem:[%s956_s0 + $0x10] ss:$20 sps:$4 sm:$0xff]  }
  0x10   :  { %641 = vmatpush3.bf16.msra.mxu0 %v722_v14  ;;  %v754_v41 = vld [vmem:[%s955_s1 + $0x108] sm:$0xff]   ;;  %v755_v44 = vld [vmem:[%s955_s1 + $0x100] sm:$0xff]  }
  0x11   :  { %669 = vmatpush3.bf16.msra.mxu1 %v723_v15  ;;  %642 = vmatprep.subr.bf16.mxu0 %v724_v16  ;;  %v757_v45 = vld [vmem:[%s956_s0 + $0x38] ss:$20 sps:$4 sm:$0xff]   ;;  %v628_v6 = vld [vmem:[%s957_s2] ss:$0 sm:$0xff] }
  0x12   :  { %670 = vmatprep.subr.bf16.mxu1 %v725_v17  ;;  %v629_v11 = vld [vmem:[%s958_s3] ss:$0 sm:$0xff] }
  0x14   :  { %643 = vmatpush3.bf16.msra.mxu0 %v726_v18 }
  0x15   :  { %671 = vmatpush3.bf16.msra.mxu1 %v727_v19  ;;  %644 = vmatprep.subr.bf16.mxu0 %v728_v20 }
  0x16   :  { %672 = vmatprep.subr.bf16.mxu1 %v729_v21 }
  0x18   :  { %645 = vmatpush3.bf16.msra.mxu0 %v730_v22 }
  0x19   :  { %673 = vmatpush3.bf16.msra.mxu1 %v731_v23  ;;  %646 = vmatprep.subr.bf16.mxu0 %v732_v24 }
  0x1a   :  { %674 = vmatprep.subr.bf16.mxu1 %v733_v25 }
  0x1c   :  { %647 = vmatpush3.bf16.msra.mxu0 %v734_v26 }
  0x1d   :  { %675 = vmatpush3.bf16.msra.mxu1 %v735_v27  ;;  %648 = vmatprep.subr.bf16.mxu0 %v736_v28 }
  0x1e   :  { %676 = vmatprep.subr.bf16.mxu1 %v737_v29 }
  0x20   :  { %649 = vmatpush3.bf16.msra.mxu0 %v738_v30 }
  0x21   :  { %677 = vmatpush3.bf16.msra.mxu1 %v739_v31  ;;  %696 = vmatprep.subr.bf16.mxu0 %v746_v36 }
  0x23   :  { %408 = vmatmul.mubr.bf16.vlgmr.msra.gmra.mxu0 %v740_v32 }
  0x24   :  { %457 = vmatmul.mubr.bf16.vlgmr.msra.gmra.mxu1 %v743_v34  ;;  %697 = vmatpush3.bf16.msra.mxu0 %v746_v36 }
  0x25   :  { %698 = vmatprep.subr.bf16.mxu0 %v747_v37  ;;  %415 = vmatprep.mubr.bf16.mxu0 %v748_v38 }
  0x26   :  { %464 = vmatprep.mubr.bf16.mxu1 %v750_v39 }
  0x28   :  { %699 = vmatpush3.bf16.msra.mxu0 %v747_v37 }
  0x29   :  { %700 = vmatprep.subr.bf16.mxu0 %v754_v41 }
  0x2b   :  { %416 = vmatmul.mubr.bf16.gmra.mxu0 %v752_v40 }
  0x2c   :  { %465 = vmatmul.mubr.bf16.gmra.mxu1 %v753_v42  ;;  %704 = vmatprep.mubr.msk.bf16.mxu0 %vm368_vm0, %v756_v43 }
  0x2d   :  { %701 = vmatpush3.bf16.msra.mxu0 %v754_v41 }
  0x2e   :  { %702 = vmatprep.subr.bf16.mxu0 %v755_v44 }
  0x31   :  { %703 = vmatpush3.bf16.msra.mxu0 %v755_v44 }
  0x34   :  { %705 = vmatmul.mubr.msk.bf16.vlgmr.msra.gmra.mxu0 %vm368_vm0, %v757_v45 }
  0xe3   :  { %v650_v46 = vpop.f32.mrf.mxu0 }
  0xe4   :  { %v678_v47 = vpop.f32.mrf.mxu1 }
  0xe5   :  { %v651_v48 = vpop.f32.mrf.mxu0 }
  0xe6   :  { %v679_v49 = vpop.f32.mrf.mxu1  ;;  %v652_v62 = vadd.f32 %v651_v48, %v650_v46 }
  0xe7   :  { %v653_v50 = vpop.f32.mrf.mxu0  ;;  %v680_v63 = vadd.f32 %v679_v49, %v678_v47 }
  0xe8   :  { %v681_v51 = vpop.f32.mrf.mxu1 }
  0xe9   :  { %v654_v52 = vpop.f32.mrf.mxu0  ;;  %v459_v10 = vadd.f32 %v680_v63, %v652_v62 }
  0xea   :  { %v682_v53 = vpop.f32.mrf.mxu1  ;;  %v655_v7 = vadd.f32 %v654_v52, %v653_v50 }
  0xeb   :  { %v656_v54 = vpop.f32.mrf.mxu0  ;;  %v683_v8 = vadd.f32 %v682_v53, %v681_v51 }
  0xec   :  { %v684_v55 = vpop.f32.mrf.mxu1 }
  0xed   :  { %v657_v56 = vpop.f32.mrf.mxu0  ;;  %v462_v20 = vadd.f32 %v683_v8, %v655_v7 }
  0xee   :  { %v685_v57 = vpop.f32.mrf.mxu1  ;;  %v658_v58 = vadd.f32 %v657_v56, %v656_v54 }
  0xef   :  { %v686_v59 = vadd.f32 %v685_v57, %v684_v55  ;;  %v659_v60 = vpop.f32.mrf.mxu0 }
  0xf0   :  { %v687_v61 = vpop.f32.mrf.mxu1 }
  0xf1   :  { %v660_v0 = vpop.f32.mrf.mxu0  ;;  %v467_v4 = vadd.f32 %v686_v59, %v658_v58 }
  0xf2   :  { %v688_v1 = vpop.f32.mrf.mxu1  ;;  %v661_v2 = vadd.f32 %v660_v0, %v659_v60 }
  0xf3   :  { %v689_v3 = vadd.f32 %v688_v1, %v687_v61 }
  0xf4   :  { %v706_v5 = vpop.f32.mrf.mxu0 }
  0xf5   :  { %v516_v9 = vadd.f32 %v706_v5, %v467_v4  ;;  %v470_v15 = vadd.f32 %v689_v3, %v661_v2 }
  0xf6   :  { %v507_v12 = vpop.f32.mrf.mxu0 }
  0xf7   :  { %v531_v13 = vmul.f32 %v628_v6, %v516_v9  ;;  %v508_v14 = vadd.f32 %v507_v12, %v459_v10 }
  0xf8   :  { %v707_v16 = vpop.f32.mrf.mxu0 }
  0xf9   :  { %v542_v17 = vadd.f32 %v629_v11, %v531_v13  ;;  %v529_v18 = vmul.f32 %v628_v6, %v508_v14  ;;  %v519_v19 = vadd.f32 %v707_v16, %v470_v15 }
  0xfa   :  { %v510_v21 = vpop.f32.mrf.mxu0 }
  0xfb   :  { %v632_v22 = vmul.f32 -1.442695, %v542_v17  ;;  %v540_v23 = vadd.f32 %v629_v11, %v529_v18  ;;  %v532_v24 = vmul.f32 %v628_v6, %v519_v19  ;;  %v511_v25 = vadd.f32 %v510_v21, %v462_v20 }
  0xfd   :  { %758 = vpow2.f32 %v632_v22  ;;  %v630_v26 = vmul.f32 -1.442695, %v540_v23  ;;  %v543_v27 = vadd.f32 %v629_v11, %v532_v24  ;;  %v530_v28 = vmul.f32 %v628_v6, %v511_v25 }
  0xff   :  { %760 = vpow2.f32 %v630_v26  ;;  %v633_v29 = vmul.f32 -1.442695, %v543_v27  ;;  %v541_v30 = vadd.f32 %v629_v11, %v530_v28 }
 0x101   :  { %762 = vpow2.f32 %v633_v29  ;;  %v631_v31 = vmul.f32 -1.442695, %v541_v30 }
 0x103   :  { %764 = vpow2.f32 %v631_v31 }
 0x10a   :  { %v759_v32 = vpop.eup %758 }
 0x10b   :  { %v558_v33 = vadd.f32 1.0, %v759_v32 }
 0x10c   :  { %v761_v34 = vpop.eup %760 }
 0x10d   :  { %766 = vrcp.f32 %v558_v33  ;;  %v556_v35 = vadd.f32 1.0, %v761_v34 }
 0x10e   :  { %v763_v36 = vpop.eup %762 }
 0x10f   :  { %768 = vrcp.f32 %v556_v35  ;;  %v559_v37 = vadd.f32 1.0, %v763_v36 }
 0x110   :  { %v765_v38 = vpop.eup %764 }
 0x111   :  { %770 = vrcp.f32 %v559_v37  ;;  %v557_v39 = vadd.f32 1.0, %v765_v38 }
 0x113   :  { %772 = vrcp.f32 %v557_v39 }
 0x11a   :  { %v767_v40 = vpop.eup %766 }
 0x11b   :  { %v570_v41 = vmul.f32 %v767_v40, %v542_v17 }
 0x11c   :  { %v769_v42 = vpop.eup %768 }
 0x11d   :  { %574 = vst [vmem:[%s959_s4 + $0x10] sm:$0xff] %v570_v41  ;;  %v568_v43 = vmul.f32 %v769_v42, %v540_v23 }
 0x11e   :  { %v771_v44 = vpop.eup %770 }
 0x11f   :  { %572 = vst [vmem:[%s959_s4] sm:$0xff] %v568_v43  ;;  %v571_v45 = vmul.f32 %v771_v44, %v543_v27 }
 0x120   :  { %v773_v46 = vpop.eup %772 }
 0x121   :  { %575 = vst [vmem:[%s959_s4 + $0x18] sm:$0xff] %v571_v45  ;;  %v569_v47 = vmul.f32 %v773_v46, %v541_v30 }
 0x123   :  { %573 = vst [vmem:[%s959_s4 + $0x8] sm:$0xff] %v569_v47 }

// kernel: effi_b7_forward.24
= control target key start
LH: loop header
LB: loop body
LE: loop exit
PB: predicated region body
PF: predicated region fallthrough
CT: control target
= control target key end

     0   :  { %vm16_vm0 = vcmask 519168   ;;  %vm90_vm1 = vcmask 1041409   ;;  %vm92_vm2 = vcmask 1042434   ;;  %vm94_vm3 = vcmask 1043459   ;;  %s159_s0 = inlined_call_operand.vmem [shape: f32[8,4,64], index: 0, kind: input, shape index: {}]   ;;  %s160_s1 = inlined_call_operand.vmem [shape: f32[8,64], index: 1, kind: output, shape index: {}]  }
   0x1   :  { %v8_v0 = vld [vmem:[%s159_s0] sm:$0xf]  ;;  %v9_v1 = vld [vmem:[%s159_s0 + $0x4] sm:$0xf]  ;;  %v10_v2 = vld [vmem:[%s159_s0 + $0x8] sm:$0xf] }
   0x2   :  { %v11_v3 = vld [vmem:[%s159_s0 + $0xc] sm:$0xf]  ;;  %v12_v4 = vld [vmem:[%s159_s0 + $0x10] sm:$0xf]  ;;  %v13_v5 = vld [vmem:[%s159_s0 + $0x14] sm:$0xf] }
   0x3   :  { %v14_v6 = vld [vmem:[%s159_s0 + $0x18] sm:$0xf]  ;;  %v17_v7 = vsel %vm16_vm0, %v8_v0, 0.0  ;;  %v24_v8 = vsel %vm16_vm0, %v9_v1, 0.0  ;;  %v15_v9 = vld [vmem:[%s159_s0 + $0x1c] sm:$0xf] }
   0x4   :  { %v18_v10 = vrot.slane %v17_v7, 4  ;;  %v25_v11 = vrot.slane %v24_v8, 4  ;;  %v31_v12 = vsel %vm16_vm0, %v10_v2, 0.0  ;;  %v38_v13 = vsel %vm16_vm0, %v11_v3, 0.0 }
   0x5   :  { %v32_v14 = vrot.slane %v31_v12, 4  ;;  %v39_v15 = vrot.slane %v38_v13, 4  ;;  %v45_v16 = vsel %vm16_vm0, %v12_v4, 0.0  ;;  %v52_v17 = vsel %vm16_vm0, %v13_v5, 0.0 }
   0x6   :  { %v19_v18 = vadd.f32 %v18_v10, %v17_v7  ;;  %v26_v19 = vadd.f32 %v25_v11, %v24_v8  ;;  %v46_v20 = vrot.slane %v45_v16, 4  ;;  %v53_v21 = vrot.slane %v52_v17, 4 }
   0x7   :  { %v33_v22 = vadd.f32 %v32_v14, %v31_v12  ;;  %v40_v23 = vadd.f32 %v39_v15, %v38_v13  ;;  %v59_v24 = vsel %vm16_vm0, %v14_v6, 0.0  ;;  %v66_v25 = vsel %vm16_vm0, %v15_v9, 0.0 }
   0x8   :  { %v20_v26 = vrot.slane %v19_v18, 2  ;;  %v27_v27 = vrot.slane %v26_v19, 2  ;;  %v47_v28 = vadd.f32 %v46_v20, %v45_v16  ;;  %v54_v29 = vadd.f32 %v53_v21, %v52_v17 }
   0x9   :  { %v34_v30 = vrot.slane %v33_v22, 2  ;;  %v41_v31 = vrot.slane %v40_v23, 2  ;;  %v60_v32 = vrot.slane %v59_v24, 4  ;;  %v67_v33 = vrot.slane %v66_v25, 4 }
   0xa   :  { %v21_v34 = vadd.f32 %v20_v26, %v19_v18  ;;  %v28_v35 = vadd.f32 %v27_v27, %v26_v19  ;;  %v48_v36 = vrot.slane %v47_v28, 2  ;;  %v55_v37 = vrot.slane %v54_v29, 2 }
   0xb   :  { %v35_v38 = vadd.f32 %v34_v30, %v33_v22  ;;  %v42_v39 = vadd.f32 %v41_v31, %v40_v23  ;;  %v61_v40 = vadd.f32 %v60_v32, %v59_v24  ;;  %v68_v41 = vadd.f32 %v67_v33, %v66_v25 }
   0xc   :  { %v22_v42 = vrot.slane %v21_v34, 1  ;;  %v29_v43 = vrot.slane %v28_v35, 1  ;;  %v49_v44 = vadd.f32 %v48_v36, %v47_v28  ;;  %v56_v45 = vadd.f32 %v55_v37, %v54_v29 }
   0xd   :  { %v36_v46 = vrot.slane %v35_v38, 1  ;;  %v43_v47 = vrot.slane %v42_v39, 1  ;;  %v62_v48 = vrot.slane %v61_v40, 2  ;;  %v69_v49 = vrot.slane %v68_v41, 2 }
   0xe   :  { %v23_v50 = vadd.f32 %v22_v42, %v21_v34  ;;  %v30_v51 = vadd.f32 %v29_v43, %v28_v35  ;;  %v50_v52 = vrot.slane %v49_v44, 1  ;;  %v57_v53 = vrot.slane %v56_v45, 1 }
   0xf   :  { %v37_v54 = vadd.f32 %v36_v46, %v35_v38  ;;  %v44_v55 = vadd.f32 %v43_v47, %v42_v39  ;;  %v63_v56 = vadd.f32 %v62_v48, %v61_v40  ;;  %v70_v57 = vadd.f32 %v69_v49, %v68_v41 }
  0x10   :  { %v51_v58 = vadd.f32 %v50_v52, %v49_v44  ;;  %v58_v59 = vadd.f32 %v57_v53, %v56_v45  ;;  %v74_v60 = vmul.f32 0.25, %v23_v50  ;;  %v75_v61 = vmul.f32 0.25, %v30_v51 }
  0x11   :  { %v64_v62 = vrot.slane %v63_v56, 1  ;;  %v71_v63 = vrot.slane %v70_v57, 1  ;;  %v76_v0 = vmul.f32 0.25, %v37_v54  ;;  %v77_v1 = vmul.f32 0.25, %v44_v55 }
  0x12   :  { %v78_v2 = vmul.f32 0.25, %v51_v58  ;;  %v79_v3 = vmul.f32 0.25, %v58_v59  ;;  %v91_v4 = vsel %vm90_vm1, %v75_v61, %v74_v60  ;;  %vm96_vm4 = vcmask 1044484  }
  0x13   :  { %v65_v5 = vadd.f32 %v64_v62, %v63_v56  ;;  %v72_v6 = vadd.f32 %v71_v63, %v70_v57  ;;  %v93_v7 = vsel %vm92_vm2, %v76_v0, %v91_v4  ;;  %vm98_vm5 = vcmask 1045509  }
  0x14   :  { %v95_v8 = vsel %vm94_vm3, %v77_v1, %v93_v7  ;;  %vm100_vm6 = vcmask 1046534   ;;  %vm102_vm7 = vcmask 1047559   ;;  %vm105_vm8 = vcmask 523264  }
  0x15   :  { %v80_v9 = vmul.f32 0.25, %v65_v5  ;;  %v81_v10 = vmul.f32 0.25, %v72_v6  ;;  %v97_v11 = vsel %vm96_vm4, %v78_v2, %v95_v8 }
  0x16   :  { %v99_v12 = vsel %vm98_vm5, %v79_v3, %v97_v11 }
  0x17   :  { %v101_v13 = vsel %vm100_vm6, %v80_v9, %v99_v12 }
  0x18   :  { %v103_v14 = vsel %vm102_vm7, %v81_v10, %v101_v13 }
  0x19   :  { %106 = vst.msk [vmem:[%s160_s1] sm:$0xff] %vm105_vm8, %v103_v14 }

// kernel: effi_b7_forward.22
= control target key start
LH: loop header
LB: loop body
LE: loop exit
PB: predicated region body
PF: predicated region fallthrough
CT: control target
= control target key end

     0   :  { %v861_v1 = vmov 0   ;;  %vm448_vm0 = vcmask 654336   ;;  %s1091_s1 = inlined_call_operand.vmem [shape: bf16[720,128], index: 1, kind: input, shape index: {}]   ;;  %s1092_s0 = inlined_call_operand.vmem [shape: bf16[32,720], index: 0, kind: input, shape index: {}]   ;;  %s1093_s2 = inlined_call_operand.vmem [shape: f32[1,128], index: 2, kind: input, shape index: {}]   ;;  %s1094_s3 = inlined_call_operand.vmem [shape: f32[1,128], index: 3, kind: input, shape index: {}]   ;;  %s1095_s4 = inlined_call_operand.vmem [shape: f32[32,128], index: 4, kind: output, shape index: {}]  }
   0x1   :  { %v782_v0 = vld [vmem:[%s1091_s1 + $0x78] sm:$0xff]   ;;  %553 = vmatprep.subr.bf16.mxu0 %v861_v1  ;;  %v784_v3 = vld [vmem:[%s1091_s1 + $0x70] sm:$0xff]   ;;  %v786_v5 = vld [vmem:[%s1091_s1 + $0x68] sm:$0xff]  }
   0x2   :  { %v783_v2 = vld [vmem:[%s1091_s1 + $0x38] sm:$0xff]   ;;  %725 = vmatprep.subr.bf16.mxu1 %v782_v0  ;;  %v785_v4 = vld [vmem:[%s1091_s1 + $0x30] sm:$0xff]   ;;  %v787_v6 = vld [vmem:[%s1091_s1 + $0x28] sm:$0xff]  }
   0x3   :  { %726 = vmatpush3.bf16.msra.mxu1 %v783_v2  ;;  %v788_v7 = vld [vmem:[%s1091_s1 + $0x60] sm:$0xff]   ;;  %v790_v8 = vld [vmem:[%s1091_s1 + $0x138] sm:$0xff]   ;;  %v793_v10 = vld [vmem:[%s1091_s1 + $0x130] sm:$0xff]  }
   0x4   :  { %727 = vmatprep.subr.bf16.mxu1 %v784_v3  ;;  %v789_v9 = vld [vmem:[%s1091_s1 + $0x20] sm:$0xff]   ;;  %554 = vmatpush1.bf16.msra.mxu0 %v790_v8  ;;  %v791_v11 = vld [vmem:[%s1091_s1 + $0x58] sm:$0xff]   ;;  %v796_v12 = vld [vmem:[%s1091_s1 + $0x128] sm:$0xff]  }
   0x5   :  { %555 = vmatprep.subr.bf16.mxu0 %v861_v1  ;;  %v792_v13 = vld [vmem:[%s1091_s1 + $0x18] sm:$0xff]   ;;  %v794_v14 = vld [vmem:[%s1091_s1 + $0x50] sm:$0xff]   ;;  %v799_v15 = vld [vmem:[%s1091_s1 + $0x120] sm:$0xff]  }
   0x6   :  { %v795_v16 = vld [vmem:[%s1091_s1 + $0x10] sm:$0xff]   ;;  %v797_v17 = vld [vmem:[%s1091_s1 + $0x48] sm:$0xff]   ;;  %v802_v18 = vld [vmem:[%s1091_s1 + $0x118] sm:$0xff]  }
   0x7   :  { %728 = vmatpush3.bf16.msra.mxu1 %v785_v4  ;;  %v805_v19 = vld [vmem:[%s1092_s0 + $0x4] ss:$24 sps:$4 sm:$0xff]   ;;  %v798_v20 = vld [vmem:[%s1091_s1 + $0x8] sm:$0xff]   ;;  %v808_v22 = vld [vmem:[%s1091_s1 + $0x110] sm:$0xff]  }
   0x8   :  { %729 = vmatprep.subr.bf16.mxu1 %v786_v5  ;;  %556 = vmatpush1.bf16.msra.mxu0 %v793_v10  ;;  %v800_v21 = vld [vmem:[%s1091_s1 + $0x40] sm:$0xff]   ;;  %v806_v24 = vld [vmem:[%s1091_s1 + $0xf8] sm:$0xff]   ;;  %v811_v26 = vld [vmem:[%s1091_s1 + $0x108] sm:$0xff]  }
   0x9   :  { %557 = vmatprep.subr.bf16.mxu0 %v861_v1  ;;  %487 = vmatprep.mubr.bf16.mxu1 %v805_v19  ;;  %v801_v23 = vld [vmem:[%s1091_s1] sm:$0xff]   ;;  %v807_v27 = vld [vmem:[%s1091_s1 + $0xb8] sm:$0xff]   ;;  %v809_v28 = vld [vmem:[%s1091_s1 + $0xf0] sm:$0xff]  }
   0xa   :  { %v803_v25 = vld [vmem:[%s1092_s0] ss:$24 sps:$4 sm:$0xff]   ;;  %v810_v29 = vld [vmem:[%s1091_s1 + $0xb0] sm:$0xff]   ;;  %v812_v31 = vld [vmem:[%s1091_s1 + $0xe8] sm:$0xff]  }
   0xb   :  { %730 = vmatpush3.bf16.msra.mxu1 %v787_v6  ;;  %v814_v30 = vld [vmem:[%s1091_s1 + $0x100] sm:$0xff]   ;;  %v819_v32 = vld [vmem:[%s1092_s0 + $0x34] ss:$24 sps:$4 sm:$0xff]   ;;  %v823_v34 = vld [vmem:[%s1092_s0 + $0x30] ss:$24 sps:$4 sm:$0xff]  }
   0xc   :  { %731 = vmatprep.subr.bf16.mxu1 %v788_v7  ;;  %558 = vmatpush1.bf16.msra.mxu0 %v796_v12  ;;  %v817_v33 = vld [vmem:[%s1091_s1 + $0x160] sm:$0xff]   ;;  %v813_v35 = vld [vmem:[%s1091_s1 + $0xa8] sm:$0xff]   ;;  %v822_v37 = vld [vmem:[%s1091_s1 + $0x158] sm:$0xff]  }
   0xd   :  { %559 = vmatprep.subr.bf16.mxu0 %v861_v1  ;;  %v815_v36 = vld [vmem:[%s1091_s1 + $0xe0] sm:$0xff]   ;;  %v818_v39 = vld [vmem:[%s1091_s1 + $0xd8] sm:$0xff]   ;;  %v826_v40 = vld [vmem:[%s1091_s1 + $0x150] sm:$0xff]  }
   0xe   :  { %v816_v38 = vld [vmem:[%s1091_s1 + $0xa0] sm:$0xff]   ;;  %v821_v41 = vld [vmem:[%s1091_s1 + $0x98] sm:$0xff]   ;;  %v824_v42 = vld [vmem:[%s1091_s1 + $0xd0] sm:$0xff]  }
   0xf   :  { %732 = vmatpush3.bf16.msra.mxu1 %v789_v9  ;;  %v835_v43 = vld [vmem:[%s1092_s0 + $0xc] ss:$24 sps:$4 sm:$0xff]   ;;  %v825_v46 = vld [vmem:[%s1091_s1 + $0x90] sm:$0xff]   ;;  %v833_v54 = vld [vmem:[%s1092_s0 + $0x8] ss:$24 sps:$4 sm:$0xff]  }
  0x10   :  { %733 = vmatprep.subr.bf16.mxu1 %v791_v11  ;;  %560 = vmatpush1.bf16.msra.mxu0 %v799_v15  ;;  %v829_v44 = vld [vmem:[%s1091_s1 + $0x148] sm:$0xff]   ;;  %v832_v48 = vld [vmem:[%s1091_s1 + $0x140] sm:$0xff]   ;;  %v839_v55 = vld [vmem:[%s1092_s0 + $0x3c] ss:$24 sps:$4 sm:$0xff]  }
  0x11   :  { %561 = vmatprep.subr.bf16.mxu0 %v861_v1  ;;  %v838_v45 = vld [vmem:[%s1092_s0 + $0x14] ss:$24 sps:$4 sm:$0xff]   ;;  %v830_v50 = vld [vmem:[%s1091_s1 + $0xc0] sm:$0xff]   ;;  %v836_v51 = vld [vmem:[%s1092_s0 + $0x10] ss:$24 sps:$4 sm:$0xff]  }
  0x12   :  { %v827_v47 = vld [vmem:[%s1091_s1 + $0xc8] sm:$0xff]   ;;  %717 = vmatprep.mubr.msk.bf16.mxu0 %vm448_vm0, %v838_v45  ;;  %v841_v52 = vld [vmem:[%s1092_s0 + $0x44] ss:$24 sps:$4 sm:$0xff]   ;;  %v844_v56 = vld [vmem:[%s1092_s0 + $0x40] ss:$24 sps:$4 sm:$0xff]  }
  0x13   :  { %734 = vmatpush3.bf16.msra.mxu1 %v792_v13  ;;  %v828_v49 = vld [vmem:[%s1091_s1 + $0x88] sm:$0xff]   ;;  %v831_v53 = vld [vmem:[%s1091_s1 + $0x80] sm:$0xff]   ;;  %v843_v57 = vld [vmem:[%s1092_s0 + $0x38] ss:$24 sps:$4 sm:$0xff]  }
  0x14   :  { %735 = vmatprep.subr.bf16.mxu1 %v794_v14  ;;  %562 = vmatpush1.bf16.msra.mxu0 %v802_v18  ;;  %v719_v14 = vld [vmem:[%s1093_s2] ss:$0 sm:$0xff] }
  0x15   :  { %563 = vmatprep.subr.bf16.mxu0 %v861_v1 }
  0x17   :  { %736 = vmatpush3.bf16.msra.mxu1 %v795_v16 }
  0x18   :  { %737 = vmatprep.subr.bf16.mxu1 %v797_v17  ;;  %564 = vmatpush1.bf16.msra.mxu0 %v808_v22 }
  0x19   :  { %565 = vmatprep.subr.bf16.mxu0 %v861_v1 }
  0x1b   :  { %738 = vmatpush3.bf16.msra.mxu1 %v798_v20  ;;  %v720_v20 = vld [vmem:[%s1094_s3] ss:$0 sm:$0xff] }
  0x1c   :  { %739 = vmatprep.subr.bf16.mxu1 %v800_v21  ;;  %566 = vmatpush1.bf16.msra.mxu0 %v811_v26 }
  0x1d   :  { %567 = vmatprep.subr.bf16.mxu0 %v861_v1 }
  0x1f   :  { %740 = vmatpush3.bf16.msra.mxu1 %v801_v23 }
  0x20   :  { %753 = vmatprep.subr.bf16.mxu1 %v806_v24  ;;  %568 = vmatpush1.bf16.msra.mxu0 %v814_v30 }
  0x21   :  { %575 = vmatprep.subr.bf16.mxu0 %v861_v1 }
  0x22   :  { %488 = vmatmul.mubr.bf16.vlgmr.msra.gmra.mxu1 %v803_v25 }
  0x23   :  { %754 = vmatpush3.bf16.msra.mxu1 %v807_v27  ;;  %495 = vmatprep.mubr.bf16.mxu1 %v819_v32 }
  0x24   :  { %755 = vmatprep.subr.bf16.mxu1 %v809_v28  ;;  %576 = vmatpush2.bf16.msra.mxu0 %v817_v33 }
  0x25   :  { %577 = vmatprep.subr.bf16.mxu0 %v861_v1 }
  0x27   :  { %756 = vmatpush3.bf16.msra.mxu1 %v810_v29 }
  0x28   :  { %757 = vmatprep.subr.bf16.mxu1 %v812_v31  ;;  %578 = vmatpush2.bf16.msra.mxu0 %v822_v37 }
  0x29   :  { %579 = vmatprep.subr.bf16.mxu0 %v861_v1 }
  0x2a   :  { %496 = vmatmul.mubr.bf16.gmra.mxu1 %v823_v34 }
  0x2b   :  { %758 = vmatpush3.bf16.msra.mxu1 %v813_v35  ;;  %536 = vmatprep.mubr.bf16.mxu1 %v835_v43 }
  0x2c   :  { %759 = vmatprep.subr.bf16.mxu1 %v815_v36  ;;  %580 = vmatpush2.bf16.msra.mxu0 %v826_v40 }
  0x2d   :  { %581 = vmatprep.subr.bf16.mxu0 %v861_v1 }
  0x2f   :  { %760 = vmatpush3.bf16.msra.mxu1 %v816_v38 }
  0x30   :  { %761 = vmatprep.subr.bf16.mxu1 %v818_v39  ;;  %582 = vmatpush2.bf16.msra.mxu0 %v829_v44 }
  0x31   :  { %583 = vmatprep.subr.bf16.mxu0 %v861_v1 }
  0x33   :  { %762 = vmatpush3.bf16.msra.mxu1 %v821_v41 }
  0x34   :  { %763 = vmatprep.subr.bf16.mxu1 %v824_v42  ;;  %584 = vmatpush2.bf16.msra.mxu0 %v832_v48 }
  0x37   :  { %764 = vmatpush3.bf16.msra.mxu1 %v825_v46  ;;  %586 = vmatmul.mubr.bf16.vlgmr.msra.gmra.mxu0 %v836_v51 }
  0x38   :  { %765 = vmatprep.subr.bf16.mxu1 %v827_v47  ;;  %718 = vmatprep.mubr.msk.bf16.mxu0 %vm448_vm0, %v841_v52 }
  0x3b   :  { %766 = vmatpush3.bf16.msra.mxu1 %v828_v49 }
  0x3c   :  { %767 = vmatprep.subr.bf16.mxu1 %v830_v50 }
  0x3f   :  { %768 = vmatpush3.bf16.msra.mxu1 %v831_v53  ;;  %594 = vmatmul.mubr.bf16.gmra.mxu0 %v844_v56 }
  0x42   :  { %537 = vmatmul.mubr.bf16.vlgmr.msra.gmra.mxu1 %v833_v54 }
  0x43   :  { %544 = vmatprep.mubr.bf16.mxu1 %v839_v55 }
  0x4a   :  { %545 = vmatmul.mubr.bf16.gmra.mxu1 %v843_v57 }
  0xe2   :  { %v741_v58 = vpop.f32.mrf.mxu1 }
  0xe4   :  { %v742_v59 = vpop.f32.mrf.mxu1 }
  0xe5   :  { %v743_v8 = vadd.f32 %v742_v59, %v741_v58 }
  0xe6   :  { %v744_v60 = vpop.f32.mrf.mxu1 }
  0xe8   :  { %v745_v61 = vpop.f32.mrf.mxu1 }
  0xe9   :  { %v746_v16 = vadd.f32 %v745_v61, %v744_v60 }
  0xea   :  { %v747_v62 = vpop.f32.mrf.mxu1 }
  0xec   :  { %v748_v63 = vpop.f32.mrf.mxu1 }
  0xed   :  { %v749_v26 = vadd.f32 %v748_v63, %v747_v62 }
  0xee   :  { %v750_v0 = vpop.f32.mrf.mxu1 }
  0xf0   :  { %v751_v3 = vpop.f32.mrf.mxu1 }
  0xf1   :  { %v752_v34 = vadd.f32 %v751_v3, %v750_v0 }
  0xf7   :  { %v587_v1 = vpop.f32.mrf.mxu0 }
  0xf9   :  { %v589_v2 = vpop.f32.mrf.mxu0 }
  0xfb   :  { %v590_v4 = vpop.f32.mrf.mxu0 }
  0xfd   :  { %v592_v6 = vpop.f32.mrf.mxu0 }
  0xff   :  { %v595_v10 = vpop.f32.mrf.mxu0 }
 0x101   :  { %v597_v13 = vpop.f32.mrf.mxu0 }
 0x102   :  { %v769_v5 = vpop.f32.mrf.mxu1 }
 0x103   :  { %v598_v19 = vpop.f32.mrf.mxu0 }
 0x104   :  { %v770_v7 = vpop.f32.mrf.mxu1 }
 0x105   :  { %v771_v9 = vadd.f32 %v770_v7, %v769_v5  ;;  %v600_v24 = vpop.f32.mrf.mxu0 }
 0x106   :  { %v772_v11 = vpop.f32.mrf.mxu1 }
 0x107   :  { %v539_v12 = vadd.f32 %v771_v9, %v743_v8 }
 0x108   :  { %v773_v15 = vpop.f32.mrf.mxu1 }
 0x109   :  { %v588_v17 = vadd.f32 %v587_v1, %v539_v12  ;;  %v774_v18 = vadd.f32 %v773_v15, %v772_v11 }
 0x10a   :  { %v775_v21 = vpop.f32.mrf.mxu1 }
 0x10b   :  { %v609_v22 = vmul.f32 %v719_v14, %v588_v17  ;;  %v542_v23 = vadd.f32 %v774_v18, %v746_v16 }
 0x10c   :  { %v776_v25 = vpop.f32.mrf.mxu1 }
 0x10d   :  { %v620_v27 = vadd.f32 %v720_v20, %v609_v22  ;;  %v591_v28 = vadd.f32 %v590_v4, %v542_v23  ;;  %v777_v29 = vadd.f32 %v776_v25, %v775_v21 }
 0x10e   :  { %v778_v30 = vpop.f32.mrf.mxu1 }
 0x10f   :  { %v721_v31 = vmul.f32 -1.442695, %v620_v27  ;;  %v610_v32 = vmul.f32 %v719_v14, %v591_v28  ;;  %v547_v33 = vadd.f32 %v777_v29, %v749_v26 }
 0x110   :  { %v779_v35 = vpop.f32.mrf.mxu1 }
 0x111   :  { %845 = vpow2.f32 %v721_v31  ;;  %v621_v36 = vadd.f32 %v720_v20, %v610_v32  ;;  %v596_v37 = vadd.f32 %v595_v10, %v547_v33  ;;  %v780_v38 = vadd.f32 %v779_v35, %v778_v30 }
 0x113   :  { %v722_v39 = vmul.f32 -1.442695, %v621_v36  ;;  %v611_v40 = vmul.f32 %v719_v14, %v596_v37  ;;  %v550_v41 = vadd.f32 %v780_v38, %v752_v34 }
 0x115   :  { %847 = vpow2.f32 %v722_v39  ;;  %v622_v42 = vadd.f32 %v720_v20, %v611_v40  ;;  %v599_v43 = vadd.f32 %v598_v19, %v550_v41 }
 0x117   :  { %v723_v44 = vmul.f32 -1.442695, %v622_v42  ;;  %v612_v45 = vmul.f32 %v719_v14, %v599_v43 }
 0x119   :  { %849 = vpow2.f32 %v723_v44  ;;  %v623_v46 = vadd.f32 %v720_v20, %v612_v45 }
 0x11b   :  { %v724_v47 = vmul.f32 -1.442695, %v623_v46 }
 0x11d   :  { %851 = vpow2.f32 %v724_v47 }
 0x11e   :  { %v846_v48 = vpop.eup %845 }
 0x11f   :  { %v636_v49 = vadd.f32 1.0, %v846_v48 }
 0x121   :  { %853 = vrcp.f32 %v636_v49 }
 0x122   :  { %v848_v50 = vpop.eup %847 }
 0x123   :  { %v637_v51 = vadd.f32 1.0, %v848_v50 }
 0x125   :  { %855 = vrcp.f32 %v637_v51 }
 0x126   :  { %v850_v52 = vpop.eup %849 }
 0x127   :  { %v638_v53 = vadd.f32 1.0, %v850_v52 }
 0x129   :  { %857 = vrcp.f32 %v638_v53 }
 0x12a   :  { %v852_v54 = vpop.eup %851 }
 0x12b   :  { %v639_v55 = vadd.f32 1.0, %v852_v54 }
 0x12d   :  { %859 = vrcp.f32 %v639_v55 }
 0x12e   :  { %v854_v56 = vpop.eup %853 }
 0x12f   :  { %v648_v57 = vmul.f32 %v854_v56, %v620_v27 }
 0x131   :  { %652 = vst [vmem:[%s1095_s4] sm:$0xff] %v648_v57 }
 0x132   :  { %v856_v58 = vpop.eup %855 }
 0x133   :  { %v649_v59 = vmul.f32 %v856_v58, %v621_v36 }
 0x135   :  { %653 = vst [vmem:[%s1095_s4 + $0x8] sm:$0xff] %v649_v59 }
 0x136   :  { %v858_v60 = vpop.eup %857 }
 0x137   :  { %v650_v61 = vmul.f32 %v858_v60, %v622_v42 }
 0x139   :  { %654 = vst [vmem:[%s1095_s4 + $0x10] sm:$0xff] %v650_v61 }
 0x13a   :  { %v860_v62 = vpop.eup %859 }
 0x13b   :  { %v651_v63 = vmul.f32 %v860_v62, %v623_v46 }
 0x13d   :  { %655 = vst [vmem:[%s1095_s4 + $0x18] sm:$0xff] %v651_v63 }

// kernel: effi_b7_forward.23
= control target key start
LH: loop header
LB: loop body
LE: loop exit
PB: predicated region body
PF: predicated region fallthrough
CT: control target
= control target key end

     0   :  { %vm80_vm0 = vcmask 785408   ;;  %s327_s1 = inlined_call_operand.vmem [shape: bf16[96,128], index: 1, kind: input, shape index: {}]   ;;  %s328_s0 = inlined_call_operand.vmem [shape: bf16[32,96], index: 0, kind: input, shape index: {}]   ;;  %s329_s2 = inlined_call_operand.vmem [shape: f32[1,128], index: 2, kind: input, shape index: {}]   ;;  %s330_s3 = inlined_call_operand.vmem [shape: f32[1,128], index: 3, kind: input, shape index: {}]   ;;  %s331_s4 = inlined_call_operand.vmem [shape: f32[32,128], index: 4, kind: output, shape index: {}]  }
   0x1   :  { %v234_v0 = vld [vmem:[%s327_s1 + $0x28] sm:$0xff]   ;;  %v235_v1 = vld [vmem:[%s327_s1 + $0x20] sm:$0xff]   ;;  %v236_v2 = vld [vmem:[%s327_s1 + $0x18] sm:$0xff]  }
   0x2   :  { %218 = vmatprep.subr.bf16.mxu0 %v234_v0  ;;  %v240_v3 = vld [vmem:[%s328_s0] sm:$0xff]   ;;  %v237_v4 = vld [vmem:[%s327_s1 + $0x10] sm:$0xff]   ;;  %v238_v5 = vld [vmem:[%s327_s1 + $0x8] sm:$0xff]  }
   0x3   :  { %219 = vmatpush3.bf16.msra.mxu0 %v234_v0  ;;  %230 = vmatprep.mubr.msk.bf16.mxu0 %vm80_vm0, %v240_v3  ;;  %v239_v6 = vld [vmem:[%s327_s1] sm:$0xff]   ;;  %v241_v7 = vld [vmem:[%s328_s0 + $0x8] sm:$0xff]  }
   0x4   :  { %220 = vmatprep.subr.bf16.mxu0 %v235_v1  ;;  %v204_v8 = vld [vmem:[%s329_s2] ss:$0 sm:$0xff] }
   0x5   :  { %v205_v10 = vld [vmem:[%s330_s3] ss:$0 sm:$0xff] }
   0x7   :  { %221 = vmatpush3.bf16.msra.mxu0 %v235_v1 }
   0x8   :  { %222 = vmatprep.subr.bf16.mxu0 %v236_v2 }
   0xb   :  { %223 = vmatpush3.bf16.msra.mxu0 %v236_v2 }
   0xc   :  { %224 = vmatprep.subr.bf16.mxu0 %v237_v4 }
   0xf   :  { %225 = vmatpush3.bf16.msra.mxu0 %v237_v4 }
  0x10   :  { %226 = vmatprep.subr.bf16.mxu0 %v238_v5 }
  0x13   :  { %227 = vmatpush3.bf16.msra.mxu0 %v238_v5 }
  0x14   :  { %228 = vmatprep.subr.bf16.mxu0 %v239_v6 }
  0x17   :  { %229 = vmatpush3.bf16.msra.mxu0 %v239_v6 }
  0x1a   :  { %231 = vmatmul.mubr.msk.bf16.vlgmr.msra.gmra.mxu0 %vm80_vm0, %v241_v7 }
  0xda   :  { %v232_v9 = vpop.f32.mrf.mxu0 }
  0xdb   :  { %v145_v11 = vmul.f32 %v232_v9, %v204_v8 }
  0xdc   :  { %v121_v12 = vpop.f32.mrf.mxu0 }
  0xdd   :  { %v156_v13 = vadd.f32 %v205_v10, %v145_v11  ;;  %v143_v14 = vmul.f32 %v204_v8, %v121_v12 }
  0xde   :  { %v233_v15 = vpop.f32.mrf.mxu0 }
  0xdf   :  { %v208_v16 = vmul.f32 -1.442695, %v156_v13  ;;  %v154_v17 = vadd.f32 %v205_v10, %v143_v14  ;;  %v146_v18 = vmul.f32 %v233_v15, %v204_v8 }
  0xe0   :  { %v124_v19 = vpop.f32.mrf.mxu0 }
  0xe1   :  { %242 = vpow2.f32 %v208_v16  ;;  %v206_v20 = vmul.f32 -1.442695, %v154_v17  ;;  %v157_v21 = vadd.f32 %v205_v10, %v146_v18  ;;  %v144_v22 = vmul.f32 %v204_v8, %v124_v19 }
  0xe3   :  { %244 = vpow2.f32 %v206_v20  ;;  %v209_v23 = vmul.f32 -1.442695, %v157_v21  ;;  %v155_v24 = vadd.f32 %v205_v10, %v144_v22 }
  0xe5   :  { %246 = vpow2.f32 %v209_v23  ;;  %v207_v25 = vmul.f32 -1.442695, %v155_v24 }
  0xe7   :  { %248 = vpow2.f32 %v207_v25 }
  0xee   :  { %v243_v26 = vpop.eup %242 }
  0xef   :  { %v172_v27 = vadd.f32 1.0, %v243_v26 }
  0xf0   :  { %v245_v28 = vpop.eup %244 }
  0xf1   :  { %250 = vrcp.f32 %v172_v27  ;;  %v170_v29 = vadd.f32 1.0, %v245_v28 }
  0xf2   :  { %v247_v30 = vpop.eup %246 }
  0xf3   :  { %252 = vrcp.f32 %v170_v29  ;;  %v173_v31 = vadd.f32 1.0, %v247_v30 }
  0xf4   :  { %v249_v32 = vpop.eup %248 }
  0xf5   :  { %254 = vrcp.f32 %v173_v31  ;;  %v171_v33 = vadd.f32 1.0, %v249_v32 }
  0xf7   :  { %256 = vrcp.f32 %v171_v33 }
  0xfe   :  { %v251_v34 = vpop.eup %250 }
  0xff   :  { %v184_v35 = vmul.f32 %v251_v34, %v156_v13 }
 0x100   :  { %v253_v36 = vpop.eup %252 }
 0x101   :  { %188 = vst [vmem:[%s331_s4 + $0x10] sm:$0xff] %v184_v35  ;;  %v182_v37 = vmul.f32 %v253_v36, %v154_v17 }
 0x102   :  { %v255_v38 = vpop.eup %254 }
 0x103   :  { %186 = vst [vmem:[%s331_s4] sm:$0xff] %v182_v37  ;;  %v185_v39 = vmul.f32 %v255_v38, %v157_v21 }
 0x104   :  { %v257_v40 = vpop.eup %256 }
 0x105   :  { %189 = vst [vmem:[%s331_s4 + $0x18] sm:$0xff] %v185_v39  ;;  %v183_v41 = vmul.f32 %v257_v40, %v155_v24 }
 0x107   :  { %187 = vst [vmem:[%s331_s4 + $0x8] sm:$0xff] %v183_v41 }

// kernel: effi_b7_forward.25
= control target key start
LH: loop header
LB: loop body
LE: loop exit
PB: predicated region body
PF: predicated region fallthrough
CT: control target
= control target key end

     0   :  { %v147_v0 = vmov 0.0   ;;  %vm148_vm0 = vmmov 0   ;;  %vm51_vm1 = vcmask 523264   ;;  %s198_s1 = inlined_call_operand.vmem [shape: bf16[64,128], index: 1, kind: input, shape index: {}]   ;;  %s199_s0 = inlined_call_operand.vmem [shape: bf16[8,64], index: 0, kind: input, shape index: {}]   ;;  %s200_s2 = inlined_call_operand.vmem [shape: f32[1,128], index: 2, kind: input, shape index: {}]   ;;  %s201_s3 = inlined_call_operand.vmem [shape: f32[1,128], index: 3, kind: input, shape index: {}]   ;;  %s202_s4 = inlined_call_operand.vmem [shape: f32[8,128], index: 4, kind: output, shape index: {}]  }
   0x1   :  { %129 = vmatprep.subr.bf16.mxu0 %v147_v0  ;;  %v143_v1 = vld [vmem:[%s198_s1 + $0x18] sm:$0xff]   ;;  %137 = vmatprep.mubr.msk.bf16.mxu0 %vm148_vm0, %v147_v0  ;;  %v144_v2 = vld [vmem:[%s198_s1 + $0x10] sm:$0xff]   ;;  %v145_v3 = vld [vmem:[%s198_s1 + $0x8] sm:$0xff]  }
   0x2   :  { %130 = vmatpush3.bf16.msra.mxu0 %v143_v1  ;;  %v146_v4 = vld [vmem:[%s198_s1] sm:$0xff]  }
   0x3   :  { %131 = vmatprep.subr.bf16.mxu0 %v147_v0  ;;  %v18_v5 = vld [vmem:[%s199_s0] sm:$0xf] }
   0x4   :  { %v122_v6 = vld [vmem:[%s200_s2] ss:$0 sm:$0xff] }
   0x5   :  { %v123_v8 = vld [vmem:[%s201_s3] ss:$0 sm:$0xff] }
   0x6   :  { %132 = vmatpush3.bf16.msra.mxu0 %v144_v2 }
   0x7   :  { %133 = vmatprep.subr.bf16.mxu0 %v147_v0 }
   0xa   :  { %134 = vmatpush3.bf16.msra.mxu0 %v145_v3 }
   0xb   :  { %135 = vmatprep.subr.bf16.mxu0 %v147_v0 }
   0xe   :  { %136 = vmatpush3.bf16.msra.mxu0 %v146_v4 }
  0x11   :  { %138 = vmatmul.mubr.msk.bf16.vlgmr.msra.gmra.mxu0 %vm51_vm1, %v18_v5 }
  0xd1   :  { %v89_v7 = vpop.f32.mrf.mxu0 }
  0xd2   :  { %v102_v9 = vmul.f32 %v122_v6, %v89_v7 }
  0xd3   :  { %v139_v10 = vpop.f32.mrf.mxu0 }
  0xd4   :  { %v110_v11 = vadd.f32 %v123_v8, %v102_v9 }
  0xd5   :  { %v92_v12 = vpop.f32.mrf.mxu0 }
  0xd6   :  { %v111_v13 = vmax.f32 %v110_v11, 0.0 }
  0xd7   :  { %v140_v14 = vpop.f32.mrf.mxu0 }
  0xd8   :  { %112 = vst [vmem:[%s202_s4] sm:$0xff] %v111_v13 }

// kernel: effi_b7_forward.26
= control target key start
LH: loop header
LB: loop body
LE: loop exit
PB: predicated region body
PF: predicated region fallthrough
CT: control target
= control target key end

     0   :  { %v133_v0 = vmov 0.0   ;;  %vm134_vm0 = vmmov 0   ;;  %vm43_vm1 = vcmask 392192   ;;  %s181_s1 = inlined_call_operand.vmem [shape: bf16[48,128], index: 1, kind: input, shape index: {}]   ;;  %s182_s0 = inlined_call_operand.vmem [shape: bf16[8,48], index: 0, kind: input, shape index: {}]   ;;  %s183_s2 = inlined_call_operand.vmem [shape: f32[1,128], index: 2, kind: input, shape index: {}]   ;;  %s184_s3 = inlined_call_operand.vmem [shape: f32[1,128], index: 3, kind: input, shape index: {}]   ;;  %s185_s4 = inlined_call_operand.vmem [shape: f32[8,128], index: 4, kind: output, shape index: {}]  }
   0x1   :  { %118 = vmatprep.subr.bf16.mxu0 %v133_v0  ;;  %v130_v1 = vld [vmem:[%s181_s1 + $0x10] sm:$0xff]   ;;  %124 = vmatprep.mubr.msk.bf16.mxu0 %vm134_vm0, %v133_v0  ;;  %v131_v2 = vld [vmem:[%s181_s1 + $0x8] sm:$0xff]   ;;  %v132_v3 = vld [vmem:[%s181_s1] sm:$0xff]  }
   0x2   :  { %119 = vmatpush3.bf16.msra.mxu0 %v130_v1  ;;  %v18_v4 = vld [vmem:[%s182_s0] sm:$0xf] }
   0x3   :  { %120 = vmatprep.subr.bf16.mxu0 %v133_v0  ;;  %v112_v5 = vld [vmem:[%s183_s2] ss:$0 sm:$0xff] }
   0x4   :  { %v113_v7 = vld [vmem:[%s184_s3] ss:$0 sm:$0xff] }
   0x6   :  { %121 = vmatpush3.bf16.msra.mxu0 %v131_v2 }
   0x7   :  { %122 = vmatprep.subr.bf16.mxu0 %v133_v0 }
   0xa   :  { %123 = vmatpush3.bf16.msra.mxu0 %v132_v3 }
   0xd   :  { %125 = vmatmul.mubr.msk.bf16.vlgmr.msra.gmra.mxu0 %vm43_vm1, %v18_v4 }
  0xcd   :  { %v81_v6 = vpop.f32.mrf.mxu0 }
  0xce   :  { %v94_v8 = vmul.f32 %v112_v5, %v81_v6 }
  0xcf   :  { %v126_v9 = vpop.f32.mrf.mxu0 }
  0xd0   :  { %v102_v10 = vadd.f32 %v113_v7, %v94_v8 }
  0xd1   :  { %v84_v11 = vpop.f32.mrf.mxu0 }
  0xd2   :  { %103 = vst [vmem:[%s185_s4] sm:$0xff] %v102_v10 }
  0xd3   :  { %v127_v12 = vpop.f32.mrf.mxu0 }

// kernel: effi_b7_forward.27
= control target key start
LH: loop header
LB: loop body
LE: loop exit
PB: predicated region body
PF: predicated region fallthrough
CT: control target
= control target key end

     0   :  { %v146_v0 = vmov 0.0   ;;  %vm147_vm0 = vmmov 0   ;;  %vm51_vm1 = vcmask 523264   ;;  %s197_s1 = inlined_call_operand.vmem [shape: bf16[64,128], index: 1, kind: input, shape index: {}]   ;;  %s198_s0 = inlined_call_operand.vmem [shape: bf16[8,64], index: 0, kind: input, shape index: {}]   ;;  %s199_s2 = inlined_call_operand.vmem [shape: f32[1,128], index: 2, kind: input, shape index: {}]   ;;  %s200_s3 = inlined_call_operand.vmem [shape: f32[1,128], index: 3, kind: input, shape index: {}]   ;;  %s201_s4 = inlined_call_operand.vmem [shape: f32[8,128], index: 4, kind: output, shape index: {}]  }
   0x1   :  { %128 = vmatprep.subr.bf16.mxu0 %v146_v0  ;;  %v142_v1 = vld [vmem:[%s197_s1 + $0x18] sm:$0xff]   ;;  %136 = vmatprep.mubr.msk.bf16.mxu0 %vm147_vm0, %v146_v0  ;;  %v143_v2 = vld [vmem:[%s197_s1 + $0x10] sm:$0xff]   ;;  %v144_v3 = vld [vmem:[%s197_s1 + $0x8] sm:$0xff]  }
   0x2   :  { %129 = vmatpush3.bf16.msra.mxu0 %v142_v1  ;;  %v145_v4 = vld [vmem:[%s197_s1] sm:$0xff]  }
   0x3   :  { %130 = vmatprep.subr.bf16.mxu0 %v146_v0  ;;  %v18_v5 = vld [vmem:[%s198_s0] sm:$0xf] }
   0x4   :  { %v121_v6 = vld [vmem:[%s199_s2] ss:$0 sm:$0xff] }
   0x5   :  { %v122_v8 = vld [vmem:[%s200_s3] ss:$0 sm:$0xff] }
   0x6   :  { %131 = vmatpush3.bf16.msra.mxu0 %v143_v2 }
   0x7   :  { %132 = vmatprep.subr.bf16.mxu0 %v146_v0 }
   0xa   :  { %133 = vmatpush3.bf16.msra.mxu0 %v144_v3 }
   0xb   :  { %134 = vmatprep.subr.bf16.mxu0 %v146_v0 }
   0xe   :  { %135 = vmatpush3.bf16.msra.mxu0 %v145_v4 }
  0x11   :  { %137 = vmatmul.mubr.msk.bf16.vlgmr.msra.gmra.mxu0 %vm51_vm1, %v18_v5 }
  0xd1   :  { %v89_v7 = vpop.f32.mrf.mxu0 }
  0xd2   :  { %v102_v9 = vmul.f32 %v121_v6, %v89_v7 }
  0xd3   :  { %v138_v10 = vpop.f32.mrf.mxu0 }
  0xd4   :  { %v110_v11 = vadd.f32 %v122_v8, %v102_v9 }
  0xd5   :  { %v92_v12 = vpop.f32.mrf.mxu0 }
  0xd6   :  { %111 = vst [vmem:[%s201_s4] sm:$0xff] %v110_v11 }
  0xd7   :  { %v139_v13 = vpop.f32.mrf.mxu0 }

</bundles_post_ra>
